<compile_context>
chip_gen: v6e
topology: v6e:2x2x1
jax: 0.10.0
libtpu: 0.0.40
codegen_flags: <defaults>
</compile_context>

<pallas_src>
import functools
import math

import jax
import jax.numpy as jnp
from jax import lax
from jax.experimental import pallas as pl
from jax.experimental.pallas import tpu as pltpu

# Small hyperparameters consistent with the module (hidden scaled down from 128 -> 32).
HIDDEN = 32
NHEAD = 4
NUM_LAYERS = 2
FFN = 2048          # nn.TransformerEncoderLayer default dim_feedforward
MAX_LEN = 16
LN_EPS = 1e-5


def _layer_norm(x, w, b):
    """x: (M, H) f32; w, b: (1, H) f32 (biased variance, eps=1e-5, PyTorch semantics)."""
    mu = jnp.mean(x, axis=-1, keepdims=True)
    xc = x - mu
    var = jnp.mean(xc * xc, axis=-1, keepdims=True)
    return xc * lax.rsqrt(var + LN_EPS) * w + b


def _mxu(a_f32, w_bf16):
    """(M, K) f32 activation x (K, N) bf16 weight -> (M, N) f32 (bf16 operands, f32 acc)."""
    return jnp.dot(a_f32.astype(jnp.bfloat16), w_bf16,
                   preferred_element_type=jnp.float32)


def transformer_kernel(h_ref, wqkv_ref, bqkv_ref, wo_ref, bo_ref,
                       ln1w_ref, ln1b_ref,
                       w1_ref, b1_ref, w2_ref, b2_ref,
                       ln2w_ref, ln2b_ref,
                       wout_ref, bout_ref, out_ref, *, tile_b, seq_l):
    H = HIDDEN
    M = tile_b * seq_l
    hd = H // NHEAD
    scale = 1.0 / math.sqrt(hd)
    bf16 = jnp.bfloat16

    # Pre-embedded rows (input embedding + positional encoding done in the wrapper).
    h = h_ref[0]                                               # (M, H) f32

    for layer in range(NUM_LAYERS):                            # static unroll
        # ---- multi-head self attention (fused QKV projection on the MXU) ----
        qkv = _mxu(h, wqkv_ref[layer]) + bqkv_ref[layer]       # (M, 3H) f32
        q = qkv[:, 0:H].reshape(tile_b, seq_l, H)
        k = qkv[:, H:2 * H].reshape(tile_b, seq_l, H)
        v = qkv[:, 2 * H:3 * H].reshape(tile_b, seq_l, H)

        heads = []
        for hh in range(NHEAD):                                # static unroll,
            lo, hi = hh * hd, (hh + 1) * hd                    # batched over TILE_B seqs
            q_h = q[:, :, lo:hi].astype(bf16)                  # (TB, L, hd) bf16
            k_h = k[:, :, lo:hi].astype(bf16)
            v_h = v[:, :, lo:hi].astype(bf16)
            s = jnp.einsum('bqd,bkd->bqk', q_h, k_h,
                           preferred_element_type=jnp.float32) * scale   # (TB, L, L) f32
            s = s - jnp.max(s, axis=-1, keepdims=True)
            e = jnp.exp(s)
            denom = jnp.sum(e, axis=-1, keepdims=True)
            p = (e * pl.reciprocal(denom, approx=True)).astype(bf16)     # softmax (EUP recip)
            heads.append(jnp.einsum('bqk,bkd->bqd', p, v_h,
                                    preferred_element_type=jnp.float32))
        attn = jnp.concatenate(heads, axis=-1).reshape(M, H)             # (M, H) f32
        attn = _mxu(attn, wo_ref[layer]) + bo_ref[layer]                 # out_proj
        h = _layer_norm(h + attn, ln1w_ref[layer], ln1b_ref[layer])

        # ---- feed-forward (relu), bf16 operands / f32 accumulation ----
        ff = jnp.maximum(_mxu(h, w1_ref[layer]) + b1_ref[layer], 0.0)    # (M, FFN) f32
        ff = _mxu(ff, w2_ref[layer]) + b2_ref[layer]                     # (M, H) f32
        h = _layer_norm(h + ff, ln2w_ref[layer], ln2b_ref[layer])

    # ---- output Linear(H, 1) on the VPU (multiply + lane reduction) ----
    out_ref[0] = jnp.sum(h * wout_ref[...], axis=-1, keepdims=True) + bout_ref[...]


def _choose_tile_b(B, L, max_rows=1024):
    """Maximize rows per grid step (M = TILE_B * L).  Never shrink the tile just to
    create extra grid steps: on single-TC v5e/v6e splitting is pure overhead, and on
    v7x a sub-256-row split leaves both cores under-utilized while duplicating weight
    DMAs.  max_rows=1024 caps the (M, 2048) f32 FFN intermediate at 8 MiB, which fits
    every generation's VMEM under the explicit 48 MiB scoped limit set below."""
    return max(1, min(B, max_rows // max(L, 1)))


def transformer_forward(params, x, t, tile_b=None):
    """x: (B, L) float, t: (B,) float -> (B, L) float32."""
    B, L = x.shape
    assert L <= MAX_LEN
    if tile_b is None:
        tile_b = _choose_tile_b(B, L)
    nb = -(-B // tile_b)
    b_pad = nb * tile_b
    M = tile_b * L

    x_f = x.astype(jnp.float32)
    t_f = t.astype(jnp.float32)
    if b_pad != B:
        x_f = jnp.pad(x_f, ((0, b_pad - B), (0, 0)))
        t_f = jnp.pad(t_f, ((0, b_pad - B),))

    # Input embedding (Linear(2, H)) + positional encoding folded into the wrapper so
    # the varying kernel input is a single lane-dense (nb, M, H) block (no (M, 1) blocks).
    w_emb = params["w_emb"].astype(jnp.float32)                      # (H, 2)
    pos = params["pos"][0, :L, :].astype(jnp.float32)                # (L, H)
    t_rows = jnp.broadcast_to(t_f[:, None], (b_pad, L))              # (b_pad, L)
    h0 = (x_f[..., None] * w_emb[:, 0] + t_rows[..., None] * w_emb[:, 1]
          + params["b_emb"][0] + pos[None, :, :])                    # (b_pad, L, H) f32
    h0 = h0.reshape(nb, M, HIDDEN)

    # One-time transpose of all big weights to (K, N) math layout + bf16 cast.
    bf16 = jnp.bfloat16
    wqkv = jnp.transpose(params["wqkv"], (0, 2, 1)).astype(bf16)     # (NL, H, 3H)
    wo = jnp.transpose(params["wo"], (0, 2, 1)).astype(bf16)         # (NL, H, H)
    w1 = jnp.transpose(params["w1"], (0, 2, 1)).astype(bf16)         # (NL, H, FFN)
    w2 = jnp.transpose(params["w2"], (0, 2, 1)).astype(bf16)         # (NL, FFN, H)

    def full(shape):
        return pl.BlockSpec(shape, lambda b, _n=len(shape): (0,) * _n)

    in_specs = [
        pl.BlockSpec((1, M, HIDDEN), lambda b: (b, 0, 0)),    # embedded rows (varying)
        full((NUM_LAYERS, HIDDEN, 3 * HIDDEN)),               # wqkv (K, N) bf16
        full((NUM_LAYERS, 1, 3 * HIDDEN)),                    # bqkv
        full((NUM_LAYERS, HIDDEN, HIDDEN)),                   # wo (K, N) bf16
        full((NUM_LAYERS, 1, HIDDEN)),                        # bo
        full((NUM_LAYERS, 1, HIDDEN)),                        # ln1w
        full((NUM_LAYERS, 1, HIDDEN)),                        # ln1b
        full((NUM_LAYERS, HIDDEN, FFN)),                      # w1 (K, N) bf16
        full((NUM_LAYERS, 1, FFN)),                           # b1
        full((NUM_LAYERS, FFN, HIDDEN)),                      # w2 (K, N) bf16
        full((NUM_LAYERS, 1, HIDDEN)),                        # b2
        full((NUM_LAYERS, 1, HIDDEN)),                        # ln2w
        full((NUM_LAYERS, 1, HIDDEN)),                        # ln2b
        full((1, HIDDEN)),                                    # wout
        full((1, 1)),                                         # bout
    ]

    kernel = functools.partial(transformer_kernel, tile_b=tile_b, seq_l=L)

    out = pl.pallas_call(
        kernel,
        out_shape=jax.ShapeDtypeStruct((nb, M, 1), jnp.float32),
        grid=(nb,),
        in_specs=in_specs,
        out_specs=pl.BlockSpec((1, M, 1), lambda b: (b, 0, 0)),
        compiler_params=pltpu.CompilerParams(
            dimension_semantics=("parallel",),
            vmem_limit_bytes=48 * 1024 * 1024),
    )(h0, wqkv, params["bqkv"], wo, params["bo"],
      params["ln1w"], params["ln1b"],
      w1, params["b1"], w2, params["b2"],
      params["ln2w"], params["ln2b"],
      params["wout"], params["bout"])

    return out.reshape(b_pad, L)[:B]                          # (B, L)


def init_params(key):
    ks = jax.random.split(key, 13)

    def g(k, shape, s=0.05):
        return (s * jax.random.normal(k, shape)).astype(jnp.float32)

    return {
        "w_emb": g(ks[0], (HIDDEN, 2)),
        "b_emb": g(ks[1], (1, HIDDEN)),
        "pos":   g(ks[2], (1, MAX_LEN, HIDDEN), 1.0),                 # torch.randn param
        "wqkv":  g(ks[3], (NUM_LAYERS, 3 * HIDDEN, HIDDEN)),          # MHA in_proj_weight
        "bqkv":  g(ks[4], (NUM_LAYERS, 1, 3 * HIDDEN)),               # MHA in_proj_bias
        "wo":    g(ks[5], (NUM_LAYERS, HIDDEN, HIDDEN)),              # MHA out_proj
        "bo":    g(ks[6], (NUM_LAYERS, 1, HIDDEN)),
        "ln1w":  jnp.ones((NUM_LAYERS, 1, HIDDEN), jnp.float32),
        "ln1b":  jnp.zeros((NUM_LAYERS, 1, HIDDEN), jnp.float32),
        "w1":    g(ks[7], (NUM_LAYERS, FFN, HIDDEN)),                 # linear1
        "b1":    g(ks[8], (NUM_LAYERS, 1, FFN)),
        "w2":    g(ks[9], (NUM_LAYERS, HIDDEN, FFN)),                 # linear2
        "b2":    g(ks[10], (NUM_LAYERS, 1, HIDDEN)),
        "ln2w":  jnp.ones((NUM_LAYERS, 1, HIDDEN), jnp.float32),
        "ln2b":  jnp.zeros((NUM_LAYERS, 1, HIDDEN), jnp.float32),
        "wout":  g(ks[11], (1, HIDDEN)),                              # output_layer
        "bout":  g(ks[12], (1, 1)),
    }


# ---------------------- pure-JAX f32 reference (PyTorch semantics) ----------------------
def _ln_ref(x, w, b):
    mu = jnp.mean(x, axis=-1, keepdims=True)
    xc = x - mu
    var = jnp.mean(xc * xc, axis=-1, keepdims=True)
    return xc / jnp.sqrt(var + LN_EPS) * w + b


def reference_forward(params, x, t):
    B, L = x.shape
    H = HIDDEN
    hd = H // NHEAD
    t_e = jnp.broadcast_to(t.astype(jnp.float32)[:, None], (B, L))
    h = jnp.stack([x.astype(jnp.float32), t_e], axis=-1)              # (B, L, 2)
    h = h @ params["w_emb"].T + params["b_emb"][0]
    h = h + params["pos"][0, :L, :]
    for layer in range(NUM_LAYERS):
        qkv = h @ params["wqkv"][layer].T + params["bqkv"][layer, 0]
        q, k, v = qkv[..., :H], qkv[..., H:2 * H], qkv[..., 2 * H:]

        def split(z):
            return z.reshape(B, L, NHEAD, hd).transpose(0, 2, 1, 3)
        qh, kh, vh = split(q), split(k), split(v)
        s = jnp.einsum('bhqd,bhkd->bhqk', qh, kh) / math.sqrt(hd)
        p = jax.nn.softmax(s, axis=-1)
        o = jnp.einsum('bhqk,bhkd->bhqd', p, vh)
        o = o.transpose(0, 2, 1, 3).reshape(B, L, H)
        o = o @ params["wo"][layer].T + params["bo"][layer, 0]
        h = _ln_ref(h + o, params["ln1w"][layer, 0], params["ln1b"][layer, 0])
        ff = jax.nn.relu(h @ params["w1"][layer].T + params["b1"][layer, 0])
        ff = ff @ params["w2"][layer].T + params["b2"][layer, 0]
        h = _ln_ref(h + ff, params["ln2w"][layer, 0], params["ln2b"][layer, 0])
    out = h @ params["wout"].T + params["bout"][0]                    # (B, L, 1)
    return out[..., 0]


if __name__ == "__main__":
    key = jax.random.PRNGKey(0)
    pkey, xkey, tkey = jax.random.split(key, 3)
    params = init_params(pkey)

    B, L = 8, 8                       # batch=8, sequence length=8 (<= MAX_LEN)
    x = jax.random.normal(xkey, (B, L), dtype=jnp.float32)
    t = jax.random.uniform(tkey, (B,), dtype=jnp.float32)

    out = transformer_forward(params, x, t)
    out = jax.block_until_ready(out)

    assert out.shape == (B, L), out.shape
    assert bool(jnp.all(jnp.isfinite(out)))

    ref = reference_forward(params, x, t)
    err = float(jnp.max(jnp.abs(out - ref)))
    assert err < 1e-1, f"max abs err vs f32 reference: {err}"
    print("KERNEL_OK")
</pallas_src>

<mosaic_0001>
module attributes {stable_mosaic.version = 11 : i64} {
  func.func @transformer_kernel(%arg0: i32, %arg1: memref<1x64x32xf32, #tpu.memory_space<vmem>>, %arg2: memref<2x32x96xbf16, #tpu.memory_space<vmem>>, %arg3: memref<2x1x96xf32, #tpu.memory_space<vmem>>, %arg4: memref<2x32x32xbf16, #tpu.memory_space<vmem>>, %arg5: memref<2x1x32xf32, #tpu.memory_space<vmem>>, %arg6: memref<2x1x32xf32, #tpu.memory_space<vmem>>, %arg7: memref<2x1x32xf32, #tpu.memory_space<vmem>>, %arg8: memref<2x32x2048xbf16, #tpu.memory_space<vmem>>, %arg9: memref<2x1x2048xf32, #tpu.memory_space<vmem>>, %arg10: memref<2x2048x32xbf16, #tpu.memory_space<vmem>>, %arg11: memref<2x1x32xf32, #tpu.memory_space<vmem>>, %arg12: memref<2x1x32xf32, #tpu.memory_space<vmem>>, %arg13: memref<2x1x32xf32, #tpu.memory_space<vmem>>, %arg14: memref<1x32xf32, #tpu.memory_space<vmem>>, %arg15: memref<1x1xf32, #tpu.memory_space<vmem>>, %arg16: memref<1x64x1xf32, #tpu.memory_space<vmem>>) attributes {dimension_semantics = [#tpu.dimension_semantics<parallel>], iteration_bounds = array<i64: 1>, scalar_prefetch = 0 : i64, scratch_operands = 0 : i64, tpu.core_type = #tpu.core_type<tc>, window_params = [{transform_indices = @transform_0, window_bounds = array<i64: 1, 64, 32>}, {pipeline_mode = #tpu.pipeline_mode<synchronous>, transform_indices = @transform_1, window_bounds = array<i64: 2, 32, 96>}, {pipeline_mode = #tpu.pipeline_mode<synchronous>, transform_indices = @transform_2, window_bounds = array<i64: 2, 1, 96>}, {pipeline_mode = #tpu.pipeline_mode<synchronous>, transform_indices = @transform_3, window_bounds = array<i64: 2, 32, 32>}, {pipeline_mode = #tpu.pipeline_mode<synchronous>, transform_indices = @transform_4, window_bounds = array<i64: 2, 1, 32>}, {pipeline_mode = #tpu.pipeline_mode<synchronous>, transform_indices = @transform_5, window_bounds = array<i64: 2, 1, 32>}, {pipeline_mode = #tpu.pipeline_mode<synchronous>, transform_indices = @transform_6, window_bounds = array<i64: 2, 1, 32>}, {pipeline_mode = #tpu.pipeline_mode<synchronous>, transform_indices = @transform_7, window_bounds = array<i64: 2, 32, 2048>}, {pipeline_mode = #tpu.pipeline_mode<synchronous>, transform_indices = @transform_8, window_bounds = array<i64: 2, 1, 2048>}, {pipeline_mode = #tpu.pipeline_mode<synchronous>, transform_indices = @transform_9, window_bounds = array<i64: 2, 2048, 32>}, {pipeline_mode = #tpu.pipeline_mode<synchronous>, transform_indices = @transform_10, window_bounds = array<i64: 2, 1, 32>}, {pipeline_mode = #tpu.pipeline_mode<synchronous>, transform_indices = @transform_11, window_bounds = array<i64: 2, 1, 32>}, {pipeline_mode = #tpu.pipeline_mode<synchronous>, transform_indices = @transform_12, window_bounds = array<i64: 2, 1, 32>}, {pipeline_mode = #tpu.pipeline_mode<synchronous>, transform_indices = @transform_13, window_bounds = array<i64: 1, 32>}, {pipeline_mode = #tpu.pipeline_mode<synchronous>, transform_indices = @transform_14, window_bounds = array<i64: 1, 1>}, {transform_indices = @transform_15, window_bounds = array<i64: 1, 64, 1>}]} {
    %c0 = arith.constant 0 : index
    %c0_0 = arith.constant 0 : index
    %c0_1 = arith.constant 0 : index
    %0 = vector.load %arg1[%c0, %c0_0, %c0_1] : memref<1x64x32xf32, #tpu.memory_space<vmem>>, vector<1x64x32xf32>
    %1 = vector.shape_cast %0 : vector<1x64x32xf32> to vector<64x32xf32>
    %c0_2 = arith.constant 0 : index
    %c0_3 = arith.constant 0 : index
    %c0_4 = arith.constant 0 : index
    %2 = vector.load %arg2[%c0_2, %c0_3, %c0_4] : memref<2x32x96xbf16, #tpu.memory_space<vmem>>, vector<1x32x96xbf16>
    %3 = vector.shape_cast %2 : vector<1x32x96xbf16> to vector<32x96xbf16>
    %4 = arith.truncf %1 : vector<64x32xf32> to vector<64x32xbf16>
    %cst = arith.constant dense<0.000000e+00> : vector<64x96xf32>
    %5 = tpu.matmul %4, %3, %cst {dimension_numbers = #tpu.dot_dimension_numbers<[1], [0], [0], [1], [0, 0, 1, 1], [], []>} : vector<64x32xbf16>, vector<32x96xbf16>, vector<64x96xf32> -> vector<64x96xf32>
    %c0_5 = arith.constant 0 : index
    %c0_6 = arith.constant 0 : index
    %c0_7 = arith.constant 0 : index
    %6 = vector.load %arg3[%c0_5, %c0_6, %c0_7] : memref<2x1x96xf32, #tpu.memory_space<vmem>>, vector<1x1x96xf32>
    %7 = vector.shape_cast %6 : vector<1x1x96xf32> to vector<1x96xf32>
    %8 = vector.broadcast %7 : vector<1x96xf32> to vector<64x96xf32>
    %9 = arith.addf %5, %8 : vector<64x96xf32>
    %10 = vector.extract_strided_slice %9 {offsets = [0, 0], sizes = [64, 32], strides = [1, 1]} : vector<64x96xf32> to vector<64x32xf32>
    %11 = vector.shape_cast %10 : vector<64x32xf32> to vector<8x8x32xf32>
    %12 = vector.extract_strided_slice %9 {offsets = [0, 32], sizes = [64, 32], strides = [1, 1]} : vector<64x96xf32> to vector<64x32xf32>
    %13 = vector.shape_cast %12 : vector<64x32xf32> to vector<8x8x32xf32>
    %14 = vector.extract_strided_slice %9 {offsets = [0, 64], sizes = [64, 32], strides = [1, 1]} : vector<64x96xf32> to vector<64x32xf32>
    %15 = vector.shape_cast %14 : vector<64x32xf32> to vector<8x8x32xf32>
    %16 = vector.extract_strided_slice %11 {offsets = [0, 0, 0], sizes = [8, 8, 8], strides = [1, 1, 1]} : vector<8x8x32xf32> to vector<8x8x8xf32>
    %17 = arith.truncf %16 : vector<8x8x8xf32> to vector<8x8x8xbf16>
    %18 = vector.extract_strided_slice %13 {offsets = [0, 0, 0], sizes = [8, 8, 8], strides = [1, 1, 1]} : vector<8x8x32xf32> to vector<8x8x8xf32>
    %19 = arith.truncf %18 : vector<8x8x8xf32> to vector<8x8x8xbf16>
    %20 = vector.extract_strided_slice %15 {offsets = [0, 0, 0], sizes = [8, 8, 8], strides = [1, 1, 1]} : vector<8x8x32xf32> to vector<8x8x8xf32>
    %21 = arith.truncf %20 : vector<8x8x8xf32> to vector<8x8x8xbf16>
    "tpu.trace_start"() <{level = 10 : i32, message = "bqd,bkd->bqk"}> : () -> ()
    %cst_8 = arith.constant dense<0.000000e+00> : vector<8x8x8xf32>
    %22 = tpu.matmul %17, %19, %cst_8 {dimension_numbers = #tpu.dot_dimension_numbers<[2], [2], [1], [1], [0, 0, 0, 1, 1, 1], [0], [0]>} : vector<8x8x8xbf16>, vector<8x8x8xbf16>, vector<8x8x8xf32> -> vector<8x8x8xf32>
    "tpu.trace_stop"() : () -> ()
    %cst_9 = arith.constant 0.353553385 : f32
    %23 = vector.broadcast %cst_9 : f32 to vector<8x8x8xf32>
    %24 = arith.mulf %22, %23 : vector<8x8x8xf32>
    %cst_10 = arith.constant dense<0xFF800000> : vector<8x8xf32>
    %25 = vector.multi_reduction <maximumf>, %24, %cst_10 [2] : vector<8x8x8xf32> to vector<8x8xf32>
    %26 = vector.shape_cast %25 : vector<8x8xf32> to vector<8x8x1xf32>
    %27 = vector.broadcast %26 : vector<8x8x1xf32> to vector<8x8x8xf32>
    %28 = arith.subf %24, %27 : vector<8x8x8xf32>
    %29 = math.exp %28 : vector<8x8x8xf32>
    %cst_11 = arith.constant dense<0.000000e+00> : vector<8x8xf32>
    %30 = vector.multi_reduction <add>, %29, %cst_11 [2] : vector<8x8x8xf32> to vector<8x8xf32>
    %31 = vector.shape_cast %30 : vector<8x8xf32> to vector<8x8x1xf32>
    %32 = tpu.reciprocal %31 {approx = true} : vector<8x8x1xf32> -> vector<8x8x1xf32>
    %33 = vector.broadcast %32 : vector<8x8x1xf32> to vector<8x8x8xf32>
    %34 = arith.mulf %29, %33 : vector<8x8x8xf32>
    %35 = arith.truncf %34 : vector<8x8x8xf32> to vector<8x8x8xbf16>
    "tpu.trace_start"() <{level = 10 : i32, message = "bqk,bkd->bqd"}> : () -> ()
    %cst_12 = arith.constant dense<0.000000e+00> : vector<8x8x8xf32>
    %36 = tpu.matmul %35, %21, %cst_12 {dimension_numbers = #tpu.dot_dimension_numbers<[2], [1], [1], [2], [0, 0, 0, 1, 1, 2], [0], [0]>} : vector<8x8x8xbf16>, vector<8x8x8xbf16>, vector<8x8x8xf32> -> vector<8x8x8xf32>
    "tpu.trace_stop"() : () -> ()
    %37 = vector.extract_strided_slice %11 {offsets = [0, 0, 8], sizes = [8, 8, 8], strides = [1, 1, 1]} : vector<8x8x32xf32> to vector<8x8x8xf32>
    %38 = arith.truncf %37 : vector<8x8x8xf32> to vector<8x8x8xbf16>
    %39 = vector.extract_strided_slice %13 {offsets = [0, 0, 8], sizes = [8, 8, 8], strides = [1, 1, 1]} : vector<8x8x32xf32> to vector<8x8x8xf32>
    %40 = arith.truncf %39 : vector<8x8x8xf32> to vector<8x8x8xbf16>
    %41 = vector.extract_strided_slice %15 {offsets = [0, 0, 8], sizes = [8, 8, 8], strides = [1, 1, 1]} : vector<8x8x32xf32> to vector<8x8x8xf32>
    %42 = arith.truncf %41 : vector<8x8x8xf32> to vector<8x8x8xbf16>
    "tpu.trace_start"() <{level = 10 : i32, message = "bqd,bkd->bqk"}> : () -> ()
    %cst_13 = arith.constant dense<0.000000e+00> : vector<8x8x8xf32>
    %43 = tpu.matmul %38, %40, %cst_13 {dimension_numbers = #tpu.dot_dimension_numbers<[2], [2], [1], [1], [0, 0, 0, 1, 1, 1], [0], [0]>} : vector<8x8x8xbf16>, vector<8x8x8xbf16>, vector<8x8x8xf32> -> vector<8x8x8xf32>
    "tpu.trace_stop"() : () -> ()
    %cst_14 = arith.constant 0.353553385 : f32
    %44 = vector.broadcast %cst_14 : f32 to vector<8x8x8xf32>
    %45 = arith.mulf %43, %44 : vector<8x8x8xf32>
    %cst_15 = arith.constant dense<0xFF800000> : vector<8x8xf32>
    %46 = vector.multi_reduction <maximumf>, %45, %cst_15 [2] : vector<8x8x8xf32> to vector<8x8xf32>
    %47 = vector.shape_cast %46 : vector<8x8xf32> to vector<8x8x1xf32>
    %48 = vector.broadcast %47 : vector<8x8x1xf32> to vector<8x8x8xf32>
    %49 = arith.subf %45, %48 : vector<8x8x8xf32>
    %50 = math.exp %49 : vector<8x8x8xf32>
    %cst_16 = arith.constant dense<0.000000e+00> : vector<8x8xf32>
    %51 = vector.multi_reduction <add>, %50, %cst_16 [2] : vector<8x8x8xf32> to vector<8x8xf32>
    %52 = vector.shape_cast %51 : vector<8x8xf32> to vector<8x8x1xf32>
    %53 = tpu.reciprocal %52 {approx = true} : vector<8x8x1xf32> -> vector<8x8x1xf32>
    %54 = vector.broadcast %53 : vector<8x8x1xf32> to vector<8x8x8xf32>
    %55 = arith.mulf %50, %54 : vector<8x8x8xf32>
    %56 = arith.truncf %55 : vector<8x8x8xf32> to vector<8x8x8xbf16>
    "tpu.trace_start"() <{level = 10 : i32, message = "bqk,bkd->bqd"}> : () -> ()
    %cst_17 = arith.constant dense<0.000000e+00> : vector<8x8x8xf32>
    %57 = tpu.matmul %56, %42, %cst_17 {dimension_numbers = #tpu.dot_dimension_numbers<[2], [1], [1], [2], [0, 0, 0, 1, 1, 2], [0], [0]>} : vector<8x8x8xbf16>, vector<8x8x8xbf16>, vector<8x8x8xf32> -> vector<8x8x8xf32>
    "tpu.trace_stop"() : () -> ()
    %58 = vector.extract_strided_slice %11 {offsets = [0, 0, 16], sizes = [8, 8, 8], strides = [1, 1, 1]} : vector<8x8x32xf32> to vector<8x8x8xf32>
    %59 = arith.truncf %58 : vector<8x8x8xf32> to vector<8x8x8xbf16>
    %60 = vector.extract_strided_slice %13 {offsets = [0, 0, 16], sizes = [8, 8, 8], strides = [1, 1, 1]} : vector<8x8x32xf32> to vector<8x8x8xf32>
    %61 = arith.truncf %60 : vector<8x8x8xf32> to vector<8x8x8xbf16>
    %62 = vector.extract_strided_slice %15 {offsets = [0, 0, 16], sizes = [8, 8, 8], strides = [1, 1, 1]} : vector<8x8x32xf32> to vector<8x8x8xf32>
    %63 = arith.truncf %62 : vector<8x8x8xf32> to vector<8x8x8xbf16>
    "tpu.trace_start"() <{level = 10 : i32, message = "bqd,bkd->bqk"}> : () -> ()
    %cst_18 = arith.constant dense<0.000000e+00> : vector<8x8x8xf32>
    %64 = tpu.matmul %59, %61, %cst_18 {dimension_numbers = #tpu.dot_dimension_numbers<[2], [2], [1], [1], [0, 0, 0, 1, 1, 1], [0], [0]>} : vector<8x8x8xbf16>, vector<8x8x8xbf16>, vector<8x8x8xf32> -> vector<8x8x8xf32>
    "tpu.trace_stop"() : () -> ()
    %cst_19 = arith.constant 0.353553385 : f32
    %65 = vector.broadcast %cst_19 : f32 to vector<8x8x8xf32>
    %66 = arith.mulf %64, %65 : vector<8x8x8xf32>
    %cst_20 = arith.constant dense<0xFF800000> : vector<8x8xf32>
    %67 = vector.multi_reduction <maximumf>, %66, %cst_20 [2] : vector<8x8x8xf32> to vector<8x8xf32>
    %68 = vector.shape_cast %67 : vector<8x8xf32> to vector<8x8x1xf32>
    %69 = vector.broadcast %68 : vector<8x8x1xf32> to vector<8x8x8xf32>
    %70 = arith.subf %66, %69 : vector<8x8x8xf32>
    %71 = math.exp %70 : vector<8x8x8xf32>
    %cst_21 = arith.constant dense<0.000000e+00> : vector<8x8xf32>
    %72 = vector.multi_reduction <add>, %71, %cst_21 [2] : vector<8x8x8xf32> to vector<8x8xf32>
    %73 = vector.shape_cast %72 : vector<8x8xf32> to vector<8x8x1xf32>
    %74 = tpu.reciprocal %73 {approx = true} : vector<8x8x1xf32> -> vector<8x8x1xf32>
    %75 = vector.broadcast %74 : vector<8x8x1xf32> to vector<8x8x8xf32>
    %76 = arith.mulf %71, %75 : vector<8x8x8xf32>
    %77 = arith.truncf %76 : vector<8x8x8xf32> to vector<8x8x8xbf16>
    "tpu.trace_start"() <{level = 10 : i32, message = "bqk,bkd->bqd"}> : () -> ()
    %cst_22 = arith.constant dense<0.000000e+00> : vector<8x8x8xf32>
    %78 = tpu.matmul %77, %63, %cst_22 {dimension_numbers = #tpu.dot_dimension_numbers<[2], [1], [1], [2], [0, 0, 0, 1, 1, 2], [0], [0]>} : vector<8x8x8xbf16>, vector<8x8x8xbf16>, vector<8x8x8xf32> -> vector<8x8x8xf32>
    "tpu.trace_stop"() : () -> ()
    %79 = vector.extract_strided_slice %11 {offsets = [0, 0, 24], sizes = [8, 8, 8], strides = [1, 1, 1]} : vector<8x8x32xf32> to vector<8x8x8xf32>
    %80 = arith.truncf %79 : vector<8x8x8xf32> to vector<8x8x8xbf16>
    %81 = vector.extract_strided_slice %13 {offsets = [0, 0, 24], sizes = [8, 8, 8], strides = [1, 1, 1]} : vector<8x8x32xf32> to vector<8x8x8xf32>
    %82 = arith.truncf %81 : vector<8x8x8xf32> to vector<8x8x8xbf16>
    %83 = vector.extract_strided_slice %15 {offsets = [0, 0, 24], sizes = [8, 8, 8], strides = [1, 1, 1]} : vector<8x8x32xf32> to vector<8x8x8xf32>
    %84 = arith.truncf %83 : vector<8x8x8xf32> to vector<8x8x8xbf16>
    "tpu.trace_start"() <{level = 10 : i32, message = "bqd,bkd->bqk"}> : () -> ()
    %cst_23 = arith.constant dense<0.000000e+00> : vector<8x8x8xf32>
    %85 = tpu.matmul %80, %82, %cst_23 {dimension_numbers = #tpu.dot_dimension_numbers<[2], [2], [1], [1], [0, 0, 0, 1, 1, 1], [0], [0]>} : vector<8x8x8xbf16>, vector<8x8x8xbf16>, vector<8x8x8xf32> -> vector<8x8x8xf32>
    "tpu.trace_stop"() : () -> ()
    %cst_24 = arith.constant 0.353553385 : f32
    %86 = vector.broadcast %cst_24 : f32 to vector<8x8x8xf32>
    %87 = arith.mulf %85, %86 : vector<8x8x8xf32>
    %cst_25 = arith.constant dense<0xFF800000> : vector<8x8xf32>
    %88 = vector.multi_reduction <maximumf>, %87, %cst_25 [2] : vector<8x8x8xf32> to vector<8x8xf32>
    %89 = vector.shape_cast %88 : vector<8x8xf32> to vector<8x8x1xf32>
    %90 = vector.broadcast %89 : vector<8x8x1xf32> to vector<8x8x8xf32>
    %91 = arith.subf %87, %90 : vector<8x8x8xf32>
    %92 = math.exp %91 : vector<8x8x8xf32>
    %cst_26 = arith.constant dense<0.000000e+00> : vector<8x8xf32>
    %93 = vector.multi_reduction <add>, %92, %cst_26 [2] : vector<8x8x8xf32> to vector<8x8xf32>
    %94 = vector.shape_cast %93 : vector<8x8xf32> to vector<8x8x1xf32>
    %95 = tpu.reciprocal %94 {approx = true} : vector<8x8x1xf32> -> vector<8x8x1xf32>
    %96 = vector.broadcast %95 : vector<8x8x1xf32> to vector<8x8x8xf32>
    %97 = arith.mulf %92, %96 : vector<8x8x8xf32>
    %98 = arith.truncf %97 : vector<8x8x8xf32> to vector<8x8x8xbf16>
    "tpu.trace_start"() <{level = 10 : i32, message = "bqk,bkd->bqd"}> : () -> ()
    %cst_27 = arith.constant dense<0.000000e+00> : vector<8x8x8xf32>
    %99 = tpu.matmul %98, %84, %cst_27 {dimension_numbers = #tpu.dot_dimension_numbers<[2], [1], [1], [2], [0, 0, 0, 1, 1, 2], [0], [0]>} : vector<8x8x8xbf16>, vector<8x8x8xbf16>, vector<8x8x8xf32> -> vector<8x8x8xf32>
    "tpu.trace_stop"() : () -> ()
    %100 = tpu.concatenate %36, %57, %78, %99 in 2 : vector<8x8x8xf32>, vector<8x8x8xf32>, vector<8x8x8xf32>, vector<8x8x8xf32> -> vector<8x8x32xf32>
    %101 = vector.shape_cast %100 : vector<8x8x32xf32> to vector<64x32xf32>
    %c0_28 = arith.constant 0 : index
    %c0_29 = arith.constant 0 : index
    %c0_30 = arith.constant 0 : index
    %102 = vector.load %arg4[%c0_28, %c0_29, %c0_30] : memref<2x32x32xbf16, #tpu.memory_space<vmem>>, vector<1x32x32xbf16>
    %103 = vector.shape_cast %102 : vector<1x32x32xbf16> to vector<32x32xbf16>
    %104 = arith.truncf %101 : vector<64x32xf32> to vector<64x32xbf16>
    %cst_31 = arith.constant dense<0.000000e+00> : vector<64x32xf32>
    %105 = tpu.matmul %104, %103, %cst_31 {dimension_numbers = #tpu.dot_dimension_numbers<[1], [0], [0], [1], [0, 0, 1, 1], [], []>} : vector<64x32xbf16>, vector<32x32xbf16>, vector<64x32xf32> -> vector<64x32xf32>
    %c0_32 = arith.constant 0 : index
    %c0_33 = arith.constant 0 : index
    %c0_34 = arith.constant 0 : index
    %106 = vector.load %arg5[%c0_32, %c0_33, %c0_34] : memref<2x1x32xf32, #tpu.memory_space<vmem>>, vector<1x1x32xf32>
    %107 = vector.shape_cast %106 : vector<1x1x32xf32> to vector<1x32xf32>
    %108 = vector.broadcast %107 : vector<1x32xf32> to vector<64x32xf32>
    %109 = arith.addf %105, %108 : vector<64x32xf32>
    %110 = arith.addf %1, %109 : vector<64x32xf32>
    %c0_35 = arith.constant 0 : index
    %c0_36 = arith.constant 0 : index
    %c0_37 = arith.constant 0 : index
    %111 = vector.load %arg6[%c0_35, %c0_36, %c0_37] : memref<2x1x32xf32, #tpu.memory_space<vmem>>, vector<1x1x32xf32>
    %112 = vector.shape_cast %111 : vector<1x1x32xf32> to vector<1x32xf32>
    %c0_38 = arith.constant 0 : index
    %c0_39 = arith.constant 0 : index
    %c0_40 = arith.constant 0 : index
    %113 = vector.load %arg7[%c0_38, %c0_39, %c0_40] : memref<2x1x32xf32, #tpu.memory_space<vmem>>, vector<1x1x32xf32>
    %114 = vector.shape_cast %113 : vector<1x1x32xf32> to vector<1x32xf32>
    %cst_41 = arith.constant dense<0.000000e+00> : vector<64xf32>
    %115 = vector.multi_reduction <add>, %110, %cst_41 [1] : vector<64x32xf32> to vector<64xf32>
    %116 = vector.shape_cast %115 : vector<64xf32> to vector<64x1xf32>
    %cst_42 = arith.constant 3.200000e+01 : f32
    %117 = vector.broadcast %cst_42 : f32 to vector<64x1xf32>
    %118 = arith.divf %116, %117 : vector<64x1xf32>
    %119 = vector.broadcast %118 : vector<64x1xf32> to vector<64x32xf32>
    %120 = arith.subf %110, %119 : vector<64x32xf32>
    %121 = arith.mulf %120, %120 : vector<64x32xf32>
    %cst_43 = arith.constant dense<0.000000e+00> : vector<64xf32>
    %122 = vector.multi_reduction <add>, %121, %cst_43 [1] : vector<64x32xf32> to vector<64xf32>
    %123 = vector.shape_cast %122 : vector<64xf32> to vector<64x1xf32>
    %cst_44 = arith.constant 3.200000e+01 : f32
    %124 = vector.broadcast %cst_44 : f32 to vector<64x1xf32>
    %125 = arith.divf %123, %124 : vector<64x1xf32>
    %cst_45 = arith.constant 9.99999974E-6 : f32
    %126 = vector.broadcast %cst_45 : f32 to vector<64x1xf32>
    %127 = arith.addf %125, %126 : vector<64x1xf32>
    %128 = math.rsqrt %127 : vector<64x1xf32>
    %129 = vector.broadcast %128 : vector<64x1xf32> to vector<64x32xf32>
    %130 = arith.mulf %120, %129 : vector<64x32xf32>
    %131 = vector.broadcast %112 : vector<1x32xf32> to vector<64x32xf32>
    %132 = arith.mulf %130, %131 : vector<64x32xf32>
    %133 = vector.broadcast %114 : vector<1x32xf32> to vector<64x32xf32>
    %134 = arith.addf %132, %133 : vector<64x32xf32>
    %c0_46 = arith.constant 0 : index
    %c0_47 = arith.constant 0 : index
    %c0_48 = arith.constant 0 : index
    %135 = vector.load %arg8[%c0_46, %c0_47, %c0_48] : memref<2x32x2048xbf16, #tpu.memory_space<vmem>>, vector<1x32x2048xbf16>
    %136 = vector.shape_cast %135 : vector<1x32x2048xbf16> to vector<32x2048xbf16>
    %137 = arith.truncf %134 : vector<64x32xf32> to vector<64x32xbf16>
    %cst_49 = arith.constant dense<0.000000e+00> : vector<64x2048xf32>
    %138 = tpu.matmul %137, %136, %cst_49 {dimension_numbers = #tpu.dot_dimension_numbers<[1], [0], [0], [1], [0, 0, 1, 1], [], []>} : vector<64x32xbf16>, vector<32x2048xbf16>, vector<64x2048xf32> -> vector<64x2048xf32>
    %c0_50 = arith.constant 0 : index
    %c0_51 = arith.constant 0 : index
    %c0_52 = arith.constant 0 : index
    %139 = vector.load %arg9[%c0_50, %c0_51, %c0_52] : memref<2x1x2048xf32, #tpu.memory_space<vmem>>, vector<1x1x2048xf32>
    %140 = vector.shape_cast %139 : vector<1x1x2048xf32> to vector<1x2048xf32>
    %141 = vector.broadcast %140 : vector<1x2048xf32> to vector<64x2048xf32>
    %142 = arith.addf %138, %141 : vector<64x2048xf32>
    %cst_53 = arith.constant 0.000000e+00 : f32
    %143 = vector.broadcast %cst_53 : f32 to vector<64x2048xf32>
    %144 = arith.maximumf %142, %143 : vector<64x2048xf32>
    %c0_54 = arith.constant 0 : index
    %c0_55 = arith.constant 0 : index
    %c0_56 = arith.constant 0 : index
    %145 = vector.load %arg10[%c0_54, %c0_55, %c0_56] : memref<2x2048x32xbf16, #tpu.memory_space<vmem>>, vector<1x2048x32xbf16>
    %146 = vector.shape_cast %145 : vector<1x2048x32xbf16> to vector<2048x32xbf16>
    %147 = arith.truncf %144 : vector<64x2048xf32> to vector<64x2048xbf16>
    %cst_57 = arith.constant dense<0.000000e+00> : vector<64x32xf32>
    %148 = tpu.matmul %147, %146, %cst_57 {dimension_numbers = #tpu.dot_dimension_numbers<[1], [0], [0], [1], [0, 0, 1, 1], [], []>} : vector<64x2048xbf16>, vector<2048x32xbf16>, vector<64x32xf32> -> vector<64x32xf32>
    %c0_58 = arith.constant 0 : index
    %c0_59 = arith.constant 0 : index
    %c0_60 = arith.constant 0 : index
    %149 = vector.load %arg11[%c0_58, %c0_59, %c0_60] : memref<2x1x32xf32, #tpu.memory_space<vmem>>, vector<1x1x32xf32>
    %150 = vector.shape_cast %149 : vector<1x1x32xf32> to vector<1x32xf32>
    %151 = vector.broadcast %150 : vector<1x32xf32> to vector<64x32xf32>
    %152 = arith.addf %148, %151 : vector<64x32xf32>
    %153 = arith.addf %134, %152 : vector<64x32xf32>
    %c0_61 = arith.constant 0 : index
    %c0_62 = arith.constant 0 : index
    %c0_63 = arith.constant 0 : index
    %154 = vector.load %arg12[%c0_61, %c0_62, %c0_63] : memref<2x1x32xf32, #tpu.memory_space<vmem>>, vector<1x1x32xf32>
    %155 = vector.shape_cast %154 : vector<1x1x32xf32> to vector<1x32xf32>
    %c0_64 = arith.constant 0 : index
    %c0_65 = arith.constant 0 : index
    %c0_66 = arith.constant 0 : index
    %156 = vector.load %arg13[%c0_64, %c0_65, %c0_66] : memref<2x1x32xf32, #tpu.memory_space<vmem>>, vector<1x1x32xf32>
    %157 = vector.shape_cast %156 : vector<1x1x32xf32> to vector<1x32xf32>
    %cst_67 = arith.constant dense<0.000000e+00> : vector<64xf32>
    %158 = vector.multi_reduction <add>, %153, %cst_67 [1] : vector<64x32xf32> to vector<64xf32>
    %159 = vector.shape_cast %158 : vector<64xf32> to vector<64x1xf32>
    %cst_68 = arith.constant 3.200000e+01 : f32
    %160 = vector.broadcast %cst_68 : f32 to vector<64x1xf32>
    %161 = arith.divf %159, %160 : vector<64x1xf32>
    %162 = vector.broadcast %161 : vector<64x1xf32> to vector<64x32xf32>
    %163 = arith.subf %153, %162 : vector<64x32xf32>
    %164 = arith.mulf %163, %163 : vector<64x32xf32>
    %cst_69 = arith.constant dense<0.000000e+00> : vector<64xf32>
    %165 = vector.multi_reduction <add>, %164, %cst_69 [1] : vector<64x32xf32> to vector<64xf32>
    %166 = vector.shape_cast %165 : vector<64xf32> to vector<64x1xf32>
    %cst_70 = arith.constant 3.200000e+01 : f32
    %167 = vector.broadcast %cst_70 : f32 to vector<64x1xf32>
    %168 = arith.divf %166, %167 : vector<64x1xf32>
    %cst_71 = arith.constant 9.99999974E-6 : f32
    %169 = vector.broadcast %cst_71 : f32 to vector<64x1xf32>
    %170 = arith.addf %168, %169 : vector<64x1xf32>
    %171 = math.rsqrt %170 : vector<64x1xf32>
    %172 = vector.broadcast %171 : vector<64x1xf32> to vector<64x32xf32>
    %173 = arith.mulf %163, %172 : vector<64x32xf32>
    %174 = vector.broadcast %155 : vector<1x32xf32> to vector<64x32xf32>
    %175 = arith.mulf %173, %174 : vector<64x32xf32>
    %176 = vector.broadcast %157 : vector<1x32xf32> to vector<64x32xf32>
    %177 = arith.addf %175, %176 : vector<64x32xf32>
    %c1 = arith.constant 1 : index
    %c0_72 = arith.constant 0 : index
    %c0_73 = arith.constant 0 : index
    %178 = vector.load %arg2[%c1, %c0_72, %c0_73] : memref<2x32x96xbf16, #tpu.memory_space<vmem>>, vector<1x32x96xbf16>
    %179 = vector.shape_cast %178 : vector<1x32x96xbf16> to vector<32x96xbf16>
    %180 = arith.truncf %177 : vector<64x32xf32> to vector<64x32xbf16>
    %cst_74 = arith.constant dense<0.000000e+00> : vector<64x96xf32>
    %181 = tpu.matmul %180, %179, %cst_74 {dimension_numbers = #tpu.dot_dimension_numbers<[1], [0], [0], [1], [0, 0, 1, 1], [], []>} : vector<64x32xbf16>, vector<32x96xbf16>, vector<64x96xf32> -> vector<64x96xf32>
    %c1_75 = arith.constant 1 : index
    %c0_76 = arith.constant 0 : index
    %c0_77 = arith.constant 0 : index
    %182 = vector.load %arg3[%c1_75, %c0_76, %c0_77] : memref<2x1x96xf32, #tpu.memory_space<vmem>>, vector<1x1x96xf32>
    %183 = vector.shape_cast %182 : vector<1x1x96xf32> to vector<1x96xf32>
    %184 = vector.broadcast %183 : vector<1x96xf32> to vector<64x96xf32>
    %185 = arith.addf %181, %184 : vector<64x96xf32>
    %186 = vector.extract_strided_slice %185 {offsets = [0, 0], sizes = [64, 32], strides = [1, 1]} : vector<64x96xf32> to vector<64x32xf32>
    %187 = vector.shape_cast %186 : vector<64x32xf32> to vector<8x8x32xf32>
    %188 = vector.extract_strided_slice %185 {offsets = [0, 32], sizes = [64, 32], strides = [1, 1]} : vector<64x96xf32> to vector<64x32xf32>
    %189 = vector.shape_cast %188 : vector<64x32xf32> to vector<8x8x32xf32>
    %190 = vector.extract_strided_slice %185 {offsets = [0, 64], sizes = [64, 32], strides = [1, 1]} : vector<64x96xf32> to vector<64x32xf32>
    %191 = vector.shape_cast %190 : vector<64x32xf32> to vector<8x8x32xf32>
    %192 = vector.extract_strided_slice %187 {offsets = [0, 0, 0], sizes = [8, 8, 8], strides = [1, 1, 1]} : vector<8x8x32xf32> to vector<8x8x8xf32>
    %193 = arith.truncf %192 : vector<8x8x8xf32> to vector<8x8x8xbf16>
    %194 = vector.extract_strided_slice %189 {offsets = [0, 0, 0], sizes = [8, 8, 8], strides = [1, 1, 1]} : vector<8x8x32xf32> to vector<8x8x8xf32>
    %195 = arith.truncf %194 : vector<8x8x8xf32> to vector<8x8x8xbf16>
    %196 = vector.extract_strided_slice %191 {offsets = [0, 0, 0], sizes = [8, 8, 8], strides = [1, 1, 1]} : vector<8x8x32xf32> to vector<8x8x8xf32>
    %197 = arith.truncf %196 : vector<8x8x8xf32> to vector<8x8x8xbf16>
    "tpu.trace_start"() <{level = 10 : i32, message = "bqd,bkd->bqk"}> : () -> ()
    %cst_78 = arith.constant dense<0.000000e+00> : vector<8x8x8xf32>
    %198 = tpu.matmul %193, %195, %cst_78 {dimension_numbers = #tpu.dot_dimension_numbers<[2], [2], [1], [1], [0, 0, 0, 1, 1, 1], [0], [0]>} : vector<8x8x8xbf16>, vector<8x8x8xbf16>, vector<8x8x8xf32> -> vector<8x8x8xf32>
    "tpu.trace_stop"() : () -> ()
    %cst_79 = arith.constant 0.353553385 : f32
    %199 = vector.broadcast %cst_79 : f32 to vector<8x8x8xf32>
    %200 = arith.mulf %198, %199 : vector<8x8x8xf32>
    %cst_80 = arith.constant dense<0xFF800000> : vector<8x8xf32>
    %201 = vector.multi_reduction <maximumf>, %200, %cst_80 [2] : vector<8x8x8xf32> to vector<8x8xf32>
    %202 = vector.shape_cast %201 : vector<8x8xf32> to vector<8x8x1xf32>
    %203 = vector.broadcast %202 : vector<8x8x1xf32> to vector<8x8x8xf32>
    %204 = arith.subf %200, %203 : vector<8x8x8xf32>
    %205 = math.exp %204 : vector<8x8x8xf32>
    %cst_81 = arith.constant dense<0.000000e+00> : vector<8x8xf32>
    %206 = vector.multi_reduction <add>, %205, %cst_81 [2] : vector<8x8x8xf32> to vector<8x8xf32>
    %207 = vector.shape_cast %206 : vector<8x8xf32> to vector<8x8x1xf32>
    %208 = tpu.reciprocal %207 {approx = true} : vector<8x8x1xf32> -> vector<8x8x1xf32>
    %209 = vector.broadcast %208 : vector<8x8x1xf32> to vector<8x8x8xf32>
    %210 = arith.mulf %205, %209 : vector<8x8x8xf32>
    %211 = arith.truncf %210 : vector<8x8x8xf32> to vector<8x8x8xbf16>
    "tpu.trace_start"() <{level = 10 : i32, message = "bqk,bkd->bqd"}> : () -> ()
    %cst_82 = arith.constant dense<0.000000e+00> : vector<8x8x8xf32>
    %212 = tpu.matmul %211, %197, %cst_82 {dimension_numbers = #tpu.dot_dimension_numbers<[2], [1], [1], [2], [0, 0, 0, 1, 1, 2], [0], [0]>} : vector<8x8x8xbf16>, vector<8x8x8xbf16>, vector<8x8x8xf32> -> vector<8x8x8xf32>
    "tpu.trace_stop"() : () -> ()
    %213 = vector.extract_strided_slice %187 {offsets = [0, 0, 8], sizes = [8, 8, 8], strides = [1, 1, 1]} : vector<8x8x32xf32> to vector<8x8x8xf32>
    %214 = arith.truncf %213 : vector<8x8x8xf32> to vector<8x8x8xbf16>
    %215 = vector.extract_strided_slice %189 {offsets = [0, 0, 8], sizes = [8, 8, 8], strides = [1, 1, 1]} : vector<8x8x32xf32> to vector<8x8x8xf32>
    %216 = arith.truncf %215 : vector<8x8x8xf32> to vector<8x8x8xbf16>
    %217 = vector.extract_strided_slice %191 {offsets = [0, 0, 8], sizes = [8, 8, 8], strides = [1, 1, 1]} : vector<8x8x32xf32> to vector<8x8x8xf32>
    %218 = arith.truncf %217 : vector<8x8x8xf32> to vector<8x8x8xbf16>
    "tpu.trace_start"() <{level = 10 : i32, message = "bqd,bkd->bqk"}> : () -> ()
    %cst_83 = arith.constant dense<0.000000e+00> : vector<8x8x8xf32>
    %219 = tpu.matmul %214, %216, %cst_83 {dimension_numbers = #tpu.dot_dimension_numbers<[2], [2], [1], [1], [0, 0, 0, 1, 1, 1], [0], [0]>} : vector<8x8x8xbf16>, vector<8x8x8xbf16>, vector<8x8x8xf32> -> vector<8x8x8xf32>
    "tpu.trace_stop"() : () -> ()
    %cst_84 = arith.constant 0.353553385 : f32
    %220 = vector.broadcast %cst_84 : f32 to vector<8x8x8xf32>
    %221 = arith.mulf %219, %220 : vector<8x8x8xf32>
    %cst_85 = arith.constant dense<0xFF800000> : vector<8x8xf32>
    %222 = vector.multi_reduction <maximumf>, %221, %cst_85 [2] : vector<8x8x8xf32> to vector<8x8xf32>
    %223 = vector.shape_cast %222 : vector<8x8xf32> to vector<8x8x1xf32>
    %224 = vector.broadcast %223 : vector<8x8x1xf32> to vector<8x8x8xf32>
    %225 = arith.subf %221, %224 : vector<8x8x8xf32>
    %226 = math.exp %225 : vector<8x8x8xf32>
    %cst_86 = arith.constant dense<0.000000e+00> : vector<8x8xf32>
    %227 = vector.multi_reduction <add>, %226, %cst_86 [2] : vector<8x8x8xf32> to vector<8x8xf32>
    %228 = vector.shape_cast %227 : vector<8x8xf32> to vector<8x8x1xf32>
    %229 = tpu.reciprocal %228 {approx = true} : vector<8x8x1xf32> -> vector<8x8x1xf32>
    %230 = vector.broadcast %229 : vector<8x8x1xf32> to vector<8x8x8xf32>
    %231 = arith.mulf %226, %230 : vector<8x8x8xf32>
    %232 = arith.truncf %231 : vector<8x8x8xf32> to vector<8x8x8xbf16>
    "tpu.trace_start"() <{level = 10 : i32, message = "bqk,bkd->bqd"}> : () -> ()
    %cst_87 = arith.constant dense<0.000000e+00> : vector<8x8x8xf32>
    %233 = tpu.matmul %232, %218, %cst_87 {dimension_numbers = #tpu.dot_dimension_numbers<[2], [1], [1], [2], [0, 0, 0, 1, 1, 2], [0], [0]>} : vector<8x8x8xbf16>, vector<8x8x8xbf16>, vector<8x8x8xf32> -> vector<8x8x8xf32>
    "tpu.trace_stop"() : () -> ()
    %234 = vector.extract_strided_slice %187 {offsets = [0, 0, 16], sizes = [8, 8, 8], strides = [1, 1, 1]} : vector<8x8x32xf32> to vector<8x8x8xf32>
    %235 = arith.truncf %234 : vector<8x8x8xf32> to vector<8x8x8xbf16>
    %236 = vector.extract_strided_slice %189 {offsets = [0, 0, 16], sizes = [8, 8, 8], strides = [1, 1, 1]} : vector<8x8x32xf32> to vector<8x8x8xf32>
    %237 = arith.truncf %236 : vector<8x8x8xf32> to vector<8x8x8xbf16>
    %238 = vector.extract_strided_slice %191 {offsets = [0, 0, 16], sizes = [8, 8, 8], strides = [1, 1, 1]} : vector<8x8x32xf32> to vector<8x8x8xf32>
    %239 = arith.truncf %238 : vector<8x8x8xf32> to vector<8x8x8xbf16>
    "tpu.trace_start"() <{level = 10 : i32, message = "bqd,bkd->bqk"}> : () -> ()
    %cst_88 = arith.constant dense<0.000000e+00> : vector<8x8x8xf32>
    %240 = tpu.matmul %235, %237, %cst_88 {dimension_numbers = #tpu.dot_dimension_numbers<[2], [2], [1], [1], [0, 0, 0, 1, 1, 1], [0], [0]>} : vector<8x8x8xbf16>, vector<8x8x8xbf16>, vector<8x8x8xf32> -> vector<8x8x8xf32>
    "tpu.trace_stop"() : () -> ()
    %cst_89 = arith.constant 0.353553385 : f32
    %241 = vector.broadcast %cst_89 : f32 to vector<8x8x8xf32>
    %242 = arith.mulf %240, %241 : vector<8x8x8xf32>
    %cst_90 = arith.constant dense<0xFF800000> : vector<8x8xf32>
    %243 = vector.multi_reduction <maximumf>, %242, %cst_90 [2] : vector<8x8x8xf32> to vector<8x8xf32>
    %244 = vector.shape_cast %243 : vector<8x8xf32> to vector<8x8x1xf32>
    %245 = vector.broadcast %244 : vector<8x8x1xf32> to vector<8x8x8xf32>
    %246 = arith.subf %242, %245 : vector<8x8x8xf32>
    %247 = math.exp %246 : vector<8x8x8xf32>
    %cst_91 = arith.constant dense<0.000000e+00> : vector<8x8xf32>
    %248 = vector.multi_reduction <add>, %247, %cst_91 [2] : vector<8x8x8xf32> to vector<8x8xf32>
    %249 = vector.shape_cast %248 : vector<8x8xf32> to vector<8x8x1xf32>
    %250 = tpu.reciprocal %249 {approx = true} : vector<8x8x1xf32> -> vector<8x8x1xf32>
    %251 = vector.broadcast %250 : vector<8x8x1xf32> to vector<8x8x8xf32>
    %252 = arith.mulf %247, %251 : vector<8x8x8xf32>
    %253 = arith.truncf %252 : vector<8x8x8xf32> to vector<8x8x8xbf16>
    "tpu.trace_start"() <{level = 10 : i32, message = "bqk,bkd->bqd"}> : () -> ()
    %cst_92 = arith.constant dense<0.000000e+00> : vector<8x8x8xf32>
    %254 = tpu.matmul %253, %239, %cst_92 {dimension_numbers = #tpu.dot_dimension_numbers<[2], [1], [1], [2], [0, 0, 0, 1, 1, 2], [0], [0]>} : vector<8x8x8xbf16>, vector<8x8x8xbf16>, vector<8x8x8xf32> -> vector<8x8x8xf32>
    "tpu.trace_stop"() : () -> ()
    %255 = vector.extract_strided_slice %187 {offsets = [0, 0, 24], sizes = [8, 8, 8], strides = [1, 1, 1]} : vector<8x8x32xf32> to vector<8x8x8xf32>
    %256 = arith.truncf %255 : vector<8x8x8xf32> to vector<8x8x8xbf16>
    %257 = vector.extract_strided_slice %189 {offsets = [0, 0, 24], sizes = [8, 8, 8], strides = [1, 1, 1]} : vector<8x8x32xf32> to vector<8x8x8xf32>
    %258 = arith.truncf %257 : vector<8x8x8xf32> to vector<8x8x8xbf16>
    %259 = vector.extract_strided_slice %191 {offsets = [0, 0, 24], sizes = [8, 8, 8], strides = [1, 1, 1]} : vector<8x8x32xf32> to vector<8x8x8xf32>
    %260 = arith.truncf %259 : vector<8x8x8xf32> to vector<8x8x8xbf16>
    "tpu.trace_start"() <{level = 10 : i32, message = "bqd,bkd->bqk"}> : () -> ()
    %cst_93 = arith.constant dense<0.000000e+00> : vector<8x8x8xf32>
    %261 = tpu.matmul %256, %258, %cst_93 {dimension_numbers = #tpu.dot_dimension_numbers<[2], [2], [1], [1], [0, 0, 0, 1, 1, 1], [0], [0]>} : vector<8x8x8xbf16>, vector<8x8x8xbf16>, vector<8x8x8xf32> -> vector<8x8x8xf32>
    "tpu.trace_stop"() : () -> ()
    %cst_94 = arith.constant 0.353553385 : f32
    %262 = vector.broadcast %cst_94 : f32 to vector<8x8x8xf32>
    %263 = arith.mulf %261, %262 : vector<8x8x8xf32>
    %cst_95 = arith.constant dense<0xFF800000> : vector<8x8xf32>
    %264 = vector.multi_reduction <maximumf>, %263, %cst_95 [2] : vector<8x8x8xf32> to vector<8x8xf32>
    %265 = vector.shape_cast %264 : vector<8x8xf32> to vector<8x8x1xf32>
    %266 = vector.broadcast %265 : vector<8x8x1xf32> to vector<8x8x8xf32>
    %267 = arith.subf %263, %266 : vector<8x8x8xf32>
    %268 = math.exp %267 : vector<8x8x8xf32>
    %cst_96 = arith.constant dense<0.000000e+00> : vector<8x8xf32>
    %269 = vector.multi_reduction <add>, %268, %cst_96 [2] : vector<8x8x8xf32> to vector<8x8xf32>
    %270 = vector.shape_cast %269 : vector<8x8xf32> to vector<8x8x1xf32>
    %271 = tpu.reciprocal %270 {approx = true} : vector<8x8x1xf32> -> vector<8x8x1xf32>
    %272 = vector.broadcast %271 : vector<8x8x1xf32> to vector<8x8x8xf32>
    %273 = arith.mulf %268, %272 : vector<8x8x8xf32>
    %274 = arith.truncf %273 : vector<8x8x8xf32> to vector<8x8x8xbf16>
    "tpu.trace_start"() <{level = 10 : i32, message = "bqk,bkd->bqd"}> : () -> ()
    %cst_97 = arith.constant dense<0.000000e+00> : vector<8x8x8xf32>
    %275 = tpu.matmul %274, %260, %cst_97 {dimension_numbers = #tpu.dot_dimension_numbers<[2], [1], [1], [2], [0, 0, 0, 1, 1, 2], [0], [0]>} : vector<8x8x8xbf16>, vector<8x8x8xbf16>, vector<8x8x8xf32> -> vector<8x8x8xf32>
    "tpu.trace_stop"() : () -> ()
    %276 = tpu.concatenate %212, %233, %254, %275 in 2 : vector<8x8x8xf32>, vector<8x8x8xf32>, vector<8x8x8xf32>, vector<8x8x8xf32> -> vector<8x8x32xf32>
    %277 = vector.shape_cast %276 : vector<8x8x32xf32> to vector<64x32xf32>
    %c1_98 = arith.constant 1 : index
    %c0_99 = arith.constant 0 : index
    %c0_100 = arith.constant 0 : index
    %278 = vector.load %arg4[%c1_98, %c0_99, %c0_100] : memref<2x32x32xbf16, #tpu.memory_space<vmem>>, vector<1x32x32xbf16>
    %279 = vector.shape_cast %278 : vector<1x32x32xbf16> to vector<32x32xbf16>
    %280 = arith.truncf %277 : vector<64x32xf32> to vector<64x32xbf16>
    %cst_101 = arith.constant dense<0.000000e+00> : vector<64x32xf32>
    %281 = tpu.matmul %280, %279, %cst_101 {dimension_numbers = #tpu.dot_dimension_numbers<[1], [0], [0], [1], [0, 0, 1, 1], [], []>} : vector<64x32xbf16>, vector<32x32xbf16>, vector<64x32xf32> -> vector<64x32xf32>
    %c1_102 = arith.constant 1 : index
    %c0_103 = arith.constant 0 : index
    %c0_104 = arith.constant 0 : index
    %282 = vector.load %arg5[%c1_102, %c0_103, %c0_104] : memref<2x1x32xf32, #tpu.memory_space<vmem>>, vector<1x1x32xf32>
    %283 = vector.shape_cast %282 : vector<1x1x32xf32> to vector<1x32xf32>
    %284 = vector.broadcast %283 : vector<1x32xf32> to vector<64x32xf32>
    %285 = arith.addf %281, %284 : vector<64x32xf32>
    %286 = arith.addf %177, %285 : vector<64x32xf32>
    %c1_105 = arith.constant 1 : index
    %c0_106 = arith.constant 0 : index
    %c0_107 = arith.constant 0 : index
    %287 = vector.load %arg6[%c1_105, %c0_106, %c0_107] : memref<2x1x32xf32, #tpu.memory_space<vmem>>, vector<1x1x32xf32>
    %288 = vector.shape_cast %287 : vector<1x1x32xf32> to vector<1x32xf32>
    %c1_108 = arith.constant 1 : index
    %c0_109 = arith.constant 0 : index
    %c0_110 = arith.constant 0 : index
    %289 = vector.load %arg7[%c1_108, %c0_109, %c0_110] : memref<2x1x32xf32, #tpu.memory_space<vmem>>, vector<1x1x32xf32>
    %290 = vector.shape_cast %289 : vector<1x1x32xf32> to vector<1x32xf32>
    %cst_111 = arith.constant dense<0.000000e+00> : vector<64xf32>
    %291 = vector.multi_reduction <add>, %286, %cst_111 [1] : vector<64x32xf32> to vector<64xf32>
    %292 = vector.shape_cast %291 : vector<64xf32> to vector<64x1xf32>
    %cst_112 = arith.constant 3.200000e+01 : f32
    %293 = vector.broadcast %cst_112 : f32 to vector<64x1xf32>
    %294 = arith.divf %292, %293 : vector<64x1xf32>
    %295 = vector.broadcast %294 : vector<64x1xf32> to vector<64x32xf32>
    %296 = arith.subf %286, %295 : vector<64x32xf32>
    %297 = arith.mulf %296, %296 : vector<64x32xf32>
    %cst_113 = arith.constant dense<0.000000e+00> : vector<64xf32>
    %298 = vector.multi_reduction <add>, %297, %cst_113 [1] : vector<64x32xf32> to vector<64xf32>
    %299 = vector.shape_cast %298 : vector<64xf32> to vector<64x1xf32>
    %cst_114 = arith.constant 3.200000e+01 : f32
    %300 = vector.broadcast %cst_114 : f32 to vector<64x1xf32>
    %301 = arith.divf %299, %300 : vector<64x1xf32>
    %cst_115 = arith.constant 9.99999974E-6 : f32
    %302 = vector.broadcast %cst_115 : f32 to vector<64x1xf32>
    %303 = arith.addf %301, %302 : vector<64x1xf32>
    %304 = math.rsqrt %303 : vector<64x1xf32>
    %305 = vector.broadcast %304 : vector<64x1xf32> to vector<64x32xf32>
    %306 = arith.mulf %296, %305 : vector<64x32xf32>
    %307 = vector.broadcast %288 : vector<1x32xf32> to vector<64x32xf32>
    %308 = arith.mulf %306, %307 : vector<64x32xf32>
    %309 = vector.broadcast %290 : vector<1x32xf32> to vector<64x32xf32>
    %310 = arith.addf %308, %309 : vector<64x32xf32>
    %c1_116 = arith.constant 1 : index
    %c0_117 = arith.constant 0 : index
    %c0_118 = arith.constant 0 : index
    %311 = vector.load %arg8[%c1_116, %c0_117, %c0_118] : memref<2x32x2048xbf16, #tpu.memory_space<vmem>>, vector<1x32x2048xbf16>
    %312 = vector.shape_cast %311 : vector<1x32x2048xbf16> to vector<32x2048xbf16>
    %313 = arith.truncf %310 : vector<64x32xf32> to vector<64x32xbf16>
    %cst_119 = arith.constant dense<0.000000e+00> : vector<64x2048xf32>
    %314 = tpu.matmul %313, %312, %cst_119 {dimension_numbers = #tpu.dot_dimension_numbers<[1], [0], [0], [1], [0, 0, 1, 1], [], []>} : vector<64x32xbf16>, vector<32x2048xbf16>, vector<64x2048xf32> -> vector<64x2048xf32>
    %c1_120 = arith.constant 1 : index
    %c0_121 = arith.constant 0 : index
    %c0_122 = arith.constant 0 : index
    %315 = vector.load %arg9[%c1_120, %c0_121, %c0_122] : memref<2x1x2048xf32, #tpu.memory_space<vmem>>, vector<1x1x2048xf32>
    %316 = vector.shape_cast %315 : vector<1x1x2048xf32> to vector<1x2048xf32>
    %317 = vector.broadcast %316 : vector<1x2048xf32> to vector<64x2048xf32>
    %318 = arith.addf %314, %317 : vector<64x2048xf32>
    %cst_123 = arith.constant 0.000000e+00 : f32
    %319 = vector.broadcast %cst_123 : f32 to vector<64x2048xf32>
    %320 = arith.maximumf %318, %319 : vector<64x2048xf32>
    %c1_124 = arith.constant 1 : index
    %c0_125 = arith.constant 0 : index
    %c0_126 = arith.constant 0 : index
    %321 = vector.load %arg10[%c1_124, %c0_125, %c0_126] : memref<2x2048x32xbf16, #tpu.memory_space<vmem>>, vector<1x2048x32xbf16>
    %322 = vector.shape_cast %321 : vector<1x2048x32xbf16> to vector<2048x32xbf16>
    %323 = arith.truncf %320 : vector<64x2048xf32> to vector<64x2048xbf16>
    %cst_127 = arith.constant dense<0.000000e+00> : vector<64x32xf32>
    %324 = tpu.matmul %323, %322, %cst_127 {dimension_numbers = #tpu.dot_dimension_numbers<[1], [0], [0], [1], [0, 0, 1, 1], [], []>} : vector<64x2048xbf16>, vector<2048x32xbf16>, vector<64x32xf32> -> vector<64x32xf32>
    %c1_128 = arith.constant 1 : index
    %c0_129 = arith.constant 0 : index
    %c0_130 = arith.constant 0 : index
    %325 = vector.load %arg11[%c1_128, %c0_129, %c0_130] : memref<2x1x32xf32, #tpu.memory_space<vmem>>, vector<1x1x32xf32>
    %326 = vector.shape_cast %325 : vector<1x1x32xf32> to vector<1x32xf32>
    %327 = vector.broadcast %326 : vector<1x32xf32> to vector<64x32xf32>
    %328 = arith.addf %324, %327 : vector<64x32xf32>
    %329 = arith.addf %310, %328 : vector<64x32xf32>
    %c1_131 = arith.constant 1 : index
    %c0_132 = arith.constant 0 : index
    %c0_133 = arith.constant 0 : index
    %330 = vector.load %arg12[%c1_131, %c0_132, %c0_133] : memref<2x1x32xf32, #tpu.memory_space<vmem>>, vector<1x1x32xf32>
    %331 = vector.shape_cast %330 : vector<1x1x32xf32> to vector<1x32xf32>
    %c1_134 = arith.constant 1 : index
    %c0_135 = arith.constant 0 : index
    %c0_136 = arith.constant 0 : index
    %332 = vector.load %arg13[%c1_134, %c0_135, %c0_136] : memref<2x1x32xf32, #tpu.memory_space<vmem>>, vector<1x1x32xf32>
    %333 = vector.shape_cast %332 : vector<1x1x32xf32> to vector<1x32xf32>
    %cst_137 = arith.constant dense<0.000000e+00> : vector<64xf32>
    %334 = vector.multi_reduction <add>, %329, %cst_137 [1] : vector<64x32xf32> to vector<64xf32>
    %335 = vector.shape_cast %334 : vector<64xf32> to vector<64x1xf32>
    %cst_138 = arith.constant 3.200000e+01 : f32
    %336 = vector.broadcast %cst_138 : f32 to vector<64x1xf32>
    %337 = arith.divf %335, %336 : vector<64x1xf32>
    %338 = vector.broadcast %337 : vector<64x1xf32> to vector<64x32xf32>
    %339 = arith.subf %329, %338 : vector<64x32xf32>
    %340 = arith.mulf %339, %339 : vector<64x32xf32>
    %cst_139 = arith.constant dense<0.000000e+00> : vector<64xf32>
    %341 = vector.multi_reduction <add>, %340, %cst_139 [1] : vector<64x32xf32> to vector<64xf32>
    %342 = vector.shape_cast %341 : vector<64xf32> to vector<64x1xf32>
    %cst_140 = arith.constant 3.200000e+01 : f32
    %343 = vector.broadcast %cst_140 : f32 to vector<64x1xf32>
    %344 = arith.divf %342, %343 : vector<64x1xf32>
    %cst_141 = arith.constant 9.99999974E-6 : f32
    %345 = vector.broadcast %cst_141 : f32 to vector<64x1xf32>
    %346 = arith.addf %344, %345 : vector<64x1xf32>
    %347 = math.rsqrt %346 : vector<64x1xf32>
    %348 = vector.broadcast %347 : vector<64x1xf32> to vector<64x32xf32>
    %349 = arith.mulf %339, %348 : vector<64x32xf32>
    %350 = vector.broadcast %331 : vector<1x32xf32> to vector<64x32xf32>
    %351 = arith.mulf %349, %350 : vector<64x32xf32>
    %352 = vector.broadcast %333 : vector<1x32xf32> to vector<64x32xf32>
    %353 = arith.addf %351, %352 : vector<64x32xf32>
    %c0_142 = arith.constant 0 : index
    %c0_143 = arith.constant 0 : index
    %354 = vector.load %arg14[%c0_142, %c0_143] : memref<1x32xf32, #tpu.memory_space<vmem>>, vector<1x32xf32>
    %355 = vector.broadcast %354 : vector<1x32xf32> to vector<64x32xf32>
    %356 = arith.mulf %353, %355 : vector<64x32xf32>
    %cst_144 = arith.constant dense<0.000000e+00> : vector<64xf32>
    %357 = vector.multi_reduction <add>, %356, %cst_144 [1] : vector<64x32xf32> to vector<64xf32>
    %358 = vector.shape_cast %357 : vector<64xf32> to vector<64x1xf32>
    %c0_145 = arith.constant 0 : index
    %c0_146 = arith.constant 0 : index
    %359 = vector.load %arg15[%c0_145, %c0_146] : memref<1x1xf32, #tpu.memory_space<vmem>>, vector<1x1xf32>
    %360 = vector.broadcast %359 : vector<1x1xf32> to vector<64x1xf32>
    %361 = arith.addf %358, %360 : vector<64x1xf32>
    %c0_147 = arith.constant 0 : index
    %c0_148 = arith.constant 0 : index
    %c0_149 = arith.constant 0 : index
    %362 = vector.load %arg16[%c0_147, %c0_148, %c0_149] : memref<1x64x1xf32, #tpu.memory_space<vmem>>, vector<1x64x1xf32>
    %363 = vector.shape_cast %362 : vector<1x64x1xf32> to vector<64x1xf32>
    %364 = vector.shape_cast %361 : vector<64x1xf32> to vector<1x64x1xf32>
    tpu.vector_store %arg16[%c0_147, %c0_148, %c0_149], %364 {strides = array<i32>} : memref<1x64x1xf32, #tpu.memory_space<vmem>>, vector<1x64x1xf32>,
    return
  }
  func.func @transform_0(%arg0: i32) -> (i32, i32, i32) {
    %c0_i32 = arith.constant 0 : i32
    %c0_i32_0 = arith.constant 0 : i32
    %c0_i32_1 = arith.constant 0 : i32
    return %arg0, %c0_i32, %c0_i32_0 : i32, i32, i32
  }
  func.func @transform_1(%arg0: i32) -> (i32, i32, i32) {
    %c0_i32 = arith.constant 0 : i32
    %c0_i32_0 = arith.constant 0 : i32
    %c0_i32_1 = arith.constant 0 : i32
    %c0_i32_2 = arith.constant 0 : i32
    return %c0_i32, %c0_i32_0, %c0_i32_1 : i32, i32, i32
  }
  func.func @transform_2(%arg0: i32) -> (i32, i32, i32) {
    %c0_i32 = arith.constant 0 : i32
    %c0_i32_0 = arith.constant 0 : i32
    %c0_i32_1 = arith.constant 0 : i32
    %c0_i32_2 = arith.constant 0 : i32
    return %c0_i32, %c0_i32_0, %c0_i32_1 : i32, i32, i32
  }
  func.func @transform_3(%arg0: i32) -> (i32, i32, i32) {
    %c0_i32 = arith.constant 0 : i32
    %c0_i32_0 = arith.constant 0 : i32
    %c0_i32_1 = arith.constant 0 : i32
    %c0_i32_2 = arith.constant 0 : i32
    return %c0_i32, %c0_i32_0, %c0_i32_1 : i32, i32, i32
  }
  func.func @transform_4(%arg0: i32) -> (i32, i32, i32) {
    %c0_i32 = arith.constant 0 : i32
    %c0_i32_0 = arith.constant 0 : i32
    %c0_i32_1 = arith.constant 0 : i32
    %c0_i32_2 = arith.constant 0 : i32
    return %c0_i32, %c0_i32_0, %c0_i32_1 : i32, i32, i32
  }
  func.func @transform_5(%arg0: i32) -> (i32, i32, i32) {
    %c0_i32 = arith.constant 0 : i32
    %c0_i32_0 = arith.constant 0 : i32
    %c0_i32_1 = arith.constant 0 : i32
    %c0_i32_2 = arith.constant 0 : i32
    return %c0_i32, %c0_i32_0, %c0_i32_1 : i32, i32, i32
  }
  func.func @transform_6(%arg0: i32) -> (i32, i32, i32) {
    %c0_i32 = arith.constant 0 : i32
    %c0_i32_0 = arith.constant 0 : i32
    %c0_i32_1 = arith.constant 0 : i32
    %c0_i32_2 = arith.constant 0 : i32
    return %c0_i32, %c0_i32_0, %c0_i32_1 : i32, i32, i32
  }
  func.func @transform_7(%arg0: i32) -> (i32, i32, i32) {
    %c0_i32 = arith.constant 0 : i32
    %c0_i32_0 = arith.constant 0 : i32
    %c0_i32_1 = arith.constant 0 : i32
    %c0_i32_2 = arith.constant 0 : i32
    return %c0_i32, %c0_i32_0, %c0_i32_1 : i32, i32, i32
  }
  func.func @transform_8(%arg0: i32) -> (i32, i32, i32) {
    %c0_i32 = arith.constant 0 : i32
    %c0_i32_0 = arith.constant 0 : i32
    %c0_i32_1 = arith.constant 0 : i32
    %c0_i32_2 = arith.constant 0 : i32
    return %c0_i32, %c0_i32_0, %c0_i32_1 : i32, i32, i32
  }
  func.func @transform_9(%arg0: i32) -> (i32, i32, i32) {
    %c0_i32 = arith.constant 0 : i32
    %c0_i32_0 = arith.constant 0 : i32
    %c0_i32_1 = arith.constant 0 : i32
    %c0_i32_2 = arith.constant 0 : i32
    return %c0_i32, %c0_i32_0, %c0_i32_1 : i32, i32, i32
  }
  func.func @transform_10(%arg0: i32) -> (i32, i32, i32) {
    %c0_i32 = arith.constant 0 : i32
    %c0_i32_0 = arith.constant 0 : i32
    %c0_i32_1 = arith.constant 0 : i32
    %c0_i32_2 = arith.constant 0 : i32
    return %c0_i32, %c0_i32_0, %c0_i32_1 : i32, i32, i32
  }
  func.func @transform_11(%arg0: i32) -> (i32, i32, i32) {
    %c0_i32 = arith.constant 0 : i32
    %c0_i32_0 = arith.constant 0 : i32
    %c0_i32_1 = arith.constant 0 : i32
    %c0_i32_2 = arith.constant 0 : i32
    return %c0_i32, %c0_i32_0, %c0_i32_1 : i32, i32, i32
  }
  func.func @transform_12(%arg0: i32) -> (i32, i32, i32) {
    %c0_i32 = arith.constant 0 : i32
    %c0_i32_0 = arith.constant 0 : i32
    %c0_i32_1 = arith.constant 0 : i32
    %c0_i32_2 = arith.constant 0 : i32
    return %c0_i32, %c0_i32_0, %c0_i32_1 : i32, i32, i32
  }
  func.func @transform_13(%arg0: i32) -> (i32, i32) {
    %c0_i32 = arith.constant 0 : i32
    %c0_i32_0 = arith.constant 0 : i32
    %c0_i32_1 = arith.constant 0 : i32
    return %c0_i32, %c0_i32_0 : i32, i32
  }
  func.func @transform_14(%arg0: i32) -> (i32, i32) {
    %c0_i32 = arith.constant 0 : i32
    %c0_i32_0 = arith.constant 0 : i32
    %c0_i32_1 = arith.constant 0 : i32
    return %c0_i32, %c0_i32_0 : i32, i32
  }
  func.func @transform_15(%arg0: i32) -> (i32, i32, i32) {
    %c0_i32 = arith.constant 0 : i32
    %c0_i32_0 = arith.constant 0 : i32
    %c0_i32_1 = arith.constant 0 : i32
    return %arg0, %c0_i32, %c0_i32_0 : i32, i32, i32
  }
}

</mosaic_0001>

<bundles_post_ra>
// kernel: tpu_custom_call.1
= control target key start
LH: loop header
LB: loop body
LE: loop exit
PB: predicated region body
PF: predicated region fallthrough
CT: control target
= control target key end

     0   :  { %vm88_vm0 = vcmask 261120   ;;  %v21534_v14 = vmov 0.0   ;;  %vm17039_vm1 = vmmov 0   ;;  %s17040_s25 = smov 96   ;;  %s17041_s26 = smov 64   ;;  %vm177_vm2 = vcmask 64512   ;;  %s21496_s1 = inlined_call_operand.vmem [shape: bf16[2,32,96], index: 1, kind: input, shape index: {}]   ;;  %s21497_s0 = inlined_call_operand.vmem [shape: f32[1,64,32], index: 0, kind: input, shape index: {}]   ;;  %s21498_s2 = inlined_call_operand.vmem [shape: f32[2,1,96], index: 2, kind: input, shape index: {}]   ;;  %s21499_s3 = inlined_call_operand.vmem [shape: bf16[2,32,32], index: 3, kind: input, shape index: {}]   ;;  %s21500_s4 = inlined_call_operand.vmem [shape: f32[2,1,32], index: 4, kind: input, shape index: {}]   ;;  %s21501_s7 = inlined_call_operand.vmem [shape: bf16[2,32,2048], index: 7, kind: input, shape index: {}]   ;;  %s21502_s5 = inlined_call_operand.vmem [shape: f32[2,1,32], index: 5, kind: input, shape index: {}]   ;;  %s21503_s6 = inlined_call_operand.vmem [shape: f32[2,1,32], index: 6, kind: input, shape index: {}]   ;;  %s21504_s9 = inlined_call_operand.vmem [shape: bf16[2,2048,32], index: 9, kind: input, shape index: {}]   ;;  %s21505_s8 = inlined_call_operand.vmem [shape: f32[2,1,2048], index: 8, kind: input, shape index: {}]   ;;  %s21506_s10 = inlined_call_operand.vmem [shape: f32[2,1,32], index: 10, kind: input, shape index: {}]   ;;  %s21507_s11 = inlined_call_operand.vmem [shape: f32[2,1,32], index: 11, kind: input, shape index: {}]   ;;  %s21508_s12 = inlined_call_operand.vmem [shape: f32[2,1,32], index: 12, kind: input, shape index: {}]   ;;  %s21509_s14 = inlined_call_operand.<no memory space> [shape: f32[1,1], index: 14, kind: input, shape index: {}]   ;;  %s21510_s13 = inlined_call_operand.vmem [shape: f32[1,32], index: 13, kind: input, shape index: {}]   ;;  %s21511_s15 = inlined_call_operand.vmem [shape: f32[1,64,1], index: 15, kind: output, shape index: {}]  }
   0x1   :  { %v16446_v0 = vld [vmem:[%s21496_s1 + $0x8] sm:$0xff]   ;;  %v16447_v1 = vld [vmem:[%s21496_s1] sm:$0xff]   ;;  %v55_v4 = vld [vmem:[%s21497_s0 + $0x10] sm:$0xff]  ;;  %vm676_vm3 = vcmask 1043456   ;;  %s17042_s27 = smov 88   ;;  %s17043_s28 = smov 120  }
   0x2   :  { %15489 = vmatprep.subr.bf16.mxu0 %v16446_v0  ;;  %16305 = vmatprep.subr.bf16.mxu1 %v16446_v0  ;;  %v53_v2 = vld [vmem:[%s21497_s0] sm:$0xff]  ;;  %v54_v3 = vld [vmem:[%s21497_s0 + $0x8] sm:$0xff]  ;;  %v56_v6 = vld [vmem:[%s21497_s0 + $0x18] sm:$0xff]  ;;  %s21530_s29 = smov 56   ;;  %s21528_s30 = smov 80   ;;  %vm3824_vm4 = vcmask 130048  }
   0x3   :  { %15490 = vmatpush3.bf16.msra.mxu0 %v16446_v0  ;;  %16307 = vmatpush3.bf16.msra.mxu1 %v16446_v0  ;;  %v65_v5 = vpack.c.bf16 %v54_v3, %v53_v2  ;;  %v57_v7 = vld [vmem:[%s21497_s0 + $0x20] sm:$0xff]  ;;  %v58_v8 = vld [vmem:[%s21497_s0 + $0x28] sm:$0xff]  ;;  %v59_v10 = vld [vmem:[%s21497_s0 + $0x30] sm:$0xff]  ;;  %v66_v12 = vpack.c.bf16 %v56_v6, %v55_v4  ;;  %s21526_s16 = smov 112   ;;  %s21524_s17 = smov 48   ;;  %vm3833_vm5 = vcmask 195584  }
   0x4   :  { %15491 = vmatprep.subr.bf16.mxu0 %v16447_v1  ;;  %16306 = vmatprep.subr.bf16.mxu1 %v16447_v1  ;;  %v67_v9 = vpack.c.bf16 %v58_v8, %v57_v7  ;;  %v60_v11 = vld [vmem:[%s21497_s0 + $0x38] sm:$0xff]  ;;  %v13712_v15 = vld [vmem:[%s21498_s2] ss:$0 sm:$0xff]  ;;  %s21516_s18 = smov 72   ;;  %s21514_s19 = smov 104   ;;  %vm13699_vm6 = vcmask 7168  }
   0x5   :  { %15493 = vmatprep.mubr.msk.bf16.mxu0 %vm88_vm0, %v65_v5  ;;  %v68_v13 = vpack.c.bf16 %v60_v11, %v59_v10  ;;  %s21512_s20 = smov 40   ;;  %s21522_s21 = smov 8  }
   0x6   :  { %15497 = vmatprep.mubr.msk.bf16.mxu1 %vm88_vm0, %v67_v9  ;;  %s21520_s22 = smov 16   ;;  %s21628_s23 = smov 24  }
   0x7   :  { %15492 = vmatpush3.bf16.msra.mxu0 %v16447_v1  ;;  %16308 = vmatpush3.bf16.msra.mxu1 %v16447_v1 }
   0x8   :  { %15513 = vmatprep.subr.bf16.mxu0 %v21534_v14  ;;  %15501 = vmatprep.subr.bf16.mxu1 %v21534_v14 }
   0xa   :  { %15494 = vmatmul.mubr.msk.bf16.vlgmr.msra.gmra.mxu0 %vm88_vm0, %v66_v12  ;;  %15498 = vmatmul.mubr.msk.bf16.vlgmr.msra.gmra.mxu1 %vm88_vm0, %v68_v13 }
   0xb   :  { %15515 = vmatprep.mubr.msk.bf16.mxu0 %vm17039_vm1, %v21534_v14  ;;  %15503 = vmatprep.mubr.msk.bf16.mxu1 %vm17039_vm1, %v21534_v14 }
  0xca   :  { %v15495_v16 = vpop.f32.mrf.mxu0  ;;  %v15499_v17 = vpop.f32.mrf.mxu1 }
  0xcb   :  { %v144_v18 = vadd.f32 %v15495_v16, %v13712_v15  ;;  %v160_v37 = vadd.f32 %v15499_v17, %v13712_v15 }
  0xcc   :  { %v135_v19 = vpop.f32.mrf.mxu0  ;;  %v151_v20 = vpop.f32.mrf.mxu1 }
  0xcd   :  { %v17178_v21 = vpack.c.bf16 %v144_v18, %v144_v18  ;;  %v136_v22 = vadd.f32 %v13712_v15, %v135_v19  ;;  %v152_v30 = vadd.f32 %v13712_v15, %v151_v20  ;;  %v17204_v39 = vpack.c.bf16 %v160_v37, %v160_v37 }
  0xce   :  { %v15496_v23 = vpop.f32.mrf.mxu0  ;;  %v15500_v24 = vpop.f32.mrf.mxu1 }
  0xcf   :  { %v17180_v25 = vpack.c.bf16 %v136_v22, %v136_v22  ;;  %v147_v26 = vadd.f32 %v15496_v23, %v13712_v15  ;;  %274 = vrot.lane.b32.xlu1 %v17178_v21, %s17040_s25  ;;  %v163_v34 = vadd.f32 %v15500_v24, %v13712_v15  ;;  %v17194_v36 = vpack.c.bf16 %v152_v30, %v152_v30 }
  0xd0   :  { %v138_v27 = vpop.f32.mrf.mxu0  ;;  %v154_v28 = vpop.f32.mrf.mxu1 }
  0xd1   :  { %v17184_v29 = vpack.c.bf16 %v147_v26, %v147_v26  ;;  %v139_v31 = vadd.f32 %v13712_v15, %v138_v27  ;;  %175 = vrot.lane.b32.xlu0 %v17180_v25, %s17040_s25  ;;  %v155_v32 = vadd.f32 %v13712_v15, %v154_v28  ;;  %v17198_v38 = vpack.c.bf16 %v163_v34, %v163_v34 }
  0xd3   :  { %v17188_v33 = vpack.c.bf16 %v139_v31, %v139_v31  ;;  %v17190_v35 = vpack.c.bf16 %v155_v32, %v155_v32  ;;  %323 = vrot.lane.b32.xlu1 %v17184_v29, %s17040_s25 }
  0xd5   :  { %225 = vrot.lane.b32.xlu0 %v17188_v33, %s17040_s25 }
  0xd7   :  { %421 = vrot.lane.b32.xlu1 %v17190_v35, %s17040_s25 }
  0xd9   :  { %372 = vrot.lane.b32.xlu0 %v17194_v36, %s17040_s25 }
  0xdb   :  { %519 = vrot.lane.b32.xlu1 %v17198_v38, %s17040_s25 }
  0xdd   :  { %470 = vrot.lane.b32.xlu0 %v17204_v39, %s17040_s25 }
  0xdf   :  { %671 = vrot.lane.b32.xlu1 %v17180_v25, %s17041_s26 }
  0xe1   :  { %720 = vrot.lane.b32.xlu0 %v17188_v33, %s17041_s26 }
  0xe3   :  { %768 = vrot.lane.b32.xlu1 %v17178_v21, %s17041_s26 }
 0x141   :  { %v275_v40 = vpop.permute.xlu1 %274 }
 0x142   :  { %v280_v41 = vsel %vm177_vm2, %v275_v40, 0 }
 0x143   :  { %15514 = vmatpush3.bf16.xpose.msra.mxu0 %v280_v41  ;;  %v176_v42 = vpop.permute.xlu0 %175 }
 0x144   :  { %v182_v43 = vsel %vm177_vm2, %v176_v42, 0  ;;  %15525 = vmatprep.subr.bf16.mxu0 %v21534_v14 }
 0x145   :  { %15502 = vmatpush3.bf16.xpose.msra.mxu1 %v182_v43  ;;  %v324_v44 = vpop.permute.xlu1 %323 }
 0x146   :  { %15507 = vmatprep.subr.bf16.mxu1 %v21534_v14  ;;  %v329_v52 = vsel %vm177_vm2, %v324_v44, 0 }
 0x147   :  { %v226_v45 = vpop.permute.xlu0 %225 }
 0x148   :  { %v231_v47 = vsel %vm177_vm2, %v226_v45, 0 }
 0x149   :  { %v422_v49 = vpop.permute.xlu1 %421 }
 0x14a   :  { %15516 = vmatmul.mubr.msk.bf16.vlgmr.msra.gmra.mxu0 %vm177_vm2, %v17178_v21  ;;  %v427_v55 = vsel %vm177_vm2, %v422_v49, 0 }
 0x14b   :  { %v373_v46 = vpop.permute.xlu0 %372  ;;  %15527 = vmatprep.mubr.msk.bf16.mxu0 %vm17039_vm1, %v21534_v14 }
 0x14c   :  { %v378_v48 = vsel %vm177_vm2, %v373_v46, 0  ;;  %15504 = vmatmul.mubr.msk.bf16.vlgmr.msra.gmra.mxu1 %vm177_vm2, %v17180_v25 }
 0x14d   :  { %15508 = vmatpush3.bf16.xpose.msra.mxu1 %v231_v47  ;;  %15526 = vmatpush3.bf16.xpose.msra.mxu0 %v378_v48  ;;  %v520_v51 = vpop.permute.xlu1 %519 }
 0x14e   :  { %15509 = vmatprep.mubr.msk.bf16.mxu1 %vm17039_vm1, %v21534_v14  ;;  %15519 = vmatprep.subr.bf16.mxu1 %v21534_v14  ;;  %v525_v57 = vsel %vm177_vm2, %v520_v51, 0 }
 0x14f   :  { %15537 = vmatprep.subr.bf16.mxu0 %v21534_v14  ;;  %v471_v50 = vpop.permute.xlu0 %470 }
 0x150   :  { %v476_v53 = vsel %vm177_vm2, %v471_v50, 0 }
 0x151   :  { %v672_v54 = vpop.permute.xlu1 %671 }
 0x152   :  { %v678_v56 = vsel %vm676_vm3, %v672_v54, 0 }
 0x153   :  { %v721_v58 = vpop.permute.xlu0 %720 }
 0x154   :  { %15510 = vmatmul.mubr.msk.bf16.vlgmr.msra.gmra.mxu1 %vm177_vm2, %v17188_v33  ;;  %15528 = vmatmul.mubr.msk.bf16.vlgmr.msra.gmra.mxu0 %vm177_vm2, %v17194_v36  ;;  %v726_v59 = vsel %vm676_vm3, %v721_v58, 0 }
 0x155   :  { %15520 = vmatpush3.bf16.xpose.msra.mxu1 %v329_v52  ;;  %15538 = vmatpush3.bf16.xpose.msra.mxu0 %v476_v53  ;;  %v17286_v58 = vpop.permute.xlu1 %768 }
 0x156   :  { %15521 = vmatprep.mubr.msk.bf16.mxu1 %vm17039_vm1, %v21534_v14  ;;  %15539 = vmatprep.mubr.msk.bf16.mxu0 %vm17039_vm1, %v21534_v14 }
 0x157   :  { %15531 = vmatprep.subr.bf16.mxu1 %v21534_v14  ;;  %15549 = vmatprep.subr.bf16.mxu0 %v21534_v14 }
 0x15c   :  { %15522 = vmatmul.mubr.msk.bf16.vlgmr.msra.gmra.mxu1 %vm177_vm2, %v17184_v29  ;;  %15540 = vmatmul.mubr.msk.bf16.vlgmr.msra.gmra.mxu0 %vm177_vm2, %v17204_v39 }
 0x15d   :  { %15532 = vmatpush3.bf16.xpose.msra.mxu1 %v427_v55  ;;  %15550 = vmatpush3.bf16.msra.mxu0 %v678_v56 }
 0x15e   :  { %15533 = vmatprep.mubr.msk.bf16.mxu1 %vm17039_vm1, %v21534_v14  ;;  %15543 = vmatprep.subr.bf16.mxu1 %v21534_v14 }
 0x15f   :  { %15551 = vmatprep.mubr.msk.bf16.mxu0 %vm17039_vm1, %v21534_v14  ;;  %15561 = vmatprep.subr.bf16.mxu0 %v21534_v14 }
 0x164   :  { %15534 = vmatmul.mubr.msk.bf16.vlgmr.msra.gmra.mxu1 %vm177_vm2, %v17190_v35 }
 0x165   :  { %15544 = vmatpush3.bf16.xpose.msra.mxu1 %v525_v57  ;;  %15545 = vmatprep.mubr.msk.bf16.mxu1 %vm17039_vm1, %v21534_v14 }
 0x166   :  { %15555 = vmatprep.subr.bf16.mxu1 %v21534_v14 }
 0x16c   :  { %15546 = vmatmul.mubr.msk.bf16.vlgmr.msra.gmra.mxu1 %vm177_vm2, %v17198_v38 }
 0x16d   :  { %15556 = vmatpush3.bf16.msra.mxu1 %v726_v59  ;;  %15557 = vmatprep.mubr.msk.bf16.mxu1 %vm17039_vm1, %v21534_v14 }
 0x16e   :  { %15567 = vmatprep.subr.bf16.mxu1 %v21534_v14 }
 0x20a   :  { %v316_v60 = vpop.f32.mrf.mxu0 }
 0x20b   :  { %v569_v61 = vmul.f32 0.35355338, %v316_v60 }
 0x20c   :  { %v218_v62 = vpop.f32.mrf.mxu1  ;;  %v15517_v63 = vpop.f32.mrf.mxu0 }
 0x20d   :  { %v567_v0 = vmul.f32 0.35355338, %v218_v62  ;;  %v581_v1 = vsel %vm177_vm2, %v569_v61, -inf }
 0x20e   :  { %v319_v2 = vpop.f32.mrf.mxu0  ;;  %582 = vmax.xlane.f32.xlu0 %v581_v1  ;;  %v15505_v3 = vpop.f32.mrf.mxu1 }
 0x20f   :  { %v575_v6 = vsel %vm177_vm2, %v567_v0, -inf }
 0x210   :  { %v221_v4 = vpop.f32.mrf.mxu1  ;;  %v15518_v5 = vpop.f32.mrf.mxu0 }
 0x212   :  { %576 = vmax.xlane.f32.xlu0 %v575_v6  ;;  %v15506_v7 = vpop.f32.mrf.mxu1 }
 0x214   :  { %v267_v8 = vpop.f32.mrf.mxu1  ;;  %v414_v9 = vpop.f32.mrf.mxu0 }
 0x215   :  { %v17270_v10 = vmul.f32 0.35355338, %v414_v9  ;;  %v568_v13 = vmul.f32 0.35355338, %v267_v8 }
 0x216   :  { %v15511_v11 = vpop.f32.mrf.mxu1  ;;  %v15529_v12 = vpop.f32.mrf.mxu0 }
 0x217   :  { %v587_v15 = vsel %vm177_vm2, %v17270_v10, -inf  ;;  %v578_v20 = vsel %vm177_vm2, %v568_v13, -inf }
 0x218   :  { %v270_v16 = vpop.f32.mrf.mxu1  ;;  %588 = vmax.xlane.f32.xlu1 %v587_v15  ;;  %v417_v17 = vpop.f32.mrf.mxu0 }
 0x21a   :  { %v15512_v18 = vpop.f32.mrf.mxu1  ;;  %v15530_v19 = vpop.f32.mrf.mxu0 }
 0x21c   :  { %v365_v22 = vpop.f32.mrf.mxu1  ;;  %579 = vmax.xlane.f32.xlu1 %v578_v20  ;;  %v512_v23 = vpop.f32.mrf.mxu0 }
 0x21d   :  { %v570_v24 = vmul.f32 0.35355338, %v365_v22  ;;  %v17275_v26 = vmul.f32 0.35355338, %v512_v23 }
 0x21e   :  { %v15523_v27 = vpop.f32.mrf.mxu1  ;;  %v15541_v28 = vpop.f32.mrf.mxu0 }
 0x21f   :  { %v584_v30 = vsel %vm177_vm2, %v570_v24, -inf  ;;  %v593_v31 = vsel %vm177_vm2, %v17275_v26, -inf }
 0x220   :  { %585 = vmax.xlane.f32.xlu0 %v584_v30  ;;  %v368_v32 = vpop.f32.mrf.mxu1  ;;  %594 = vmax.xlane.f32.xlu1 %v593_v31  ;;  %v515_v34 = vpop.f32.mrf.mxu0 }
 0x222   :  { %v15524_v37 = vpop.f32.mrf.mxu1  ;;  %v15542_v40 = vpop.f32.mrf.mxu0 }
 0x224   :  { %v463_v41 = vpop.f32.mrf.mxu1 }
 0x225   :  { %v572_v42 = vmul.f32 0.35355338, %v463_v41 }
 0x226   :  { %v15535_v43 = vpop.f32.mrf.mxu1 }
 0x227   :  { %v590_v44 = vsel %vm177_vm2, %v572_v42, -inf }
 0x228   :  { %591 = vmax.xlane.f32.xlu0 %v590_v44  ;;  %v466_v45 = vpop.f32.mrf.mxu1 }
 0x22a   :  { %v15536_v46 = vpop.f32.mrf.mxu1 }
 0x22c   :  { %v561_v47 = vpop.f32.mrf.mxu1 }
 0x22d   :  { %v574_v48 = vmul.f32 0.35355338, %v561_v47 }
 0x22e   :  { %v15547_v49 = vpop.f32.mrf.mxu1 }
 0x22f   :  { %v596_v50 = vsel %vm177_vm2, %v574_v48, -inf  ;;  %v774_v49 = vsel %vm676_vm3, %v17286_v58, 0 }
 0x230   :  { %597 = vmax.xlane.f32.xlu0 %v596_v50  ;;  %v564_v51 = vpop.f32.mrf.mxu1 }
 0x231   :  { %816 = vrot.lane.b32.xlu1 %v17184_v29, %s17041_s26 }
 0x232   :  { %v15548_v52 = vpop.f32.mrf.mxu1 }
 0x246   :  { %864 = vrot.lane.b32.xlu0 %v17194_v36, %s17041_s26 }
 0x297   :  { %v583_v53 = vpop.xlane.xlu0 %582 }
 0x298   :  { %v601_v54 = vsub.f32 %v569_v61, %v583_v53 }
 0x29a   :  { %v611_v55 = vmul.f32 1.442695, %v601_v54 }
 0x29b   :  { %v577_v56 = vpop.xlane.xlu0 %576 }
 0x29c   :  { %16710 = vpow2.f32 %v611_v55  ;;  %v599_v57 = vsub.f32 %v567_v0, %v577_v56 }
 0x29e   :  { %v607_v59 = vmul.f32 1.442695, %v599_v57 }
 0x2a0   :  { %16712 = vpow2.f32 %v607_v59 }
 0x2a1   :  { %v589_v60 = vpop.xlane.xlu1 %588 }
 0x2a2   :  { %v603_v18 = vsub.f32 %v17270_v10, %v589_v60 }
 0x2a4   :  { %v615_v20 = vmul.f32 1.442695, %v603_v18 }
 0x2a5   :  { %v580_v62 = vpop.xlane.xlu1 %579 }
 0x2a6   :  { %v600_v63 = vsub.f32 %v568_v13, %v580_v62 }
 0x2a8   :  { %v609_v1 = vmul.f32 1.442695, %v600_v63 }
 0x2a9   :  { %v17288_v2 = vpop.eup %16710  ;;  %v586_v3 = vpop.xlane.xlu0 %585 }
 0x2aa   :  { %16714 = vpow2.f32 %v609_v1  ;;  %v602_v4 = vsub.f32 %v570_v24, %v586_v3  ;;  %v629_v61 = vsel %vm177_vm2, %v17288_v2, 0.0  ;;  %v595_v19 = vpop.xlane.xlu1 %594 }
 0x2ab   :  { %630 = vadd.xlane.f32.xlu1 %v629_v61  ;;  %v605_v22 = vsub.f32 %v17275_v26, %v595_v19 }
 0x2ac   :  { %v613_v5 = vmul.f32 1.442695, %v602_v4 }
 0x2ad   :  { %v17292_v6 = vpop.eup %16712  ;;  %v619_v23 = vmul.f32 1.442695, %v605_v22 }
 0x2ae   :  { %v623_v0 = vsel %vm177_vm2, %v17292_v6, 0.0  ;;  %16716 = vpow2.f32 %v613_v5  ;;  %v817_v37 = vpop.permute.xlu1 %816 }
 0x2af   :  { %624 = vadd.xlane.f32.xlu1 %v623_v0  ;;  %v822_v58 = vsel %vm676_vm3, %v817_v37, 0 }
 0x2b1   :  { %v592_v7 = vpop.xlane.xlu0 %591 }
 0x2b2   :  { %v604_v8 = vsub.f32 %v572_v42, %v592_v7 }
 0x2b4   :  { %v617_v9 = vmul.f32 1.442695, %v604_v8 }
 0x2b6   :  { %16718 = vpow2.f32 %v617_v9 }
 0x2b7   :  { %v17296_v11 = vpop.eup %16714  ;;  %16720 = vpow2.f32 %v615_v20 }
 0x2b8   :  { %v626_v12 = vsel %vm177_vm2, %v17296_v11, 0.0  ;;  %16722 = vpow2.f32 %v619_v23 }
 0x2b9   :  { %627 = vadd.xlane.f32.xlu0 %v626_v12  ;;  %v598_v24 = vpop.xlane.xlu0 %597 }
 0x2ba   :  { %v606_v28 = vsub.f32 %v574_v48, %v598_v24 }
 0x2bb   :  { %v17300_v13 = vpop.eup %16716 }
 0x2bc   :  { %v632_v15 = vsel %vm177_vm2, %v17300_v13, 0.0  ;;  %v621_v10 = vmul.f32 1.442695, %v606_v28 }
 0x2bd   :  { %633 = vadd.xlane.f32.xlu0 %v632_v15  ;;  %v865_v42 = vpop.permute.xlu0 %864 }
 0x2be   :  { %16724 = vpow2.f32 %v621_v10  ;;  %v870_v55 = vsel %vm676_vm3, %v865_v42, 0 }
 0x2c0   :  { %912 = vrot.lane.b32.xlu1 %v17190_v35, %s17041_s26 }
 0x2c3   :  { %v17306_v16 = vpop.eup %16718 }
 0x2c4   :  { %v638_v17 = vsel %vm177_vm2, %v17306_v16, 0.0  ;;  %v17314_v27 = vpop.eup %16720 }
 0x2c5   :  { %639 = vadd.xlane.f32.xlu0 %v638_v17  ;;  %v635_v30 = vsel %vm177_vm2, %v17314_v27, 0.0  ;;  %v17318_v31 = vpop.eup %16722 }
 0x2c6   :  { %v641_v26 = vsel %vm177_vm2, %v17318_v31, 0.0 }
 0x2cb   :  { %v17322_v32 = vpop.eup %16724 }
 0x2cc   :  { %v644_v34 = vsel %vm177_vm2, %v17322_v32, 0.0 }
 0x2db   :  { %960 = vrot.lane.b32.xlu0 %v17204_v39, %s17041_s26 }
 0x2e4   :  { %636 = vadd.xlane.f32.xlu1 %v635_v30 }
 0x2e8   :  { %642 = vadd.xlane.f32.xlu1 %v641_v26 }
 0x2f9   :  { %1008 = vrot.lane.b32.xlu1 %v17198_v38, %s17041_s26 }
 0x2fa   :  { %645 = vadd.xlane.f32.xlu0 %v644_v34 }
 0x2fd   :  { %1108 = vrot.lane.b32.xlu1 %v17188_v33, %s17042_s27 }
 0x301   :  { %1106 = vrot.lane.b32.xlu1 %v17188_v33, %s17043_s28 }
 0x305   :  { %1208 = vrot.lane.b32.xlu1 %v17184_v29, %s17042_s27 }
 0x309   :  { %1206 = vrot.lane.b32.xlu1 %v17184_v29, %s17043_s28 }
 0x30d   :  { %1308 = vrot.lane.b32.xlu1 %v17190_v35, %s17042_s27 }
 0x310   :  { %1058 = vrot.lane.b32.xlu0 %v17180_v25, %s17042_s27 }
 0x311   :  { %1306 = vrot.lane.b32.xlu1 %v17190_v35, %s17043_s28 }
 0x314   :  { %1056 = vrot.lane.b32.xlu0 %v17180_v25, %s17043_s28 }
 0x315   :  { %1408 = vrot.lane.b32.xlu1 %v17198_v38, %s17042_s27 }
 0x318   :  { %1158 = vrot.lane.b32.xlu0 %v17178_v21, %s17042_s27 }
 0x319   :  { %1406 = vrot.lane.b32.xlu1 %v17198_v38, %s17043_s28 }
 0x31c   :  { %1156 = vrot.lane.b32.xlu0 %v17178_v21, %s17043_s28 }
 0x31d   :  { %1560 = vrot.lane.b32.xlu1 %v17180_v25, %s21530_s29 }
 0x320   :  { %1258 = vrot.lane.b32.xlu0 %v17194_v36, %s17042_s27 }
 0x321   :  { %1656 = vrot.lane.b32.xlu1 %v17178_v21, %s21530_s29 }
 0x324   :  { %1256 = vrot.lane.b32.xlu0 %v17194_v36, %s17043_s28 }
 0x325   :  { %1704 = vrot.lane.b32.xlu1 %v17184_v29, %s21530_s29 }
 0x328   :  { %1358 = vrot.lane.b32.xlu0 %v17204_v39, %s17042_s27 }
 0x32c   :  { %1356 = vrot.lane.b32.xlu0 %v17204_v39, %s17043_s28 }
 0x330   :  { %1608 = vrot.lane.b32.xlu0 %v17188_v33, %s21530_s29 }
 0x334   :  { %v631_v40 = vpop.xlane.xlu1 %630 }
 0x338   :  { %v625_v41 = vpop.xlane.xlu1 %624 }
 0x339   :  { %16726 = vrcp.f32 %v625_v41 }
 0x33a   :  { %16728 = vrcp.f32 %v631_v40 }
 0x33c   :  { %v913_v60 = vpop.permute.xlu1 %912 }
 0x33d   :  { %v918_v1 = vsel %vm676_vm3, %v913_v60, 0 }
 0x342   :  { %v628_v43 = vpop.xlane.xlu0 %627 }
 0x343   :  { %16730 = vrcp.f32 %v628_v43 }
 0x346   :  { %v16727_v44 = vpop.eup %16726  ;;  %v634_v45 = vpop.xlane.xlu0 %633 }
 0x347   :  { %v655_v46 = vmul.f32 %v16727_v44, %v17292_v6  ;;  %16732 = vrcp.f32 %v634_v45  ;;  %v16729_v48 = vpop.eup %16728 }
 0x348   :  { %v657_v50 = vmul.f32 %v16729_v48, %v17288_v2 }
 0x349   :  { %v663_v47 = vpack.c.bf16 %v655_v46, %v655_v46 }
 0x34a   :  { %v665_v53 = vpack.c.bf16 %v657_v50, %v657_v50 }
 0x34b   :  { %15552 = vmatmul.mubr.msk.bf16.vlgmr.msra.gmra.mxu0 %vm177_vm2, %v663_v47 }
 0x34c   :  { %15562 = vmatpush3.bf16.msra.mxu0 %v774_v49  ;;  %15563 = vmatprep.mubr.msk.bf16.mxu0 %vm17039_vm1, %v21534_v14 }
 0x34d   :  { %15573 = vmatprep.subr.bf16.mxu0 %v21534_v14 }
 0x34e   :  { %v640_v51 = vpop.xlane.xlu0 %639 }
 0x34f   :  { %16734 = vrcp.f32 %v640_v51 }
 0x350   :  { %v16731_v52 = vpop.eup %16730 }
 0x351   :  { %v656_v54 = vmul.f32 %v16731_v52, %v17296_v11 }
 0x352   :  { %v961_v9 = vpop.permute.xlu0 %960 }
 0x353   :  { %15564 = vmatmul.mubr.msk.bf16.vlgmr.msra.gmra.mxu0 %vm177_vm2, %v665_v53  ;;  %v664_v56 = vpack.c.bf16 %v656_v54, %v656_v54  ;;  %v966_v15 = vsel %vm676_vm3, %v961_v9, 0 }
 0x354   :  { %15574 = vmatpush3.bf16.msra.mxu0 %v870_v55  ;;  %15575 = vmatprep.mubr.msk.bf16.mxu0 %vm17039_vm1, %v21534_v14  ;;  %v16733_v57 = vpop.eup %16732 }
 0x355   :  { %15558 = vmatmul.mubr.msk.bf16.vlgmr.msra.gmra.mxu1 %vm177_vm2, %v664_v56  ;;  %15585 = vmatprep.subr.bf16.mxu0 %v21534_v14  ;;  %v658_v59 = vmul.f32 %v16733_v57, %v17300_v13 }
 0x356   :  { %15568 = vmatpush3.bf16.msra.mxu1 %v822_v58  ;;  %15569 = vmatprep.mubr.msk.bf16.mxu1 %vm17039_vm1, %v21534_v14 }
 0x357   :  { %15579 = vmatprep.subr.bf16.mxu1 %v21534_v14  ;;  %v666_v62 = vpack.c.bf16 %v658_v59, %v658_v59 }
 0x35c   :  { %v16735_v63 = vpop.eup %16734 }
 0x35d   :  { %15570 = vmatmul.mubr.msk.bf16.vlgmr.msra.gmra.mxu1 %vm177_vm2, %v666_v62  ;;  %v660_v2 = vmul.f32 %v16735_v63, %v17306_v16 }
 0x35e   :  { %15580 = vmatpush3.bf16.msra.mxu1 %v918_v1  ;;  %15581 = vmatprep.mubr.msk.bf16.mxu1 %vm17039_vm1, %v21534_v14 }
 0x35f   :  { %15591 = vmatprep.subr.bf16.mxu1 %v21534_v14  ;;  %v668_v3 = vpack.c.bf16 %v660_v2, %v660_v2 }
 0x365   :  { %15582 = vmatmul.mubr.msk.bf16.vlgmr.msra.gmra.mxu1 %vm177_vm2, %v668_v3 }
 0x366   :  { %15593 = vmatprep.mubr.msk.bf16.mxu1 %vm17039_vm1, %v21534_v14 }
 0x36d   :  { %v637_v4 = vpop.xlane.xlu1 %636 }
 0x36e   :  { %16736 = vrcp.f32 %v637_v4 }
 0x371   :  { %v643_v61 = vpop.xlane.xlu1 %642 }
 0x372   :  { %16738 = vrcp.f32 %v643_v61 }
 0x375   :  { %v1009_v5 = vpop.permute.xlu1 %1008 }
 0x376   :  { %v1014_v6 = vsel %vm676_vm3, %v1009_v5, 0 }
 0x377   :  { %15592 = vmatpush3.bf16.msra.mxu1 %v1014_v6 }
 0x378   :  { %15603 = vmatprep.subr.bf16.mxu1 %v21534_v14 }
 0x379   :  { %v1109_v0 = vpop.permute.xlu1 %1108 }
 0x37a   :  { %v1114_v40 = vsel %vm177_vm2, %v1109_v0, 0 }
 0x37b   :  { %v16737_v7 = vpop.eup %16736 }
 0x37c   :  { %v659_v8 = vmul.f32 %v16737_v7, %v17314_v27 }
 0x37d   :  { %v1107_v11 = vpop.permute.xlu1 %1106 }
 0x37e   :  { %v667_v12 = vpack.c.bf16 %v659_v8, %v659_v8 }
 0x37f   :  { %v16739_v13 = vpop.eup %16738 }
 0x380   :  { %15576 = vmatmul.mubr.msk.bf16.vlgmr.msra.gmra.mxu0 %vm177_vm2, %v667_v12  ;;  %v661_v17 = vmul.f32 %v16739_v13, %v17318_v31 }
 0x381   :  { %15586 = vmatpush3.bf16.msra.mxu0 %v966_v15  ;;  %v1209_v16 = vpop.permute.xlu1 %1208  ;;  %15587 = vmatprep.mubr.msk.bf16.mxu0 %vm17039_vm1, %v21534_v14 }
 0x382   :  { %15597 = vmatprep.subr.bf16.mxu0 %v21534_v14  ;;  %v669_v19 = vpack.c.bf16 %v661_v17, %v661_v17  ;;  %v1214_v44 = vsel %vm177_vm2, %v1209_v16, 0 }
 0x383   :  { %v646_v18 = vpop.xlane.xlu0 %645 }
 0x384   :  { %16740 = vrcp.f32 %v646_v18 }
 0x385   :  { %v1207_v20 = vpop.permute.xlu1 %1206 }
 0x387   :  { %v1059_v22 = vpop.permute.xlu0 %1058 }
 0x388   :  { %v1064_v23 = vsel %vm177_vm2, %v1059_v22, 0  ;;  %15588 = vmatmul.mubr.msk.bf16.vlgmr.msra.gmra.mxu0 %vm177_vm2, %v669_v19 }
 0x389   :  { %15598 = vmatpush3.bf16.xpose.msra.mxu0 %v1064_v23  ;;  %15599 = vmatprep.mubr.msk.bf16.mxu0 %vm17039_vm1, %v21534_v14  ;;  %v1309_v27 = vpop.permute.xlu1 %1308 }
 0x38a   :  { %15609 = vmatprep.subr.bf16.mxu0 %v21534_v14  ;;  %v1314_v49 = vsel %vm177_vm2, %v1309_v27, 0 }
 0x38b   :  { %v1057_v24 = vpop.permute.xlu0 %1056 }
 0x38d   :  { %v1307_v26 = vpop.permute.xlu1 %1306 }
 0x38f   :  { %v1159_v28 = vpop.permute.xlu0 %1158 }
 0x390   :  { %v1164_v30 = vsel %vm177_vm2, %v1159_v28, 0  ;;  %15600 = vmatmul.mubr.msk.bf16.vlgmr.msra.gmra.mxu0 %vm177_vm2, %v1057_v24 }
 0x391   :  { %v16741_v31 = vpop.eup %16740  ;;  %15610 = vmatpush3.bf16.xpose.msra.mxu0 %v1164_v30  ;;  %15611 = vmatprep.mubr.msk.bf16.mxu0 %vm17039_vm1, %v21534_v14 }
 0x392   :  { %v662_v10 = vmul.f32 %v16741_v31, %v17322_v32  ;;  %15621 = vmatprep.subr.bf16.mxu0 %v21534_v14  ;;  %v1409_v32 = vpop.permute.xlu1 %1408 }
 0x393   :  { %v1157_v34 = vpop.permute.xlu0 %1156  ;;  %v1414_v52 = vsel %vm177_vm2, %v1409_v32, 0 }
 0x394   :  { %v670_v37 = vpack.c.bf16 %v662_v10, %v662_v10 }
 0x396   :  { %15594 = vmatmul.mubr.msk.bf16.vlgmr.msra.gmra.mxu1 %vm177_vm2, %v670_v37  ;;  %v1407_v45 = vpop.permute.xlu1 %1406 }
 0x397   :  { %15604 = vmatpush3.bf16.xpose.msra.mxu1 %v1114_v40  ;;  %v1259_v41 = vpop.permute.xlu0 %1258  ;;  %15605 = vmatprep.mubr.msk.bf16.mxu1 %vm17039_vm1, %v21534_v14 }
 0x398   :  { %v1264_v42 = vsel %vm177_vm2, %v1259_v41, 0  ;;  %15612 = vmatmul.mubr.msk.bf16.vlgmr.msra.gmra.mxu0 %vm177_vm2, %v1157_v34  ;;  %15615 = vmatprep.subr.bf16.mxu1 %v21534_v14 }
 0x399   :  { %15622 = vmatpush3.bf16.xpose.msra.mxu0 %v1264_v42  ;;  %15623 = vmatprep.mubr.msk.bf16.mxu0 %vm17039_vm1, %v21534_v14 }
 0x39a   :  { %15633 = vmatprep.subr.bf16.mxu0 %v21534_v14  ;;  %v1561_v48 = vpop.permute.xlu1 %1560 }
 0x39b   :  { %v1257_v43 = vpop.permute.xlu0 %1256  ;;  %v1566_v51 = vsel %vm676_vm3, %v1561_v48, 0 }
 0x39e   :  { %15606 = vmatmul.mubr.msk.bf16.vlgmr.msra.gmra.mxu1 %vm177_vm2, %v1107_v11 }
 0x39f   :  { %15616 = vmatpush3.bf16.xpose.msra.mxu1 %v1214_v44  ;;  %v1359_v46 = vpop.permute.xlu0 %1358  ;;  %15617 = vmatprep.mubr.msk.bf16.mxu1 %vm17039_vm1, %v21534_v14 }
 0x3a0   :  { %v1364_v47 = vsel %vm177_vm2, %v1359_v46, 0  ;;  %15624 = vmatmul.mubr.msk.bf16.vlgmr.msra.gmra.mxu0 %vm177_vm2, %v1257_v43  ;;  %15627 = vmatprep.subr.bf16.mxu1 %v21534_v14 }
 0x3a1   :  { %15634 = vmatpush3.bf16.xpose.msra.mxu0 %v1364_v47  ;;  %15635 = vmatprep.mubr.msk.bf16.mxu0 %vm17039_vm1, %v21534_v14 }
 0x3a2   :  { %15645 = vmatprep.subr.bf16.mxu0 %v21534_v14 }
 0x3a3   :  { %v1357_v50 = vpop.permute.xlu0 %1356 }
 0x3a6   :  { %15618 = vmatmul.mubr.msk.bf16.vlgmr.msra.gmra.mxu1 %vm177_vm2, %v1207_v20 }
 0x3a7   :  { %15628 = vmatpush3.bf16.xpose.msra.mxu1 %v1314_v49  ;;  %15629 = vmatprep.mubr.msk.bf16.mxu1 %vm17039_vm1, %v21534_v14  ;;  %v1609_v53 = vpop.permute.xlu0 %1608 }
 0x3a8   :  { %15636 = vmatmul.mubr.msk.bf16.vlgmr.msra.gmra.mxu0 %vm177_vm2, %v1357_v50  ;;  %15639 = vmatprep.subr.bf16.mxu1 %v21534_v14  ;;  %v1614_v54 = vsel %vm676_vm3, %v1609_v53, 0 }
 0x3a9   :  { %15646 = vmatpush3.bf16.msra.mxu0 %v1566_v51  ;;  %15647 = vmatprep.mubr.msk.bf16.mxu0 %vm17039_vm1, %v21534_v14 }
 0x3aa   :  { %15657 = vmatprep.subr.bf16.mxu0 %v21534_v14 }
 0x3ae   :  { %15630 = vmatmul.mubr.msk.bf16.vlgmr.msra.gmra.mxu1 %vm177_vm2, %v1307_v26 }
 0x3af   :  { %15640 = vmatpush3.bf16.xpose.msra.mxu1 %v1414_v52  ;;  %15641 = vmatprep.mubr.msk.bf16.mxu1 %vm17039_vm1, %v21534_v14 }
 0x3b0   :  { %15651 = vmatprep.subr.bf16.mxu1 %v21534_v14 }
 0x3b6   :  { %15642 = vmatmul.mubr.msk.bf16.vlgmr.msra.gmra.mxu1 %vm177_vm2, %v1407_v45 }
 0x3b7   :  { %15652 = vmatpush3.bf16.msra.mxu1 %v1614_v54  ;;  %15653 = vmatprep.mubr.msk.bf16.mxu1 %vm17039_vm1, %v21534_v14 }
 0x3b8   :  { %15663 = vmatprep.subr.bf16.mxu1 %v21534_v14 }
 0x40b   :  { %v17457_v55 = vpop.f32.mrf.mxu0 }
 0x40d   :  { %v15553_v56 = vpop.f32.mrf.mxu0 }
 0x40f   :  { %v717_v57 = vpop.f32.mrf.mxu0 }
 0x411   :  { %v15554_v58 = vpop.f32.mrf.mxu0 }
 0x413   :  { %v17459_v59 = vpop.f32.mrf.mxu0 }
 0x415   :  { %v17461_v60 = vpop.f32.mrf.mxu1  ;;  %v15565_v62 = vpop.f32.mrf.mxu0 }
 0x417   :  { %v15559_v63 = vpop.f32.mrf.mxu1  ;;  %v813_v1 = vpop.f32.mrf.mxu0 }
 0x419   :  { %v765_v2 = vpop.f32.mrf.mxu1  ;;  %v15566_v3 = vpop.f32.mrf.mxu0 }
 0x41b   :  { %v15560_v4 = vpop.f32.mrf.mxu1 }
 0x41d   :  { %v17463_v61 = vpop.f32.mrf.mxu1 }
 0x41f   :  { %v15571_v5 = vpop.f32.mrf.mxu1 }
 0x421   :  { %v861_v6 = vpop.f32.mrf.mxu1 }
 0x423   :  { %v15572_v0 = vpop.f32.mrf.mxu1 }
 0x425   :  { %v17465_v7 = vpop.f32.mrf.mxu1 }
 0x427   :  { %v15583_v8 = vpop.f32.mrf.mxu1 }
 0x429   :  { %v957_v9 = vpop.f32.mrf.mxu1 }
 0x42b   :  { %v15584_v11 = vpop.f32.mrf.mxu1 }
 0x440   :  { %v17467_v12 = vpop.f32.mrf.mxu0 }
 0x442   :  { %v15577_v13 = vpop.f32.mrf.mxu0 }
 0x444   :  { %v909_v15 = vpop.f32.mrf.mxu0 }
 0x446   :  { %v15578_v16 = vpop.f32.mrf.mxu0 }
 0x448   :  { %v17469_v17 = vpop.f32.mrf.mxu0 }
 0x44a   :  { %v15589_v18 = vpop.f32.mrf.mxu0 }
 0x44c   :  { %v1005_v19 = vpop.f32.mrf.mxu0 }
 0x44e   :  { %v15590_v20 = vpop.f32.mrf.mxu0 }
 0x450   :  { %v1100_v22 = vpop.f32.mrf.mxu0 }
 0x451   :  { %v17471_v23 = vmul.f32 0.35355338, %v1100_v22 }
 0x452   :  { %v15601_v24 = vpop.f32.mrf.mxu0 }
 0x453   :  { %v1464_v27 = vsel %vm177_vm2, %v17471_v23, -inf }
 0x454   :  { %1465 = vmax.xlane.f32.xlu0 %v1464_v27  ;;  %v1103_v28 = vpop.f32.mrf.mxu0 }
 0x456   :  { %v17475_v30 = vpop.f32.mrf.mxu1  ;;  %v15602_v31 = vpop.f32.mrf.mxu0 }
 0x458   :  { %v15595_v10 = vpop.f32.mrf.mxu1  ;;  %v1200_v26 = vpop.f32.mrf.mxu0 }
 0x459   :  { %v1458_v34 = vmul.f32 0.35355338, %v1200_v26 }
 0x45a   :  { %v1053_v37 = vpop.f32.mrf.mxu1  ;;  %v15613_v40 = vpop.f32.mrf.mxu0 }
 0x45b   :  { %v1470_v41 = vsel %vm177_vm2, %v1458_v34, -inf  ;;  %v17492_v37 = vpop.permute.xlu1 %1656 }
 0x45c   :  { %v15596_v42 = vpop.f32.mrf.mxu1  ;;  %1471 = vmax.xlane.f32.xlu0 %v1470_v41  ;;  %v1203_v32 = vpop.f32.mrf.mxu0 }
 0x45e   :  { %v1150_v43 = vpop.f32.mrf.mxu1  ;;  %v15614_v44 = vpop.f32.mrf.mxu0 }
 0x45f   :  { %v1457_v45 = vmul.f32 0.35355338, %v1150_v43  ;;  %v17494_v42 = vpop.permute.xlu1 %1704 }
 0x460   :  { %v15607_v46 = vpop.f32.mrf.mxu1  ;;  %v1300_v47 = vpop.f32.mrf.mxu0 }
 0x461   :  { %v1460_v48 = vmul.f32 0.35355338, %v1300_v47  ;;  %v1467_v49 = vsel %vm177_vm2, %v1457_v45, -inf }
 0x462   :  { %1468 = vmax.xlane.f32.xlu1 %v1467_v49  ;;  %v1153_v50 = vpop.f32.mrf.mxu1  ;;  %v15625_v51 = vpop.f32.mrf.mxu0 }
 0x463   :  { %v1476_v54 = vsel %vm177_vm2, %v1460_v48, -inf }
 0x464   :  { %v15608_v52 = vpop.f32.mrf.mxu1  ;;  %v1303_v53 = vpop.f32.mrf.mxu0 }
 0x466   :  { %v1250_v56 = vpop.f32.mrf.mxu1  ;;  %1477 = vmax.xlane.f32.xlu1 %v1476_v54  ;;  %v15626_v57 = vpop.f32.mrf.mxu0 }
 0x467   :  { %v1459_v58 = vmul.f32 0.35355338, %v1250_v56 }
 0x468   :  { %v15619_v62 = vpop.f32.mrf.mxu1  ;;  %v1400_v63 = vpop.f32.mrf.mxu0 }
 0x469   :  { %v17480_v1 = vmul.f32 0.35355338, %v1400_v63  ;;  %v1473_v2 = vsel %vm177_vm2, %v1459_v58, -inf }
 0x46a   :  { %v1253_v3 = vpop.f32.mrf.mxu1  ;;  %1474 = vmax.xlane.f32.xlu0 %v1473_v2  ;;  %v15637_v4 = vpop.f32.mrf.mxu0 }
 0x46b   :  { %v1482_v5 = vsel %vm177_vm2, %v17480_v1, -inf }
 0x46c   :  { %v15620_v6 = vpop.f32.mrf.mxu1  ;;  %1483 = vmax.xlane.f32.xlu1 %v1482_v5  ;;  %v1403_v0 = vpop.f32.mrf.mxu0 }
 0x46e   :  { %v1350_v8 = vpop.f32.mrf.mxu1  ;;  %v15638_v9 = vpop.f32.mrf.mxu0 }
 0x46f   :  { %v1461_v11 = vmul.f32 0.35355338, %v1350_v8 }
 0x470   :  { %v15631_v13 = vpop.f32.mrf.mxu1 }
 0x471   :  { %v1479_v15 = vsel %vm177_vm2, %v1461_v11, -inf }
 0x472   :  { %v1353_v16 = vpop.f32.mrf.mxu1  ;;  %1480 = vmax.xlane.f32.xlu0 %v1479_v15 }
 0x474   :  { %v15632_v18 = vpop.f32.mrf.mxu1 }
 0x476   :  { %v1450_v19 = vpop.f32.mrf.mxu1 }
 0x477   :  { %v1463_v20 = vmul.f32 0.35355338, %v1450_v19 }
 0x478   :  { %v15643_v22 = vpop.f32.mrf.mxu1 }
 0x479   :  { %v1485_v24 = vsel %vm177_vm2, %v1463_v20, -inf }
 0x47a   :  { %v1453_v27 = vpop.f32.mrf.mxu1  ;;  %1486 = vmax.xlane.f32.xlu0 %v1485_v24 }
 0x47c   :  { %v15644_v28 = vpop.f32.mrf.mxu1 }
 0x47d   :  { %1800 = vrot.lane.b32.xlu1 %v17190_v35, %s21530_s29 }
 0x490   :  { %1752 = vrot.lane.b32.xlu0 %v17194_v36, %s21530_s29 }
 0x4dd   :  { %v1466_v31 = vpop.xlane.xlu0 %1465 }
 0x4de   :  { %v1488_v10 = vsub.f32 %v17471_v23, %v1466_v31 }
 0x4e0   :  { %v1496_v26 = vmul.f32 1.442695, %v1488_v10 }
 0x4e2   :  { %16742 = vpow2.f32 %v1496_v26 }
 0x4e5   :  { %v1472_v40 = vpop.xlane.xlu0 %1471 }
 0x4e6   :  { %v1490_v41 = vsub.f32 %v1458_v34, %v1472_v40 }
 0x4e8   :  { %v1500_v32 = vmul.f32 1.442695, %v1490_v41  ;;  %v1662_v41 = vsel %vm676_vm3, %v17492_v37, 0 }
 0x4ea   :  { %16744 = vpow2.f32 %v1500_v32 }
 0x4eb   :  { %v1469_v43 = vpop.xlane.xlu1 %1468 }
 0x4ec   :  { %v1489_v44 = vsub.f32 %v1457_v45, %v1469_v43 }
 0x4ee   :  { %v1498_v46 = vmul.f32 1.442695, %v1489_v44 }
 0x4ef   :  { %v17496_v47 = vpop.eup %16742  ;;  %v1478_v49 = vpop.xlane.xlu1 %1477 }
 0x4f0   :  { %16746 = vpow2.f32 %v1498_v46  ;;  %v1492_v50 = vsub.f32 %v1460_v48, %v1478_v49  ;;  %v1512_v23 = vsel %vm177_vm2, %v17496_v47, 0.0 }
 0x4f1   :  { %1513 = vadd.xlane.f32.xlu1 %v1512_v23 }
 0x4f2   :  { %v1504_v51 = vmul.f32 1.442695, %v1492_v50 }
 0x4f3   :  { %v1475_v52 = vpop.xlane.xlu0 %1474 }
 0x4f4   :  { %16748 = vpow2.f32 %v1504_v51  ;;  %v1491_v34 = vsub.f32 %v1459_v58, %v1475_v52  ;;  %v1710_v52 = vsel %vm676_vm3, %v17494_v42, 0 }
 0x4f5   :  { %v1484_v0 = vpop.xlane.xlu1 %1483 }
 0x4f6   :  { %v1502_v53 = vmul.f32 1.442695, %v1491_v34  ;;  %v1494_v8 = vsub.f32 %v17480_v1, %v1484_v0 }
 0x4f7   :  { %v17500_v54 = vpop.eup %16744 }
 0x4f8   :  { %16750 = vpow2.f32 %v1502_v53  ;;  %v1518_v45 = vsel %vm177_vm2, %v17500_v54, 0.0  ;;  %v1508_v9 = vmul.f32 1.442695, %v1494_v8 }
 0x4f9   :  { %1519 = vadd.xlane.f32.xlu1 %v1518_v45 }
 0x4fb   :  { %v1481_v56 = vpop.xlane.xlu0 %1480 }
 0x4fc   :  { %v1493_v57 = vsub.f32 %v1461_v11, %v1481_v56 }
 0x4fd   :  { %v17504_v62 = vpop.eup %16746 }
 0x4fe   :  { %v1506_v48 = vmul.f32 1.442695, %v1493_v57  ;;  %v1515_v63 = vsel %vm177_vm2, %v17504_v62, 0.0 }
 0x4ff   :  { %1516 = vadd.xlane.f32.xlu0 %v1515_v63 }
 0x500   :  { %16752 = vpow2.f32 %v1506_v48 }
 0x501   :  { %v17508_v2 = vpop.eup %16748  ;;  %16754 = vpow2.f32 %v1508_v9 }
 0x502   :  { %v1524_v58 = vsel %vm177_vm2, %v17508_v2, 0.0 }
 0x503   :  { %1525 = vadd.xlane.f32.xlu1 %v1524_v58  ;;  %v1487_v11 = vpop.xlane.xlu0 %1486 }
 0x504   :  { %v1495_v13 = vsub.f32 %v1463_v20, %v1487_v11  ;;  %v1801_v20 = vpop.permute.xlu1 %1800 }
 0x505   :  { %v17512_v3 = vpop.eup %16750 }
 0x506   :  { %v1521_v4 = vsel %vm177_vm2, %v17512_v3, 0.0  ;;  %v1510_v15 = vmul.f32 1.442695, %v1495_v13 }
 0x507   :  { %1522 = vadd.xlane.f32.xlu0 %v1521_v4  ;;  %v1753_v27 = vpop.permute.xlu0 %1752 }
 0x508   :  { %16756 = vpow2.f32 %v1510_v15 }
 0x50d   :  { %v17516_v5 = vpop.eup %16752 }
 0x50e   :  { %v1527_v6 = vsel %vm177_vm2, %v17516_v5, 0.0  ;;  %v17525_v16 = vpop.eup %16754 }
 0x50f   :  { %1528 = vadd.xlane.f32.xlu0 %v1527_v6  ;;  %v1530_v18 = vsel %vm177_vm2, %v17525_v16, 0.0 }
 0x514   :  { %1896 = vrot.lane.b32.xlu1 %v17198_v38, %s21530_s29 }
 0x515   :  { %v17529_v19 = vpop.eup %16756 }
 0x516   :  { %v1533_v1 = vsel %vm177_vm2, %v17529_v19, 0.0 }
 0x525   :  { %1848 = vrot.lane.b32.xlu0 %v17204_v39, %s21530_s29 }
 0x538   :  { %1531 = vadd.xlane.f32.xlu1 %v1530_v18 }
 0x544   :  { %1534 = vadd.xlane.f32.xlu0 %v1533_v1 }
 0x549   :  { %1996 = vrot.lane.b32.xlu1 %v17188_v33, %s21528_s30 }
 0x54d   :  { %1994 = vrot.lane.b32.xlu1 %v17188_v33, %s21526_s16 }
 0x551   :  { %2096 = vrot.lane.b32.xlu1 %v17184_v29, %s21528_s30 }
 0x555   :  { %2094 = vrot.lane.b32.xlu1 %v17184_v29, %s21526_s16 }
 0x559   :  { %2196 = vrot.lane.b32.xlu1 %v17190_v35, %s21528_s30 }
 0x55a   :  { %1946 = vrot.lane.b32.xlu0 %v17180_v25, %s21528_s30 }
 0x55d   :  { %2194 = vrot.lane.b32.xlu1 %v17190_v35, %s21526_s16 }
 0x55e   :  { %1944 = vrot.lane.b32.xlu0 %v17180_v25, %s21526_s16 }
 0x561   :  { %2296 = vrot.lane.b32.xlu1 %v17198_v38, %s21528_s30 }
 0x562   :  { %2046 = vrot.lane.b32.xlu0 %v17178_v21, %s21528_s30 }
 0x565   :  { %2294 = vrot.lane.b32.xlu1 %v17198_v38, %s21526_s16 }
 0x566   :  { %2044 = vrot.lane.b32.xlu0 %v17178_v21, %s21526_s16 }
 0x569   :  { %2448 = vrot.lane.b32.xlu1 %v17180_v25, %s21524_s17 }
 0x56a   :  { %2146 = vrot.lane.b32.xlu0 %v17194_v36, %s21528_s30 }
 0x56d   :  { %2544 = vrot.lane.b32.xlu1 %v17178_v21, %s21524_s17 }
 0x56e   :  { %2144 = vrot.lane.b32.xlu0 %v17194_v36, %s21526_s16 }
 0x571   :  { %2592 = vrot.lane.b32.xlu1 %v17184_v29, %s21524_s17 }
 0x572   :  { %2246 = vrot.lane.b32.xlu0 %v17204_v39, %s21528_s30 }
 0x576   :  { %2244 = vrot.lane.b32.xlu0 %v17204_v39, %s21526_s16 }
 0x57a   :  { %v1514_v22 = vpop.xlane.xlu1 %1513  ;;  %2496 = vrot.lane.b32.xlu0 %v17188_v33, %s21524_s17 }
 0x57b   :  { %16758 = vrcp.f32 %v1514_v22 }
 0x582   :  { %v1520_v24 = vpop.xlane.xlu1 %1519 }
 0x583   :  { %16760 = vrcp.f32 %v1520_v24 }
 0x588   :  { %v16759_v28 = vpop.eup %16758  ;;  %v1517_v31 = vpop.xlane.xlu0 %1516 }
 0x589   :  { %16762 = vrcp.f32 %v1517_v31  ;;  %v1544_v10 = vmul.f32 %v16759_v28, %v17496_v47  ;;  %v1758_v47 = vsel %vm676_vm3, %v1753_v27, 0 }
 0x58b   :  { %v1552_v26 = vpack.c.bf16 %v1544_v10, %v1544_v10 }
 0x58c   :  { %v1526_v40 = vpop.xlane.xlu1 %1525 }
 0x58d   :  { %16764 = vrcp.f32 %v1526_v40  ;;  %15648 = vmatmul.mubr.msk.bf16.vlgmr.msra.gmra.mxu0 %vm177_vm2, %v1552_v26 }
 0x58e   :  { %15658 = vmatpush3.bf16.msra.mxu0 %v1662_v41  ;;  %15659 = vmatprep.mubr.msk.bf16.mxu0 %vm17039_vm1, %v21534_v14 }
 0x58f   :  { %15669 = vmatprep.subr.bf16.mxu0 %v21534_v14 }
 0x590   :  { %v16761_v32 = vpop.eup %16760  ;;  %v1523_v43 = vpop.xlane.xlu0 %1522 }
 0x591   :  { %16766 = vrcp.f32 %v1523_v43  ;;  %v1546_v44 = vmul.f32 %v16761_v32, %v17500_v54 }
 0x593   :  { %v1554_v46 = vpack.c.bf16 %v1546_v44, %v1546_v44 }
 0x595   :  { %15660 = vmatmul.mubr.msk.bf16.vlgmr.msra.gmra.mxu0 %vm177_vm2, %v1554_v46 }
 0x596   :  { %v16763_v37 = vpop.eup %16762  ;;  %15670 = vmatpush3.bf16.msra.mxu0 %v1758_v47  ;;  %15671 = vmatprep.mubr.msk.bf16.mxu0 %vm17039_vm1, %v21534_v14 }
 0x597   :  { %v1545_v49 = vmul.f32 %v16763_v37, %v17504_v62  ;;  %15681 = vmatprep.subr.bf16.mxu0 %v21534_v14  ;;  %v1806_v62 = vsel %vm676_vm3, %v1801_v20, 0 }
 0x598   :  { %v1529_v50 = vpop.xlane.xlu0 %1528 }
 0x599   :  { %16768 = vrcp.f32 %v1529_v50  ;;  %v1553_v23 = vpack.c.bf16 %v1545_v49, %v1545_v49 }
 0x59a   :  { %v16765_v51 = vpop.eup %16764 }
 0x59b   :  { %15654 = vmatmul.mubr.msk.bf16.vlgmr.msra.gmra.mxu1 %vm177_vm2, %v1553_v23  ;;  %v1548_v34 = vmul.f32 %v16765_v51, %v17508_v2  ;;  %v1897_v2 = vpop.permute.xlu1 %1896 }
 0x59c   :  { %15664 = vmatpush3.bf16.msra.mxu1 %v1710_v52  ;;  %v1849_v53 = vpop.permute.xlu0 %1848  ;;  %15665 = vmatprep.mubr.msk.bf16.mxu1 %vm17039_vm1, %v21534_v14 }
 0x59d   :  { %v1854_v54 = vsel %vm676_vm3, %v1849_v53, 0  ;;  %v1556_v45 = vpack.c.bf16 %v1548_v34, %v1548_v34  ;;  %15675 = vmatprep.subr.bf16.mxu1 %v21534_v14 }
 0x59e   :  { %v16767_v56 = vpop.eup %16766 }
 0x59f   :  { %15672 = vmatmul.mubr.msk.bf16.vlgmr.msra.gmra.mxu0 %vm177_vm2, %v1556_v45  ;;  %v1547_v57 = vmul.f32 %v16767_v56, %v17512_v3  ;;  %v1902_v3 = vsel %vm676_vm3, %v1897_v2, 0 }
 0x5a0   :  { %15682 = vmatpush3.bf16.msra.mxu0 %v1854_v54  ;;  %15683 = vmatprep.mubr.msk.bf16.mxu0 %vm17039_vm1, %v21534_v14 }
 0x5a1   :  { %v1555_v42 = vpack.c.bf16 %v1547_v57, %v1547_v57  ;;  %15693 = vmatprep.subr.bf16.mxu0 %v21534_v14 }
 0x5a3   :  { %15666 = vmatmul.mubr.msk.bf16.vlgmr.msra.gmra.mxu1 %vm177_vm2, %v1555_v42 }
 0x5a4   :  { %15676 = vmatpush3.bf16.msra.mxu1 %v1806_v62  ;;  %15677 = vmatprep.mubr.msk.bf16.mxu1 %vm17039_vm1, %v21534_v14 }
 0x5a5   :  { %15687 = vmatprep.subr.bf16.mxu1 %v21534_v14 }
 0x5a6   :  { %v16769_v48 = vpop.eup %16768 }
 0x5a7   :  { %v1549_v63 = vmul.f32 %v16769_v48, %v17516_v5 }
 0x5a9   :  { %v1557_v58 = vpack.c.bf16 %v1549_v63, %v1549_v63 }
 0x5ab   :  { %15678 = vmatmul.mubr.msk.bf16.vlgmr.msra.gmra.mxu1 %vm177_vm2, %v1557_v58 }
 0x5ac   :  { %15688 = vmatpush3.bf16.msra.mxu1 %v1902_v3  ;;  %15689 = vmatprep.mubr.msk.bf16.mxu1 %vm17039_vm1, %v21534_v14 }
 0x5ad   :  { %15699 = vmatprep.subr.bf16.mxu1 %v21534_v14 }
 0x5c1   :  { %v1532_v4 = vpop.xlane.xlu1 %1531 }
 0x5c2   :  { %16770 = vrcp.f32 %v1532_v4 }
 0x5c5   :  { %v1997_v6 = vpop.permute.xlu1 %1996 }
 0x5c6   :  { %v2002_v40 = vsel %vm177_vm2, %v1997_v6, 0 }
 0x5c9   :  { %v1995_v0 = vpop.permute.xlu1 %1994 }
 0x5cd   :  { %v2097_v8 = vpop.permute.xlu1 %2096  ;;  %v1535_v9 = vpop.xlane.xlu0 %1534 }
 0x5ce   :  { %16772 = vrcp.f32 %v1535_v9  ;;  %v2102_v44 = vsel %vm177_vm2, %v2097_v8, 0 }
 0x5cf   :  { %v16771_v5 = vpop.eup %16770 }
 0x5d0   :  { %v1550_v11 = vmul.f32 %v16771_v5, %v17525_v16 }
 0x5d1   :  { %v1947_v13 = vpop.permute.xlu0 %1946  ;;  %v2095_v1 = vpop.permute.xlu1 %2094 }
 0x5d2   :  { %v1952_v15 = vsel %vm177_vm2, %v1947_v13, 0  ;;  %v1558_v18 = vpack.c.bf16 %v1550_v11, %v1550_v11 }
 0x5d4   :  { %15684 = vmatmul.mubr.msk.bf16.vlgmr.msra.gmra.mxu0 %vm177_vm2, %v1558_v18 }
 0x5d5   :  { %15694 = vmatpush3.bf16.xpose.msra.mxu0 %v1952_v15  ;;  %v1945_v20 = vpop.permute.xlu0 %1944  ;;  %15695 = vmatprep.mubr.msk.bf16.mxu0 %vm17039_vm1, %v21534_v14  ;;  %v2197_v22 = vpop.permute.xlu1 %2196 }
 0x5d6   :  { %15705 = vmatprep.subr.bf16.mxu0 %v21534_v14  ;;  %v2202_v49 = vsel %vm177_vm2, %v2197_v22, 0 }
 0x5d9   :  { %v2047_v24 = vpop.permute.xlu0 %2046  ;;  %v2195_v26 = vpop.permute.xlu1 %2194 }
 0x5da   :  { %v2052_v27 = vsel %vm177_vm2, %v2047_v24, 0 }
 0x5db   :  { %v16773_v28 = vpop.eup %16772 }
 0x5dc   :  { %15696 = vmatmul.mubr.msk.bf16.vlgmr.msra.gmra.mxu0 %vm177_vm2, %v1945_v20  ;;  %v1551_v16 = vmul.f32 %v16773_v28, %v17529_v19 }
 0x5dd   :  { %15706 = vmatpush3.bf16.xpose.msra.mxu0 %v2052_v27  ;;  %v2045_v31 = vpop.permute.xlu0 %2044  ;;  %15707 = vmatprep.mubr.msk.bf16.mxu0 %vm17039_vm1, %v21534_v14  ;;  %v2297_v32 = vpop.permute.xlu1 %2296 }
 0x5de   :  { %v1559_v10 = vpack.c.bf16 %v1551_v16, %v1551_v16  ;;  %15717 = vmatprep.subr.bf16.mxu0 %v21534_v14  ;;  %v2302_v52 = vsel %vm177_vm2, %v2297_v32, 0 }
 0x5e0   :  { %15690 = vmatmul.mubr.msk.bf16.vlgmr.msra.gmra.mxu1 %vm177_vm2, %v1559_v10 }
 0x5e1   :  { %15700 = vmatpush3.bf16.xpose.msra.mxu1 %v2002_v40  ;;  %v2147_v41 = vpop.permute.xlu0 %2146  ;;  %15701 = vmatprep.mubr.msk.bf16.mxu1 %vm17039_vm1, %v21534_v14  ;;  %v2295_v37 = vpop.permute.xlu1 %2294 }
 0x5e2   :  { %v2152_v19 = vsel %vm177_vm2, %v2147_v41, 0  ;;  %15711 = vmatprep.subr.bf16.mxu1 %v21534_v14 }
 0x5e4   :  { %15708 = vmatmul.mubr.msk.bf16.vlgmr.msra.gmra.mxu0 %vm177_vm2, %v2045_v31 }
 0x5e5   :  { %15718 = vmatpush3.bf16.xpose.msra.mxu0 %v2152_v19  ;;  %v2145_v43 = vpop.permute.xlu0 %2144  ;;  %15719 = vmatprep.mubr.msk.bf16.mxu0 %vm17039_vm1, %v21534_v14  ;;  %v2449_v50 = vpop.permute.xlu1 %2448 }
 0x5e6   :  { %15729 = vmatprep.subr.bf16.mxu0 %v21534_v14  ;;  %v2454_v51 = vsel %vm676_vm3, %v2449_v50, 0 }
 0x5e8   :  { %15702 = vmatmul.mubr.msk.bf16.vlgmr.msra.gmra.mxu1 %vm177_vm2, %v1995_v0 }
 0x5e9   :  { %15712 = vmatpush3.bf16.xpose.msra.mxu1 %v2102_v44  ;;  %v2247_v46 = vpop.permute.xlu0 %2246  ;;  %15713 = vmatprep.mubr.msk.bf16.mxu1 %vm17039_vm1, %v21534_v14 }
 0x5ea   :  { %v2252_v47 = vsel %vm177_vm2, %v2247_v46, 0  ;;  %15723 = vmatprep.subr.bf16.mxu1 %v21534_v14 }
 0x5ec   :  { %15720 = vmatmul.mubr.msk.bf16.vlgmr.msra.gmra.mxu0 %vm177_vm2, %v2145_v43 }
 0x5ed   :  { %15730 = vmatpush3.bf16.xpose.msra.mxu0 %v2252_v47  ;;  %15731 = vmatprep.mubr.msk.bf16.mxu0 %vm17039_vm1, %v21534_v14  ;;  %v2245_v23 = vpop.permute.xlu0 %2244 }
 0x5ee   :  { %15741 = vmatprep.subr.bf16.mxu0 %v21534_v14 }
 0x5f0   :  { %15714 = vmatmul.mubr.msk.bf16.vlgmr.msra.gmra.mxu1 %vm177_vm2, %v2095_v1 }
 0x5f1   :  { %15724 = vmatpush3.bf16.xpose.msra.mxu1 %v2202_v49  ;;  %15725 = vmatprep.mubr.msk.bf16.mxu1 %vm17039_vm1, %v21534_v14  ;;  %v2497_v34 = vpop.permute.xlu0 %2496 }
 0x5f2   :  { %15735 = vmatprep.subr.bf16.mxu1 %v21534_v14  ;;  %v2502_v53 = vsel %vm676_vm3, %v2497_v34, 0 }
 0x5f4   :  { %15732 = vmatmul.mubr.msk.bf16.vlgmr.msra.gmra.mxu0 %vm177_vm2, %v2245_v23 }
 0x5f5   :  { %15742 = vmatpush3.bf16.msra.mxu0 %v2454_v51  ;;  %15743 = vmatprep.mubr.msk.bf16.mxu0 %vm17039_vm1, %v21534_v14 }
 0x5f6   :  { %15753 = vmatprep.subr.bf16.mxu0 %v21534_v14 }
 0x5f8   :  { %15726 = vmatmul.mubr.msk.bf16.vlgmr.msra.gmra.mxu1 %vm177_vm2, %v2195_v26 }
 0x5f9   :  { %15736 = vmatpush3.bf16.xpose.msra.mxu1 %v2302_v52  ;;  %15737 = vmatprep.mubr.msk.bf16.mxu1 %vm17039_vm1, %v21534_v14 }
 0x5fa   :  { %15747 = vmatprep.subr.bf16.mxu1 %v21534_v14 }
 0x600   :  { %15738 = vmatmul.mubr.msk.bf16.vlgmr.msra.gmra.mxu1 %vm177_vm2, %v2295_v37 }
 0x601   :  { %15748 = vmatpush3.bf16.msra.mxu1 %v2502_v53  ;;  %15749 = vmatprep.mubr.msk.bf16.mxu1 %vm17039_vm1, %v21534_v14 }
 0x602   :  { %15759 = vmatprep.subr.bf16.mxu1 %v21534_v14 }
 0x64d   :  { %v17663_v54 = vpop.f32.mrf.mxu0 }
 0x64f   :  { %v15649_v45 = vpop.f32.mrf.mxu0 }
 0x651   :  { %v1605_v56 = vpop.f32.mrf.mxu0 }
 0x653   :  { %v15650_v57 = vpop.f32.mrf.mxu0 }
 0x655   :  { %v17665_v42 = vpop.f32.mrf.mxu0 }
 0x657   :  { %v15661_v62 = vpop.f32.mrf.mxu0 }
 0x659   :  { %v1701_v48 = vpop.f32.mrf.mxu0 }
 0x65b   :  { %v17667_v63 = vpop.f32.mrf.mxu1  ;;  %v15662_v2 = vpop.f32.mrf.mxu0 }
 0x65c   :  { %v16326_v58 = vpack.i.bf16 %v17667_v63, %v17663_v54 }
 0x65d   :  { %v15655_v3 = vpop.f32.mrf.mxu1 }
 0x65f   :  { %v1653_v4 = vpop.f32.mrf.mxu1  ;;  %v17671_v6 = vpop.f32.mrf.mxu0 }
 0x661   :  { %v15656_v0 = vpop.f32.mrf.mxu1  ;;  %v15673_v8 = vpop.f32.mrf.mxu0 }
 0x663   :  { %v17673_v9 = vpop.f32.mrf.mxu1  ;;  %v1797_v5 = vpop.f32.mrf.mxu0 }
 0x664   :  { %v16331_v11 = vpack.i.bf16 %v17673_v9, %v17665_v42 }
 0x665   :  { %v15667_v13 = vpop.f32.mrf.mxu1  ;;  %v15674_v15 = vpop.f32.mrf.mxu0 }
 0x667   :  { %v1749_v18 = vpop.f32.mrf.mxu1 }
 0x669   :  { %v15668_v1 = vpop.f32.mrf.mxu1 }
 0x66b   :  { %v17677_v20 = vpop.f32.mrf.mxu1 }
 0x66c   :  { %v16356_v22 = vpack.i.bf16 %v17677_v20, %v17671_v6 }
 0x66d   :  { %v15679_v24 = vpop.f32.mrf.mxu1 }
 0x66f   :  { %v1845_v27 = vpop.f32.mrf.mxu1 }
 0x671   :  { %v15680_v28 = vpop.f32.mrf.mxu1 }
 0x694   :  { %v17681_v16 = vpop.f32.mrf.mxu0 }
 0x696   :  { %v15685_v31 = vpop.f32.mrf.mxu0 }
 0x698   :  { %v1893_v10 = vpop.f32.mrf.mxu0 }
 0x69a   :  { %v15686_v26 = vpop.f32.mrf.mxu0 }
 0x69c   :  { %v1988_v40 = vpop.f32.mrf.mxu0 }
 0x69d   :  { %v17683_v41 = vmul.f32 0.35355338, %v1988_v40 }
 0x69e   :  { %v15697_v19 = vpop.f32.mrf.mxu0 }
 0x69f   :  { %v2352_v32 = vsel %vm177_vm2, %v17683_v41, -inf }
 0x6a0   :  { %v17687_v43 = vpop.f32.mrf.mxu1  ;;  %2353 = vmax.xlane.f32.xlu0 %v2352_v32  ;;  %v1991_v44 = vpop.f32.mrf.mxu0 }
 0x6a1   :  { %v16361_v46 = vpack.i.bf16 %v17687_v43, %v17681_v16 }
 0x6a2   :  { %v15691_v47 = vpop.f32.mrf.mxu1  ;;  %v15698_v37 = vpop.f32.mrf.mxu0 }
 0x6a4   :  { %v1941_v49 = vpop.f32.mrf.mxu1  ;;  %v2088_v50 = vpop.f32.mrf.mxu0 }
 0x6a5   :  { %v2346_v23 = vmul.f32 0.35355338, %v2088_v50 }
 0x6a6   :  { %v15692_v51 = vpop.f32.mrf.mxu1  ;;  %v15709_v52 = vpop.f32.mrf.mxu0 }
 0x6a7   :  { %v2358_v34 = vsel %vm177_vm2, %v2346_v23, -inf }
 0x6a8   :  { %v2038_v53 = vpop.f32.mrf.mxu1  ;;  %2359 = vmax.xlane.f32.xlu0 %v2358_v34  ;;  %v2091_v45 = vpop.f32.mrf.mxu0 }
 0x6a9   :  { %v2345_v56 = vmul.f32 0.35355338, %v2038_v53 }
 0x6aa   :  { %v15703_v57 = vpop.f32.mrf.mxu1  ;;  %v15710_v62 = vpop.f32.mrf.mxu0 }
 0x6ab   :  { %v2355_v48 = vsel %vm177_vm2, %v2345_v56, -inf }
 0x6ac   :  { %2356 = vmax.xlane.f32.xlu1 %v2355_v48  ;;  %v2041_v2 = vpop.f32.mrf.mxu1  ;;  %v2188_v3 = vpop.f32.mrf.mxu0 }
 0x6ad   :  { %v2348_v4 = vmul.f32 0.35355338, %v2188_v3 }
 0x6ae   :  { %v15704_v0 = vpop.f32.mrf.mxu1  ;;  %v15721_v8 = vpop.f32.mrf.mxu0 }
 0x6af   :  { %v2364_v5 = vsel %vm177_vm2, %v2348_v4, -inf  ;;  %v17706_v0 = vpop.permute.xlu1 %2544 }
 0x6b0   :  { %v2138_v13 = vpop.f32.mrf.mxu1  ;;  %2365 = vmax.xlane.f32.xlu1 %v2364_v5  ;;  %v2191_v15 = vpop.f32.mrf.mxu0 }
 0x6b1   :  { %v2347_v18 = vmul.f32 0.35355338, %v2138_v13 }
 0x6b2   :  { %v15715_v1 = vpop.f32.mrf.mxu1  ;;  %v15722_v24 = vpop.f32.mrf.mxu0 }
 0x6b3   :  { %v2361_v27 = vsel %vm177_vm2, %v2347_v18, -inf  ;;  %v17708_v5 = vpop.permute.xlu1 %2592 }
 0x6b4   :  { %v2141_v28 = vpop.f32.mrf.mxu1  ;;  %2362 = vmax.xlane.f32.xlu0 %v2361_v27  ;;  %v2288_v31 = vpop.f32.mrf.mxu0 }
 0x6b5   :  { %v17695_v10 = vmul.f32 0.35355338, %v2288_v31 }
 0x6b6   :  { %v15716_v26 = vpop.f32.mrf.mxu1  ;;  %v15733_v40 = vpop.f32.mrf.mxu0 }
 0x6b7   :  { %v2370_v19 = vsel %vm177_vm2, %v17695_v10, -inf }
 0x6b8   :  { %v2238_v32 = vpop.f32.mrf.mxu1  ;;  %2371 = vmax.xlane.f32.xlu1 %v2370_v19  ;;  %v2291_v44 = vpop.f32.mrf.mxu0 }
 0x6b9   :  { %v2349_v47 = vmul.f32 0.35355338, %v2238_v32 }
 0x6ba   :  { %v15727_v37 = vpop.f32.mrf.mxu1  ;;  %v15734_v49 = vpop.f32.mrf.mxu0 }
 0x6bb   :  { %v2367_v50 = vsel %vm177_vm2, %v2349_v47, -inf }
 0x6bc   :  { %v2241_v51 = vpop.f32.mrf.mxu1  ;;  %2368 = vmax.xlane.f32.xlu0 %v2367_v50 }
 0x6be   :  { %v15728_v52 = vpop.f32.mrf.mxu1 }
 0x6c0   :  { %v2338_v34 = vpop.f32.mrf.mxu1 }
 0x6c1   :  { %v2351_v53 = vmul.f32 0.35355338, %v2338_v34 }
 0x6c2   :  { %v15739_v45 = vpop.f32.mrf.mxu1 }
 0x6c3   :  { %v2373_v57 = vsel %vm177_vm2, %v2351_v53, -inf }
 0x6c4   :  { %v2341_v62 = vpop.f32.mrf.mxu1  ;;  %2374 = vmax.xlane.f32.xlu0 %v2373_v57 }
 0x6c6   :  { %v15740_v48 = vpop.f32.mrf.mxu1 }
 0x6c9   :  { %2688 = vrot.lane.b32.xlu1 %v17190_v35, %s21524_s17 }
 0x6da   :  { %2640 = vrot.lane.b32.xlu0 %v17194_v36, %s21524_s17 }
 0x729   :  { %v2354_v2 = vpop.xlane.xlu0 %2353 }
 0x72a   :  { %v2376_v3 = vsub.f32 %v17683_v41, %v2354_v2 }
 0x72c   :  { %v2384_v8 = vmul.f32 1.442695, %v2376_v3 }
 0x72e   :  { %16774 = vpow2.f32 %v2384_v8 }
 0x731   :  { %v2360_v13 = vpop.xlane.xlu0 %2359 }
 0x732   :  { %v2378_v15 = vsub.f32 %v2346_v23, %v2360_v13 }
 0x734   :  { %v2388_v1 = vmul.f32 1.442695, %v2378_v15 }
 0x735   :  { %v2357_v24 = vpop.xlane.xlu1 %2356 }
 0x736   :  { %16776 = vpow2.f32 %v2388_v1  ;;  %v2377_v27 = vsub.f32 %v2345_v56, %v2357_v24 }
 0x738   :  { %v2386_v28 = vmul.f32 1.442695, %v2377_v27 }
 0x739   :  { %v2366_v31 = vpop.xlane.xlu1 %2365 }
 0x73a   :  { %16778 = vpow2.f32 %v2386_v28  ;;  %v2380_v26 = vsub.f32 %v2348_v4, %v2366_v31 }
 0x73b   :  { %v17710_v40 = vpop.eup %16774 }
 0x73c   :  { %v2392_v19 = vmul.f32 1.442695, %v2380_v26  ;;  %v2400_v41 = vsel %vm177_vm2, %v17710_v40, 0.0 }
 0x73d   :  { %2401 = vadd.xlane.f32.xlu1 %v2400_v41  ;;  %v2363_v32 = vpop.xlane.xlu0 %2362 }
 0x73e   :  { %16780 = vpow2.f32 %v2392_v19  ;;  %v2379_v44 = vsub.f32 %v2347_v18, %v2363_v32 }
 0x740   :  { %v2390_v37 = vmul.f32 1.442695, %v2379_v44 }
 0x741   :  { %v2372_v48 = vpop.xlane.xlu1 %2371 }
 0x742   :  { %16782 = vpow2.f32 %v2390_v37  ;;  %v2382_v2 = vsub.f32 %v17695_v10, %v2372_v48  ;;  %v2550_v37 = vsel %vm676_vm3, %v17706_v0, 0 }
 0x743   :  { %v17714_v23 = vpop.eup %16776 }
 0x744   :  { %v2406_v56 = vsel %vm177_vm2, %v17714_v23, 0.0  ;;  %v2396_v3 = vmul.f32 1.442695, %v2382_v2 }
 0x745   :  { %2407 = vadd.xlane.f32.xlu1 %v2406_v56  ;;  %v2369_v49 = vpop.xlane.xlu0 %2368 }
 0x746   :  { %v2381_v4 = vsub.f32 %v2349_v47, %v2369_v49 }
 0x747   :  { %v17718_v50 = vpop.eup %16778 }
 0x748   :  { %v2394_v51 = vmul.f32 1.442695, %v2381_v4  ;;  %v2403_v52 = vsel %vm177_vm2, %v17718_v50, 0.0 }
 0x749   :  { %2404 = vadd.xlane.f32.xlu0 %v2403_v52 }
 0x74a   :  { %16784 = vpow2.f32 %v2394_v51 }
 0x74b   :  { %v17722_v34 = vpop.eup %16780  ;;  %16786 = vpow2.f32 %v2396_v3 }
 0x74c   :  { %v2412_v18 = vsel %vm177_vm2, %v17722_v34, 0.0 }
 0x74d   :  { %2413 = vadd.xlane.f32.xlu1 %v2412_v18  ;;  %v2375_v8 = vpop.xlane.xlu0 %2374 }
 0x74e   :  { %v2383_v13 = vsub.f32 %v2351_v53, %v2375_v8  ;;  %v2689_v53 = vpop.permute.xlu1 %2688 }
 0x74f   :  { %v17726_v45 = vpop.eup %16782 }
 0x750   :  { %v2409_v57 = vsel %vm177_vm2, %v17726_v45, 0.0  ;;  %v2398_v15 = vmul.f32 1.442695, %v2383_v13 }
 0x751   :  { %2410 = vadd.xlane.f32.xlu0 %v2409_v57  ;;  %v2641_v31 = vpop.permute.xlu0 %2640 }
 0x752   :  { %16788 = vpow2.f32 %v2398_v15  ;;  %v2646_v52 = vsel %vm676_vm3, %v2641_v31, 0 }
 0x757   :  { %v17730_v47 = vpop.eup %16784 }
 0x758   :  { %v2415_v62 = vsel %vm177_vm2, %v17730_v47, 0.0  ;;  %v17739_v1 = vpop.eup %16786 }
 0x759   :  { %2416 = vadd.xlane.f32.xlu0 %v2415_v62  ;;  %v2418_v24 = vsel %vm177_vm2, %v17739_v1, 0.0 }
 0x75e   :  { %2784 = vrot.lane.b32.xlu1 %v17198_v38, %s21524_s17 }
 0x75f   :  { %v17743_v27 = vpop.eup %16788 }
 0x760   :  { %v2421_v10 = vsel %vm177_vm2, %v17743_v27, 0.0 }
 0x76f   :  { %2736 = vrot.lane.b32.xlu0 %v17204_v39, %s21524_s17  ;;  %s21622_s17 = smov 104  }
 0x782   :  { %2419 = vadd.xlane.f32.xlu1 %v2418_v24 }
 0x78e   :  { %2422 = vadd.xlane.f32.xlu0 %v2421_v10 }
 0x793   :  { %2884 = vrot.lane.b32.xlu1 %v17188_v33, %s21516_s18 }
 0x797   :  { %2882 = vrot.lane.b32.xlu1 %v17188_v33, %s21514_s19 }
 0x79b   :  { %2984 = vrot.lane.b32.xlu1 %v17184_v29, %s21516_s18 }
 0x79f   :  { %2982 = vrot.lane.b32.xlu1 %v17184_v29, %s21514_s19 }
 0x7a3   :  { %3084 = vrot.lane.b32.xlu1 %v17190_v35, %s21516_s18 }
 0x7a4   :  { %2834 = vrot.lane.b32.xlu0 %v17180_v25, %s21516_s18 }
 0x7a7   :  { %3082 = vrot.lane.b32.xlu1 %v17190_v35, %s21514_s19 }
 0x7a8   :  { %2832 = vrot.lane.b32.xlu0 %v17180_v25, %s21514_s19 }
 0x7ab   :  { %3184 = vrot.lane.b32.xlu1 %v17198_v38, %s21516_s18 }
 0x7ac   :  { %2934 = vrot.lane.b32.xlu0 %v17178_v21, %s21516_s18 }
 0x7af   :  { %3182 = vrot.lane.b32.xlu1 %v17198_v38, %s21514_s19 }
 0x7b0   :  { %2932 = vrot.lane.b32.xlu0 %v17178_v21, %s21514_s19 }
 0x7b3   :  { %3336 = vrot.lane.b32.xlu1 %v17180_v25, %s21512_s20 }
 0x7b4   :  { %3034 = vrot.lane.b32.xlu0 %v17194_v36, %s21516_s18 }
 0x7b8   :  { %3032 = vrot.lane.b32.xlu0 %v17194_v36, %s21514_s19 }
 0x7bc   :  { %3134 = vrot.lane.b32.xlu0 %v17204_v39, %s21516_s18  ;;  %s21518_s18 = smov 24  }
 0x7c0   :  { %3132 = vrot.lane.b32.xlu0 %v17204_v39, %s21514_s19 }
 0x7c6   :  { %v2402_v28 = vpop.xlane.xlu1 %2401 }
 0x7c7   :  { %16790 = vrcp.f32 %v2402_v28 }
 0x7ce   :  { %v2408_v26 = vpop.xlane.xlu1 %2407 }
 0x7cf   :  { %16792 = vrcp.f32 %v2408_v26 }
 0x7d2   :  { %v2405_v19 = vpop.xlane.xlu0 %2404 }
 0x7d3   :  { %16794 = vrcp.f32 %v2405_v19 }
 0x7d4   :  { %v16791_v25 = vpop.eup %16790 }
 0x7d5   :  { %v2432_v41 = vmul.f32 %v16791_v25, %v17710_v40 }
 0x7d6   :  { %v2414_v32 = vpop.xlane.xlu1 %2413 }
 0x7d7   :  { %16796 = vrcp.f32 %v2414_v32  ;;  %v2440_v44 = vpack.c.bf16 %v2432_v41, %v2432_v41 }
 0x7d9   :  { %15744 = vmatmul.mubr.msk.bf16.vlgmr.msra.gmra.mxu0 %vm177_vm2, %v2440_v44 }
 0x7da   :  { %15754 = vmatpush3.bf16.msra.mxu0 %v2550_v37  ;;  %v2411_v56 = vpop.xlane.xlu0 %2410  ;;  %15755 = vmatprep.mubr.msk.bf16.mxu0 %vm17039_vm1, %v21534_v14  ;;  %v2785_v24 = vpop.permute.xlu1 %2784 }
 0x7db   :  { %16798 = vrcp.f32 %v2411_v56  ;;  %15765 = vmatprep.subr.bf16.mxu0 %v21534_v14  ;;  %v2790_v28 = vsel %vm676_vm3, %v2785_v24, 0 }
 0x7dc   :  { %v16793_v49 = vpop.eup %16792 }
 0x7dd   :  { %v2434_v4 = vmul.f32 %v16793_v49, %v17714_v23  ;;  %v2598_v23 = vsel %vm676_vm3, %v17708_v5, 0 }
 0x7df   :  { %v2442_v40 = vpack.c.bf16 %v2434_v4, %v2434_v4 }
 0x7e0   :  { %v16795_v51 = vpop.eup %16794 }
 0x7e1   :  { %15756 = vmatmul.mubr.msk.bf16.vlgmr.msra.gmra.mxu0 %vm177_vm2, %v2442_v40  ;;  %v2433_v0 = vmul.f32 %v16795_v51, %v17718_v50 }
 0x7e2   :  { %15766 = vmatpush3.bf16.msra.mxu0 %v2646_v52  ;;  %v2417_v18 = vpop.xlane.xlu0 %2416  ;;  %15767 = vmatprep.mubr.msk.bf16.mxu0 %vm17039_vm1, %v21534_v14 }
 0x7e3   :  { %16800 = vrcp.f32 %v2417_v18  ;;  %v2441_v57 = vpack.c.bf16 %v2433_v0, %v2433_v0  ;;  %15777 = vmatprep.subr.bf16.mxu0 %v21534_v14 }
 0x7e4   :  { %v16797_v62 = vpop.eup %16796 }
 0x7e5   :  { %15750 = vmatmul.mubr.msk.bf16.vlgmr.msra.gmra.mxu1 %vm177_vm2, %v2441_v57  ;;  %v2436_v48 = vmul.f32 %v16797_v62, %v17722_v34  ;;  %v2694_v34 = vsel %vm676_vm3, %v2689_v53, 0 }
 0x7e6   :  { %15760 = vmatpush3.bf16.msra.mxu1 %v2598_v23  ;;  %v2737_v2 = vpop.permute.xlu0 %2736  ;;  %15761 = vmatprep.mubr.msk.bf16.mxu1 %vm17039_vm1, %v21534_v14 }
 0x7e7   :  { %v2742_v50 = vsel %vm676_vm3, %v2737_v2, 0  ;;  %v2444_v3 = vpack.c.bf16 %v2436_v48, %v2436_v48  ;;  %15771 = vmatprep.subr.bf16.mxu1 %v21534_v14 }
 0x7e8   :  { %v16799_v8 = vpop.eup %16798 }
 0x7e9   :  { %15768 = vmatmul.mubr.msk.bf16.vlgmr.msra.gmra.mxu0 %vm177_vm2, %v2444_v3  ;;  %v2435_v13 = vmul.f32 %v16799_v8, %v17726_v45 }
 0x7ea   :  { %15778 = vmatpush3.bf16.msra.mxu0 %v2742_v50  ;;  %15779 = vmatprep.mubr.msk.bf16.mxu0 %vm17039_vm1, %v21534_v14 }
 0x7eb   :  { %v2443_v5 = vpack.c.bf16 %v2435_v13, %v2435_v13  ;;  %15789 = vmatprep.subr.bf16.mxu0 %v21534_v14 }
 0x7ed   :  { %15762 = vmatmul.mubr.msk.bf16.vlgmr.msra.gmra.mxu1 %vm177_vm2, %v2443_v5 }
 0x7ee   :  { %15772 = vmatpush3.bf16.msra.mxu1 %v2694_v34  ;;  %15773 = vmatprep.mubr.msk.bf16.mxu1 %vm17039_vm1, %v21534_v14 }
 0x7ef   :  { %15783 = vmatprep.subr.bf16.mxu1 %v21534_v14 }
 0x7f0   :  { %v16801_v15 = vpop.eup %16800 }
 0x7f1   :  { %v2437_v45 = vmul.f32 %v16801_v15, %v17730_v47 }
 0x7f3   :  { %v2445_v10 = vpack.c.bf16 %v2437_v45, %v2437_v45 }
 0x7f5   :  { %15774 = vmatmul.mubr.msk.bf16.vlgmr.msra.gmra.mxu1 %vm177_vm2, %v2445_v10 }
 0x7f6   :  { %15784 = vmatpush3.bf16.msra.mxu1 %v2790_v28  ;;  %15785 = vmatprep.mubr.msk.bf16.mxu1 %vm17039_vm1, %v21534_v14 }
 0x7f7   :  { %15795 = vmatprep.subr.bf16.mxu1 %v21534_v14 }
 0x80b   :  { %v2420_v53 = vpop.xlane.xlu1 %2419 }
 0x80c   :  { %16802 = vrcp.f32 %v2420_v53 }
 0x80f   :  { %v2885_v31 = vpop.permute.xlu1 %2884 }
 0x810   :  { %v2890_v62 = vsel %vm177_vm2, %v2885_v31, 0 }
 0x813   :  { %v2883_v26 = vpop.permute.xlu1 %2882 }
 0x817   :  { %v2985_v19 = vpop.permute.xlu1 %2984  ;;  %v2423_v25 = vpop.xlane.xlu0 %2422 }
 0x818   :  { %16804 = vrcp.f32 %v2423_v25  ;;  %v2990_v50 = vsel %vm177_vm2, %v2985_v19, 0 }
 0x819   :  { %v16803_v47 = vpop.eup %16802 }
 0x81a   :  { %v2438_v41 = vmul.f32 %v16803_v47, %v17739_v1 }
 0x81b   :  { %v2835_v32 = vpop.permute.xlu0 %2834  ;;  %v2983_v56 = vpop.permute.xlu1 %2982 }
 0x81c   :  { %v2840_v44 = vsel %vm177_vm2, %v2835_v32, 0  ;;  %v2446_v37 = vpack.c.bf16 %v2438_v41, %v2438_v41 }
 0x81e   :  { %15780 = vmatmul.mubr.msk.bf16.vlgmr.msra.gmra.mxu0 %vm177_vm2, %v2446_v37 }
 0x81f   :  { %15790 = vmatpush3.bf16.xpose.msra.mxu0 %v2840_v44  ;;  %v2833_v49 = vpop.permute.xlu0 %2832  ;;  %15791 = vmatprep.mubr.msk.bf16.mxu0 %vm17039_vm1, %v21534_v14  ;;  %v3085_v4 = vpop.permute.xlu1 %3084 }
 0x820   :  { %15801 = vmatprep.subr.bf16.mxu0 %v21534_v14  ;;  %v3090_v5 = vsel %vm177_vm2, %v3085_v4, 0 }
 0x823   :  { %v2935_v40 = vpop.permute.xlu0 %2934  ;;  %v3083_v57 = vpop.permute.xlu1 %3082 }
 0x824   :  { %v2940_v51 = vsel %vm177_vm2, %v2935_v40, 0 }
 0x825   :  { %v16805_v52 = vpop.eup %16804 }
 0x826   :  { %15792 = vmatmul.mubr.msk.bf16.vlgmr.msra.gmra.mxu0 %vm177_vm2, %v2833_v49  ;;  %v2439_v1 = vmul.f32 %v16805_v52, %v17743_v27 }
 0x827   :  { %15802 = vmatpush3.bf16.xpose.msra.mxu0 %v2940_v51  ;;  %v2933_v0 = vpop.permute.xlu0 %2932  ;;  %15803 = vmatprep.mubr.msk.bf16.mxu0 %vm17039_vm1, %v21534_v14  ;;  %v3185_v48 = vpop.permute.xlu1 %3184 }
 0x828   :  { %v2447_v18 = vpack.c.bf16 %v2439_v1, %v2439_v1  ;;  %15813 = vmatprep.subr.bf16.mxu0 %v21534_v14  ;;  %v3190_v24 = vsel %vm177_vm2, %v3185_v48, 0 }
 0x82a   :  { %15786 = vmatmul.mubr.msk.bf16.vlgmr.msra.gmra.mxu1 %vm177_vm2, %v2447_v18 }
 0x82b   :  { %15796 = vmatpush3.bf16.xpose.msra.mxu1 %v2890_v62  ;;  %v3035_v23 = vpop.permute.xlu0 %3034  ;;  %15797 = vmatprep.mubr.msk.bf16.mxu1 %vm17039_vm1, %v21534_v14  ;;  %v3183_v13 = vpop.permute.xlu1 %3182 }
 0x82c   :  { %v3040_v27 = vsel %vm177_vm2, %v3035_v23, 0  ;;  %15807 = vmatprep.subr.bf16.mxu1 %v21534_v14 }
 0x82e   :  { %15804 = vmatmul.mubr.msk.bf16.vlgmr.msra.gmra.mxu0 %vm177_vm2, %v2933_v0 }
 0x82f   :  { %15814 = vmatpush3.bf16.xpose.msra.mxu0 %v3040_v27  ;;  %v3033_v2 = vpop.permute.xlu0 %3032  ;;  %15815 = vmatprep.mubr.msk.bf16.mxu0 %vm17039_vm1, %v21534_v14  ;;  %v3337_v34 = vpop.permute.xlu1 %3336 }
 0x830   :  { %15825 = vmatprep.subr.bf16.mxu0 %v21534_v14  ;;  %v3342_v45 = vsel %vm676_vm3, %v3337_v34, 0 }
 0x832   :  { %15798 = vmatmul.mubr.msk.bf16.vlgmr.msra.gmra.mxu1 %vm177_vm2, %v2883_v26 }
 0x833   :  { %15808 = vmatpush3.bf16.xpose.msra.mxu1 %v2990_v50  ;;  %v3135_v3 = vpop.permute.xlu0 %3134  ;;  %15809 = vmatprep.mubr.msk.bf16.mxu1 %vm17039_vm1, %v21534_v14 }
 0x834   :  { %v3140_v8 = vsel %vm177_vm2, %v3135_v3, 0  ;;  %15819 = vmatprep.subr.bf16.mxu1 %v21534_v14 }
 0x836   :  { %15816 = vmatmul.mubr.msk.bf16.vlgmr.msra.gmra.mxu0 %vm177_vm2, %v3033_v2 }
 0x837   :  { %15826 = vmatpush3.bf16.xpose.msra.mxu0 %v3140_v8  ;;  %15827 = vmatprep.mubr.msk.bf16.mxu0 %vm17039_vm1, %v21534_v14  ;;  %v3133_v15 = vpop.permute.xlu0 %3132 }
 0x838   :  { %15837 = vmatprep.subr.bf16.mxu0 %v21534_v14 }
 0x83a   :  { %15810 = vmatmul.mubr.msk.bf16.vlgmr.msra.gmra.mxu1 %vm177_vm2, %v2983_v56 }
 0x83b   :  { %15820 = vmatpush3.bf16.xpose.msra.mxu1 %v3090_v5  ;;  %15821 = vmatprep.mubr.msk.bf16.mxu1 %vm17039_vm1, %v21534_v14 }
 0x83c   :  { %15831 = vmatprep.subr.bf16.mxu1 %v21534_v14 }
 0x83e   :  { %15828 = vmatmul.mubr.msk.bf16.vlgmr.msra.gmra.mxu0 %vm177_vm2, %v3133_v15 }
 0x83f   :  { %15838 = vmatpush3.bf16.msra.mxu0 %v3342_v45  ;;  %15839 = vmatprep.mubr.msk.bf16.mxu0 %vm17039_vm1, %v21534_v14 }
 0x840   :  { %15849 = vmatprep.subr.bf16.mxu0 %v21534_v14 }
 0x842   :  { %15822 = vmatmul.mubr.msk.bf16.vlgmr.msra.gmra.mxu1 %vm177_vm2, %v3083_v57 }
 0x843   :  { %15832 = vmatpush3.bf16.xpose.msra.mxu1 %v3190_v24  ;;  %15833 = vmatprep.mubr.msk.bf16.mxu1 %vm17039_vm1, %v21534_v14 }
 0x844   :  { %15843 = vmatprep.subr.bf16.mxu1 %v21534_v14 }
 0x84a   :  { %15834 = vmatmul.mubr.msk.bf16.vlgmr.msra.gmra.mxu1 %vm177_vm2, %v3183_v13 }
 0x84b   :  { %15845 = vmatprep.mubr.msk.bf16.mxu1 %vm17039_vm1, %v21534_v14 }
 0x899   :  { %v17869_v10 = vpop.f32.mrf.mxu0 }
 0x89b   :  { %v15745_v28 = vpop.f32.mrf.mxu0 }
 0x89d   :  { %v2493_v53 = vpop.f32.mrf.mxu0 }
 0x89f   :  { %v15746_v31 = vpop.f32.mrf.mxu0 }
 0x8a1   :  { %v17871_v26 = vpop.f32.mrf.mxu0 }
 0x8a3   :  { %v15757_v19 = vpop.f32.mrf.mxu0 }
 0x8a5   :  { %v17873_v25 = vpop.f32.mrf.mxu1  ;;  %v2589_v47 = vpop.f32.mrf.mxu0 }
 0x8a6   :  { %v16336_v41 = vpack.i.bf16 %v17873_v25, %v17869_v10 }
 0x8a7   :  { %v15751_v32 = vpop.f32.mrf.mxu1  ;;  %v15758_v44 = vpop.f32.mrf.mxu0 }
 0x8a9   :  { %v2541_v37 = vpop.f32.mrf.mxu1  ;;  %v17877_v56 = vpop.f32.mrf.mxu0 }
 0x8ab   :  { %v15752_v49 = vpop.f32.mrf.mxu1  ;;  %v15769_v4 = vpop.f32.mrf.mxu0 }
 0x8ad   :  { %v17879_v40 = vpop.f32.mrf.mxu1  ;;  %v2685_v51 = vpop.f32.mrf.mxu0 }
 0x8ae   :  { %v16341_v52 = vpack.i.bf16 %v17879_v40, %v17871_v26 }
 0x8af   :  { %v15763_v1 = vpop.f32.mrf.mxu1  ;;  %v15770_v0 = vpop.f32.mrf.mxu0 }
 0x8b1   :  { %v2637_v18 = vpop.f32.mrf.mxu1 }
 0x8b3   :  { %v15764_v57 = vpop.f32.mrf.mxu1 }
 0x8b5   :  { %v17883_v62 = vpop.f32.mrf.mxu1 }
 0x8b6   :  { %v16366_v23 = vpack.i.bf16 %v17883_v62, %v17877_v56 }
 0x8b7   :  { %v15775_v27 = vpop.f32.mrf.mxu1 }
 0x8b9   :  { %v2733_v48 = vpop.f32.mrf.mxu1 }
 0x8bb   :  { %v15776_v2 = vpop.f32.mrf.mxu1 }
 0x8de   :  { %v17887_v50 = vpop.f32.mrf.mxu0 }
 0x8e0   :  { %v15781_v3 = vpop.f32.mrf.mxu0 }
 0x8e2   :  { %v2781_v8 = vpop.f32.mrf.mxu0 }
 0x8e4   :  { %v15782_v13 = vpop.f32.mrf.mxu0 }
 0x8e6   :  { %v2876_v5 = vpop.f32.mrf.mxu0 }
 0x8e7   :  { %v17889_v34 = vmul.f32 0.35355338, %v2876_v5 }
 0x8e8   :  { %v15793_v15 = vpop.f32.mrf.mxu0 }
 0x8e9   :  { %v3240_v45 = vsel %vm177_vm2, %v17889_v34, -inf }
 0x8ea   :  { %v17893_v24 = vpop.f32.mrf.mxu1  ;;  %3241 = vmax.xlane.f32.xlu0 %v3240_v45  ;;  %v2879_v28 = vpop.f32.mrf.mxu0 }
 0x8eb   :  { %v16371_v53 = vpack.i.bf16 %v17893_v24, %v17887_v50 }
 0x8ec   :  { %v15787_v31 = vpop.f32.mrf.mxu1  ;;  %v15794_v19 = vpop.f32.mrf.mxu0 }
 0x8ee   :  { %v2829_v47 = vpop.f32.mrf.mxu1  ;;  %v2976_v32 = vpop.f32.mrf.mxu0 }
 0x8ef   :  { %v3234_v44 = vmul.f32 0.35355338, %v2976_v32 }
 0x8f0   :  { %v15788_v37 = vpop.f32.mrf.mxu1  ;;  %v15805_v49 = vpop.f32.mrf.mxu0 }
 0x8f1   :  { %v3246_v4 = vsel %vm177_vm2, %v3234_v44, -inf }
 0x8f2   :  { %v2926_v51 = vpop.f32.mrf.mxu1  ;;  %3247 = vmax.xlane.f32.xlu0 %v3246_v4  ;;  %v2979_v1 = vpop.f32.mrf.mxu0 }
 0x8f3   :  { %v3233_v0 = vmul.f32 0.35355338, %v2926_v51 }
 0x8f4   :  { %v15799_v18 = vpop.f32.mrf.mxu1  ;;  %v15806_v57 = vpop.f32.mrf.mxu0 }
 0x8f5   :  { %v3243_v27 = vsel %vm177_vm2, %v3233_v0, -inf }
 0x8f6   :  { %3244 = vmax.xlane.f32.xlu1 %v3243_v27  ;;  %v2929_v48 = vpop.f32.mrf.mxu1  ;;  %v3076_v2 = vpop.f32.mrf.mxu0 }
 0x8f7   :  { %v17899_v3 = vmul.f32 0.35355338, %v3076_v2 }
 0x8f8   :  { %v15800_v8 = vpop.f32.mrf.mxu1  ;;  %v15817_v13 = vpop.f32.mrf.mxu0 }
 0x8f9   :  { %v3252_v5 = vsel %vm177_vm2, %v17899_v3, -inf }
 0x8fa   :  { %v3026_v15 = vpop.f32.mrf.mxu1  ;;  %3253 = vmax.xlane.f32.xlu1 %v3252_v5  ;;  %v3079_v45 = vpop.f32.mrf.mxu0 }
 0x8fb   :  { %v3235_v28 = vmul.f32 0.35355338, %v3026_v15 }
 0x8fc   :  { %v15811_v31 = vpop.f32.mrf.mxu1  ;;  %v15818_v19 = vpop.f32.mrf.mxu0 }
 0x8fd   :  { %v3249_v47 = vsel %vm177_vm2, %v3235_v28, -inf }
 0x8fe   :  { %v3029_v32 = vpop.f32.mrf.mxu1  ;;  %3250 = vmax.xlane.f32.xlu0 %v3249_v47  ;;  %v3176_v37 = vpop.f32.mrf.mxu0 }
 0x8ff   :  { %v17904_v49 = vmul.f32 0.35355338, %v3176_v37 }
 0x900   :  { %v15812_v4 = vpop.f32.mrf.mxu1  ;;  %v15829_v51 = vpop.f32.mrf.mxu0 }
 0x901   :  { %v3258_v1 = vsel %vm177_vm2, %v17904_v49, -inf }
 0x902   :  { %v3126_v18 = vpop.f32.mrf.mxu1  ;;  %3259 = vmax.xlane.f32.xlu1 %v3258_v1  ;;  %v3179_v57 = vpop.f32.mrf.mxu0 }
 0x903   :  { %v3237_v27 = vmul.f32 0.35355338, %v3126_v18 }
 0x904   :  { %v15823_v48 = vpop.f32.mrf.mxu1  ;;  %v15830_v2 = vpop.f32.mrf.mxu0 }
 0x905   :  { %v3255_v8 = vsel %vm177_vm2, %v3237_v27, -inf }
 0x906   :  { %v3129_v13 = vpop.f32.mrf.mxu1  ;;  %3256 = vmax.xlane.f32.xlu0 %v3255_v8 }
 0x908   :  { %v15824_v5 = vpop.f32.mrf.mxu1 }
 0x90a   :  { %v3226_v15 = vpop.f32.mrf.mxu1 }
 0x90b   :  { %v3239_v45 = vmul.f32 0.35355338, %v3226_v15 }
 0x90c   :  { %v15835_v31 = vpop.f32.mrf.mxu1 }
 0x90d   :  { %v3261_v19 = vsel %vm177_vm2, %v3239_v45, -inf }
 0x90e   :  { %v3229_v47 = vpop.f32.mrf.mxu1  ;;  %3262 = vmax.xlane.f32.xlu0 %v3261_v19 }
 0x910   :  { %v15836_v32 = vpop.f32.mrf.mxu1 }
 0x913   :  { %3432 = vrot.lane.b32.xlu1 %v17178_v21, %s21512_s20 }
 0x917   :  { %3480 = vrot.lane.b32.xlu1 %v17184_v29, %s21512_s20 }
 0x924   :  { %3384 = vrot.lane.b32.xlu0 %v17188_v33, %s21512_s20 }
 0x973   :  { %v3242_v37 = vpop.xlane.xlu0 %3241 }
 0x974   :  { %v3264_v4 = vsub.f32 %v17889_v34, %v3242_v37 }
 0x976   :  { %v3272_v51 = vmul.f32 1.442695, %v3264_v4 }
 0x978   :  { %16806 = vpow2.f32 %v3272_v51 }
 0x97b   :  { %v3248_v1 = vpop.xlane.xlu0 %3247 }
 0x97c   :  { %v3266_v18 = vsub.f32 %v3234_v44, %v3248_v1 }
 0x97e   :  { %v3276_v57 = vmul.f32 1.442695, %v3266_v18 }
 0x97f   :  { %v3245_v48 = vpop.xlane.xlu1 %3244 }
 0x980   :  { %16808 = vpow2.f32 %v3276_v57  ;;  %v3265_v2 = vsub.f32 %v3233_v0, %v3245_v48 }
 0x982   :  { %v3274_v8 = vmul.f32 1.442695, %v3265_v2 }
 0x983   :  { %v3254_v4 = vpop.xlane.xlu1 %3253 }
 0x984   :  { %16810 = vpow2.f32 %v3274_v8  ;;  %v3268_v51 = vsub.f32 %v17899_v3, %v3254_v4 }
 0x985   :  { %v17917_v21 = vpop.eup %16806 }
 0x986   :  { %v3288_v29 = vsel %vm177_vm2, %v17917_v21, 0.0  ;;  %v3280_v18 = vmul.f32 1.442695, %v3268_v51 }
 0x987   :  { %3289 = vadd.xlane.f32.xlu1 %v3288_v29  ;;  %v3251_v33 = vpop.xlane.xlu0 %3250 }
 0x988   :  { %v3267_v13 = vsub.f32 %v3235_v28, %v3251_v33 }
 0x98a   :  { %v3278_v5 = vmul.f32 1.442695, %v3267_v13 }
 0x98b   :  { %v3260_v1 = vpop.xlane.xlu1 %3259 }
 0x98c   :  { %16812 = vpow2.f32 %v3278_v5  ;;  %v3270_v57 = vsub.f32 %v17904_v49, %v3260_v1 }
 0x98d   :  { %v17921_v34 = vpop.eup %16808  ;;  %16814 = vpow2.f32 %v3280_v18 }
 0x98e   :  { %v3294_v44 = vsel %vm177_vm2, %v17921_v34, 0.0  ;;  %v3284_v48 = vmul.f32 1.442695, %v3270_v57 }
 0x98f   :  { %3295 = vadd.xlane.f32.xlu1 %v3294_v44  ;;  %v3257_v31 = vpop.xlane.xlu0 %3256 }
 0x990   :  { %16816 = vpow2.f32 %v3284_v48  ;;  %v3269_v2 = vsub.f32 %v3237_v27, %v3257_v31 }
 0x991   :  { %v17925_v15 = vpop.eup %16810 }
 0x992   :  { %v3291_v0 = vsel %vm177_vm2, %v17925_v15, 0.0  ;;  %v3282_v8 = vmul.f32 1.442695, %v3269_v2 }
 0x993   :  { %3292 = vadd.xlane.f32.xlu0 %v3291_v0 }
 0x994   :  { %16818 = vpow2.f32 %v3282_v8 }
 0x997   :  { %v3263_v19 = vpop.xlane.xlu0 %3262 }
 0x998   :  { %v3271_v29 = vsub.f32 %v3239_v45, %v3263_v19 }
 0x999   :  { %v17929_v47 = vpop.eup %16812 }
 0x99a   :  { %v3297_v28 = vsel %vm177_vm2, %v17929_v47, 0.0  ;;  %v3286_v33 = vmul.f32 1.442695, %v3271_v29  ;;  %v17941_v13 = vpop.eup %16814 }
 0x99b   :  { %3298 = vadd.xlane.f32.xlu0 %v3297_v28  ;;  %v3385_v32 = vpop.permute.xlu0 %3384 }
 0x99c   :  { %v3390_v37 = vsel %vm676_vm3, %v3385_v32, 0  ;;  %16820 = vpow2.f32 %v3286_v33 }
 0x99d   :  { %15844 = vmatpush3.bf16.msra.mxu1 %v3390_v37  ;;  %v17945_v3 = vpop.eup %16816 }
 0x99e   :  { %15855 = vmatprep.subr.bf16.mxu1 %v21534_v14 }
 0x9a0   :  { %3576 = vrot.lane.b32.xlu1 %v17190_v35, %s21512_s20  ;;  %v3300_v35 = vsel %vm177_vm2, %v17941_v13, 0.0 }
 0x9a1   :  { %v17949_v49 = vpop.eup %16818 }
 0x9a2   :  { %v3303_v27 = vsel %vm177_vm2, %v17949_v49, 0.0 }
 0x9a9   :  { %v17953_v45 = vpop.eup %16820 }
 0x9aa   :  { %v3309_v5 = vsel %vm177_vm2, %v17953_v45, 0.0 }
 0x9b1   :  { %3528 = vrot.lane.b32.xlu0 %v17194_v36, %s21512_s20  ;;  %v3306_v36 = vsel %vm177_vm2, %v17945_v3, 0.0 }
 0x9c4   :  { %3301 = vadd.xlane.f32.xlu1 %v3300_v35 }
 0x9c8   :  { %3307 = vadd.xlane.f32.xlu1 %v3306_v36 }
 0x9d0   :  { %3304 = vadd.xlane.f32.xlu0 %v3303_v27 }
 0x9d4   :  { %3310 = vadd.xlane.f32.xlu0 %v3309_v5 }
 0x9d9   :  { %3672 = vrot.lane.b32.xlu1 %v17198_v38, %s21512_s20  ;;  %v3433_v38 = vpop.permute.xlu1 %3432 }
 0x9da   :  { %v3438_v54 = vsel %vm676_vm3, %v3433_v38, 0 }
 0x9dd   :  { %16332 = vrot.lane.b32.xlu1 %v16331_v11, %s21522_s21  ;;  %v3481_v42 = vpop.permute.xlu1 %3480 }
 0x9de   :  { %v3486_v19 = vsel %vm676_vm3, %v3481_v42, 0 }
 0x9e1   :  { %16342 = vrot.lane.b32.xlu1 %v16341_v52, %s21520_s22 }
 0x9ea   :  { %3624 = vrot.lane.b32.xlu0 %v17204_v39, %s21512_s20 }
 0x9ee   :  { %16327 = vrot.lane.b32.xlu0 %v16326_v58, %s21522_s21 }
 0x9f2   :  { %16337 = vrot.lane.b32.xlu0 %v16336_v41, %s21520_s22 }
 0xa10   :  { %v3290_v9 = vpop.xlane.xlu1 %3289 }
 0xa11   :  { %16822 = vrcp.f32 %v3290_v9 }
 0xa18   :  { %v3296_v11 = vpop.xlane.xlu1 %3295 }
 0xa19   :  { %16824 = vrcp.f32 %v3296_v11 }
 0xa1c   :  { %v3293_v26 = vpop.xlane.xlu0 %3292  ;;  %v3577_v28 = vpop.permute.xlu1 %3576 }
 0xa1d   :  { %16826 = vrcp.f32 %v3293_v26  ;;  %v3582_v37 = vsel %vm676_vm3, %v3577_v28, 0 }
 0xa1e   :  { %v16823_v40 = vpop.eup %16822 }
 0xa1f   :  { %v3320_v39 = vmul.f32 %v16823_v40, %v17917_v21 }
 0xa21   :  { %v3328_v52 = vpack.c.bf16 %v3320_v39, %v3320_v39  ;;  %v16448_v39 = vld [vmem:[%s21499_s3 + $0x8] sm:$0xff]  }
 0xa23   :  { %15840 = vmatmul.mubr.msk.bf16.vlgmr.msra.gmra.mxu0 %vm177_vm2, %v3328_v52 }
 0xa24   :  { %15850 = vmatpush3.bf16.msra.mxu0 %v3438_v54  ;;  %v3299_v63 = vpop.xlane.xlu0 %3298  ;;  %15851 = vmatprep.mubr.msk.bf16.mxu0 %vm17039_vm1, %v21534_v14 }
 0xa25   :  { %16828 = vrcp.f32 %v3299_v63  ;;  %15861 = vmatprep.subr.bf16.mxu0 %v21534_v14  ;;  %v16449_v63 = vld [vmem:[%s21499_s3] sm:$0xff]  }
 0xa26   :  { %v16825_v58 = vpop.eup %16824 }
 0xa27   :  { %v3322_v10 = vmul.f32 %v16825_v58, %v17921_v34 }
 0xa28   :  { %v3529_v25 = vpop.permute.xlu0 %3528 }
 0xa29   :  { %v3330_v41 = vpack.c.bf16 %v3322_v10, %v3322_v10  ;;  %v3534_v21 = vsel %vm676_vm3, %v3529_v25, 0 }
 0xa2a   :  { %v16827_v44 = vpop.eup %16826 }
 0xa2b   :  { %v3321_v0 = vmul.f32 %v16827_v44, %v17925_v15  ;;  %15852 = vmatmul.mubr.msk.bf16.vlgmr.msra.gmra.mxu0 %vm177_vm2, %v3330_v41 }
 0xa2c   :  { %15862 = vmatpush3.bf16.msra.mxu0 %v3534_v21  ;;  %15863 = vmatprep.mubr.msk.bf16.mxu0 %vm17039_vm1, %v21534_v14 }
 0xa2d   :  { %v3329_v31 = vpack.c.bf16 %v3321_v0, %v3321_v0  ;;  %15873 = vmatprep.subr.bf16.mxu0 %v21534_v14 }
 0xa2f   :  { %15846 = vmatmul.mubr.msk.bf16.vlgmr.msra.gmra.mxu1 %vm177_vm2, %v3329_v31 }
 0xa30   :  { %15856 = vmatpush3.bf16.msra.mxu1 %v3486_v19  ;;  %15857 = vmatprep.mubr.msk.bf16.mxu1 %vm17039_vm1, %v21534_v14 }
 0xa31   :  { %15867 = vmatprep.subr.bf16.mxu1 %v21534_v14 }
 0xa32   :  { %v16829_v34 = vpop.eup %16828 }
 0xa33   :  { %v3323_v15 = vmul.f32 %v16829_v34, %v17929_v47 }
 0xa35   :  { %v3331_v32 = vpack.c.bf16 %v3323_v15, %v3323_v15 }
 0xa37   :  { %15858 = vmatmul.mubr.msk.bf16.vlgmr.msra.gmra.mxu1 %vm177_vm2, %v3331_v32 }
 0xa38   :  { %15868 = vmatpush3.bf16.msra.mxu1 %v3582_v37  ;;  %15869 = vmatprep.mubr.msk.bf16.mxu1 %vm17039_vm1, %v21534_v14 }
 0xa39   :  { %15879 = vmatprep.subr.bf16.mxu1 %v21534_v14 }
 0xa4d   :  { %v3302_v4 = vpop.xlane.xlu1 %3301 }
 0xa4e   :  { %16830 = vrcp.f32 %v3302_v4 }
 0xa51   :  { %v3308_v51 = vpop.xlane.xlu1 %3307 }
 0xa52   :  { %16832 = vrcp.f32 %v3308_v51 }
 0xa59   :  { %v3305_v1 = vpop.xlane.xlu0 %3304 }
 0xa5a   :  { %16834 = vrcp.f32 %v3305_v1 }
 0xa5b   :  { %v16831_v18 = vpop.eup %16830 }
 0xa5c   :  { %v3324_v47 = vmul.f32 %v16831_v18, %v17941_v13  ;;  %v3673_v13 = vpop.permute.xlu1 %3672 }
 0xa5d   :  { %v3311_v57 = vpop.xlane.xlu0 %3310  ;;  %v3678_v42 = vsel %vm676_vm3, %v3673_v13, 0 }
 0xa5e   :  { %v3332_v48 = vpack.c.bf16 %v3324_v47, %v3324_v47  ;;  %16836 = vrcp.f32 %v3311_v57 }
 0xa5f   :  { %v16833_v2 = vpop.eup %16832 }
 0xa60   :  { %15864 = vmatmul.mubr.msk.bf16.vlgmr.msra.gmra.mxu0 %vm177_vm2, %v3332_v48  ;;  %v3326_v29 = vmul.f32 %v16833_v2, %v17945_v3  ;;  %v16333_v57 = vpop.permute.xlu1 %16332 }
 0xa61   :  { %v3625_v8 = vpop.permute.xlu0 %3624  ;;  %15875 = vmatprep.mubr.msk.bf16.mxu0 %vm17039_vm1, %v21534_v14 }
 0xa62   :  { %v3630_v33 = vsel %vm676_vm3, %v3625_v8, 0  ;;  %v3334_v35 = vpack.c.bf16 %v3326_v29, %v3326_v29 }
 0xa63   :  { %15874 = vmatpush3.bf16.msra.mxu0 %v3630_v33 }
 0xa64   :  { %15885 = vmatprep.subr.bf16.mxu0 %v16448_v39 }
 0xa67   :  { %v16835_v36 = vpop.eup %16834 }
 0xa68   :  { %v3325_v27 = vmul.f32 %v16835_v36, %v17949_v49  ;;  %15876 = vmatmul.mubr.msk.bf16.vlgmr.msra.gmra.mxu0 %vm177_vm2, %v3334_v35 }
 0xa69   :  { %15886 = vmatpush3.bf16.msra.mxu0 %v16448_v39 }
 0xa6a   :  { %v3333_v5 = vpack.c.bf16 %v3325_v27, %v3325_v27  ;;  %15887 = vmatprep.subr.bf16.mxu0 %v16449_v63 }
 0xa6b   :  { %v16837_v38 = vpop.eup %16836 }
 0xa6c   :  { %15870 = vmatmul.mubr.msk.bf16.vlgmr.msra.gmra.mxu1 %vm177_vm2, %v3333_v5  ;;  %v3327_v3 = vmul.f32 %v16837_v38, %v17953_v45 }
 0xa6d   :  { %15880 = vmatpush3.bf16.msra.mxu1 %v3678_v42  ;;  %15881 = vmatprep.mubr.msk.bf16.mxu1 %vm17039_vm1, %v21534_v14  ;;  %v16343_v42 = vpop.permute.xlu1 %16342 }
 0xa6e   :  { %v3335_v9 = vpack.c.bf16 %v3327_v3, %v3327_v3  ;;  %15888 = vmatpush3.bf16.msra.mxu0 %v16449_v63  ;;  %v16344_v39 = vunpack.i.l.bf16 %v16343_v42 }
 0xa74   :  { %15882 = vmatmul.mubr.msk.bf16.vlgmr.msra.gmra.mxu1 %vm177_vm2, %v3335_v9 }
 0xae3   :  { %v3378_v11 = vpop.f32.mrf.mxu0 }
 0xae5   :  { %v15841_v49 = vpop.f32.mrf.mxu0 }
 0xae6   :  { %v16335_v49 = vunpack.i.h.bf16 %v16333_v57 }
 0xae7   :  { %v3381_v26 = vpop.f32.mrf.mxu0 }
 0xae8   :  { %v16334_v26 = vunpack.i.l.bf16 %v16333_v57 }
 0xae9   :  { %v15842_v40 = vpop.f32.mrf.mxu0 }
 0xaea   :  { %v16345_v40 = vunpack.i.h.bf16 %v16343_v42 }
 0xaeb   :  { %v3474_v52 = vpop.f32.mrf.mxu0 }
 0xaed   :  { %v15853_v54 = vpop.f32.mrf.mxu0 }
 0xaef   :  { %v3426_v45 = vpop.f32.mrf.mxu1  ;;  %v3477_v58 = vpop.f32.mrf.mxu0 }
 0xaf0   :  { %v16346_v10 = vpack.i.bf16 %v3426_v45, %v3378_v11 }
 0xaf1   :  { %v15847_v25 = vpop.f32.mrf.mxu1  ;;  %v15854_v41 = vpop.f32.mrf.mxu0 }
 0xaf2   :  { %16347 = vrot.lane.b32.xlu0 %v16346_v10, %s21518_s18 }
 0xaf3   :  { %v3429_v21 = vpop.f32.mrf.mxu1 }
 0xaf5   :  { %v15848_v44 = vpop.f32.mrf.mxu1 }
 0xaf6   :  { %16357 = vrot.lane.b32.xlu0 %v16356_v22, %s21522_s21 }
 0xaf7   :  { %v3522_v0 = vpop.f32.mrf.mxu1 }
 0xaf8   :  { %v16351_v31 = vpack.i.bf16 %v3522_v0, %v3474_v52  ;;  %v3818_v52 = vsel %vm177_vm2, %v17459_v59, %v16334_v26 }
 0xaf9   :  { %v15859_v19 = vpop.f32.mrf.mxu1  ;;  %v3827_v45 = vsel %vm3824_vm4, %v3818_v52, %v16344_v39 }
 0xafa   :  { %16367 = vrot.lane.b32.xlu0 %v16366_v23, %s21520_s22  ;;  %16352 = vrot.lane.b32.xlu1 %v16351_v31, %s21518_s18 }
 0xafb   :  { %v3525_v34 = vpop.f32.mrf.mxu1 }
 0xafd   :  { %v15860_v15 = vpop.f32.mrf.mxu1 }
 0xafe   :  { %16362 = vrot.lane.b32.xlu1 %v16361_v46, %s21522_s21  ;;  %s21625_s21 = smov 16  }
 0xb02   :  { %16372 = vrot.lane.b32.xlu1 %v16371_v53, %s21520_s22  ;;  %v16328_v53 = vpop.permute.xlu0 %16327  ;;  %s21624_s22 = smov 8  }
 0xb03   :  { %v16330_v48 = vunpack.i.h.bf16 %v16328_v53  ;;  %v16329_v2 = vunpack.i.l.bf16 %v16328_v53 }
 0xb05   :  { %v3817_v35 = vsel %vm177_vm2, %v17461_v60, %v16330_v48  ;;  %v3816_v36 = vsel %vm177_vm2, %v17457_v55, %v16329_v2  ;;  %v3819_v55 = vsel %vm177_vm2, %v17463_v61, %v16335_v49 }
 0xb06   :  { %v16338_v47 = vpop.permute.xlu0 %16337  ;;  %v3828_v58 = vsel %vm3824_vm4, %v3819_v55, %v16345_v40 }
 0xb07   :  { %v16340_v8 = vunpack.i.h.bf16 %v16338_v47  ;;  %v16339_v29 = vunpack.i.l.bf16 %v16338_v47 }
 0xb09   :  { %v3825_v5 = vsel %vm3824_vm4, %v3816_v36, %v16339_v29  ;;  %v3826_v38 = vsel %vm3824_vm4, %v3817_v35, %v16340_v8 }
 0xb20   :  { %v3570_v6 = vpop.f32.mrf.mxu0 }
 0xb22   :  { %v15865_v20 = vpop.f32.mrf.mxu0 }
 0xb24   :  { %v3573_v22 = vpop.f32.mrf.mxu0 }
 0xb26   :  { %v15866_v28 = vpop.f32.mrf.mxu0 }
 0xb28   :  { %v3666_v56 = vpop.f32.mrf.mxu0 }
 0xb2a   :  { %v15877_v62 = vpop.f32.mrf.mxu0 }
 0xb2c   :  { %v3618_v23 = vpop.f32.mrf.mxu1  ;;  %v3669_v32 = vpop.f32.mrf.mxu0 }
 0xb2d   :  { %v16376_v37 = vpack.i.bf16 %v3618_v23, %v3570_v6 }
 0xb2e   :  { %v15871_v4 = vpop.f32.mrf.mxu1  ;;  %v15878_v51 = vpop.f32.mrf.mxu0 }
 0xb2f   :  { %16377 = vrot.lane.b32.xlu0 %v16376_v37, %s21518_s18 }
 0xb30   :  { %v3621_v16 = vpop.f32.mrf.mxu1 }
 0xb32   :  { %v15872_v43 = vpop.f32.mrf.mxu1 }
 0xb34   :  { %v3714_v46 = vpop.f32.mrf.mxu1 }
 0xb35   :  { %v16381_v1 = vpack.i.bf16 %v3714_v46, %v3666_v56 }
 0xb36   :  { %v15883_v18 = vpop.f32.mrf.mxu1 }
 0xb37   :  { %16382 = vrot.lane.b32.xlu1 %v16381_v1, %s21518_s18 }
 0xb38   :  { %v3717_v50 = vpop.f32.mrf.mxu1 }
 0xb3a   :  { %v15884_v24 = vpop.f32.mrf.mxu1 }
 0xb64   :  { %v16348_v33 = vpop.permute.xlu0 %16347 }
 0xb65   :  { %v16350_v27 = vunpack.i.h.bf16 %v16348_v33  ;;  %v16349_v13 = vunpack.i.l.bf16 %v16348_v33  ;;  %v17030_v33 = vld [vmem:[%s21497_s0] sm:$0xff] }
 0xb67   :  { %v3834_v3 = vsel %vm3833_vm5, %v3825_v5, %v16349_v13  ;;  %v3835_v9 = vsel %vm3833_vm5, %v3826_v38, %v16350_v27  ;;  %v17031_v27 = vld [vmem:[%s21497_s0 + $0x10] sm:$0xff] }
 0xb68   :  { %v3846_v11 = vpack.c.bf16 %v3835_v9, %v3834_v3  ;;  %v16358_v21 = vpop.permute.xlu0 %16357  ;;  %v17032_v3 = vld [vmem:[%s21497_s0 + $0x8] sm:$0xff] }
 0xb69   :  { %v16360_v0 = vunpack.i.h.bf16 %v16358_v21  ;;  %v16359_v61 = vunpack.i.l.bf16 %v16358_v21 }
 0xb6a   :  { %15889 = vmatprep.mubr.msk.bf16.mxu0 %vm88_vm0, %v3846_v11  ;;  %v17033_v11 = vld [vmem:[%s21497_s0 + $0x18] sm:$0xff] }
 0xb6b   :  { %v3821_v15 = vsel %vm177_vm2, %v17465_v7, %v16360_v0  ;;  %v3820_v6 = vsel %vm177_vm2, %v17467_v12, %v16359_v61  ;;  %v17036_v61 = vld [vmem:[%s21497_s0 + $0x28] sm:$0xff] }
 0xb6c   :  { %v16353_v60 = vpop.permute.xlu1 %16352  ;;  %v16368_v44 = vpop.permute.xlu0 %16367 }
 0xb6d   :  { %v16355_v54 = vunpack.i.h.bf16 %v16353_v60  ;;  %v16354_v63 = vunpack.i.l.bf16 %v16353_v60  ;;  %v16370_v19 = vunpack.i.h.bf16 %v16368_v44  ;;  %v16369_v59 = vunpack.i.l.bf16 %v16368_v44 }
 0xb6f   :  { %v3837_v10 = vsel %vm3833_vm5, %v3828_v58, %v16355_v54  ;;  %v3836_v25 = vsel %vm3833_vm5, %v3827_v45, %v16354_v63  ;;  %v3829_v28 = vsel %vm3824_vm4, %v3820_v6, %v16369_v59  ;;  %v3830_v56 = vsel %vm3824_vm4, %v3821_v15, %v16370_v19  ;;  %v17034_v45 = vld [vmem:[%s21497_s0 + $0x20] sm:$0xff]  ;;  %v17037_v19 = vld [vmem:[%s21497_s0 + $0x38] sm:$0xff] }
 0xb70   :  { %v3847_v41 = vpack.c.bf16 %v3837_v10, %v3836_v25  ;;  %v16363_v31 = vpop.permute.xlu1 %16362  ;;  %v17035_v25 = vld [vmem:[%s21497_s0 + $0x30] sm:$0xff]  ;;  %s21623_s0 = smov 40  }
 0xb71   :  { %v16365_v4 = vunpack.i.h.bf16 %v16363_v31  ;;  %v16364_v51 = vunpack.i.l.bf16 %v16363_v31 }
 0xb72   :  { %15890 = vmatmul.mubr.msk.bf16.vlgmr.msra.gmra.mxu0 %vm88_vm0, %v3847_v41 }
 0xb73   :  { %v3823_v12 = vsel %vm177_vm2, %v17475_v30, %v16365_v4  ;;  %v3822_v46 = vsel %vm177_vm2, %v17469_v17, %v16364_v51  ;;  %v13783_v30 = vld [vmem:[%s21500_s4] ss:$0 sm:$0xff] }
 0xb74   :  { %v16373_v62 = vpop.permute.xlu1 %16372 }
 0xb75   :  { %v16375_v16 = vunpack.i.h.bf16 %v16373_v62  ;;  %v16374_v43 = vunpack.i.l.bf16 %v16373_v62 }
 0xb77   :  { %v3831_v50 = vsel %vm3824_vm4, %v3822_v46, %v16374_v43  ;;  %v3832_v24 = vsel %vm3824_vm4, %v3823_v12, %v16375_v16 }
 0xba1   :  { %v16378_v34 = vpop.permute.xlu0 %16377 }
 0xba2   :  { %v16380_v20 = vunpack.i.h.bf16 %v16378_v34  ;;  %v16379_v22 = vunpack.i.l.bf16 %v16378_v34 }
 0xba4   :  { %v3838_v23 = vsel %vm3833_vm5, %v3829_v28, %v16379_v22  ;;  %v3839_v32 = vsel %vm3833_vm5, %v3830_v56, %v16380_v20 }
 0xba5   :  { %v3848_v37 = vpack.c.bf16 %v3839_v32, %v3838_v23 }
 0xba7   :  { %15893 = vmatprep.mubr.msk.bf16.mxu0 %vm88_vm0, %v3848_v37 }
 0xba9   :  { %v16383_v7 = vpop.permute.xlu1 %16382 }
 0xbaa   :  { %v16385_v1 = vunpack.i.h.bf16 %v16383_v7  ;;  %v16384_v18 = vunpack.i.l.bf16 %v16383_v7 }
 0xbac   :  { %v3841_v53 = vsel %vm3833_vm5, %v3832_v24, %v16385_v1  ;;  %v3840_v47 = vsel %vm3833_vm5, %v3831_v50, %v16384_v18 }
 0xbad   :  { %v3849_v57 = vpack.c.bf16 %v3841_v53, %v3840_v47  ;;  %v4105_v47 = vld [vmem:[%s21501_s7 + $0x80] sm:$0xff] }
 0xbaf   :  { %15894 = vmatmul.mubr.msk.bf16.gmra.mxu0 %vm88_vm0, %v3849_v57  ;;  %v4113_v57 = vld [vmem:[%s21501_s7 + $0xc0] sm:$0xff] }
 0xc32   :  { %v15891_v48 = vpop.f32.mrf.mxu0 }
 0xc33   :  { %v3924_v17 = vadd.f32 %v15891_v48, %v13783_v30  ;;  %v4106_v48 = vld [vmem:[%s21501_s7 + $0x88] sm:$0xff] }
 0xc34   :  { %v3915_v2 = vpop.f32.mrf.mxu0 }
 0xc35   :  { %v3916_v8 = vadd.f32 %v13783_v30, %v3915_v2  ;;  %v3948_v13 = vadd.f32 %v17031_v27, %v3924_v17  ;;  %v4114_v2 = vld [vmem:[%s21501_s7 + $0xc8] sm:$0xff]  ;;  %v13808_v17 = vcombine.low %v4105_v47, %v4113_v57 }
 0xc36   :  { %v15892_v29 = vpop.f32.mrf.mxu0 }
 0xc37   :  { %v3946_v35 = vadd.f32 %v17030_v33, %v3916_v8  ;;  %v3927_v5 = vadd.f32 %v15892_v29, %v13783_v30  ;;  %v3962_v40 = vsel %vm88_vm0, %v3948_v13, 0.0  ;;  %v13810_v8 = vcombine.low %v4106_v48, %v4114_v2  ;;  %v4089_v33 = vld [vmem:[%s21501_s7] sm:$0xff] }
 0xc38   :  { %v3918_v36 = vpop.f32.mrf.mxu0  ;;  %v13811_v29 = vcombine.high %v4106_v48, %v4114_v2  ;;  %v18234_v2 = vld [vmem:[%s21502_s5] ss:$0 sm:$0xff] }
 0xc39   :  { %v3919_v38 = vadd.f32 %v13783_v30, %v3918_v36  ;;  %v3956_v42 = vsel %vm88_vm0, %v3946_v35, 0.0  ;;  %v3949_v49 = vadd.f32 %v17033_v11, %v3927_v5  ;;  %v4090_v36 = vld [vmem:[%s21501_s7 + $0x8] sm:$0xff] }
 0xc3a   :  { %3957 = vadd.xlane.f32.xlu0 %v3956_v42  ;;  %4466 = vmatprep.subr.bf16.mxu0 %v13811_v29 }
 0xc3b   :  { %v3947_v9 = vadd.f32 %v17032_v3, %v3919_v38  ;;  %v3965_v39 = vsel %vm88_vm0, %v3949_v49, 0.0  ;;  %4467 = vmatpush1.bf16.msra.mxu0 %v13810_v8  ;;  %v21532_v3 = vmov 0  }
 0xc3c   :  { %4413 = vmatprep.mubr.bf16.mxu1 %v21532_v3  ;;  %4486 = vmatprep.mubr.bf16.mxu0 %v21532_v3 }
 0xc3d   :  { %v3959_v26 = vsel %vm88_vm0, %v3947_v9, 0.0 }
 0xc3e   :  { %3960 = vadd.xlane.f32.xlu1 %v3959_v26  ;;  %3963 = vadd.xlane.f32.xlu0 %v3962_v40 }
 0xc42   :  { %3966 = vadd.xlane.f32.xlu0 %v3965_v39 }
 0xc6f   :  { %v15895_v60 = vpop.f32.mrf.mxu0 }
 0xc70   :  { %v3940_v52 = vadd.f32 %v15895_v60, %v13783_v30 }
 0xc71   :  { %v3931_v55 = vpop.f32.mrf.mxu0 }
 0xc72   :  { %v3932_v54 = vadd.f32 %v13783_v30, %v3931_v55  ;;  %v18104_v41 = vadd.f32 %v17035_v25, %v3940_v52 }
 0xc73   :  { %v15896_v63 = vpop.f32.mrf.mxu0 }
 0xc74   :  { %v18099_v58 = vadd.f32 %v17034_v45, %v3932_v54  ;;  %v3943_v21 = vadd.f32 %v15896_v63, %v13783_v30  ;;  %v3974_v34 = vsel %vm88_vm0, %v18104_v41, 0.0 }
 0xc75   :  { %v3934_v10 = vpop.f32.mrf.mxu0 }
 0xc76   :  { %v3935_v44 = vadd.f32 %v13783_v30, %v3934_v10  ;;  %v3968_v0 = vsel %vm88_vm0, %v18099_v58, 0.0  ;;  %v18116_v59 = vadd.f32 %v17037_v19, %v3943_v21  ;;  %v13809_v30 = vcombine.high %v4105_v47, %v4113_v57  ;;  %v4115_v19 = vld [vmem:[%s21501_s7 + $0xd0] sm:$0xff] }
 0xc77   :  { %3969 = vadd.xlane.f32.xlu1 %v3968_v0 }
 0xc78   :  { %v18111_v31 = vadd.f32 %v17036_v61, %v3935_v44  ;;  %v3977_v6 = vsel %vm88_vm0, %v18116_v59, 0.0  ;;  %4393 = vmatprep.subr.bf16.mxu1 %v13809_v30 }
 0xc79   :  { %4394 = vmatpush1.bf16.msra.mxu1 %v13808_v17 }
 0xc7a   :  { %v3971_v15 = vsel %vm88_vm0, %v18111_v31, 0.0 }
 0xc7b   :  { %3975 = vadd.xlane.f32.xlu1 %v3974_v34  ;;  %3972 = vadd.xlane.f32.xlu0 %v3971_v15  ;;  %v4116_v15 = vld [vmem:[%s21501_s7 + $0xd8] sm:$0xff] }
 0xc7f   :  { %3978 = vadd.xlane.f32.xlu0 %v3977_v6 }
 0xcc3   :  { %v3958_v20 = vpop.xlane.xlu0 %3957 }
 0xcc4   :  { %v3981_v22 = vmul.f32 0.03125, %v3958_v20 }
 0xcc6   :  { %v18124_v28 = vsub.f32 %v3946_v35, %v3981_v22  ;;  %v4097_v35 = vld [vmem:[%s21501_s7 + $0x40] sm:$0xff] }
 0xcc7   :  { %v3961_v56 = vpop.xlane.xlu1 %3960  ;;  %v3964_v62 = vpop.xlane.xlu0 %3963  ;;  %v13793_v27 = vcombine.high %v4089_v33, %v4097_v35  ;;  %v13792_v5 = vcombine.low %v4089_v33, %v4097_v35  ;;  %v18241_v35 = vld [vmem:[%s21503_s6] ss:$0 sm:$0xff] }
 0xcc8   :  { %v3982_v23 = vmul.f32 0.03125, %v3961_v56  ;;  %v3983_v32 = vmul.f32 0.03125, %v3964_v62  ;;  %v3997_v37 = vmul.f32 %v18124_v28, %v18124_v28  ;;  %v18209_v56 = vld [vmem:[%s21501_s7 + $0xa0] sm:$0xff] }
 0xcc9   :  { %4395 = vmatprep.subr.bf16.mxu1 %v13793_v27  ;;  %v18214_v62 = vld [vmem:[%s21501_s7 + $0xe0] sm:$0xff] }
 0xcca   :  { %v18128_v4 = vsub.f32 %v3947_v9, %v3982_v23  ;;  %v18130_v51 = vsub.f32 %v3948_v13, %v3983_v32  ;;  %v4005_v16 = vsel %vm88_vm0, %v3997_v37, 0.0  ;;  %v4098_v13 = vld [vmem:[%s21501_s7 + $0x48] sm:$0xff]  ;;  %4396 = vmatpush1.bf16.msra.mxu1 %v13792_v5 }
 0xccb   :  { %4006 = vadd.xlane.f32.xlu1 %v4005_v16  ;;  %v3967_v43 = vpop.xlane.xlu0 %3966  ;;  %v13794_v38 = vcombine.low %v4090_v36, %v4098_v13  ;;  %v13795_v42 = vcombine.high %v4090_v36, %v4098_v13  ;;  %v18219_v23 = vld [vmem:[%s21501_s7 + $0xa8] sm:$0xff]  ;;  %v4091_v13 = vld [vmem:[%s21501_s7 + $0x10] sm:$0xff] }
 0xccc   :  { %v3984_v7 = vmul.f32 0.03125, %v3967_v43  ;;  %v3998_v12 = vmul.f32 %v18128_v4, %v18128_v4  ;;  %v3999_v46 = vmul.f32 %v18130_v51, %v18130_v51  ;;  %v18224_v37 = vld [vmem:[%s21501_s7 + $0xe8] sm:$0xff] }
 0xccd   :  { %4468 = vmatprep.subr.bf16.mxu0 %v13795_v42  ;;  %v4099_v42 = vld [vmem:[%s21501_s7 + $0x50] sm:$0xff] }
 0xcce   :  { %v18137_v1 = vsub.f32 %v3949_v49, %v3984_v7  ;;  %v4008_v18 = vsel %vm88_vm0, %v3998_v12, 0.0  ;;  %v4011_v50 = vsel %vm88_vm0, %v3999_v46, 0.0  ;;  %4469 = vmatpush1.bf16.msra.mxu0 %v13794_v38  ;;  %v13816_v7 = vcombine.low %v18209_v56, %v18214_v62 }
 0xccf   :  { %4009 = vadd.xlane.f32.xlu0 %v4008_v18  ;;  %4012 = vadd.xlane.f32.xlu1 %v4011_v50  ;;  %v13818_v12 = vcombine.low %v18219_v23, %v18224_v37 }
 0xcd0   :  { %v4000_v24 = vmul.f32 %v18137_v1, %v18137_v1 }
 0xcd2   :  { %v4014_v53 = vsel %vm88_vm0, %v4000_v24, 0.0 }
 0xcd3   :  { %4015 = vadd.xlane.f32.xlu0 %v4014_v53 }
 0xd00   :  { %v3970_v9 = vpop.xlane.xlu1 %3969 }
 0xd01   :  { %v3985_v11 = vmul.f32 0.03125, %v3970_v9  ;;  %v4100_v9 = vld [vmem:[%s21501_s7 + $0x58] sm:$0xff] }
 0xd03   :  { %v18171_v49 = vsub.f32 %v18099_v58, %v3985_v11 }
 0xd04   :  { %v3976_v26 = vpop.xlane.xlu1 %3975  ;;  %v3973_v40 = vpop.xlane.xlu0 %3972 }
 0xd05   :  { %v3987_v39 = vmul.f32 0.03125, %v3976_v26  ;;  %v3986_v60 = vmul.f32 0.03125, %v3973_v40  ;;  %v4001_v55 = vmul.f32 %v18171_v49, %v18171_v49 }
 0xd07   :  { %v18176_v52 = vsub.f32 %v18104_v41, %v3987_v39  ;;  %v18179_v54 = vsub.f32 %v18111_v31, %v3986_v60  ;;  %v4017_v63 = vsel %vm88_vm0, %v4001_v55, 0.0  ;;  %v4107_v31 = vld [vmem:[%s21501_s7 + $0x90] sm:$0xff]  ;;  %v13797_v39 = vcombine.high %v4091_v13, %v4099_v42 }
 0xd08   :  { %4018 = vadd.xlane.f32.xlu1 %v4017_v63  ;;  %v3979_v45 = vpop.xlane.xlu0 %3978  ;;  %v13813_v34 = vcombine.high %v4107_v31, %v4115_v19  ;;  %v13812_v26 = vcombine.low %v4107_v31, %v4115_v19 }
 0xd09   :  { %v3988_v10 = vmul.f32 0.03125, %v3979_v45  ;;  %v4003_v58 = vmul.f32 %v18176_v52, %v18176_v52  ;;  %v4002_v25 = vmul.f32 %v18179_v54, %v18179_v54  ;;  %v13796_v45 = vcombine.low %v4091_v13, %v4099_v42  ;;  %v4119_v13 = vld [vmem:[%s21501_s7 + $0xf0] sm:$0xff]  ;;  %v4120_v42 = vld [vmem:[%s21501_s7 + $0xf8] sm:$0xff] }
 0xd0a   :  { %4539 = vmatprep.subr.bf16.mxu1 %v13813_v34 }
 0xd0b   :  { %v18187_v21 = vsub.f32 %v18116_v59, %v3988_v10  ;;  %v4023_v41 = vsel %vm88_vm0, %v4003_v58, 0.0  ;;  %v4020_v44 = vsel %vm88_vm0, %v4002_v25, 0.0  ;;  %v4108_v59 = vld [vmem:[%s21501_s7 + $0x98] sm:$0xff]  ;;  %v13817_v58 = vcombine.high %v18209_v56, %v18214_v62  ;;  %v4095_v56 = vld [vmem:[%s21501_s7 + $0x30] sm:$0xff] }
 0xd0c   :  { %4024 = vadd.xlane.f32.xlu1 %v4023_v41  ;;  %4021 = vadd.xlane.f32.xlu0 %v4020_v44  ;;  %v13815_v6 = vcombine.high %v4108_v59, %v4116_v15  ;;  %v13814_v40 = vcombine.low %v4108_v59, %v4116_v15  ;;  %v13819_v25 = vcombine.high %v18219_v23, %v18224_v37  ;;  %v4103_v62 = vld [vmem:[%s21501_s7 + $0x70] sm:$0xff]  ;;  %v4096_v23 = vld [vmem:[%s21501_s7 + $0x38] sm:$0xff] }
 0xd0d   :  { %v4004_v0 = vmul.f32 %v18187_v21, %v18187_v21  ;;  %v4104_v37 = vld [vmem:[%s21501_s7 + $0x78] sm:$0xff] }
 0xd0e   :  { %4612 = vmatprep.subr.bf16.mxu0 %v13815_v6 }
 0xd0f   :  { %v4026_v61 = vsel %vm88_vm0, %v4004_v0, 0.0 }
 0xd10   :  { %4027 = vadd.xlane.f32.xlu0 %v4026_v61 }
 0xd54   :  { %v4007_v20 = vpop.xlane.xlu1 %4006 }
 0xd55   :  { %v4029_v22 = vmul.f32 0.03125, %v4007_v20 }
 0xd57   :  { %v4037_v32 = vadd.f32 1e-05, %v4029_v22 }
 0xd58   :  { %v4013_v16 = vpop.xlane.xlu1 %4012  ;;  %v4010_v43 = vpop.xlane.xlu0 %4009 }
 0xd59   :  { %16838 = vrsqrt.f32 %v4037_v32  ;;  %v4031_v46 = vmul.f32 0.03125, %v4013_v16  ;;  %v4030_v18 = vmul.f32 0.03125, %v4010_v43 }
 0xd5b   :  { %v4038_v50 = vadd.f32 1e-05, %v4030_v18  ;;  %v4039_v24 = vadd.f32 1e-05, %v4031_v46 }
 0xd5c   :  { %v4016_v53 = vpop.xlane.xlu0 %4015 }
 0xd5d   :  { %v4032_v47 = vmul.f32 0.03125, %v4016_v53  ;;  %16840 = vrsqrt.f32 %v4038_v50 }
 0xd5e   :  { %16842 = vrsqrt.f32 %v4039_v24 }
 0xd5f   :  { %v4040_v57 = vadd.f32 1e-05, %v4032_v47 }
 0xd61   :  { %16844 = vrsqrt.f32 %v4040_v57 }
 0xd66   :  { %v16839_v48 = vpop.eup %16838 }
 0xd67   :  { %v4053_v30 = vmul.f32 %v16839_v48, %v18124_v28 }
 0xd69   :  { %v4067_v8 = vmul.f32 %v18234_v2, %v4053_v30 }
 0xd6a   :  { %v16841_v17 = vpop.eup %16840 }
 0xd6b   :  { %v4054_v29 = vmul.f32 %v16841_v17, %v18128_v4  ;;  %v16843_v33 = vpop.eup %16842  ;;  %v18249_v5 = vadd.f32 %v18241_v35, %v4067_v8 }
 0xd6c   :  { %v4055_v4 = vmul.f32 %v16843_v33, %v18130_v51 }
 0xd6d   :  { %v4068_v27 = vmul.f32 %v18234_v2, %v4054_v29 }
 0xd6e   :  { %v16845_v36 = vpop.eup %16844  ;;  %v4069_v55 = vmul.f32 %v18234_v2, %v4055_v4  ;;  %v4112_v4 = vld [vmem:[%s21501_s7 + $0xb8] sm:$0xff] }
 0xd6f   :  { %v4056_v28 = vmul.f32 %v16845_v36, %v18137_v1  ;;  %v18253_v38 = vadd.f32 %v18241_v35, %v4068_v27  ;;  %v4092_v1 = vld [vmem:[%s21501_s7 + $0x18] sm:$0xff]  ;;  %v4094_v36 = vld [vmem:[%s21501_s7 + $0x28] sm:$0xff] }
 0xd70   :  { %v13799_v60 = vcombine.high %v4092_v1, %v4100_v9  ;;  %v13798_v10 = vcombine.low %v4092_v1, %v4100_v9  ;;  %v18284_v41 = vadd.f32 %v18241_v35, %v4069_v55  ;;  %v4102_v27 = vld [vmem:[%s21501_s7 + $0x68] sm:$0xff]  ;;  %v13807_v55 = vcombine.high %v4096_v23, %v4104_v37 }
 0xd71   :  { %v18266_v11 = vpack.c.bf16 %v18253_v38, %v18249_v5  ;;  %v4070_v51 = vmul.f32 %v18234_v2, %v4056_v28  ;;  %v4111_v28 = vld [vmem:[%s21501_s7 + $0xb0] sm:$0xff]  ;;  %v13803_v9 = vcombine.high %v4094_v36, %v4102_v27 }
 0xd72   :  { %21565 = vst [vmem:[#allocation4_spill] sm:$0xff] %v18284_v41 }
 0xd73   :  { %13824 = vmatmul.mubr.msk.bf16.vlgmr.msra.gmra.mxu1 %vm88_vm0, %v18266_v11  ;;  %13828 = vmatmul.mubr.msk.bf16.vlgmr.msra.gmra.mxu0 %vm88_vm0, %v18266_v11  ;;  %v18277_v63 = vadd.f32 %v18241_v35, %v4070_v51 }
 0xd74   :  { %4423 = vmatprep.mubr.bf16.mxu1 %v21532_v3  ;;  %4496 = vmatprep.mubr.bf16.mxu0 %v21532_v3 }
 0xd75   :  { %21564 = vst [vmem:[#allocation3_spill] sm:$0xff] %v18277_v63  ;;  %4540 = vmatpush1.bf16.msra.mxu1 %v13812_v26  ;;  %4613 = vmatpush1.bf16.msra.mxu0 %v13814_v40  ;;  %v18288_v44 = vpack.c.bf16 %v18277_v63, %v18284_v41  ;;  %v13802_v26 = vcombine.low %v4094_v36, %v4102_v27  ;;  %v16481_v36 = vld [vmem:[%s21504_s9 + $0x80] sm:$0xff]   ;;  %v16482_v27 = vld [vmem:[%s21504_s9 + $0x178] sm:$0xff]  }
 0xd76   :  { %4541 = vmatprep.subr.bf16.mxu1 %v13797_v39  ;;  %4614 = vmatprep.subr.bf16.mxu0 %v13799_v60  ;;  %v13821_v40 = vcombine.high %v4111_v28, %v4119_v13  ;;  %v13823_v39 = vcombine.high %v4112_v4, %v4120_v42  ;;  %v13805_v60 = vcombine.high %v4095_v56, %v4103_v62 }
 0xd79   :  { %4542 = vmatpush1.bf16.msra.mxu1 %v13796_v45  ;;  %4615 = vmatpush1.bf16.msra.mxu0 %v13798_v10  ;;  %v16450_v45 = vld [vmem:[%s21504_s9 + $0x78] sm:$0xff]  }
 0xd7a   :  { %4685 = vmatprep.subr.bf16.mxu1 %v13817_v58  ;;  %4758 = vmatprep.subr.bf16.mxu0 %v13819_v25  ;;  %v16451_v10 = vld [vmem:[%s21504_s9 + $0xf8] sm:$0xff]   ;;  %v13804_v58 = vcombine.low %v4095_v56, %v4103_v62  ;;  %v13806_v25 = vcombine.low %v4096_v23, %v4104_v37 }
 0xd7b   :  { %13825 = vmatmul.mubr.msk.bf16.gmra.mxu1 %vm88_vm0, %v18288_v44  ;;  %13829 = vmatmul.mubr.msk.bf16.gmra.mxu0 %vm88_vm0, %v18288_v44 }
 0xd7c   :  { %4433 = vmatprep.mubr.bf16.mxu1 %v21532_v3  ;;  %4506 = vmatprep.mubr.bf16.mxu0 %v21532_v3 }
 0xd91   :  { %v4019_v0 = vpop.xlane.xlu1 %4018 }
 0xd92   :  { %v4033_v61 = vmul.f32 0.03125, %v4019_v0  ;;  %v16452_v0 = vld [vmem:[%s21504_s9 + $0x38] sm:$0xff]  }
 0xd94   :  { %v4041_v31 = vadd.f32 1e-05, %v4033_v61  ;;  %v16453_v61 = vld [vmem:[%s21504_s9 + $0xb8] sm:$0xff]  }
 0xd95   :  { %v4025_v19 = vpop.xlane.xlu1 %4024  ;;  %v4022_v59 = vpop.xlane.xlu0 %4021 }
 0xd96   :  { %16846 = vrsqrt.f32 %v4041_v31  ;;  %v4035_v34 = vmul.f32 0.03125, %v4025_v19  ;;  %v4034_v15 = vmul.f32 0.03125, %v4022_v59  ;;  %v16454_v31 = vld [vmem:[%s21504_s9 + $0x70] sm:$0xff]  }
 0xd97   :  { %v16455_v19 = vld [vmem:[%s21504_s9 + $0xf0] sm:$0xff]  }
 0xd98   :  { %v4042_v6 = vadd.f32 1e-05, %v4034_v15  ;;  %v4043_v20 = vadd.f32 1e-05, %v4035_v34  ;;  %v16456_v59 = vld [vmem:[%s21504_s9 + $0x30] sm:$0xff]   ;;  %v16458_v15 = vld [vmem:[%s21504_s9 + $0x68] sm:$0xff]  }
 0xd99   :  { %v4028_v22 = vpop.xlane.xlu0 %4027  ;;  %v16457_v34 = vld [vmem:[%s21504_s9 + $0xb0] sm:$0xff]  }
 0xd9a   :  { %v4036_v32 = vmul.f32 0.03125, %v4028_v22  ;;  %16848 = vrsqrt.f32 %v4042_v6  ;;  %v16460_v6 = vld [vmem:[%s21504_s9 + $0x28] sm:$0xff]   ;;  %v16462_v22 = vld [vmem:[%s21504_s9 + $0x60] sm:$0xff]  }
 0xd9b   :  { %16850 = vrsqrt.f32 %v4043_v20  ;;  %v16461_v20 = vld [vmem:[%s21504_s9 + $0xa8] sm:$0xff]  }
 0xd9c   :  { %v4044_v16 = vadd.f32 1e-05, %v4036_v32  ;;  %v16463_v32 = vld [vmem:[%s21504_s9 + $0xe0] sm:$0xff]  }
 0xd9e   :  { %16852 = vrsqrt.f32 %v4044_v16  ;;  %v16464_v16 = vld [vmem:[%s21504_s9 + $0x20] sm:$0xff]  }
 0xda3   :  { %v16847_v43 = vpop.eup %16846 }
 0xda4   :  { %v4057_v46 = vmul.f32 %v16847_v43, %v18171_v49  ;;  %v16465_v43 = vld [vmem:[%s21504_s9 + $0xa0] sm:$0xff]  }
 0xda6   :  { %v4071_v50 = vmul.f32 %v18234_v2, %v4057_v46  ;;  %v16466_v46 = vld [vmem:[%s21504_s9 + $0x58] sm:$0xff]  }
 0xda7   :  { %v16849_v18 = vpop.eup %16848 }
 0xda8   :  { %v4058_v24 = vmul.f32 %v16849_v18, %v18179_v54  ;;  %v16851_v53 = vpop.eup %16850  ;;  %v18302_v30 = vadd.f32 %v18241_v35, %v4071_v50  ;;  %v16468_v18 = vld [vmem:[%s21504_s9 + $0x18] sm:$0xff]  }
 0xda9   :  { %v4059_v17 = vmul.f32 %v16851_v53, %v18176_v52  ;;  %v16469_v50 = vld [vmem:[%s21504_s9 + $0x98] sm:$0xff]   ;;  %v16471_v53 = vld [vmem:[%s21504_s9 + $0xd0] sm:$0xff]  }
 0xdaa   :  { %v4072_v57 = vmul.f32 %v18234_v2, %v4058_v24  ;;  %21566 = vst [vmem:[#allocation5_spill] sm:$0xff] %v18302_v30  ;;  %v16470_v24 = vld [vmem:[%s21504_s9 + $0x50] sm:$0xff]  }
 0xdab   :  { %v16853_v47 = vpop.eup %16852  ;;  %v4073_v29 = vmul.f32 %v18234_v2, %v4059_v17  ;;  %v16475_v17 = vld [vmem:[%s21504_s9 + $0xc8] sm:$0xff]  }
 0xdac   :  { %v4060_v48 = vmul.f32 %v16853_v47, %v18187_v21  ;;  %v18306_v8 = vadd.f32 %v18241_v35, %v4072_v57  ;;  %v16472_v47 = vld [vmem:[%s21504_s9 + $0x10] sm:$0xff]  }
 0xdad   :  { %v18324_v21 = vadd.f32 %v18241_v35, %v4073_v29  ;;  %v16473_v57 = vld [vmem:[%s21504_s9 + $0x90] sm:$0xff]   ;;  %v16478_v29 = vld [vmem:[%s21504_s9 + $0x40] sm:$0xff]  }
 0xdae   :  { %21567 = vst [vmem:[#allocation6_spill] sm:$0xff] %v18306_v8  ;;  %v18310_v49 = vpack.c.bf16 %v18306_v8, %v18302_v30  ;;  %v4074_v54 = vmul.f32 %v18234_v2, %v4060_v48  ;;  %v4093_v2 = vld [vmem:[%s21501_s7 + $0x20] sm:$0xff]  ;;  %v16474_v48 = vld [vmem:[%s21504_s9 + $0x48] sm:$0xff]  }
 0xdaf   :  { %21569 = vst [vmem:[#allocation8_spill] sm:$0xff] %v18324_v21 }
 0xdb0   :  { %13826 = vmatmul.mubr.msk.bf16.gmra.mxu1 %vm88_vm0, %v18310_v49  ;;  %13830 = vmatmul.mubr.msk.bf16.gmra.mxu0 %vm88_vm0, %v18310_v49  ;;  %v18321_v52 = vadd.f32 %v18241_v35, %v4074_v54  ;;  %v4101_v35 = vld [vmem:[%s21501_s7 + $0x60] sm:$0xff]  ;;  %v16477_v54 = vld [vmem:[%s21504_s9 + $0x88] sm:$0xff]  }
 0xdb1   :  { %4443 = vmatprep.mubr.bf16.mxu1 %v21532_v3  ;;  %4516 = vmatprep.mubr.bf16.mxu0 %v21532_v3  ;;  %v13801_v1 = vcombine.high %v4093_v2, %v4101_v35  ;;  %v13800_v51 = vcombine.low %v4093_v2, %v4101_v35  ;;  %v16479_v2 = vld [vmem:[%s21504_s9 + $0xc0] sm:$0xff]  }
 0xdb2   :  { %21568 = vst [vmem:[#allocation7_spill] sm:$0xff] %v18321_v52  ;;  %v18328_v33 = vpack.c.bf16 %v18321_v52, %v18324_v21  ;;  %v16480_v35 = vld [vmem:[%s21504_s9] sm:$0xff]  }
 0xdb8   :  { %13827 = vmatmul.mubr.msk.bf16.gmra.mxu1 %vm88_vm0, %v18328_v33  ;;  %13831 = vmatmul.mubr.msk.bf16.gmra.mxu0 %vm88_vm0, %v18328_v33 }
 0xdb9   :  { %4559 = vmatprep.mubr.bf16.mxu1 %v21532_v3  ;;  %4632 = vmatprep.mubr.bf16.mxu0 %v21532_v3 }
 0xdc0   :  { %13832 = vmatmul.mubr.msk.bf16.vlgmr.msra.gmra.mxu1 %vm88_vm0, %v18266_v11  ;;  %13836 = vmatmul.mubr.msk.bf16.vlgmr.msra.gmra.mxu0 %vm88_vm0, %v18266_v11 }
 0xdc1   :  { %4569 = vmatprep.mubr.bf16.mxu1 %v21532_v3  ;;  %4642 = vmatprep.mubr.bf16.mxu0 %v21532_v3 }
 0xdc2   :  { %4686 = vmatpush1.bf16.msra.mxu1 %v13816_v7  ;;  %4759 = vmatpush1.bf16.msra.mxu0 %v13818_v12  ;;  %v13820_v7 = vcombine.low %v4111_v28, %v4119_v13  ;;  %v13822_v12 = vcombine.low %v4112_v4, %v4120_v42  ;;  %v16483_v28 = vld [vmem:[%s21504_s9 + $0x1f8] sm:$0xff]  }
 0xdc3   :  { %4687 = vmatprep.subr.bf16.mxu1 %v13801_v1  ;;  %4760 = vmatprep.subr.bf16.mxu0 %v13803_v9  ;;  %v18561_v1 = vld [vmem:[%s21505_s8] sm:$0xff] }
 0xdc6   :  { %4688 = vmatpush1.bf16.msra.mxu1 %v13800_v51  ;;  %4761 = vmatpush1.bf16.msra.mxu0 %v13802_v26 }
 0xdc7   :  { %4831 = vmatprep.subr.bf16.mxu1 %v13821_v40  ;;  %4904 = vmatprep.subr.bf16.mxu0 %v13823_v39 }
 0xdc8   :  { %13833 = vmatmul.mubr.msk.bf16.gmra.mxu1 %vm88_vm0, %v18288_v44  ;;  %13837 = vmatmul.mubr.msk.bf16.gmra.mxu0 %vm88_vm0, %v18288_v44 }
 0xdc9   :  { %4579 = vmatprep.mubr.bf16.mxu1 %v21532_v3  ;;  %4652 = vmatprep.mubr.bf16.mxu0 %v21532_v3 }
 0xdd0   :  { %13834 = vmatmul.mubr.msk.bf16.gmra.mxu1 %vm88_vm0, %v18310_v49  ;;  %13838 = vmatmul.mubr.msk.bf16.gmra.mxu0 %vm88_vm0, %v18310_v49 }
 0xdd1   :  { %4589 = vmatprep.mubr.bf16.mxu1 %v21532_v3  ;;  %4662 = vmatprep.mubr.bf16.mxu0 %v21532_v3 }
 0xdd8   :  { %13835 = vmatmul.mubr.msk.bf16.gmra.mxu1 %vm88_vm0, %v18328_v33  ;;  %13839 = vmatmul.mubr.msk.bf16.gmra.mxu0 %vm88_vm0, %v18328_v33 }
 0xdd9   :  { %4705 = vmatprep.mubr.bf16.mxu1 %v21532_v3  ;;  %4778 = vmatprep.mubr.bf16.mxu0 %v21532_v3 }
 0xde0   :  { %13840 = vmatmul.mubr.msk.bf16.vlgmr.msra.gmra.mxu1 %vm88_vm0, %v18266_v11  ;;  %13844 = vmatmul.mubr.msk.bf16.vlgmr.msra.gmra.mxu0 %vm88_vm0, %v18266_v11 }
 0xde1   :  { %4715 = vmatprep.mubr.bf16.mxu1 %v21532_v3  ;;  %4788 = vmatprep.mubr.bf16.mxu0 %v21532_v3 }
 0xde2   :  { %4832 = vmatpush1.bf16.msra.mxu1 %v13820_v7  ;;  %4905 = vmatpush1.bf16.msra.mxu0 %v13822_v12 }
 0xde3   :  { %4833 = vmatprep.subr.bf16.mxu1 %v13805_v60  ;;  %4906 = vmatprep.subr.bf16.mxu0 %v13807_v55 }
 0xde6   :  { %4834 = vmatpush1.bf16.msra.mxu1 %v13804_v58  ;;  %4907 = vmatpush1.bf16.msra.mxu0 %v13806_v25 }
 0xde7   :  { %14709 = vmatprep.subr.bf16.mxu1 %v16450_v45  ;;  %14749 = vmatprep.subr.bf16.mxu0 %v16451_v10 }
 0xde8   :  { %13841 = vmatmul.mubr.msk.bf16.gmra.mxu1 %vm88_vm0, %v18288_v44  ;;  %13845 = vmatmul.mubr.msk.bf16.gmra.mxu0 %vm88_vm0, %v18288_v44 }
 0xde9   :  { %4725 = vmatprep.mubr.bf16.mxu1 %v21532_v3  ;;  %4798 = vmatprep.mubr.bf16.mxu0 %v21532_v3 }
 0xdf0   :  { %13842 = vmatmul.mubr.msk.bf16.gmra.mxu1 %vm88_vm0, %v18310_v49  ;;  %13846 = vmatmul.mubr.msk.bf16.gmra.mxu0 %vm88_vm0, %v18310_v49 }
 0xdf1   :  { %4735 = vmatprep.mubr.bf16.mxu1 %v21532_v3  ;;  %4808 = vmatprep.mubr.bf16.mxu0 %v21532_v3 }
 0xdf8   :  { %13843 = vmatmul.mubr.msk.bf16.gmra.mxu1 %vm88_vm0, %v18328_v33  ;;  %13847 = vmatmul.mubr.msk.bf16.gmra.mxu0 %vm88_vm0, %v18328_v33 }
 0xdf9   :  { %4851 = vmatprep.mubr.bf16.mxu1 %v21532_v3  ;;  %4924 = vmatprep.mubr.bf16.mxu0 %v21532_v3 }
 0xe00   :  { %13848 = vmatmul.mubr.msk.bf16.vlgmr.msra.gmra.mxu1 %vm88_vm0, %v18266_v11  ;;  %13852 = vmatmul.mubr.msk.bf16.vlgmr.msra.gmra.mxu0 %vm88_vm0, %v18266_v11  ;;  %v16459_v11 = vld [vmem:[%s21504_s9 + $0xe8] sm:$0xff]  }
 0xe01   :  { %4861 = vmatprep.mubr.bf16.mxu1 %v21532_v3  ;;  %4934 = vmatprep.mubr.bf16.mxu0 %v21532_v3 }
 0xe02   :  { %14710 = vmatpush3.bf16.msra.mxu1 %v16452_v0  ;;  %14750 = vmatpush3.bf16.msra.mxu0 %v16453_v61 }
 0xe03   :  { %14711 = vmatprep.subr.bf16.mxu1 %v16454_v31  ;;  %14751 = vmatprep.subr.bf16.mxu0 %v16455_v19 }
 0xe06   :  { %14712 = vmatpush3.bf16.msra.mxu1 %v16456_v59  ;;  %14752 = vmatpush3.bf16.msra.mxu0 %v16457_v34 }
 0xe07   :  { %14713 = vmatprep.subr.bf16.mxu1 %v16458_v15  ;;  %14753 = vmatprep.subr.bf16.mxu0 %v16459_v11 }
 0xe08   :  { %13849 = vmatmul.mubr.msk.bf16.gmra.mxu1 %vm88_vm0, %v18288_v44  ;;  %13853 = vmatmul.mubr.msk.bf16.gmra.mxu0 %vm88_vm0, %v18288_v44  ;;  %v16467_v44 = vld [vmem:[%s21504_s9 + $0xd8] sm:$0xff]  }
 0xe09   :  { %4871 = vmatprep.mubr.bf16.mxu1 %v21532_v3  ;;  %4944 = vmatprep.mubr.bf16.mxu0 %v21532_v3 }
 0xe0a   :  { %14714 = vmatpush3.bf16.msra.mxu1 %v16460_v6  ;;  %14754 = vmatpush3.bf16.msra.mxu0 %v16461_v20 }
 0xe0b   :  { %14715 = vmatprep.subr.bf16.mxu1 %v16462_v22  ;;  %14755 = vmatprep.subr.bf16.mxu0 %v16463_v32 }
 0xe0e   :  { %14716 = vmatpush3.bf16.msra.mxu1 %v16464_v16  ;;  %14756 = vmatpush3.bf16.msra.mxu0 %v16465_v43 }
 0xe0f   :  { %14717 = vmatprep.subr.bf16.mxu1 %v16466_v46  ;;  %14757 = vmatprep.subr.bf16.mxu0 %v16467_v44 }
 0xe10   :  { %13850 = vmatmul.mubr.msk.bf16.gmra.mxu1 %vm88_vm0, %v18310_v49  ;;  %13854 = vmatmul.mubr.msk.bf16.gmra.mxu0 %vm88_vm0, %v18310_v49  ;;  %v16476_v49 = vld [vmem:[%s21504_s9 + $0x8] sm:$0xff]  }
 0xe11   :  { %4881 = vmatprep.mubr.bf16.mxu1 %v21532_v3  ;;  %4954 = vmatprep.mubr.bf16.mxu0 %v21532_v3 }
 0xe12   :  { %14718 = vmatpush3.bf16.msra.mxu1 %v16468_v18  ;;  %14758 = vmatpush3.bf16.msra.mxu0 %v16469_v50  ;;  %v16484_v50 = vld [vmem:[%s21504_s9 + $0x138] sm:$0xff]  }
 0xe13   :  { %14719 = vmatprep.subr.bf16.mxu1 %v16470_v24  ;;  %14759 = vmatprep.subr.bf16.mxu0 %v16471_v53 }
 0xe16   :  { %14720 = vmatpush3.bf16.msra.mxu1 %v16472_v47  ;;  %14760 = vmatpush3.bf16.msra.mxu0 %v16473_v57 }
 0xe17   :  { %14721 = vmatprep.subr.bf16.mxu1 %v16474_v48  ;;  %14761 = vmatprep.subr.bf16.mxu0 %v16475_v17  ;;  %v16485_v48 = vld [vmem:[%s21504_s9 + $0x1b8] sm:$0xff]   ;;  %v16486_v17 = vld [vmem:[%s21504_s9 + $0x170] sm:$0xff]  }
 0xe18   :  { %13851 = vmatmul.mubr.msk.bf16.gmra.mxu1 %vm88_vm0, %v18328_v33  ;;  %13855 = vmatmul.mubr.msk.bf16.gmra.mxu0 %vm88_vm0, %v18328_v33  ;;  %v4129_v33 = vlaneseq }
 0xe1a   :  { %14722 = vmatpush3.bf16.msra.mxu1 %v16476_v49  ;;  %14762 = vmatpush3.bf16.msra.mxu0 %v16477_v54  ;;  %v18550_v13 = vshrl.u32 %v4129_v33, 7 }
 0xe1b   :  { %14723 = vmatprep.subr.bf16.mxu1 %v16478_v29  ;;  %14763 = vmatprep.subr.bf16.mxu0 %v16479_v2 }
 0xe1c   :  { %v18553_v4 = vsub.s32 1, %v18550_v13  ;;  %v18556_v42 = vsub.s32 3, %v18550_v13  ;;  %v18564_v9 = vsub.s32 0, %v18550_v13  ;;  %v18567_v51 = vsub.s32 2, %v18550_v13 }
 0xe1e   :  { %14724 = vmatpush3.bf16.msra.mxu1 %v16480_v35  ;;  %14764 = vmatpush3.bf16.msra.mxu0 %v16481_v36  ;;  %21570 = vst [vmem:[#allocation9_spill] sm:$0xff] %v18553_v4  ;;  %21571 = vst [vmem:[#allocation10_spill] sm:$0xff] %v18556_v42  ;;  %v18571_v26 = vrot.slane %v18561_v1, %v18553_v4  ;;  %v18575_v40 = vrot.slane %v18561_v1, %v18556_v42  ;;  %v16487_v35 = vld [vmem:[%s21504_s9 + $0x1f0] sm:$0xff]  }
 0xe1f   :  { %14789 = vmatprep.subr.bf16.mxu1 %v16482_v27  ;;  %14829 = vmatprep.subr.bf16.mxu0 %v16483_v28  ;;  %21572 = vst [vmem:[#allocation11_spill] sm:$0xff] %v18564_v9  ;;  %21573 = vst [vmem:[#allocation12_spill] sm:$0xff] %v18567_v51  ;;  %v18579_v62 = vrot.slane %v18561_v1, %v18564_v9  ;;  %v18583_v23 = vrot.slane %v18561_v1, %v18567_v51 }
 0xe33   :  { %v4415_v39 = vpop.f32.mrf.mxu1  ;;  %v4488_v56 = vpop.f32.mrf.mxu0 }
 0xe34   :  { %v4416_v25 = vadd.f32 %v4415_v39, %v18579_v62  ;;  %v4489_v0 = vadd.f32 %v4488_v56, %v18583_v23 }
 0xe35   :  { %v4417_v37 = vpop.f32.mrf.mxu1  ;;  %v4490_v7 = vpop.f32.mrf.mxu0 }
 0xe36   :  { %v4418_v12 = vadd.f32 %v4417_v37, %v18571_v26  ;;  %v4491_v60 = vadd.f32 %v4490_v7, %v18575_v40  ;;  %v4965_v43 = vmax.f32 %v4416_v25, 0.0  ;;  %v4967_v46 = vmax.f32 %v4489_v0, 0.0  ;;  %v16490_v25 = vld [vmem:[%s21504_s9 + $0x168] sm:$0xff]  }
 0xe37   :  { %v4419_v55 = vpop.f32.mrf.mxu1  ;;  %v4492_v45 = vpop.f32.mrf.mxu0  ;;  %v16491_v0 = vld [vmem:[%s21504_s9 + $0x1e8] sm:$0xff]  }
 0xe38   :  { %v4420_v10 = vadd.f32 %v4419_v55, %v18579_v62  ;;  %v4493_v58 = vadd.f32 %v4492_v45, %v18583_v23  ;;  %v4966_v61 = vmax.f32 %v4418_v12, 0.0  ;;  %v4968_v31 = vmax.f32 %v4491_v60, 0.0  ;;  %v16488_v12 = vld [vmem:[%s21504_s9 + $0x130] sm:$0xff]  }
 0xe39   :  { %v4421_v19 = vpop.f32.mrf.mxu1  ;;  %v4494_v59 = vpop.f32.mrf.mxu0  ;;  %v16489_v60 = vld [vmem:[%s21504_s9 + $0x1b0] sm:$0xff]  }
 0xe3a   :  { %v4981_v34 = vmax.f32 %v4420_v10, 0.0  ;;  %v4983_v15 = vmax.f32 %v4493_v58, 0.0  ;;  %v4422_v11 = vadd.f32 %v4421_v19, %v18571_v26  ;;  %v4495_v6 = vadd.f32 %v4494_v59, %v18575_v40 }
 0xe3b   :  { %v4425_v20 = vpop.f32.mrf.mxu1  ;;  %v4498_v22 = vpop.f32.mrf.mxu0 }
 0xe3c   :  { %v4982_v32 = vmax.f32 %v4422_v11, 0.0  ;;  %v4984_v16 = vmax.f32 %v4495_v6, 0.0  ;;  %v5349_v49 = vpack.c.bf16 %v4981_v34, %v4965_v43  ;;  %v5351_v54 = vpack.c.bf16 %v4983_v15, %v4967_v46  ;;  %v16492_v34 = vld [vmem:[%s21504_s9 + $0x128] sm:$0xff]   ;;  %v16496_v43 = vld [vmem:[%s21504_s9 + $0x120] sm:$0xff]  }
 0xe3d   :  { %v4427_v44 = vpop.f32.mrf.mxu1  ;;  %v4500_v18 = vpop.f32.mrf.mxu0  ;;  %v4426_v28 = vadd.f32 %v4425_v20, %v18579_v62  ;;  %v4499_v33 = vadd.f32 %v4498_v22, %v18583_v23  ;;  %v16493_v15 = vld [vmem:[%s21504_s9 + $0x1a8] sm:$0xff]   ;;  %v16494_v20 = vld [vmem:[%s21504_s9 + $0x160] sm:$0xff]  }
 0xe3e   :  { %v4428_v24 = vadd.f32 %v4427_v44, %v18571_v26  ;;  %v4501_v53 = vadd.f32 %v4500_v18, %v18575_v40  ;;  %v5350_v47 = vpack.c.bf16 %v4982_v32, %v4966_v61  ;;  %v5352_v57 = vpack.c.bf16 %v4984_v16, %v4968_v31  ;;  %v16495_v22 = vld [vmem:[%s21504_s9 + $0x1e0] sm:$0xff]   ;;  %v16498_v44 = vld [vmem:[%s21504_s9 + $0x158] sm:$0xff]  }
 0xe3f   :  { %v4429_v29 = vpop.f32.mrf.mxu1  ;;  %v4502_v2 = vpop.f32.mrf.mxu0  ;;  %v4997_v19 = vmax.f32 %v4426_v28, 0.0  ;;  %v4999_v59 = vmax.f32 %v4499_v33, 0.0  ;;  %v16497_v46 = vld [vmem:[%s21504_s9 + $0x1a0] sm:$0xff]   ;;  %v16499_v18 = vld [vmem:[%s21504_s9 + $0x1d8] sm:$0xff]  }
 0xe40   :  { %v4430_v36 = vadd.f32 %v4429_v29, %v18579_v62  ;;  %v4503_v27 = vadd.f32 %v4502_v2, %v18583_v23  ;;  %6220 = vmatprep.mubr.bf16.mxu1 %v5350_v47  ;;  %6285 = vmatprep.mubr.bf16.mxu0 %v5352_v57  ;;  %v4998_v39 = vmax.f32 %v4428_v24, 0.0  ;;  %v5000_v56 = vmax.f32 %v4501_v53, 0.0  ;;  %v16501_v24 = vld [vmem:[%s21504_s9 + $0x198] sm:$0xff]   ;;  %v16502_v53 = vld [vmem:[%s21504_s9 + $0x150] sm:$0xff]   ;;  %v16509_v29 = vld [vmem:[%s21504_s9 + $0x188] sm:$0xff]  }
 0xe41   :  { %v4431_v37 = vpop.f32.mrf.mxu1  ;;  %v4504_v7 = vpop.f32.mrf.mxu0  ;;  %6221 = vmatmul.mubr.bf16.vlgmr.msra.gmra.mxu1 %v5349_v49  ;;  %6286 = vmatmul.mubr.bf16.vlgmr.msra.gmra.mxu0 %v5351_v54  ;;  %v16503_v47 = vld [vmem:[%s21504_s9 + $0x1d0] sm:$0xff]   ;;  %v16507_v49 = vld [vmem:[%s21504_s9 + $0x1c8] sm:$0xff]   ;;  %v16510_v2 = vld [vmem:[%s21504_s9 + $0x140] sm:$0xff]  }
 0xe42   :  { %v5013_v55 = vmax.f32 %v4430_v36, 0.0  ;;  %v5015_v45 = vmax.f32 %v4503_v27, 0.0  ;;  %v4432_v10 = vadd.f32 %v4431_v37, %v18571_v26  ;;  %v4505_v58 = vadd.f32 %v4504_v7, %v18575_v40  ;;  %14790 = vmatpush3.bf16.msra.mxu1 %v16484_v50  ;;  %14830 = vmatpush3.bf16.msra.mxu0 %v16485_v48  ;;  %v16500_v50 = vld [vmem:[%s21504_s9 + $0x118] sm:$0xff]   ;;  %v16504_v57 = vld [vmem:[%s21504_s9 + $0x110] sm:$0xff]   ;;  %v16508_v54 = vld [vmem:[%s21504_s9 + $0x108] sm:$0xff]  }
 0xe43   :  { %14791 = vmatprep.subr.bf16.mxu1 %v16486_v17  ;;  %14831 = vmatprep.subr.bf16.mxu0 %v16487_v35  ;;  %v16505_v48 = vld [vmem:[%s21504_s9 + $0x190] sm:$0xff]   ;;  %v16506_v17 = vld [vmem:[%s21504_s9 + $0x148] sm:$0xff]   ;;  %v16511_v35 = vld [vmem:[%s21504_s9 + $0x1c0] sm:$0xff]  }
 0xe44   :  { %v5014_v61 = vmax.f32 %v4432_v10, 0.0  ;;  %v5016_v31 = vmax.f32 %v4505_v58, 0.0  ;;  %v5365_v32 = vpack.c.bf16 %v5013_v55, %v4997_v19  ;;  %v5367_v16 = vpack.c.bf16 %v5015_v45, %v4999_v59  ;;  %v16512_v36 = vld [vmem:[%s21504_s9 + $0x100] sm:$0xff]   ;;  %v16514_v28 = vld [vmem:[%s21504_s9 + $0x278] sm:$0xff]  }
 0xe45   :  { %v16513_v27 = vld [vmem:[%s21504_s9 + $0x180] sm:$0xff]   ;;  %v16515_v33 = vld [vmem:[%s21504_s9 + $0x2f8] sm:$0xff]  }
 0xe46   :  { %v5366_v11 = vpack.c.bf16 %v5014_v61, %v4998_v39  ;;  %v5368_v6 = vpack.c.bf16 %v5016_v31, %v5000_v56  ;;  %14792 = vmatpush3.bf16.msra.mxu1 %v16488_v12  ;;  %14832 = vmatpush3.bf16.msra.mxu0 %v16489_v60 }
 0xe47   :  { %14793 = vmatprep.subr.bf16.mxu1 %v16490_v25  ;;  %14833 = vmatprep.subr.bf16.mxu0 %v16491_v0 }
 0xe48   :  { %6228 = vmatprep.mubr.bf16.mxu1 %v5366_v11  ;;  %6293 = vmatprep.mubr.bf16.mxu0 %v5368_v6 }
 0xe49   :  { %6229 = vmatmul.mubr.bf16.gmra.mxu1 %v5365_v32  ;;  %6294 = vmatmul.mubr.bf16.gmra.mxu0 %v5367_v16 }
 0xe4a   :  { %14794 = vmatpush3.bf16.msra.mxu1 %v16492_v34  ;;  %14834 = vmatpush3.bf16.msra.mxu0 %v16493_v15 }
 0xe4b   :  { %14795 = vmatprep.subr.bf16.mxu1 %v16494_v20  ;;  %14835 = vmatprep.subr.bf16.mxu0 %v16495_v22 }
 0xe4e   :  { %14796 = vmatpush3.bf16.msra.mxu1 %v16496_v43  ;;  %14836 = vmatpush3.bf16.msra.mxu0 %v16497_v46 }
 0xe4f   :  { %14797 = vmatprep.subr.bf16.mxu1 %v16498_v44  ;;  %14837 = vmatprep.subr.bf16.mxu0 %v16499_v18 }
 0xe52   :  { %14798 = vmatpush3.bf16.msra.mxu1 %v16500_v50  ;;  %14838 = vmatpush3.bf16.msra.mxu0 %v16501_v24 }
 0xe53   :  { %14799 = vmatprep.subr.bf16.mxu1 %v16502_v53  ;;  %14839 = vmatprep.subr.bf16.mxu0 %v16503_v47  ;;  %v18706_v53 = vsub.s32 5, %v18550_v13 }
 0xe55   :  { %21574 = vst [vmem:[#allocation13_spill] sm:$0xff] %v18706_v53 }
 0xe56   :  { %14800 = vmatpush3.bf16.msra.mxu1 %v16504_v57  ;;  %14840 = vmatpush3.bf16.msra.mxu0 %v16505_v48 }
 0xe57   :  { %14801 = vmatprep.subr.bf16.mxu1 %v16506_v17  ;;  %14841 = vmatprep.subr.bf16.mxu0 %v16507_v49 }
 0xe5a   :  { %14802 = vmatpush3.bf16.msra.mxu1 %v16508_v54  ;;  %14842 = vmatpush3.bf16.msra.mxu0 %v16509_v29  ;;  %v18710_v54 = vsub.s32 7, %v18550_v13 }
 0xe5b   :  { %14803 = vmatprep.subr.bf16.mxu1 %v16510_v2  ;;  %14843 = vmatprep.subr.bf16.mxu0 %v16511_v35 }
 0xe5c   :  { %21575 = vst [vmem:[#allocation14_spill] sm:$0xff] %v18710_v54 }
 0xe5e   :  { %14804 = vmatpush3.bf16.msra.mxu1 %v16512_v36  ;;  %14844 = vmatpush3.bf16.msra.mxu0 %v16513_v27 }
 0xe5f   :  { %14869 = vmatprep.subr.bf16.mxu1 %v16514_v28  ;;  %14909 = vmatprep.subr.bf16.mxu0 %v16515_v33 }
 0xe70   :  { %v4435_v39 = vpop.f32.mrf.mxu1  ;;  %v4508_v56 = vpop.f32.mrf.mxu0 }
 0xe71   :  { %v4436_v25 = vadd.f32 %v4435_v39, %v18579_v62  ;;  %v4509_v0 = vadd.f32 %v4508_v56, %v18583_v23  ;;  %v18718_v39 = vsub.s32 4, %v18550_v13  ;;  %v18721_v56 = vsub.s32 6, %v18550_v13 }
 0xe72   :  { %v4437_v37 = vpop.f32.mrf.mxu1  ;;  %v4510_v7 = vpop.f32.mrf.mxu0 }
 0xe73   :  { %v4438_v55 = vadd.f32 %v4437_v37, %v18571_v26  ;;  %v4511_v45 = vadd.f32 %v4510_v7, %v18575_v40  ;;  %v5029_v43 = vmax.f32 %v4436_v25, 0.0  ;;  %v5031_v46 = vmax.f32 %v4509_v0, 0.0  ;;  %21576 = vst [vmem:[#allocation15_spill] sm:$0xff] %v18718_v39  ;;  %21577 = vst [vmem:[#allocation16_spill] sm:$0xff] %v18721_v56 }
 0xe74   :  { %v4439_v12 = vpop.f32.mrf.mxu1  ;;  %v4512_v60 = vpop.f32.mrf.mxu0 }
 0xe75   :  { %v4440_v10 = vadd.f32 %v4439_v12, %v18579_v62  ;;  %v4513_v58 = vadd.f32 %v4512_v60, %v18583_v23  ;;  %v5030_v20 = vmax.f32 %v4438_v55, 0.0  ;;  %v5032_v22 = vmax.f32 %v4511_v45, 0.0 }
 0xe76   :  { %v4441_v61 = vpop.f32.mrf.mxu1  ;;  %v4514_v31 = vpop.f32.mrf.mxu0  ;;  %v18731_v45 = vrot.slane %v18561_v1, %v18710_v54 }
 0xe77   :  { %v4442_v19 = vadd.f32 %v4441_v61, %v18571_v26  ;;  %v4515_v59 = vadd.f32 %v4514_v31, %v18575_v40  ;;  %v5045_v34 = vmax.f32 %v4440_v10, 0.0  ;;  %v5047_v15 = vmax.f32 %v4513_v58, 0.0 }
 0xe78   :  { %v4445_v11 = vpop.f32.mrf.mxu1  ;;  %v4518_v6 = vpop.f32.mrf.mxu0  ;;  %v18739_v61 = vrot.slane %v18561_v1, %v18721_v56 }
 0xe79   :  { %v5046_v32 = vmax.f32 %v4442_v19, 0.0  ;;  %v5048_v16 = vmax.f32 %v4515_v59, 0.0  ;;  %v5381_v47 = vpack.c.bf16 %v5045_v34, %v5029_v43  ;;  %v5383_v57 = vpack.c.bf16 %v5047_v15, %v5031_v46 }
 0xe7a   :  { %v4447_v44 = vpop.f32.mrf.mxu1  ;;  %v4520_v18 = vpop.f32.mrf.mxu0  ;;  %v4446_v36 = vadd.f32 %v4445_v11, %v18579_v62  ;;  %v4519_v27 = vadd.f32 %v4518_v6, %v18583_v23 }
 0xe7b   :  { %v5382_v50 = vpack.c.bf16 %v5046_v32, %v5030_v20  ;;  %v5384_v24 = vpack.c.bf16 %v5048_v16, %v5032_v22  ;;  %v4448_v48 = vadd.f32 %v4447_v44, %v18571_v26  ;;  %v4521_v29 = vadd.f32 %v4520_v18, %v18575_v40 }
 0xe7c   :  { %v4449_v17 = vpop.f32.mrf.mxu1  ;;  %v4522_v49 = vpop.f32.mrf.mxu0  ;;  %v5061_v0 = vmax.f32 %v4446_v36, 0.0 }
 0xe7d   :  { %v4450_v2 = vadd.f32 %v4449_v17, %v18579_v62  ;;  %v4523_v35 = vadd.f32 %v4522_v49, %v18583_v23  ;;  %6236 = vmatprep.mubr.bf16.mxu1 %v5382_v50  ;;  %6301 = vmatprep.mubr.bf16.mxu0 %v5384_v24  ;;  %v18727_v23 = vrot.slane %v18561_v1, %v18706_v53  ;;  %v5062_v10 = vmax.f32 %v4448_v48, 0.0 }
 0xe7e   :  { %v4451_v28 = vpop.f32.mrf.mxu1  ;;  %v4524_v33 = vpop.f32.mrf.mxu0  ;;  %6237 = vmatmul.mubr.bf16.gmra.mxu1 %v5381_v47  ;;  %6302 = vmatmul.mubr.bf16.gmra.mxu0 %v5383_v57  ;;  %v5064_v58 = vmax.f32 %v4521_v29, 0.0 }
 0xe7f   :  { %v4452_v37 = vadd.f32 %v4451_v28, %v18571_v26  ;;  %v4525_v7 = vadd.f32 %v4524_v33, %v18575_v40  ;;  %v5077_v12 = vmax.f32 %v4450_v2, 0.0  ;;  %v5079_v60 = vmax.f32 %v4523_v35, 0.0 }
 0xe80   :  { %v4561_v55 = vpop.f32.mrf.mxu1  ;;  %v4634_v62 = vpop.f32.mrf.mxu0  ;;  %v5063_v26 = vmax.f32 %v4519_v27, 0.0  ;;  %v18735_v40 = vrot.slane %v18561_v1, %v18718_v39 }
 0xe81   :  { %v5078_v13 = vmax.f32 %v4452_v37, 0.0  ;;  %v5080_v25 = vmax.f32 %v4525_v7, 0.0  ;;  %v5397_v15 = vpack.c.bf16 %v5077_v12, %v5061_v0  ;;  %v4635_v46 = vadd.f32 %v4634_v62, %v18739_v61  ;;  %v16516_v12 = vld [vmem:[%s21504_s9 + $0x238] sm:$0xff]  }
 0xe82   :  { %v4563_v31 = vpop.f32.mrf.mxu1  ;;  %v4636_v19 = vpop.f32.mrf.mxu0  ;;  %v5399_v11 = vpack.c.bf16 %v5079_v60, %v5063_v26  ;;  %v4562_v1 = vadd.f32 %v4561_v55, %v18735_v40  ;;  %v16517_v60 = vld [vmem:[%s21504_s9 + $0x2b8] sm:$0xff]  }
 0xe83   :  { %v5398_v59 = vpack.c.bf16 %v5078_v13, %v5062_v10  ;;  %v5400_v34 = vpack.c.bf16 %v5080_v25, %v5064_v58  ;;  %v4564_v6 = vadd.f32 %v4563_v31, %v18727_v23  ;;  %v4637_v32 = vadd.f32 %v4636_v19, %v18731_v45  ;;  %v16518_v13 = vld [vmem:[%s21504_s9 + $0x270] sm:$0xff]  }
 0xe84   :  { %v4565_v20 = vpop.f32.mrf.mxu1  ;;  %v4638_v22 = vpop.f32.mrf.mxu0  ;;  %v4969_v36 = vmax.f32 %v4562_v1, 0.0  ;;  %v4971_v27 = vmax.f32 %v4635_v46, 0.0  ;;  %v16519_v25 = vld [vmem:[%s21504_s9 + $0x2f0] sm:$0xff]  }
 0xe85   :  { %v4566_v16 = vadd.f32 %v4565_v20, %v18735_v40  ;;  %v4639_v43 = vadd.f32 %v4638_v22, %v18739_v61  ;;  %6244 = vmatprep.mubr.bf16.mxu1 %v5398_v59  ;;  %6309 = vmatprep.mubr.bf16.mxu0 %v5400_v34  ;;  %v4970_v49 = vmax.f32 %v4564_v6, 0.0  ;;  %v4972_v29 = vmax.f32 %v4637_v32, 0.0  ;;  %v16520_v22 = vld [vmem:[%s21504_s9 + $0x230] sm:$0xff]  }
 0xe86   :  { %v4567_v44 = vpop.f32.mrf.mxu1  ;;  %v4640_v18 = vpop.f32.mrf.mxu0  ;;  %6245 = vmatmul.mubr.bf16.gmra.mxu1 %v5397_v15  ;;  %6310 = vmatmul.mubr.bf16.gmra.mxu0 %v5399_v11  ;;  %v16521_v32 = vld [vmem:[%s21504_s9 + $0x2b0] sm:$0xff]  }
 0xe87   :  { %v4568_v50 = vadd.f32 %v4567_v44, %v18727_v23  ;;  %v4641_v24 = vadd.f32 %v4640_v18, %v18731_v45  ;;  %v4985_v47 = vmax.f32 %v4566_v16, 0.0  ;;  %v4987_v57 = vmax.f32 %v4639_v43, 0.0  ;;  %v16522_v44 = vld [vmem:[%s21504_s9 + $0x268] sm:$0xff]  }
 0xe88   :  { %v4571_v48 = vpop.f32.mrf.mxu1  ;;  %v4644_v17 = vpop.f32.mrf.mxu0  ;;  %v16523_v18 = vld [vmem:[%s21504_s9 + $0x2e8] sm:$0xff]  }
 0xe89   :  { %v4986_v2 = vmax.f32 %v4568_v50, 0.0  ;;  %v4988_v35 = vmax.f32 %v4641_v24, 0.0  ;;  %v5353_v55 = vpack.c.bf16 %v4985_v47, %v4969_v36  ;;  %v5355_v62 = vpack.c.bf16 %v4987_v57, %v4971_v27 }
 0xe8a   :  { %v4573_v28 = vpop.f32.mrf.mxu1  ;;  %v4646_v33 = vpop.f32.mrf.mxu0  ;;  %v4572_v19 = vadd.f32 %v4571_v48, %v18735_v40  ;;  %v4645_v59 = vadd.f32 %v4644_v17, %v18739_v61 }
 0xe8b   :  { %v5354_v37 = vpack.c.bf16 %v4986_v2, %v4970_v49  ;;  %v5356_v7 = vpack.c.bf16 %v4988_v35, %v4972_v29  ;;  %v4574_v0 = vadd.f32 %v4573_v28, %v18727_v23  ;;  %v4647_v34 = vadd.f32 %v4646_v33, %v18731_v45  ;;  %v16524_v35 = vld [vmem:[%s21504_s9 + $0x228] sm:$0xff]  }
 0xe8c   :  { %v4575_v10 = vpop.f32.mrf.mxu1  ;;  %v4648_v58 = vpop.f32.mrf.mxu0  ;;  %v5001_v57 = vmax.f32 %v4572_v19, 0.0  ;;  %v5003_v48 = vmax.f32 %v4645_v59, 0.0  ;;  %v16528_v59 = vld [vmem:[%s21504_s9 + $0x220] sm:$0xff]  }
 0xe8d   :  { %v4576_v26 = vadd.f32 %v4575_v10, %v18735_v40  ;;  %v4649_v31 = vadd.f32 %v4648_v58, %v18739_v61  ;;  %6350 = vmatprep.mubr.bf16.mxu1 %v5354_v37  ;;  %6415 = vmatprep.mubr.bf16.mxu0 %v5356_v7  ;;  %v5002_v50 = vmax.f32 %v4574_v0, 0.0  ;;  %v5004_v17 = vmax.f32 %v4647_v34, 0.0  ;;  %v16525_v7 = vld [vmem:[%s21504_s9 + $0x2a8] sm:$0xff]   ;;  %v16527_v58 = vld [vmem:[%s21504_s9 + $0x2e0] sm:$0xff]  }
 0xe8e   :  { %v4577_v15 = vpop.f32.mrf.mxu1  ;;  %v4650_v11 = vpop.f32.mrf.mxu0  ;;  %6351 = vmatmul.mubr.bf16.vlgmr.msra.gmra.mxu1 %v5353_v55  ;;  %6416 = vmatmul.mubr.bf16.vlgmr.msra.gmra.mxu0 %v5355_v62 }
 0xe8f   :  { %v4578_v6 = vadd.f32 %v4577_v15, %v18727_v23  ;;  %v4651_v20 = vadd.f32 %v4650_v11, %v18731_v45  ;;  %14870 = vmatpush3.bf16.msra.mxu1 %v16516_v12  ;;  %14910 = vmatpush3.bf16.msra.mxu0 %v16517_v60  ;;  %v5017_v16 = vmax.f32 %v4576_v26, 0.0  ;;  %v5019_v43 = vmax.f32 %v4649_v31, 0.0  ;;  %v16526_v12 = vld [vmem:[%s21504_s9 + $0x260] sm:$0xff]  }
 0xe90   :  { %v4581_v1 = vpop.f32.mrf.mxu1  ;;  %v4654_v46 = vpop.f32.mrf.mxu0  ;;  %14871 = vmatprep.subr.bf16.mxu1 %v16518_v13  ;;  %14911 = vmatprep.subr.bf16.mxu0 %v16519_v25 }
 0xe91   :  { %v5018_v24 = vmax.f32 %v4578_v6, 0.0  ;;  %v5020_v47 = vmax.f32 %v4651_v20, 0.0  ;;  %v5369_v36 = vpack.c.bf16 %v5017_v16, %v5001_v57  ;;  %v5371_v27 = vpack.c.bf16 %v5019_v43, %v5003_v48  ;;  %v16529_v20 = vld [vmem:[%s21504_s9 + $0x2a0] sm:$0xff]   ;;  %v16532_v48 = vld [vmem:[%s21504_s9 + $0x218] sm:$0xff]  }
 0xe92   :  { %v4583_v49 = vpop.f32.mrf.mxu1  ;;  %v4656_v29 = vpop.f32.mrf.mxu0  ;;  %v4582_v13 = vadd.f32 %v4581_v1, %v18735_v40  ;;  %v4655_v25 = vadd.f32 %v4654_v46, %v18739_v61 }
 0xe93   :  { %14872 = vmatpush3.bf16.msra.mxu1 %v16520_v22  ;;  %14912 = vmatpush3.bf16.msra.mxu0 %v16521_v32  ;;  %v5370_v2 = vpack.c.bf16 %v5018_v24, %v5002_v50  ;;  %v5372_v37 = vpack.c.bf16 %v5020_v47, %v5004_v17  ;;  %v4584_v60 = vadd.f32 %v4583_v49, %v18727_v23  ;;  %v16530_v22 = vld [vmem:[%s21504_s9 + $0x258] sm:$0xff]  }
 0xe94   :  { %v4585_v28 = vpop.f32.mrf.mxu1  ;;  %v4658_v33 = vpop.f32.mrf.mxu0  ;;  %14873 = vmatprep.subr.bf16.mxu1 %v16522_v44  ;;  %14913 = vmatprep.subr.bf16.mxu0 %v16523_v18  ;;  %v4657_v55 = vadd.f32 %v4656_v29, %v18731_v45  ;;  %v5033_v46 = vmax.f32 %v4582_v13, 0.0  ;;  %v5035_v44 = vmax.f32 %v4655_v25, 0.0  ;;  %v16531_v24 = vld [vmem:[%s21504_s9 + $0x2d8] sm:$0xff]   ;;  %v18836_v13 = vld [vmem:[%s21505_s8 + $0x8] sm:$0xff] }
 0xe95   :  { %v4586_v62 = vadd.f32 %v4585_v28, %v18735_v40  ;;  %v4659_v10 = vadd.f32 %v4658_v33, %v18739_v61  ;;  %6358 = vmatprep.mubr.bf16.mxu1 %v5370_v2  ;;  %6423 = vmatprep.mubr.bf16.mxu0 %v5372_v37  ;;  %v5034_v32 = vmax.f32 %v4584_v60, 0.0 }
 0xe96   :  { %v4587_v0 = vpop.f32.mrf.mxu1  ;;  %v4660_v26 = vpop.f32.mrf.mxu0  ;;  %6359 = vmatmul.mubr.bf16.gmra.mxu1 %v5369_v36  ;;  %6424 = vmatmul.mubr.bf16.gmra.mxu0 %v5371_v27  ;;  %v5036_v16 = vmax.f32 %v4657_v55, 0.0  ;;  %v16533_v36 = vld [vmem:[%s21504_s9 + $0x298] sm:$0xff]   ;;  %v16534_v27 = vld [vmem:[%s21504_s9 + $0x250] sm:$0xff]  }
 0xe97   :  { %v4588_v31 = vadd.f32 %v4587_v0, %v18727_v23  ;;  %v4661_v19 = vadd.f32 %v4660_v26, %v18731_v45  ;;  %14874 = vmatpush3.bf16.msra.mxu1 %v16524_v35  ;;  %v5049_v34 = vmax.f32 %v4586_v62, 0.0  ;;  %v5051_v15 = vmax.f32 %v4659_v10, 0.0  ;;  %14914 = vmatpush3.bf16.msra.mxu0 %v16525_v7  ;;  %v16535_v7 = vld [vmem:[%s21504_s9 + $0x2d0] sm:$0xff]  }
 0xe98   :  { %v4591_v11 = vpop.f32.mrf.mxu1  ;;  %v4664_v6 = vpop.f32.mrf.mxu0  ;;  %14875 = vmatprep.subr.bf16.mxu1 %v16526_v12  ;;  %14915 = vmatprep.subr.bf16.mxu0 %v16527_v58 }
 0xe99   :  { %v5050_v43 = vmax.f32 %v4588_v31, 0.0  ;;  %v5052_v1 = vmax.f32 %v4661_v19, 0.0  ;;  %v5385_v17 = vpack.c.bf16 %v5049_v34, %v5033_v46  ;;  %v5387_v49 = vpack.c.bf16 %v5051_v15, %v5035_v44  ;;  %v16537_v31 = vld [vmem:[%s21504_s9 + $0x290] sm:$0xff]   ;;  %v16538_v19 = vld [vmem:[%s21504_s9 + $0x248] sm:$0xff]  }
 0xe9a   :  { %v4593_v18 = vpop.f32.mrf.mxu1  ;;  %v4666_v50 = vpop.f32.mrf.mxu0  ;;  %v4592_v12 = vadd.f32 %v4591_v11, %v18735_v40  ;;  %v4665_v60 = vadd.f32 %v4664_v6, %v18739_v61 }
 0xe9b   :  { %14876 = vmatpush3.bf16.msra.mxu1 %v16528_v59  ;;  %v5386_v47 = vpack.c.bf16 %v5050_v43, %v5034_v32  ;;  %v5388_v57 = vpack.c.bf16 %v5052_v1, %v5036_v16  ;;  %v4594_v29 = vadd.f32 %v4593_v18, %v18727_v23  ;;  %14916 = vmatpush3.bf16.msra.mxu0 %v16529_v20  ;;  %v16539_v1 = vld [vmem:[%s21504_s9 + $0x2c8] sm:$0xff]  }
 0xe9c   :  { %v4595_v2 = vpop.f32.mrf.mxu1  ;;  %v4668_v35 = vpop.f32.mrf.mxu0  ;;  %14877 = vmatprep.subr.bf16.mxu1 %v16530_v22  ;;  %v4667_v28 = vadd.f32 %v4666_v50, %v18731_v45  ;;  %14917 = vmatprep.subr.bf16.mxu0 %v16531_v24  ;;  %v5065_v6 = vmax.f32 %v4592_v12, 0.0  ;;  %v5067_v20 = vmax.f32 %v4665_v60, 0.0  ;;  %v18857_v22 = vrot.slane %v18836_v13, %v18564_v9  ;;  %v16540_v18 = vld [vmem:[%s21504_s9 + $0x208] sm:$0xff]   ;;  %v16544_v60 = vld [vmem:[%s21504_s9 + $0x200] sm:$0xff]  }
 0xe9d   :  { %v4596_v33 = vadd.f32 %v4595_v2, %v18735_v40  ;;  %v4669_v37 = vadd.f32 %v4668_v35, %v18739_v61  ;;  %6366 = vmatprep.mubr.bf16.mxu1 %v5386_v47  ;;  %6431 = vmatprep.mubr.bf16.mxu0 %v5388_v57  ;;  %v16536_v40 = vld [vmem:[%s21504_s9 + $0x210] sm:$0xff]   ;;  %v5066_v59 = vmax.f32 %v4594_v29, 0.0  ;;  %v18861_v32 = vrot.slane %v18836_v13, %v18567_v51 }
 0xe9e   :  { %v4597_v55 = vpop.f32.mrf.mxu1  ;;  %v4670_v62 = vpop.f32.mrf.mxu0  ;;  %6367 = vmatmul.mubr.bf16.gmra.mxu1 %v5385_v17  ;;  %6432 = vmatmul.mubr.bf16.gmra.mxu0 %v5387_v49  ;;  %v5068_v34 = vmax.f32 %v4667_v28, 0.0  ;;  %v16541_v17 = vld [vmem:[%s21504_s9 + $0x288] sm:$0xff]   ;;  %v16542_v49 = vld [vmem:[%s21504_s9 + $0x240] sm:$0xff]  }
 0xe9f   :  { %v4598_v10 = vadd.f32 %v4597_v55, %v18727_v23  ;;  %v4671_v58 = vadd.f32 %v4670_v62, %v18731_v45  ;;  %14878 = vmatpush3.bf16.msra.mxu1 %v16532_v48  ;;  %v5081_v61 = vmax.f32 %v4596_v33, 0.0  ;;  %v5083_v25 = vmax.f32 %v4669_v37, 0.0  ;;  %14918 = vmatpush3.bf16.msra.mxu0 %v16533_v36  ;;  %v16543_v36 = vld [vmem:[%s21504_s9 + $0x2c0] sm:$0xff]  }
 0xea0   :  { %v4707_v0 = vpop.f32.mrf.mxu1  ;;  %v4780_v26 = vpop.f32.mrf.mxu0  ;;  %v18843_v23 = vrot.slane %v18836_v13, %v18553_v4  ;;  %v18847_v45 = vrot.slane %v18836_v13, %v18556_v42  ;;  %14879 = vmatprep.subr.bf16.mxu1 %v16534_v27  ;;  %14919 = vmatprep.subr.bf16.mxu0 %v16535_v7 }
 0xea1   :  { %v5082_v15 = vmax.f32 %v4598_v10, 0.0  ;;  %v5084_v11 = vmax.f32 %v4671_v58, 0.0  ;;  %v5401_v50 = vpack.c.bf16 %v5081_v61, %v5065_v6  ;;  %v5403_v24 = vpack.c.bf16 %v5083_v25, %v5067_v20  ;;  %v16546_v61 = vld [vmem:[%s21504_s9 + $0x378] sm:$0xff]  }
 0xea2   :  { %v4709_v16 = vpop.f32.mrf.mxu1  ;;  %v4782_v43 = vpop.f32.mrf.mxu0  ;;  %v4708_v27 = vadd.f32 %v4707_v0, %v18857_v22  ;;  %v4781_v28 = vadd.f32 %v4780_v26, %v18861_v32 }
 0xea3   :  { %14880 = vmatpush3.bf16.msra.mxu1 %v16536_v40  ;;  %v5402_v46 = vpack.c.bf16 %v5082_v15, %v5066_v59  ;;  %v5404_v44 = vpack.c.bf16 %v5084_v11, %v5068_v34  ;;  %v4710_v47 = vadd.f32 %v4709_v16, %v18843_v23  ;;  %14920 = vmatpush3.bf16.msra.mxu0 %v16537_v31  ;;  %v16545_v40 = vld [vmem:[%s21504_s9 + $0x280] sm:$0xff]   ;;  %v16547_v11 = vld [vmem:[%s21504_s9 + $0x3f8] sm:$0xff]  }
 0xea4   :  { %v4711_v57 = vpop.f32.mrf.mxu1  ;;  %v4784_v48 = vpop.f32.mrf.mxu0  ;;  %14881 = vmatprep.subr.bf16.mxu1 %v16538_v19  ;;  %v4783_v29 = vadd.f32 %v4782_v43, %v18847_v45  ;;  %14921 = vmatprep.subr.bf16.mxu0 %v16539_v1  ;;  %v4973_v19 = vmax.f32 %v4708_v27, 0.0  ;;  %v4975_v59 = vmax.f32 %v4781_v28, 0.0  ;;  %v16548_v16 = vld [vmem:[%s21504_s9 + $0x338] sm:$0xff]   ;;  %v16552_v28 = vld [vmem:[%s21504_s9 + $0x330] sm:$0xff]  }
 0xea5   :  { %v4712_v2 = vadd.f32 %v4711_v57, %v18857_v22  ;;  %v4785_v35 = vadd.f32 %v4784_v48, %v18861_v32  ;;  %6374 = vmatprep.mubr.bf16.mxu1 %v5402_v46  ;;  %6439 = vmatprep.mubr.bf16.mxu0 %v5404_v44  ;;  %v4974_v25 = vmax.f32 %v4710_v47, 0.0 }
 0xea6   :  { %v4713_v33 = vpop.f32.mrf.mxu1  ;;  %v4786_v37 = vpop.f32.mrf.mxu0  ;;  %6375 = vmatmul.mubr.bf16.gmra.mxu1 %v5401_v50  ;;  %6440 = vmatmul.mubr.bf16.gmra.mxu0 %v5403_v24  ;;  %v4976_v0 = vmax.f32 %v4783_v29, 0.0  ;;  %v16549_v50 = vld [vmem:[%s21504_s9 + $0x3b8] sm:$0xff]   ;;  %v16550_v24 = vld [vmem:[%s21504_s9 + $0x370] sm:$0xff]  }
 0xea7   :  { %v4714_v7 = vadd.f32 %v4713_v33, %v18843_v23  ;;  %v4787_v12 = vadd.f32 %v4786_v37, %v18847_v45  ;;  %14882 = vmatpush3.bf16.msra.mxu1 %v16540_v18  ;;  %v4989_v55 = vmax.f32 %v4712_v2, 0.0  ;;  %v4991_v62 = vmax.f32 %v4785_v35, 0.0  ;;  %14922 = vmatpush3.bf16.msra.mxu0 %v16541_v17  ;;  %v16551_v17 = vld [vmem:[%s21504_s9 + $0x3f0] sm:$0xff]  }
 0xea8   :  { %v4717_v10 = vpop.f32.mrf.mxu1  ;;  %v4790_v58 = vpop.f32.mrf.mxu0  ;;  %14883 = vmatprep.subr.bf16.mxu1 %v16542_v49  ;;  %14923 = vmatprep.subr.bf16.mxu0 %v16543_v36 }
 0xea9   :  { %v4990_v26 = vmax.f32 %v4714_v7, 0.0  ;;  %v4992_v31 = vmax.f32 %v4787_v12, 0.0  ;;  %v5357_v43 = vpack.c.bf16 %v4989_v55, %v4973_v19  ;;  %v5359_v1 = vpack.c.bf16 %v4991_v62, %v4975_v59  ;;  %v16554_v55 = vld [vmem:[%s21504_s9 + $0x368] sm:$0xff]  }
 0xeaa   :  { %v4719_v34 = vpop.f32.mrf.mxu1  ;;  %v4792_v15 = vpop.f32.mrf.mxu0  ;;  %v4718_v49 = vadd.f32 %v4717_v10, %v18857_v22  ;;  %v4791_v29 = vadd.f32 %v4790_v58, %v18861_v32 }
 0xeab   :  { %14884 = vmatpush3.bf16.msra.mxu1 %v16544_v60  ;;  %v5358_v6 = vpack.c.bf16 %v4990_v26, %v4974_v25  ;;  %v5360_v20 = vpack.c.bf16 %v4992_v31, %v4976_v0  ;;  %v4720_v46 = vadd.f32 %v4719_v34, %v18843_v23  ;;  %14924 = vmatpush3.bf16.msra.mxu0 %v16545_v40  ;;  %v16553_v60 = vld [vmem:[%s21504_s9 + $0x3b0] sm:$0xff]   ;;  %v16555_v31 = vld [vmem:[%s21504_s9 + $0x3e8] sm:$0xff]  }
 0xeac   :  { %v4721_v44 = vpop.f32.mrf.mxu1  ;;  %v4794_v18 = vpop.f32.mrf.mxu0  ;;  %14949 = vmatprep.subr.bf16.mxu1 %v16546_v61  ;;  %v4793_v47 = vadd.f32 %v4792_v15, %v18847_v45  ;;  %14989 = vmatprep.subr.bf16.mxu0 %v16547_v11  ;;  %v5005_v61 = vmax.f32 %v4718_v49, 0.0  ;;  %v5007_v25 = vmax.f32 %v4791_v29, 0.0  ;;  %v16556_v34 = vld [vmem:[%s21504_s9 + $0x328] sm:$0xff]   ;;  %v16560_v29 = vld [vmem:[%s21504_s9 + $0x320] sm:$0xff]  }
 0xead   :  { %v4722_v57 = vadd.f32 %v4721_v44, %v18857_v22  ;;  %v4795_v48 = vadd.f32 %v4794_v18, %v18861_v32  ;;  %6480 = vmatprep.mubr.bf16.mxu1 %v5358_v6  ;;  %6545 = vmatprep.mubr.bf16.mxu0 %v5360_v20  ;;  %v5006_v62 = vmax.f32 %v4720_v46, 0.0 }
 0xeae   :  { %v4723_v2 = vpop.f32.mrf.mxu1  ;;  %v4796_v35 = vpop.f32.mrf.mxu0  ;;  %6481 = vmatmul.mubr.bf16.vlgmr.msra.gmra.mxu1 %v5357_v43  ;;  %6546 = vmatmul.mubr.bf16.vlgmr.msra.gmra.mxu0 %v5359_v1  ;;  %v5008_v10 = vmax.f32 %v4793_v47, 0.0  ;;  %v16557_v43 = vld [vmem:[%s21504_s9 + $0x3a8] sm:$0xff]   ;;  %v16558_v1 = vld [vmem:[%s21504_s9 + $0x360] sm:$0xff]  }
 0xeaf   :  { %v4724_v36 = vadd.f32 %v4723_v2, %v18843_v23  ;;  %v4797_v27 = vadd.f32 %v4796_v35, %v18847_v45  ;;  %14950 = vmatpush3.bf16.msra.mxu1 %v16548_v16  ;;  %v5021_v33 = vmax.f32 %v4722_v57, 0.0  ;;  %v5023_v37 = vmax.f32 %v4795_v48, 0.0  ;;  %14990 = vmatpush3.bf16.msra.mxu0 %v16549_v50  ;;  %v16559_v50 = vld [vmem:[%s21504_s9 + $0x3e0] sm:$0xff]  }
 0xeb0   :  { %v4727_v7 = vpop.f32.mrf.mxu1  ;;  %v4800_v12 = vpop.f32.mrf.mxu0  ;;  %14951 = vmatprep.subr.bf16.mxu1 %v16550_v24  ;;  %14991 = vmatprep.subr.bf16.mxu0 %v16551_v17 }
 0xeb1   :  { %v5022_v58 = vmax.f32 %v4724_v36, 0.0  ;;  %v5024_v40 = vmax.f32 %v4797_v27, 0.0  ;;  %v5373_v15 = vpack.c.bf16 %v5021_v33, %v5005_v61  ;;  %v5375_v11 = vpack.c.bf16 %v5023_v37, %v5007_v25  ;;  %v16562_v33 = vld [vmem:[%s21504_s9 + $0x358] sm:$0xff]  }
 0xeb2   :  { %v4729_v0 = vpop.f32.mrf.mxu1  ;;  %v4802_v26 = vpop.f32.mrf.mxu0  ;;  %v4728_v24 = vadd.f32 %v4727_v7, %v18857_v22  ;;  %v4801_v47 = vadd.f32 %v4800_v12, %v18861_v32 }
 0xeb3   :  { %14952 = vmatpush3.bf16.msra.mxu1 %v16552_v28  ;;  %v5374_v19 = vpack.c.bf16 %v5022_v58, %v5006_v62  ;;  %v5376_v59 = vpack.c.bf16 %v5024_v40, %v5008_v10  ;;  %v4730_v6 = vadd.f32 %v4729_v0, %v18843_v23  ;;  %14992 = vmatpush3.bf16.msra.mxu0 %v16553_v60  ;;  %v16561_v28 = vld [vmem:[%s21504_s9 + $0x3a0] sm:$0xff]   ;;  %v16563_v40 = vld [vmem:[%s21504_s9 + $0x3d8] sm:$0xff]  }
 0xeb4   :  { %v4731_v20 = vpop.f32.mrf.mxu1  ;;  %v4804_v16 = vpop.f32.mrf.mxu0  ;;  %14953 = vmatprep.subr.bf16.mxu1 %v16554_v55  ;;  %v4803_v46 = vadd.f32 %v4802_v26, %v18847_v45  ;;  %14993 = vmatprep.subr.bf16.mxu0 %v16555_v31  ;;  %v5037_v55 = vmax.f32 %v4728_v24, 0.0  ;;  %v5039_v62 = vmax.f32 %v4801_v47, 0.0  ;;  %v16564_v0 = vld [vmem:[%s21504_s9 + $0x318] sm:$0xff]   ;;  %v16568_v47 = vld [vmem:[%s21504_s9 + $0x310] sm:$0xff]  }
 0xeb5   :  { %v4732_v44 = vadd.f32 %v4731_v20, %v18857_v22  ;;  %v4805_v18 = vadd.f32 %v4804_v16, %v18861_v32  ;;  %6488 = vmatprep.mubr.bf16.mxu1 %v5374_v19  ;;  %6553 = vmatprep.mubr.bf16.mxu0 %v5376_v59  ;;  %v5038_v37 = vmax.f32 %v4730_v6, 0.0 }
 0xeb6   :  { %v4733_v57 = vpop.f32.mrf.mxu1  ;;  %v4806_v48 = vpop.f32.mrf.mxu0  ;;  %6489 = vmatmul.mubr.bf16.gmra.mxu1 %v5373_v15  ;;  %6554 = vmatmul.mubr.bf16.gmra.mxu0 %v5375_v11  ;;  %v5040_v7 = vmax.f32 %v4803_v46, 0.0  ;;  %v16565_v15 = vld [vmem:[%s21504_s9 + $0x398] sm:$0xff]   ;;  %v16566_v11 = vld [vmem:[%s21504_s9 + $0x350] sm:$0xff]  }
 0xeb7   :  { %v4734_v17 = vadd.f32 %v4733_v57, %v18843_v23  ;;  %v4807_v49 = vadd.f32 %v4806_v48, %v18847_v45  ;;  %14954 = vmatpush3.bf16.msra.mxu1 %v16556_v34  ;;  %v5053_v2 = vmax.f32 %v4732_v44, 0.0  ;;  %v5055_v35 = vmax.f32 %v4805_v18, 0.0  ;;  %14994 = vmatpush3.bf16.msra.mxu0 %v16557_v43  ;;  %v16567_v43 = vld [vmem:[%s21504_s9 + $0x3d0] sm:$0xff]  }
 0xeb8   :  { %v4737_v36 = vpop.f32.mrf.mxu1  ;;  %v4810_v27 = vpop.f32.mrf.mxu0  ;;  %14955 = vmatprep.subr.bf16.mxu1 %v16558_v1  ;;  %14995 = vmatprep.subr.bf16.mxu0 %v16559_v50 }
 0xeb9   :  { %v5054_v12 = vmax.f32 %v4734_v17, 0.0  ;;  %v5056_v60 = vmax.f32 %v4807_v49, 0.0  ;;  %v5389_v26 = vpack.c.bf16 %v5053_v2, %v5037_v55  ;;  %v5391_v31 = vpack.c.bf16 %v5055_v35, %v5039_v62  ;;  %v16570_v49 = vld [vmem:[%s21504_s9 + $0x348] sm:$0xff]  }
 0xeba   :  { %v4739_v10 = vpop.f32.mrf.mxu1  ;;  %v4812_v58 = vpop.f32.mrf.mxu0  ;;  %v4738_v1 = vadd.f32 %v4737_v36, %v18857_v22  ;;  %v4811_v46 = vadd.f32 %v4810_v27, %v18861_v32 }
 0xebb   :  { %14956 = vmatpush3.bf16.msra.mxu1 %v16560_v29  ;;  %v5390_v61 = vpack.c.bf16 %v5054_v12, %v5038_v37  ;;  %v5392_v25 = vpack.c.bf16 %v5056_v60, %v5040_v7  ;;  %v4740_v19 = vadd.f32 %v4739_v10, %v18843_v23  ;;  %14996 = vmatpush3.bf16.msra.mxu0 %v16561_v28  ;;  %v16571_v60 = vld [vmem:[%s21504_s9 + $0x3c8] sm:$0xff]  }
 0xebc   :  { %v4741_v59 = vpop.f32.mrf.mxu1  ;;  %v4814_v34 = vpop.f32.mrf.mxu0  ;;  %14957 = vmatprep.subr.bf16.mxu1 %v16562_v33  ;;  %v4813_v6 = vadd.f32 %v4812_v58, %v18847_v45  ;;  %14997 = vmatprep.subr.bf16.mxu0 %v16563_v40  ;;  %v5069_v27 = vmax.f32 %v4738_v1, 0.0  ;;  %v5071_v28 = vmax.f32 %v4811_v46, 0.0  ;;  %v19001_v33 = vrot.slane %v18836_v13, %v18718_v39  ;;  %v16572_v10 = vld [vmem:[%s21504_s9 + $0x308] sm:$0xff]   ;;  %v16576_v1 = vld [vmem:[%s21504_s9 + $0x300] sm:$0xff]  }
 0xebd   :  { %v4742_v20 = vadd.f32 %v4741_v59, %v18857_v22  ;;  %v4815_v16 = vadd.f32 %v4814_v34, %v18861_v32  ;;  %6496 = vmatprep.mubr.bf16.mxu1 %v5390_v61  ;;  %6561 = vmatprep.mubr.bf16.mxu0 %v5392_v25  ;;  %v18987_v32 = vrot.slane %v18836_v13, %v18706_v53  ;;  %v5070_v29 = vmax.f32 %v4740_v19, 0.0  ;;  %v16575_v34 = vld [vmem:[%s21504_s9 + $0x3c0] sm:$0xff]  }
 0xebe   :  { %v4743_v44 = vpop.f32.mrf.mxu1  ;;  %v4816_v18 = vpop.f32.mrf.mxu0  ;;  %6497 = vmatmul.mubr.bf16.gmra.mxu1 %v5389_v26  ;;  %6562 = vmatmul.mubr.bf16.gmra.mxu0 %v5391_v31  ;;  %v5072_v2 = vmax.f32 %v4813_v6, 0.0  ;;  %v19005_v37 = vrot.slane %v18836_v13, %v18721_v56  ;;  %v16574_v26 = vld [vmem:[%s21504_s9 + $0x340] sm:$0xff]  }
 0xebf   :  { %v4744_v50 = vadd.f32 %v4743_v44, %v18843_v23  ;;  %v4817_v24 = vadd.f32 %v4816_v18, %v18847_v45  ;;  %14958 = vmatpush3.bf16.msra.mxu1 %v16564_v0  ;;  %v5085_v57 = vmax.f32 %v4742_v20, 0.0  ;;  %v5087_v48 = vmax.f32 %v4815_v16, 0.0  ;;  %14998 = vmatpush3.bf16.msra.mxu0 %v16565_v15  ;;  %v16569_v45 = vld [vmem:[%s21504_s9 + $0x390] sm:$0xff]   ;;  %v16573_v0 = vld [vmem:[%s21504_s9 + $0x388] sm:$0xff]  }
 0xec0   :  { %v4853_v22 = vpop.f32.mrf.mxu1  ;;  %v4926_v17 = vpop.f32.mrf.mxu0  ;;  %v18991_v23 = vrot.slane %v18836_v13, %v18710_v54  ;;  %14959 = vmatprep.subr.bf16.mxu1 %v16566_v11  ;;  %14999 = vmatprep.subr.bf16.mxu0 %v16567_v43 }
 0xec1   :  { %v5086_v35 = vmax.f32 %v4744_v50, 0.0  ;;  %v5088_v36 = vmax.f32 %v4817_v24, 0.0  ;;  %v5405_v58 = vpack.c.bf16 %v5085_v57, %v5069_v27  ;;  %v5407_v40 = vpack.c.bf16 %v5087_v48, %v5071_v28  ;;  %v16577_v24 = vld [vmem:[%s21504_s9 + $0x380] sm:$0xff]  }
 0xec2   :  { %v4855_v7 = vpop.f32.mrf.mxu1  ;;  %v4928_v12 = vpop.f32.mrf.mxu0  ;;  %v4854_v15 = vadd.f32 %v4853_v22, %v19001_v33  ;;  %v4927_v11 = vadd.f32 %v4926_v17, %v19005_v37 }
 0xec3   :  { %14960 = vmatpush3.bf16.msra.mxu1 %v16568_v47  ;;  %v5406_v55 = vpack.c.bf16 %v5086_v35, %v5070_v29  ;;  %v5408_v62 = vpack.c.bf16 %v5088_v36, %v5072_v2  ;;  %v4856_v61 = vadd.f32 %v4855_v7, %v18987_v32  ;;  %15000 = vmatpush3.bf16.msra.mxu0 %v16569_v45 }
 0xec4   :  { %v4857_v13 = vpop.f32.mrf.mxu1  ;;  %v4930_v25 = vpop.f32.mrf.mxu0  ;;  %14961 = vmatprep.subr.bf16.mxu1 %v16570_v49  ;;  %v4929_v31 = vadd.f32 %v4928_v12, %v18991_v23  ;;  %15001 = vmatprep.subr.bf16.mxu0 %v16571_v60  ;;  %v4977_v17 = vmax.f32 %v4854_v15, 0.0  ;;  %v4979_v45 = vmax.f32 %v4927_v11, 0.0 }
 0xec5   :  { %v4858_v19 = vadd.f32 %v4857_v13, %v19001_v33  ;;  %v4931_v59 = vadd.f32 %v4930_v25, %v19005_v37  ;;  %6504 = vmatprep.mubr.bf16.mxu1 %v5406_v55  ;;  %6569 = vmatprep.mubr.bf16.mxu0 %v5408_v62  ;;  %v4978_v47 = vmax.f32 %v4856_v61, 0.0 }
 0xec6   :  { %v4859_v6 = vpop.f32.mrf.mxu1  ;;  %v4932_v20 = vpop.f32.mrf.mxu0  ;;  %6505 = vmatmul.mubr.bf16.gmra.mxu1 %v5405_v58  ;;  %6570 = vmatmul.mubr.bf16.gmra.mxu0 %v5407_v40  ;;  %v4980_v57 = vmax.f32 %v4929_v31, 0.0 }
 0xec7   :  { %v4860_v16 = vadd.f32 %v4859_v6, %v18987_v32  ;;  %v4933_v43 = vadd.f32 %v4932_v20, %v18991_v23  ;;  %14962 = vmatpush3.bf16.msra.mxu1 %v16572_v10  ;;  %v4993_v46 = vmax.f32 %v4858_v19, 0.0  ;;  %v4995_v44 = vmax.f32 %v4931_v59, 0.0  ;;  %15002 = vmatpush3.bf16.msra.mxu0 %v16573_v0 }
 0xec8   :  { %v4863_v18 = vpop.f32.mrf.mxu1  ;;  %v4936_v50 = vpop.f32.mrf.mxu0  ;;  %14963 = vmatprep.subr.bf16.mxu1 %v16574_v26  ;;  %15003 = vmatprep.subr.bf16.mxu0 %v16575_v34 }
 0xec9   :  { %v4994_v48 = vmax.f32 %v4860_v16, 0.0  ;;  %v4996_v22 = vmax.f32 %v4933_v43, 0.0  ;;  %v5361_v36 = vpack.c.bf16 %v4993_v46, %v4977_v17  ;;  %v5363_v27 = vpack.c.bf16 %v4995_v44, %v4979_v45 }
 0xeca   :  { %v4865_v49 = vpop.f32.mrf.mxu1  ;;  %v4938_v29 = vpop.f32.mrf.mxu0  ;;  %v4864_v10 = vadd.f32 %v4863_v18, %v19001_v33  ;;  %v4937_v58 = vadd.f32 %v4936_v50, %v19005_v37 }
 0xecb   :  { %14964 = vmatpush3.bf16.msra.mxu1 %v16576_v1  ;;  %v5362_v2 = vpack.c.bf16 %v4994_v48, %v4978_v47  ;;  %v5364_v35 = vpack.c.bf16 %v4996_v22, %v4980_v57  ;;  %v4866_v28 = vadd.f32 %v4865_v49, %v18987_v32  ;;  %15004 = vmatpush3.bf16.msra.mxu0 %v16577_v24 }
 0xecc   :  { %v4867_v7 = vpop.f32.mrf.mxu1  ;;  %v4940_v12 = vpop.f32.mrf.mxu0  ;;  %v4939_v60 = vadd.f32 %v4938_v29, %v18991_v23  ;;  %15909 = vmatprep.subr.bf16.mxu0 %v21534_v14  ;;  %v5009_v6 = vmax.f32 %v4864_v10, 0.0  ;;  %v5011_v20 = vmax.f32 %v4937_v58, 0.0 }
 0xecd   :  { %v4868_v55 = vadd.f32 %v4867_v7, %v19001_v33  ;;  %v4941_v62 = vadd.f32 %v4940_v12, %v19005_v37  ;;  %6610 = vmatprep.mubr.bf16.mxu1 %v5362_v2  ;;  %6675 = vmatprep.mubr.bf16.mxu0 %v5364_v35  ;;  %v5010_v59 = vmax.f32 %v4866_v28, 0.0 }
 0xece   :  { %v4869_v40 = vpop.f32.mrf.mxu1  ;;  %v4942_v61 = vpop.f32.mrf.mxu0  ;;  %6611 = vmatmul.mubr.bf16.vlgmr.msra.gmra.mxu1 %v5361_v36  ;;  %6676 = vmatmul.mubr.bf16.vlgmr.msra.gmra.mxu0 %v5363_v27  ;;  %v5012_v34 = vmax.f32 %v4939_v60, 0.0 }
 0xecf   :  { %v4870_v13 = vadd.f32 %v4869_v40, %v18987_v32  ;;  %v4943_v25 = vadd.f32 %v4942_v61, %v18991_v23  ;;  %v5025_v0 = vmax.f32 %v4868_v55, 0.0  ;;  %v5027_v26 = vmax.f32 %v4941_v62, 0.0 }
 0xed0   :  { %v4873_v31 = vpop.f32.mrf.mxu1  ;;  %v4946_v19 = vpop.f32.mrf.mxu0 }
 0xed1   :  { %v5026_v15 = vmax.f32 %v4870_v13, 0.0  ;;  %v5028_v11 = vmax.f32 %v4943_v25, 0.0  ;;  %v5377_v44 = vpack.c.bf16 %v5025_v0, %v5009_v6  ;;  %v5379_v18 = vpack.c.bf16 %v5027_v26, %v5011_v20 }
 0xed2   :  { %v4875_v16 = vpop.f32.mrf.mxu1  ;;  %v4948_v43 = vpop.f32.mrf.mxu0  ;;  %v4874_v17 = vadd.f32 %v4873_v31, %v19001_v33  ;;  %v4947_v45 = vadd.f32 %v4946_v19, %v19005_v37 }
 0xed3   :  { %v5378_v1 = vpack.c.bf16 %v5026_v15, %v5010_v59  ;;  %v5380_v46 = vpack.c.bf16 %v5028_v11, %v5012_v34  ;;  %v4876_v50 = vadd.f32 %v4875_v16, %v18987_v32  ;;  %v4949_v57 = vadd.f32 %v4948_v43, %v18991_v23 }
 0xed4   :  { %v4877_v24 = vpop.f32.mrf.mxu1  ;;  %v4950_v47 = vpop.f32.mrf.mxu0  ;;  %v5041_v10 = vmax.f32 %v4874_v17, 0.0  ;;  %v5043_v58 = vmax.f32 %v4947_v45, 0.0 }
 0xed5   :  { %v4878_v48 = vadd.f32 %v4877_v24, %v19001_v33  ;;  %v4951_v22 = vadd.f32 %v4950_v47, %v19005_v37  ;;  %6618 = vmatprep.mubr.bf16.mxu1 %v5378_v1  ;;  %6683 = vmatprep.mubr.bf16.mxu0 %v5380_v46  ;;  %v5042_v12 = vmax.f32 %v4876_v50, 0.0  ;;  %v5044_v60 = vmax.f32 %v4949_v57, 0.0 }
 0xed6   :  { %v4879_v49 = vpop.f32.mrf.mxu1  ;;  %v4952_v29 = vpop.f32.mrf.mxu0  ;;  %6619 = vmatmul.mubr.bf16.gmra.mxu1 %v5377_v44  ;;  %6684 = vmatmul.mubr.bf16.gmra.mxu0 %v5379_v18 }
 0xed7   :  { %v4880_v2 = vadd.f32 %v4879_v49, %v18987_v32  ;;  %v4953_v35 = vadd.f32 %v4952_v29, %v18991_v23  ;;  %v5057_v36 = vmax.f32 %v4878_v48, 0.0  ;;  %v5059_v27 = vmax.f32 %v4951_v22, 0.0 }
 0xed8   :  { %v4883_v28 = vpop.f32.mrf.mxu1  ;;  %v4956_v7 = vpop.f32.mrf.mxu0 }
 0xed9   :  { %v5058_v55 = vmax.f32 %v4880_v2, 0.0  ;;  %v5060_v62 = vmax.f32 %v4953_v35, 0.0  ;;  %v5393_v0 = vpack.c.bf16 %v5057_v36, %v5041_v10  ;;  %v5395_v26 = vpack.c.bf16 %v5059_v27, %v5043_v58 }
 0xeda   :  { %v4885_v40 = vpop.f32.mrf.mxu1  ;;  %v4958_v61 = vpop.f32.mrf.mxu0  ;;  %v4884_v6 = vadd.f32 %v4883_v28, %v19001_v33  ;;  %v4957_v43 = vadd.f32 %v4956_v7, %v19005_v37 }
 0xedb   :  { %v5394_v13 = vpack.c.bf16 %v5058_v55, %v5042_v12  ;;  %v5396_v25 = vpack.c.bf16 %v5060_v62, %v5044_v60  ;;  %v4886_v31 = vadd.f32 %v4885_v40, %v18987_v32  ;;  %v4959_v34 = vadd.f32 %v4958_v61, %v18991_v23 }
 0xedc   :  { %v4887_v19 = vpop.f32.mrf.mxu1  ;;  %v4960_v59 = vpop.f32.mrf.mxu0  ;;  %v5073_v48 = vmax.f32 %v4884_v6, 0.0  ;;  %v5075_v22 = vmax.f32 %v4957_v43, 0.0 }
 0xedd   :  { %v4888_v15 = vadd.f32 %v4887_v19, %v19001_v33  ;;  %v4961_v11 = vadd.f32 %v4960_v59, %v19005_v37  ;;  %6626 = vmatprep.mubr.bf16.mxu1 %v5394_v13  ;;  %6691 = vmatprep.mubr.bf16.mxu0 %v5396_v25  ;;  %v5074_v44 = vmax.f32 %v4886_v31, 0.0  ;;  %v5076_v50 = vmax.f32 %v4959_v34, 0.0  ;;  %v13856_v37 = vld [vmem:[%s21506_s10] ss:$0 sm:$0xff] }
 0xede   :  { %v4889_v20 = vpop.f32.mrf.mxu1  ;;  %v4962_v16 = vpop.f32.mrf.mxu0  ;;  %6627 = vmatmul.mubr.bf16.gmra.mxu1 %v5393_v0  ;;  %6692 = vmatmul.mubr.bf16.gmra.mxu0 %v5395_v26 }
 0xedf   :  { %v4890_v1 = vadd.f32 %v4889_v20, %v18987_v32  ;;  %v4963_v46 = vadd.f32 %v4962_v16, %v18991_v23  ;;  %v5089_v18 = vmax.f32 %v4888_v15, 0.0  ;;  %v5091_v24 = vmax.f32 %v4961_v11, 0.0 }
 0xee1   :  { %v5090_v47 = vmax.f32 %v4890_v1, 0.0  ;;  %v5092_v57 = vmax.f32 %v4963_v46, 0.0  ;;  %v5409_v45 = vpack.c.bf16 %v5089_v18, %v5073_v48  ;;  %v5411_v49 = vpack.c.bf16 %v5091_v24, %v5075_v22 }
 0xee3   :  { %v5410_v17 = vpack.c.bf16 %v5090_v47, %v5074_v44  ;;  %v5412_v33 = vpack.c.bf16 %v5092_v57, %v5076_v50 }
 0xee5   :  { %6634 = vmatprep.mubr.bf16.mxu1 %v5410_v17  ;;  %6699 = vmatprep.mubr.bf16.mxu0 %v5412_v33 }
 0xee6   :  { %6635 = vmatmul.mubr.bf16.gmra.mxu1 %v5409_v45  ;;  %6700 = vmatmul.mubr.bf16.gmra.mxu0 %v5411_v49 }
 0xee7   :  { %15911 = vmatprep.mubr.msk.bf16.mxu0 %vm17039_vm1, %v21534_v14 }
 0xf01   :  { %v14725_v32 = vpop.f32.mrf.mxu1  ;;  %v14765_v23 = vpop.f32.mrf.mxu0 }
 0xf03   :  { %v14726_v29 = vpop.f32.mrf.mxu1  ;;  %v14766_v2 = vpop.f32.mrf.mxu0 }
 0xf04   :  { %v14727_v35 = vadd.f32 %v14726_v29, %v14725_v32  ;;  %v14767_v36 = vadd.f32 %v14766_v2, %v14765_v23 }
 0xf05   :  { %v14728_v27 = vpop.f32.mrf.mxu1  ;;  %v14768_v28 = vpop.f32.mrf.mxu0 }
 0xf06   :  { %v6223_v7 = vadd.f32 %v14727_v35, %v13856_v37 }
 0xf07   :  { %v14729_v12 = vpop.f32.mrf.mxu1  ;;  %v14769_v60 = vpop.f32.mrf.mxu0 }
 0xf08   :  { %v19066_v55 = vadd.f32 %v14767_v36, %v6223_v7  ;;  %v14730_v62 = vadd.f32 %v14729_v12, %v14728_v27  ;;  %v14770_v61 = vadd.f32 %v14769_v60, %v14768_v28 }
 0xf09   :  { %v14731_v10 = vpop.f32.mrf.mxu1  ;;  %v14771_v58 = vpop.f32.mrf.mxu0 }
 0xf0a   :  { %v6226_v40 = vadd.f32 %v14730_v62, %v13856_v37 }
 0xf0b   :  { %v14732_v13 = vpop.f32.mrf.mxu1  ;;  %v14772_v25 = vpop.f32.mrf.mxu0 }
 0xf0c   :  { %v19068_v0 = vadd.f32 %v14770_v61, %v6226_v40  ;;  %v14733_v26 = vadd.f32 %v14732_v13, %v14731_v10  ;;  %v14773_v31 = vadd.f32 %v14772_v25, %v14771_v58 }
 0xf0d   :  { %v14734_v19 = vpop.f32.mrf.mxu1  ;;  %v14774_v59 = vpop.f32.mrf.mxu0 }
 0xf0e   :  { %v6231_v34 = vadd.f32 %v14733_v26, %v13856_v37 }
 0xf0f   :  { %v14735_v15 = vpop.f32.mrf.mxu1  ;;  %v14775_v11 = vpop.f32.mrf.mxu0 }
 0xf10   :  { %v19070_v6 = vadd.f32 %v14773_v31, %v6231_v34  ;;  %v14736_v20 = vadd.f32 %v14735_v15, %v14734_v19  ;;  %v14776_v43 = vadd.f32 %v14775_v11, %v14774_v59 }
 0xf12   :  { %v6234_v16 = vadd.f32 %v14736_v20, %v13856_v37 }
 0xf14   :  { %v19072_v1 = vadd.f32 %v14776_v43, %v6234_v16 }
 0xf3e   :  { %v14737_v46 = vpop.f32.mrf.mxu1  ;;  %v14777_v44 = vpop.f32.mrf.mxu0 }
 0xf40   :  { %v14738_v18 = vpop.f32.mrf.mxu1  ;;  %v14778_v50 = vpop.f32.mrf.mxu0 }
 0xf41   :  { %v14739_v24 = vadd.f32 %v14738_v18, %v14737_v46  ;;  %v14779_v47 = vadd.f32 %v14778_v50, %v14777_v44 }
 0xf42   :  { %v14740_v57 = vpop.f32.mrf.mxu1  ;;  %v14780_v48 = vpop.f32.mrf.mxu0 }
 0xf43   :  { %v6239_v22 = vadd.f32 %v14739_v24, %v13856_v37 }
 0xf44   :  { %v14741_v17 = vpop.f32.mrf.mxu1  ;;  %v14781_v33 = vpop.f32.mrf.mxu0 }
 0xf45   :  { %v19074_v45 = vadd.f32 %v14779_v47, %v6239_v22  ;;  %v14742_v49 = vadd.f32 %v14741_v17, %v14740_v57  ;;  %v14782_v2 = vadd.f32 %v14781_v33, %v14780_v48 }
 0xf46   :  { %v14743_v32 = vpop.f32.mrf.mxu1  ;;  %v14783_v23 = vpop.f32.mrf.mxu0 }
 0xf47   :  { %v6242_v29 = vadd.f32 %v14742_v49, %v13856_v37 }
 0xf48   :  { %v14744_v35 = vpop.f32.mrf.mxu1  ;;  %v14784_v36 = vpop.f32.mrf.mxu0 }
 0xf49   :  { %v19076_v27 = vadd.f32 %v14782_v2, %v6242_v29  ;;  %v14745_v28 = vadd.f32 %v14744_v35, %v14743_v32  ;;  %v14785_v7 = vadd.f32 %v14784_v36, %v14783_v23 }
 0xf4a   :  { %v14746_v12 = vpop.f32.mrf.mxu1  ;;  %v14786_v60 = vpop.f32.mrf.mxu0 }
 0xf4b   :  { %v6247_v62 = vadd.f32 %v14745_v28, %v13856_v37 }
 0xf4c   :  { %v14747_v10 = vpop.f32.mrf.mxu1  ;;  %v14787_v58 = vpop.f32.mrf.mxu0 }
 0xf4d   :  { %v19078_v40 = vadd.f32 %v14785_v7, %v6247_v62  ;;  %v14748_v61 = vadd.f32 %v14747_v10, %v14746_v12  ;;  %v14788_v31 = vadd.f32 %v14787_v58, %v14786_v60 }
 0xf4e   :  { %v14805_v13 = vpop.f32.mrf.mxu1  ;;  %v19080_v25 = vpop.f32.mrf.mxu0 }
 0xf4f   :  { %21578 = vst [vmem:[#allocation17_spill] sm:$0xff] %v19078_v40  ;;  %v6250_v26 = vadd.f32 %v14748_v61, %v13856_v37 }
 0xf50   :  { %v14806_v19 = vpop.f32.mrf.mxu1  ;;  %v14846_v59 = vpop.f32.mrf.mxu0 }
 0xf51   :  { %v19082_v34 = vadd.f32 %v14788_v31, %v6250_v26 }
 0xf52   :  { %v14808_v15 = vpop.f32.mrf.mxu1  ;;  %v19084_v11 = vpop.f32.mrf.mxu0 }
 0xf53   :  { %21579 = vst [vmem:[#allocation18_spill] sm:$0xff] %v19082_v34 }
 0xf54   :  { %v14809_v20 = vpop.f32.mrf.mxu1  ;;  %v19086_v16 = vpop.f32.mrf.mxu0 }
 0xf56   :  { %v14811_v43 = vpop.f32.mrf.mxu1  ;;  %v19088_v46 = vpop.f32.mrf.mxu0 }
 0xf58   :  { %v14812_v44 = vpop.f32.mrf.mxu1  ;;  %v19090_v18 = vpop.f32.mrf.mxu0 }
 0xf5a   :  { %v19092_v50 = vpop.f32.mrf.mxu1  ;;  %v19094_v37 = vpop.f32.mrf.mxu0 }
 0xf5c   :  { %v14815_v24 = vpop.f32.mrf.mxu1  ;;  %v19096_v47 = vpop.f32.mrf.mxu0 }
 0xf5e   :  { %v19098_v57 = vpop.f32.mrf.mxu1  ;;  %v19100_v48 = vpop.f32.mrf.mxu0 }
 0xf60   :  { %v19102_v22 = vpop.f32.mrf.mxu1  ;;  %v19104_v17 = vpop.f32.mrf.mxu0 }
 0xf62   :  { %v19106_v33 = vpop.f32.mrf.mxu1  ;;  %v19108_v49 = vpop.f32.mrf.mxu0 }
 0xf64   :  { %v19110_v32 = vpop.f32.mrf.mxu1  ;;  %v19112_v23 = vpop.f32.mrf.mxu0 }
 0xf66   :  { %v19114_v29 = vpop.f32.mrf.mxu1  ;;  %v19116_v2 = vpop.f32.mrf.mxu0 }
 0xf67   :  { %21580 = vst [vmem:[#allocation19_spill] sm:$0xff] %v19116_v2 }
 0xf68   :  { %v19118_v35 = vpop.f32.mrf.mxu1  ;;  %v19120_v36 = vpop.f32.mrf.mxu0 }
 0xf69   :  { %21581 = vst [vmem:[#allocation20_spill] sm:$0xff] %v19120_v36 }
 0xf6a   :  { %v19122_v28 = vpop.f32.mrf.mxu1  ;;  %v19124_v7 = vpop.f32.mrf.mxu0 }
 0xf6b   :  { %21582 = vst [vmem:[#allocation21_spill] sm:$0xff] %v19122_v28  ;;  %21583 = vst [vmem:[#allocation22_spill] sm:$0xff] %v19124_v7  ;;  %v14807_v7 = vadd.f32 %v14806_v19, %v14805_v13  ;;  %v14813_v13 = vadd.f32 %v14812_v44, %v14811_v43 }
 0xf6c   :  { %v19126_v12 = vpop.f32.mrf.mxu1  ;;  %v19128_v60 = vpop.f32.mrf.mxu0 }
 0xf6d   :  { %21584 = vst [vmem:[#allocation23_spill] sm:$0xff] %v19126_v12  ;;  %21585 = vst [vmem:[#allocation24_spill] sm:$0xff] %v19128_v60  ;;  %v6353_v41 = vadd.f32 %v14807_v7, %v19066_v55  ;;  %v14810_v12 = vadd.f32 %v14809_v20, %v14808_v15  ;;  %v14850_v55 = vadd.f32 %v19086_v16, %v19084_v11 }
 0xf6e   :  { %v14885_v62 = vpop.f32.mrf.mxu1  ;;  %v14925_v10 = vpop.f32.mrf.mxu0 }
 0xf70   :  { %v14886_v58 = vpop.f32.mrf.mxu1  ;;  %v14926_v61 = vpop.f32.mrf.mxu0 }
 0xf71   :  { %v14887_v40 = vadd.f32 %v14886_v58, %v14885_v62 }
 0xf72   :  { %v14888_v26 = vpop.f32.mrf.mxu1  ;;  %v14928_v31 = vpop.f32.mrf.mxu0 }
 0xf74   :  { %v14889_v3 = vpop.f32.mrf.mxu1  ;;  %v14929_v14 = vpop.f32.mrf.mxu0 }
 0xf75   :  { %v14890_v20 = vadd.f32 %v14889_v3, %v14888_v26 }
 0xf76   :  { %v14891_v56 = vpop.f32.mrf.mxu1  ;;  %v19130_v39 = vpop.f32.mrf.mxu0 }
 0xf78   :  { %v14892_v54 = vpop.f32.mrf.mxu1  ;;  %v19132_v53 = vpop.f32.mrf.mxu0 }
 0xf7a   :  { %v14894_v51 = vpop.f32.mrf.mxu1  ;;  %v19134_v9 = vpop.f32.mrf.mxu0 }
 0xf7c   :  { %v14895_v42 = vpop.f32.mrf.mxu1  ;;  %v19136_v4 = vpop.f32.mrf.mxu0 }
 0xf7e   :  { %v19138_v52 = vpop.f32.mrf.mxu1  ;;  %v19140_v21 = vpop.f32.mrf.mxu0 }
 0xf7f   :  { %21586 = vst [vmem:[#allocation25_spill] sm:$0xff] %v19140_v21 }
 0xf80   :  { %v19142_v8 = vpop.f32.mrf.mxu1  ;;  %v19144_v30 = vpop.f32.mrf.mxu0 }
 0xf81   :  { %21587 = vst [vmem:[#allocation26_spill] sm:$0xff] %v19144_v30  ;;  %v14847_v30 = vadd.f32 %v14846_v59, %v19080_v25  ;;  %v6361_v25 = vadd.f32 %v14813_v13, %v19070_v6  ;;  %v14816_v59 = vadd.f32 %v14815_v24, %v19092_v50  ;;  %v14819_v6 = vadd.f32 %v19102_v22, %v19098_v57 }
 0xf82   :  { %v19146_v60 = vpop.f32.mrf.mxu1  ;;  %v19148_v63 = vpop.f32.mrf.mxu0  ;;  %v14930_v50 = vadd.f32 %v14929_v14, %v14928_v31  ;;  %v14933_v14 = vadd.f32 %v19132_v53, %v19130_v39 }
 0xf83   :  { %21588 = vst [vmem:[#allocation27_spill] sm:$0xff] %v19146_v60  ;;  %21589 = vst [vmem:[#allocation28_spill] sm:$0xff] %v19148_v63  ;;  %v6418_v63 = vadd.f32 %v14847_v30, %v6353_v41  ;;  %v14927_v41 = vadd.f32 %v14926_v61, %v14925_v10  ;;  %v6369_v22 = vadd.f32 %v14819_v6, %v19074_v45 }
 0xf84   :  { %v19150_v34 = vpop.f32.mrf.mxu1  ;;  %v19152_v36 = vpop.f32.mrf.mxu0 }
 0xf85   :  { %21590 = vst [vmem:[#allocation29_spill] sm:$0xff] %v19150_v34  ;;  %21591 = vst [vmem:[#allocation30_spill] sm:$0xff] %v19152_v36  ;;  %v6356_v36 = vadd.f32 %v14810_v12, %v19068_v0  ;;  %v6483_v15 = vadd.f32 %v14887_v40, %v6418_v63  ;;  %v14853_v0 = vadd.f32 %v19090_v18, %v19088_v46 }
 0xf86   :  { %v19154_v2 = vpop.f32.mrf.mxu1  ;;  %v19157_v28 = vpop.f32.mrf.mxu0  ;;  %v14893_v12 = vadd.f32 %v14892_v54, %v14891_v56  ;;  %v6364_v40 = vadd.f32 %v14816_v59, %v19072_v1  ;;  %v14856_v46 = vadd.f32 %v19096_v47, %v19094_v37  ;;  %v14896_v56 = vadd.f32 %v14895_v42, %v14894_v51 }
 0xf87   :  { %21592 = vst [vmem:[#allocation31_spill] sm:$0xff] %v19154_v2  ;;  %v6421_v44 = vadd.f32 %v14850_v55, %v6356_v36  ;;  %v6548_v58 = vadd.f32 %v14927_v41, %v6483_v15  ;;  %v6426_v3 = vadd.f32 %v14853_v0, %v6361_v25  ;;  %v14822_v1 = vadd.f32 %v19110_v32, %v19106_v33 }
 0xf88   :  { %v19159_v21 = vpop.f32.mrf.mxu1  ;;  %v19162_v60 = vpop.f32.mrf.mxu0  ;;  %v6429_v15 = vadd.f32 %v14856_v46, %v6364_v40  ;;  %v14859_v51 = vadd.f32 %v19104_v17, %v19100_v48  ;;  %v14899_v33 = vadd.f32 %v19142_v8, %v19138_v52  ;;  %v14936_v48 = vadd.f32 %v19136_v4, %v19134_v9 }
 0xf89   :  { %v6491_v54 = vadd.f32 %v14893_v12, %v6426_v3  ;;  %v6372_v59 = vadd.f32 %v14822_v1, %v19076_v27  ;;  %v21596_v3 = vld [vmem:[#allocation17_spill] sm:$0xff] }
 0xf8a   :  { %v19164_v19 = vpop.f32.mrf.mxu1  ;;  %v19167_v34 = vpop.f32.mrf.mxu0  ;;  %v6494_v47 = vadd.f32 %v14896_v56, %v6429_v15  ;;  %v21594_v27 = vld [vmem:[#allocation27_spill] sm:$0xff] }
 0xf8b   :  { %21593 = vst [vmem:[#allocation32_spill] sm:$0xff] %v19167_v34  ;;  %v6486_v34 = vadd.f32 %v14890_v20, %v6421_v44 }
 0xf8c   :  { %v19169_v2 = vpop.f32.mrf.mxu1  ;;  %v19173_v7 = vpop.f32.mrf.mxu0  ;;  %v6559_v0 = vadd.f32 %v14936_v48, %v6494_v47  ;;  %v21595_v12 = vld [vmem:[#allocation29_spill] sm:$0xff]  ;;  %v21610_v48 = vld [vmem:[#allocation24_spill] sm:$0xff] }
 0xf8d   :  { %v6551_v61 = vadd.f32 %v14930_v50, %v6486_v34  ;;  %v6556_v34 = vadd.f32 %v14933_v14, %v6491_v54  ;;  %v21601_v54 = vld [vmem:[#allocation4_spill] sm:$0xff] }
 0xf8e   :  { %v14965_v43 = vpop.f32.mrf.mxu1  ;;  %v15005_v30 = vpop.f32.mrf.mxu0 }
 0xf90   :  { %v14966_v62 = vpop.f32.mrf.mxu1  ;;  %v15006_v63 = vpop.f32.mrf.mxu0 }
 0xf91   :  { %v14967_v11 = vadd.f32 %v14966_v62, %v14965_v43  ;;  %v15007_v36 = vadd.f32 %v15006_v63, %v15005_v30  ;;  %v6434_v43 = vadd.f32 %v14859_v51, %v6369_v22  ;;  %v14862_v30 = vadd.f32 %v19112_v23, %v19108_v49  ;;  %v21599_v49 = vld [vmem:[#allocation25_spill] sm:$0xff]  ;;  %v21600_v23 = vld [vmem:[#allocation26_spill] sm:$0xff]  ;;  %v21605_v51 = vld [vmem:[#allocation28_spill] sm:$0xff] }
 0xf92   :  { %v14968_v16 = vpop.f32.mrf.mxu1  ;;  %v15008_v10 = vpop.f32.mrf.mxu0  ;;  %v14902_v62 = vadd.f32 %v21595_v12, %v21594_v27 }
 0xf93   :  { %v6613_v24 = vadd.f32 %v14967_v11, %v6548_v58  ;;  %v6437_v63 = vadd.f32 %v14862_v30, %v6372_v59 }
 0xf94   :  { %v14969_v18 = vpop.f32.mrf.mxu1  ;;  %v15009_v55 = vpop.f32.mrf.mxu0 }
 0xf95   :  { %v6678_v26 = vadd.f32 %v15007_v36, %v6613_v24  ;;  %v14970_v13 = vadd.f32 %v14969_v18, %v14968_v16  ;;  %v15010_v20 = vadd.f32 %v15009_v55, %v15008_v10  ;;  %v21598_v16 = vld [vmem:[#allocation23_spill] sm:$0xff]  ;;  %v14939_v24 = vadd.f32 %v21600_v23, %v21599_v49  ;;  %v21612_v49 = vld [vmem:[#allocation32_spill] sm:$0xff] }
 0xf96   :  { %v14971_v57 = vpop.f32.mrf.mxu1  ;;  %v15011_v37 = vpop.f32.mrf.mxu0  ;;  %v21602_v18 = vld [vmem:[#allocation19_spill] sm:$0xff] }
 0xf97   :  { %v6616_v31 = vadd.f32 %v14970_v13, %v6551_v61  ;;  %v19190_v42 = vadd.f32 %v6678_v26, %v18249_v5  ;;  %v14825_v5 = vadd.f32 %v19118_v35, %v19114_v29  ;;  %v6499_v35 = vadd.f32 %v14899_v33, %v6434_v43  ;;  %v21603_v61 = vld [vmem:[#allocation20_spill] sm:$0xff]  ;;  %v21604_v55 = vld [vmem:[#allocation31_spill] sm:$0xff]  ;;  %v21607_v33 = vld [vmem:[#allocation18_spill] sm:$0xff] }
 0xf98   :  { %v14972_v25 = vpop.f32.mrf.mxu1  ;;  %v15012_v39 = vpop.f32.mrf.mxu0  ;;  %v14865_v26 = vadd.f32 %v21603_v61, %v21602_v18  ;;  %v6502_v13 = vadd.f32 %v14902_v62, %v6437_v63  ;;  %v14905_v15 = vadd.f32 %v19159_v21, %v21604_v55  ;;  %v21608_v21 = vld [vmem:[#allocation3_spill] sm:$0xff]  ;;  %v14945_v62 = vadd.f32 %v19162_v60, %v19157_v28 }
 0xf99   :  { %v6681_v32 = vadd.f32 %v15010_v20, %v6616_v31  ;;  %v14973_v53 = vadd.f32 %v14972_v25, %v14971_v57  ;;  %v6718_v45 = vsel %vm88_vm0, %v19190_v42, 0.0  ;;  %v15013_v41 = vadd.f32 %v15012_v39, %v15011_v37 }
 0xf9a   :  { %v14974_v17 = vpop.f32.mrf.mxu1  ;;  %6719 = vadd.xlane.f32.xlu1 %v6718_v45  ;;  %v15014_v8 = vpop.f32.mrf.mxu0  ;;  %v6377_v40 = vadd.f32 %v14825_v5, %v21596_v3  ;;  %v6564_v14 = vadd.f32 %v14939_v24, %v6499_v35  ;;  %v21609_v5 = vld [vmem:[#allocation22_spill] sm:$0xff]  ;;  %v14948_v28 = vadd.f32 %v19173_v7, %v21612_v49  ;;  %v21616_v49 = vmov 0.0  }
 0xf9b   :  { %v6621_v44 = vadd.f32 %v14973_v53, %v6556_v34  ;;  %v19204_v52 = vadd.f32 %v6681_v32, %v18253_v38  ;;  %v21597_v38 = vld [vmem:[#allocation21_spill] sm:$0xff]  ;;  %v21606_v34 = vld [vmem:[#allocation30_spill] sm:$0xff] }
 0xf9c   :  { %v14975_v29 = vpop.f32.mrf.mxu1  ;;  %v15015_v9 = vpop.f32.mrf.mxu0  ;;  %v14828_v6 = vadd.f32 %v21598_v16, %v21597_v38  ;;  %v6442_v37 = vadd.f32 %v14865_v26, %v6377_v40  ;;  %v14942_v47 = vadd.f32 %v21606_v34, %v21605_v51 }
 0xf9d   :  { %v6686_v58 = vadd.f32 %v15013_v41, %v6621_v44  ;;  %v14976_v4 = vadd.f32 %v14975_v29, %v14974_v17  ;;  %v6721_v11 = vsel %vm88_vm0, %v19204_v52, 0.0  ;;  %v15016_v10 = vadd.f32 %v15015_v9, %v15014_v8 }
 0xf9e   :  { %v14977_v50 = vpop.f32.mrf.mxu1  ;;  %6722 = vadd.xlane.f32.xlu0 %v6721_v11  ;;  %v15017_v46 = vpop.f32.mrf.mxu0  ;;  %v6380_v32 = vadd.f32 %v14828_v6, %v21607_v33  ;;  %v14868_v17 = vadd.f32 %v21610_v48, %v21609_v5  ;;  %v6567_v43 = vadd.f32 %v14942_v47, %v6502_v13  ;;  %v6507_v44 = vadd.f32 %v14905_v15, %v6442_v37  ;;  %v21611_v11 = vld [vmem:[#allocation5_spill] sm:$0xff] }
 0xf9f   :  { %v6624_v36 = vadd.f32 %v14976_v4, %v6559_v0  ;;  %v19218_v56 = vadd.f32 %v6686_v58, %v21601_v54  ;;  %v14908_v8 = vadd.f32 %v19169_v2, %v19164_v19 }
 0xfa0   :  { %v14978_v1 = vpop.f32.mrf.mxu1  ;;  %v15018_v31 = vpop.f32.mrf.mxu0  ;;  %v6445_v35 = vadd.f32 %v14868_v17, %v6380_v32  ;;  %v6572_v3 = vadd.f32 %v14945_v62, %v6507_v44 }
 0xfa1   :  { %v6689_v57 = vadd.f32 %v15016_v10, %v6624_v36  ;;  %v14979_v22 = vadd.f32 %v14978_v1, %v14977_v50  ;;  %v6724_v20 = vsel %vm88_vm0, %v19218_v56, 0.0  ;;  %v15019_v39 = vadd.f32 %v15018_v31, %v15017_v46  ;;  %v21613_v36 = vld [vmem:[#allocation6_spill] sm:$0xff]  ;;  %v21614_v1 = vld [vmem:[#allocation8_spill] sm:$0xff] }
 0xfa2   :  { %v14980_v25 = vpop.f32.mrf.mxu1  ;;  %6725 = vadd.xlane.f32.xlu1 %v6724_v20  ;;  %v15020_v45 = vpop.f32.mrf.mxu0  ;;  %v6510_v2 = vadd.f32 %v14908_v8, %v6445_v35 }
 0xfa3   :  { %v6629_v53 = vadd.f32 %v14979_v22, %v6564_v14  ;;  %v19230_v59 = vadd.f32 %v6689_v57, %v21608_v21  ;;  %v21615_v22 = vld [vmem:[#allocation7_spill] sm:$0xff] }
 0xfa4   :  { %v14981_v41 = vpop.f32.mrf.mxu1  ;;  %v15021_v27 = vpop.f32.mrf.mxu0  ;;  %v6575_v54 = vadd.f32 %v14948_v28, %v6510_v2 }
 0xfa5   :  { %v6694_v30 = vadd.f32 %v15019_v39, %v6629_v53  ;;  %v14982_v0 = vadd.f32 %v14981_v41, %v14980_v25  ;;  %v6727_v12 = vsel %vm88_vm0, %v19230_v59, 0.0  ;;  %v15022_v4 = vadd.f32 %v15021_v27, %v15020_v45 }
 0xfa6   :  { %v14983_v29 = vpop.f32.mrf.mxu1  ;;  %6728 = vadd.xlane.f32.xlu0 %v6727_v12  ;;  %v15023_v9 = vpop.f32.mrf.mxu0 }
 0xfa7   :  { %v6632_v58 = vadd.f32 %v14982_v0, %v6567_v43  ;;  %v6712_v63 = vadd.f32 %v6694_v30, %v21611_v11 }
 0xfa8   :  { %v14984_v40 = vpop.f32.mrf.mxu1  ;;  %v15024_v16 = vpop.f32.mrf.mxu0 }
 0xfa9   :  { %v6697_v19 = vadd.f32 %v15022_v4, %v6632_v58  ;;  %v14985_v38 = vadd.f32 %v14984_v40, %v14983_v29  ;;  %v6730_v6 = vsel %vm88_vm0, %v6712_v63, 0.0  ;;  %v15025_v23 = vadd.f32 %v15024_v16, %v15023_v9 }
 0xfaa   :  { %v14986_v50 = vpop.f32.mrf.mxu1  ;;  %6731 = vadd.xlane.f32.xlu1 %v6730_v6  ;;  %v15026_v24 = vpop.f32.mrf.mxu0  ;;  %v16578_v6 = vld [vmem:[%s21496_s1 + $0x18] sm:$0xff]  }
 0xfab   :  { %v6637_v60 = vadd.f32 %v14985_v38, %v6572_v3  ;;  %v6713_v10 = vadd.f32 %v6697_v19, %v21613_v36  ;;  %15897 = vmatprep.subr.bf16.mxu1 %v16578_v6 }
 0xfac   :  { %v14987_v46 = vpop.f32.mrf.mxu1  ;;  %v15027_v26 = vpop.f32.mrf.mxu0  ;;  %15898 = vmatpush3.bf16.msra.mxu1 %v16578_v6 }
 0xfad   :  { %v6702_v18 = vadd.f32 %v15025_v23, %v6637_v60  ;;  %v14988_v61 = vadd.f32 %v14987_v46, %v14986_v50  ;;  %v6733_v13 = vsel %vm88_vm0, %v6713_v10, 0.0  ;;  %v15028_v15 = vadd.f32 %v15027_v26, %v15026_v24  ;;  %v16579_v50 = vld [vmem:[%s21496_s1 + $0x10] sm:$0xff]  }
 0xfae   :  { %6734 = vadd.xlane.f32.xlu0 %v6733_v13  ;;  %15899 = vmatprep.subr.bf16.mxu1 %v16579_v50 }
 0xfaf   :  { %v6640_v55 = vadd.f32 %v14988_v61, %v6575_v54  ;;  %v6714_v14 = vadd.f32 %v6702_v18, %v21614_v1 }
 0xfb0   :  { %15900 = vmatpush3.bf16.msra.mxu1 %v16579_v50 }
 0xfb1   :  { %v6705_v57 = vadd.f32 %v15028_v15, %v6640_v55  ;;  %v6736_v7 = vsel %vm88_vm0, %v6714_v14, 0.0  ;;  %15915 = vmatprep.subr.bf16.mxu1 %v21616_v49 }
 0xfb2   :  { %6737 = vadd.xlane.f32.xlu1 %v6736_v7  ;;  %v13985_v7 = vld [vmem:[%s21507_s11] ss:$0 sm:$0xff] }
 0xfb3   :  { %v6715_v31 = vadd.f32 %v6705_v57, %v21615_v22 }
 0xfb5   :  { %v6739_v20 = vsel %vm88_vm0, %v6715_v31, 0.0 }
 0xfb6   :  { %6740 = vadd.xlane.f32.xlu0 %v6739_v20 }
0x1023   :  { %v6720_v37 = vpop.xlane.xlu1 %6719 }
0x1024   :  { %v6742_v51 = vmul.f32 0.03125, %v6720_v37 }
0x1026   :  { %v19251_v34 = vsub.f32 %v19190_v42, %v6742_v51 }
0x1027   :  { %v6723_v47 = vpop.xlane.xlu0 %6722 }
0x1028   :  { %v6743_v25 = vmul.f32 0.03125, %v6723_v47  ;;  %v6758_v33 = vmul.f32 %v19251_v34, %v19251_v34 }
0x102a   :  { %v19256_v32 = vsub.f32 %v19204_v52, %v6743_v25  ;;  %v6766_v53 = vsel %vm88_vm0, %v6758_v33, 0.0  ;;  %v13986_v25 = vld [vmem:[%s21508_s12] ss:$0 sm:$0xff] }
0x102b   :  { %v6726_v39 = vpop.xlane.xlu1 %6725  ;;  %6767 = vadd.xlane.f32.xlu1 %v6766_v53 }
0x102c   :  { %v6744_v45 = vmul.f32 0.03125, %v6726_v39  ;;  %v6759_v21 = vmul.f32 %v19256_v32, %v19256_v32 }
0x102e   :  { %v19262_v5 = vsub.f32 %v19218_v56, %v6744_v45  ;;  %v6769_v42 = vsel %vm88_vm0, %v6759_v21, 0.0 }
0x102f   :  { %v6729_v48 = vpop.xlane.xlu0 %6728  ;;  %6770 = vadd.xlane.f32.xlu0 %v6769_v42 }
0x1030   :  { %v6745_v17 = vmul.f32 0.03125, %v6729_v48  ;;  %v6760_v52 = vmul.f32 %v19262_v5, %v19262_v5 }
0x1032   :  { %v19268_v43 = vsub.f32 %v19230_v59, %v6745_v17  ;;  %v6772_v44 = vsel %vm88_vm0, %v6760_v52, 0.0 }
0x1033   :  { %v6732_v41 = vpop.xlane.xlu1 %6731  ;;  %6773 = vadd.xlane.f32.xlu1 %v6772_v44 }
0x1034   :  { %v6746_v8 = vmul.f32 0.03125, %v6732_v41  ;;  %v6761_v56 = vmul.f32 %v19268_v43, %v19268_v43 }
0x1036   :  { %v19273_v30 = vsub.f32 %v6712_v63, %v6746_v8  ;;  %v6775_v0 = vsel %vm88_vm0, %v6761_v56, 0.0 }
0x1037   :  { %v6735_v27 = vpop.xlane.xlu0 %6734  ;;  %6776 = vadd.xlane.f32.xlu0 %v6775_v0 }
0x1038   :  { %v6747_v12 = vmul.f32 0.03125, %v6735_v27  ;;  %v6762_v62 = vmul.f32 %v19273_v30, %v19273_v30 }
0x103a   :  { %v19278_v59 = vsub.f32 %v6713_v10, %v6747_v12  ;;  %v6778_v29 = vsel %vm88_vm0, %v6762_v62, 0.0 }
0x103b   :  { %6779 = vadd.xlane.f32.xlu1 %v6778_v29  ;;  %v6738_v35 = vpop.xlane.xlu1 %6737 }
0x103c   :  { %v6748_v58 = vmul.f32 0.03125, %v6738_v35  ;;  %v6763_v4 = vmul.f32 %v19278_v59, %v19278_v59 }
0x103e   :  { %v19283_v9 = vsub.f32 %v6714_v14, %v6748_v58  ;;  %v6781_v11 = vsel %vm88_vm0, %v6763_v4, 0.0 }
0x103f   :  { %6782 = vadd.xlane.f32.xlu0 %v6781_v11  ;;  %v6741_v63 = vpop.xlane.xlu0 %6740 }
0x1040   :  { %v6749_v3 = vmul.f32 0.03125, %v6741_v63  ;;  %v6764_v40 = vmul.f32 %v19283_v9, %v19283_v9 }
0x1042   :  { %v19288_v2 = vsub.f32 %v6715_v31, %v6749_v3  ;;  %v6784_v19 = vsel %vm88_vm0, %v6764_v40, 0.0 }
0x1043   :  { %6785 = vadd.xlane.f32.xlu1 %v6784_v19 }
0x1044   :  { %v6765_v38 = vmul.f32 %v19288_v2, %v19288_v2 }
0x1046   :  { %v6787_v16 = vsel %vm88_vm0, %v6765_v38, 0.0 }
0x1047   :  { %6788 = vadd.xlane.f32.xlu0 %v6787_v16 }
0x10b4   :  { %v6768_v28 = vpop.xlane.xlu1 %6767 }
0x10b5   :  { %v6790_v60 = vmul.f32 0.03125, %v6768_v28 }
0x10b7   :  { %v6798_v23 = vadd.f32 1e-05, %v6790_v60 }
0x10b8   :  { %v6771_v24 = vpop.xlane.xlu0 %6770 }
0x10b9   :  { %16854 = vrsqrt.f32 %v6798_v23  ;;  %v6791_v36 = vmul.f32 0.03125, %v6771_v24 }
0x10bb   :  { %v6799_v10 = vadd.f32 1e-05, %v6791_v36 }
0x10bc   :  { %v6774_v46 = vpop.xlane.xlu1 %6773 }
0x10bd   :  { %16856 = vrsqrt.f32 %v6799_v10  ;;  %v6792_v54 = vmul.f32 0.03125, %v6774_v46 }
0x10bf   :  { %v6800_v18 = vadd.f32 1e-05, %v6792_v54 }
0x10c0   :  { %v6777_v61 = vpop.xlane.xlu0 %6776 }
0x10c1   :  { %16858 = vrsqrt.f32 %v6800_v18  ;;  %v6793_v26 = vmul.f32 0.03125, %v6777_v61 }
0x10c3   :  { %v6801_v13 = vadd.f32 1e-05, %v6793_v26 }
0x10c4   :  { %v6780_v55 = vpop.xlane.xlu1 %6779 }
0x10c5   :  { %16860 = vrsqrt.f32 %v6801_v13  ;;  %v6794_v15 = vmul.f32 0.03125, %v6780_v55 }
0x10c6   :  { %v16855_v1 = vpop.eup %16854 }
0x10c7   :  { %v6802_v14 = vadd.f32 1e-05, %v6794_v15  ;;  %v6814_v57 = vmul.f32 %v16855_v1, %v19251_v34 }
0x10c8   :  { %v6783_v22 = vpop.xlane.xlu0 %6782 }
0x10c9   :  { %16862 = vrsqrt.f32 %v6802_v14  ;;  %v6795_v31 = vmul.f32 0.03125, %v6783_v22  ;;  %v6828_v47 = vmul.f32 %v13985_v7, %v6814_v57 }
0x10ca   :  { %v16857_v20 = vpop.eup %16856 }
0x10cb   :  { %v6803_v37 = vadd.f32 1e-05, %v6795_v31  ;;  %v6815_v51 = vmul.f32 %v16857_v20, %v19256_v32  ;;  %v19310_v42 = vadd.f32 %v13986_v25, %v6828_v47 }
0x10cc   :  { %v6786_v33 = vpop.xlane.xlu1 %6785 }
0x10cd   :  { %16864 = vrsqrt.f32 %v6803_v37  ;;  %v6796_v53 = vmul.f32 0.03125, %v6786_v33  ;;  %v6829_v34 = vmul.f32 %v13985_v7, %v6815_v51 }
0x10ce   :  { %v16859_v39 = vpop.eup %16858 }
0x10cf   :  { %v6816_v45 = vmul.f32 %v16859_v39, %v19262_v5  ;;  %v6804_v21 = vadd.f32 1e-05, %v6796_v53  ;;  %v19312_v48 = vadd.f32 %v13986_v25, %v6829_v34 }
0x10d0   :  { %v6789_v17 = vpop.xlane.xlu0 %6788 }
0x10d1   :  { %16866 = vrsqrt.f32 %v6804_v21  ;;  %v6797_v32 = vmul.f32 0.03125, %v6789_v17  ;;  %v6855_v52 = vpack.c.bf16 %v19312_v48, %v19310_v42  ;;  %v6830_v41 = vmul.f32 %v13985_v7, %v6816_v45 }
0x10d2   :  { %v16861_v44 = vpop.eup %16860 }
0x10d3   :  { %v6817_v8 = vmul.f32 %v16861_v44, %v19268_v43  ;;  %v6805_v56 = vadd.f32 1e-05, %v6797_v32  ;;  %15901 = vmatprep.mubr.msk.bf16.mxu1 %vm88_vm0, %v6855_v52  ;;  %v19318_v27 = vadd.f32 %v13986_v25, %v6830_v41 }
0x10d5   :  { %v6831_v0 = vmul.f32 %v13985_v7, %v6817_v8  ;;  %16868 = vrsqrt.f32 %v6805_v56 }
0x10d6   :  { %v16863_v5 = vpop.eup %16862 }
0x10d7   :  { %v19320_v12 = vadd.f32 %v13986_v25, %v6831_v0  ;;  %v6818_v62 = vmul.f32 %v16863_v5, %v19273_v30 }
0x10d9   :  { %v6856_v29 = vpack.c.bf16 %v19320_v12, %v19318_v27  ;;  %v6832_v58 = vmul.f32 %v13985_v7, %v6818_v62 }
0x10da   :  { %v16865_v35 = vpop.eup %16864 }
0x10db   :  { %15902 = vmatmul.mubr.msk.bf16.vlgmr.msra.gmra.mxu1 %vm88_vm0, %v6856_v29  ;;  %v6819_v43 = vmul.f32 %v16865_v35, %v19278_v59  ;;  %v19328_v3 = vadd.f32 %v13986_v25, %v6832_v58 }
0x10dd   :  { %v6833_v4 = vmul.f32 %v13985_v7, %v6819_v43 }
0x10de   :  { %v16867_v11 = vpop.eup %16866 }
0x10df   :  { %v6820_v63 = vmul.f32 %v16867_v11, %v19283_v9  ;;  %v19330_v40 = vadd.f32 %v13986_v25, %v6833_v4 }
0x10e1   :  { %v6857_v30 = vpack.c.bf16 %v19330_v40, %v19328_v3  ;;  %v6834_v16 = vmul.f32 %v13985_v7, %v6820_v63 }
0x10e2   :  { %v16869_v19 = vpop.eup %16868 }
0x10e3   :  { %v6821_v38 = vmul.f32 %v16869_v19, %v19288_v2  ;;  %15905 = vmatprep.mubr.msk.bf16.mxu1 %vm88_vm0, %v6857_v30  ;;  %v19336_v59 = vadd.f32 %v13986_v25, %v6834_v16  ;;  %v13992_v2 = vld [vmem:[%s21498_s2 + $0x1] ss:$0 sm:$0xff]  ;;  %s21617_s2 = smov 56  }
0x10e5   :  { %v6835_v6 = vmul.f32 %v13985_v7, %v6821_v38 }
0x10e7   :  { %v19338_v50 = vadd.f32 %v13986_v25, %v6835_v6 }
0x10e9   :  { %v6858_v9 = vpack.c.bf16 %v19338_v50, %v19336_v59 }
0x10eb   :  { %15906 = vmatmul.mubr.msk.bf16.gmra.mxu1 %vm88_vm0, %v6858_v9 }
0x10ec   :  { %15917 = vmatprep.mubr.msk.bf16.mxu1 %vm17039_vm1, %v21616_v49 }
0x119b   :  { %v15903_v28 = vpop.f32.mrf.mxu1 }
0x119c   :  { %v6934_v36 = vadd.f32 %v15903_v28, %v13992_v2 }
0x119d   :  { %v6925_v60 = vpop.f32.mrf.mxu1 }
0x119e   :  { %v6926_v23 = vadd.f32 %v13992_v2, %v6925_v60  ;;  %v19352_v18 = vpack.c.bf16 %v6934_v36, %v6934_v36 }
0x119f   :  { %v15904_v24 = vpop.f32.mrf.mxu1 }
0x11a0   :  { %v19348_v10 = vpack.c.bf16 %v6926_v23, %v6926_v23  ;;  %v6937_v61 = vadd.f32 %v15904_v24, %v13992_v2 }
0x11a1   :  { %v6928_v46 = vpop.f32.mrf.mxu1 }
0x11a2   :  { %v6929_v54 = vadd.f32 %v13992_v2, %v6928_v46  ;;  %6965 = vrot.lane.b32.xlu1 %v19348_v10, %s17040_s25  ;;  %v19360_v13 = vpack.c.bf16 %v6937_v61, %v6937_v61 }
0x11a4   :  { %v19354_v26 = vpack.c.bf16 %v6929_v54, %v6929_v54 }
0x11a6   :  { %7014 = vrot.lane.b32.xlu0 %v19354_v26, %s17040_s25  ;;  %7063 = vrot.lane.b32.xlu1 %v19352_v18, %s17040_s25 }
0x11aa   :  { %7112 = vrot.lane.b32.xlu1 %v19360_v13, %s17040_s25 }
0x11ab   :  { %v15907_v55 = vpop.f32.mrf.mxu1 }
0x11ac   :  { %v6950_v57 = vadd.f32 %v15907_v55, %v13992_v2 }
0x11ad   :  { %v6941_v15 = vpop.f32.mrf.mxu1 }
0x11ae   :  { %v6942_v1 = vadd.f32 %v13992_v2, %v6941_v15  ;;  %v19368_v20 = vpack.c.bf16 %v6950_v57, %v6950_v57 }
0x11af   :  { %v15908_v14 = vpop.f32.mrf.mxu1 }
0x11b0   :  { %v19364_v7 = vpack.c.bf16 %v6942_v1, %v6942_v1  ;;  %v6953_v37 = vadd.f32 %v15908_v14, %v13992_v2 }
0x11b1   :  { %v6944_v22 = vpop.f32.mrf.mxu1 }
0x11b2   :  { %v6945_v31 = vadd.f32 %v13992_v2, %v6944_v22  ;;  %7161 = vrot.lane.b32.xlu0 %v19364_v7, %s17040_s25  ;;  %v19376_v47 = vpack.c.bf16 %v6953_v37, %v6953_v37 }
0x11b4   :  { %v19370_v51 = vpack.c.bf16 %v6945_v31, %v6945_v31 }
0x11b6   :  { %7210 = vrot.lane.b32.xlu1 %v19370_v51, %s17040_s25  ;;  %7259 = vrot.lane.b32.xlu0 %v19368_v20, %s17040_s25 }
0x11ba   :  { %7308 = vrot.lane.b32.xlu1 %v19376_v47, %s17040_s25  ;;  %7508 = vrot.lane.b32.xlu0 %v19354_v26, %s17041_s26  ;;  %s21618_s25 = smov 80  }
0x11be   :  { %7460 = vrot.lane.b32.xlu1 %v19348_v10, %s17041_s26 }
0x11c2   :  { %7556 = vrot.lane.b32.xlu1 %v19352_v18, %s17041_s26 }
0x11c6   :  { %7604 = vrot.lane.b32.xlu1 %v19360_v13, %s17041_s26 }
0x1214   :  { %v6966_v25 = vpop.permute.xlu1 %6965 }
0x1215   :  { %v6971_v33 = vsel %vm177_vm2, %v6966_v25, 0 }
0x1216   :  { %15910 = vmatpush3.bf16.xpose.msra.mxu0 %v6971_v33 }
0x1217   :  { %15921 = vmatprep.subr.bf16.mxu0 %v21616_v49 }
0x1218   :  { %v7015_v53 = vpop.permute.xlu0 %7014  ;;  %v7064_v34 = vpop.permute.xlu1 %7063 }
0x1219   :  { %v7020_v39 = vsel %vm177_vm2, %v7015_v53, 0  ;;  %v7069_v45 = vsel %vm177_vm2, %v7064_v34, 0 }
0x121a   :  { %15916 = vmatpush3.bf16.xpose.msra.mxu1 %v7020_v39 }
0x121b   :  { %15927 = vmatprep.subr.bf16.mxu1 %v21616_v49 }
0x121c   :  { %v7113_v21 = vpop.permute.xlu1 %7112 }
0x121d   :  { %15912 = vmatmul.mubr.msk.bf16.vlgmr.msra.gmra.mxu0 %vm177_vm2, %v19348_v10  ;;  %v7118_v17 = vsel %vm177_vm2, %v7113_v21, 0 }
0x121e   :  { %15922 = vmatpush3.bf16.xpose.msra.mxu0 %v7069_v45  ;;  %15923 = vmatprep.mubr.msk.bf16.mxu0 %vm17039_vm1, %v21616_v49 }
0x121f   :  { %15933 = vmatprep.subr.bf16.mxu0 %v21616_v49 }
0x1221   :  { %15918 = vmatmul.mubr.msk.bf16.vlgmr.msra.gmra.mxu1 %vm177_vm2, %v19354_v26 }
0x1222   :  { %15928 = vmatpush3.bf16.xpose.msra.mxu1 %v7118_v17  ;;  %15929 = vmatprep.mubr.msk.bf16.mxu1 %vm17039_vm1, %v21616_v49 }
0x1223   :  { %15939 = vmatprep.subr.bf16.mxu1 %v21616_v49 }
0x1224   :  { %v7162_v32 = vpop.permute.xlu0 %7161 }
0x1225   :  { %v7167_v52 = vsel %vm177_vm2, %v7162_v32, 0  ;;  %15924 = vmatmul.mubr.msk.bf16.vlgmr.msra.gmra.mxu0 %vm177_vm2, %v19352_v18 }
0x1226   :  { %15934 = vmatpush3.bf16.xpose.msra.mxu0 %v7167_v52  ;;  %15935 = vmatprep.mubr.msk.bf16.mxu0 %vm17039_vm1, %v21616_v49 }
0x1227   :  { %15945 = vmatprep.subr.bf16.mxu0 %v21616_v49 }
0x1228   :  { %v7211_v44 = vpop.permute.xlu1 %7210  ;;  %v7260_v8 = vpop.permute.xlu0 %7259 }
0x1229   :  { %v7216_v41 = vsel %vm177_vm2, %v7211_v44, 0  ;;  %15930 = vmatmul.mubr.msk.bf16.vlgmr.msra.gmra.mxu1 %vm177_vm2, %v19360_v13  ;;  %v7265_v0 = vsel %vm177_vm2, %v7260_v8, 0 }
0x122a   :  { %15940 = vmatpush3.bf16.xpose.msra.mxu1 %v7216_v41  ;;  %15941 = vmatprep.mubr.msk.bf16.mxu1 %vm17039_vm1, %v21616_v49 }
0x122b   :  { %15951 = vmatprep.subr.bf16.mxu1 %v21616_v49 }
0x122c   :  { %v7309_v56 = vpop.permute.xlu1 %7308  ;;  %v7509_v35 = vpop.permute.xlu0 %7508 }
0x122d   :  { %15936 = vmatmul.mubr.msk.bf16.vlgmr.msra.gmra.mxu0 %vm177_vm2, %v19364_v7  ;;  %v7314_v5 = vsel %vm177_vm2, %v7309_v56, 0  ;;  %v7514_v43 = vsel %vm676_vm3, %v7509_v35, 0 }
0x122e   :  { %15946 = vmatpush3.bf16.xpose.msra.mxu0 %v7265_v0  ;;  %15947 = vmatprep.mubr.msk.bf16.mxu0 %vm17039_vm1, %v21616_v49 }
0x122f   :  { %15957 = vmatprep.subr.bf16.mxu0 %v21616_v49 }
0x1230   :  { %v7461_v62 = vpop.permute.xlu1 %7460 }
0x1231   :  { %15942 = vmatmul.mubr.msk.bf16.vlgmr.msra.gmra.mxu1 %vm177_vm2, %v19370_v51  ;;  %v7466_v29 = vsel %vm676_vm3, %v7461_v62, 0 }
0x1232   :  { %15952 = vmatpush3.bf16.xpose.msra.mxu1 %v7314_v5  ;;  %15953 = vmatprep.mubr.msk.bf16.mxu1 %vm17039_vm1, %v21616_v49 }
0x1233   :  { %15963 = vmatprep.subr.bf16.mxu1 %v21616_v49 }
0x1235   :  { %15948 = vmatmul.mubr.msk.bf16.vlgmr.msra.gmra.mxu0 %vm177_vm2, %v19368_v20 }
0x1236   :  { %15958 = vmatpush3.bf16.msra.mxu0 %v7466_v29  ;;  %15959 = vmatprep.mubr.msk.bf16.mxu0 %vm17039_vm1, %v21616_v49 }
0x1237   :  { %15969 = vmatprep.subr.bf16.mxu0 %v21616_v49 }
0x1239   :  { %15954 = vmatmul.mubr.msk.bf16.vlgmr.msra.gmra.mxu1 %vm177_vm2, %v19376_v47 }
0x123a   :  { %15964 = vmatpush3.bf16.msra.mxu1 %v7514_v43  ;;  %15965 = vmatprep.mubr.msk.bf16.mxu1 %vm17039_vm1, %v21616_v49 }
0x123b   :  { %15975 = vmatprep.subr.bf16.mxu1 %v21616_v49 }
0x12dd   :  { %v7007_v58 = vpop.f32.mrf.mxu0 }
0x12de   :  { %v7356_v4 = vmul.f32 0.35355338, %v7007_v58 }
0x12df   :  { %v15913_v11 = vpop.f32.mrf.mxu0 }
0x12e0   :  { %v7364_v63 = vsel %vm177_vm2, %v7356_v4, -inf  ;;  %v19455_v11 = vpop.permute.xlu1 %7556 }
0x12e1   :  { %v7056_v30 = vpop.f32.mrf.mxu1  ;;  %7365 = vmax.xlane.f32.xlu0 %v7364_v63  ;;  %v7010_v19 = vpop.f32.mrf.mxu0 }
0x12e2   :  { %v7357_v38 = vmul.f32 0.35355338, %v7056_v30 }
0x12e3   :  { %v15914_v16 = vpop.f32.mrf.mxu0  ;;  %v15919_v6 = vpop.f32.mrf.mxu1 }
0x12e4   :  { %v7367_v9 = vsel %vm177_vm2, %v7357_v38, -inf  ;;  %v19457_v63 = vpop.permute.xlu1 %7604 }
0x12e5   :  { %v7059_v28 = vpop.f32.mrf.mxu1  ;;  %7368 = vmax.xlane.f32.xlu1 %v7367_v9  ;;  %v7105_v2 = vpop.f32.mrf.mxu0 }
0x12e6   :  { %v7358_v60 = vmul.f32 0.35355338, %v7105_v2 }
0x12e7   :  { %v15920_v23 = vpop.f32.mrf.mxu1  ;;  %v15925_v24 = vpop.f32.mrf.mxu0 }
0x12e8   :  { %v7370_v36 = vsel %vm177_vm2, %v7358_v60, -inf }
0x12e9   :  { %7371 = vmax.xlane.f32.xlu0 %v7370_v36  ;;  %v7108_v46 = vpop.f32.mrf.mxu0  ;;  %v7154_v54 = vpop.f32.mrf.mxu1 }
0x12ea   :  { %v7359_v61 = vmul.f32 0.35355338, %v7154_v54 }
0x12eb   :  { %v15926_v55 = vpop.f32.mrf.mxu0  ;;  %v15931_v15 = vpop.f32.mrf.mxu1 }
0x12ec   :  { %v7373_v1 = vsel %vm177_vm2, %v7359_v61, -inf }
0x12ed   :  { %v7203_v14 = vpop.f32.mrf.mxu0  ;;  %7374 = vmax.xlane.f32.xlu0 %v7373_v1  ;;  %v7157_v57 = vpop.f32.mrf.mxu1 }
0x12ee   :  { %v7360_v22 = vmul.f32 0.35355338, %v7203_v14 }
0x12ef   :  { %v15932_v31 = vpop.f32.mrf.mxu1  ;;  %v15937_v37 = vpop.f32.mrf.mxu0 }
0x12f0   :  { %v7376_v25 = vsel %vm177_vm2, %v7360_v22, -inf }
0x12f1   :  { %7377 = vmax.xlane.f32.xlu1 %v7376_v25  ;;  %v7206_v33 = vpop.f32.mrf.mxu0  ;;  %v7252_v53 = vpop.f32.mrf.mxu1 }
0x12f2   :  { %v7361_v34 = vmul.f32 0.35355338, %v7252_v53 }
0x12f3   :  { %v15938_v39 = vpop.f32.mrf.mxu0  ;;  %v15943_v45 = vpop.f32.mrf.mxu1 }
0x12f4   :  { %v7379_v21 = vsel %vm177_vm2, %v7361_v34, -inf }
0x12f5   :  { %v7301_v17 = vpop.f32.mrf.mxu0  ;;  %7380 = vmax.xlane.f32.xlu0 %v7379_v21  ;;  %v7255_v32 = vpop.f32.mrf.mxu1 }
0x12f6   :  { %v19446_v52 = vmul.f32 0.35355338, %v7301_v17 }
0x12f7   :  { %v15944_v44 = vpop.f32.mrf.mxu1  ;;  %v15949_v41 = vpop.f32.mrf.mxu0 }
0x12f8   :  { %v7382_v8 = vsel %vm177_vm2, %v19446_v52, -inf }
0x12f9   :  { %7383 = vmax.xlane.f32.xlu1 %v7382_v8  ;;  %v7304_v56 = vpop.f32.mrf.mxu0  ;;  %v7350_v0 = vpop.f32.mrf.mxu1 }
0x12fa   :  { %v7363_v5 = vmul.f32 0.35355338, %v7350_v0 }
0x12fb   :  { %v15950_v62 = vpop.f32.mrf.mxu0  ;;  %v15955_v29 = vpop.f32.mrf.mxu1 }
0x12fc   :  { %v7385_v35 = vsel %vm177_vm2, %v7363_v5, -inf }
0x12fd   :  { %7386 = vmax.xlane.f32.xlu0 %v7385_v35  ;;  %v7353_v43 = vpop.f32.mrf.mxu1 }
0x12ff   :  { %v15956_v58 = vpop.f32.mrf.mxu1 }
0x130a   :  { %7700 = vrot.lane.b32.xlu1 %v19370_v51, %s17041_s26 }
0x1313   :  { %7652 = vrot.lane.b32.xlu0 %v19364_v7, %s17041_s26 }
0x136a   :  { %v7366_v30 = vpop.xlane.xlu0 %7365 }
0x136b   :  { %v7388_v19 = vsub.f32 %v7356_v4, %v7366_v30 }
0x136d   :  { %v7396_v16 = vmul.f32 1.442695, %v7388_v19 }
0x136e   :  { %v7369_v6 = vpop.xlane.xlu1 %7368 }
0x136f   :  { %16870 = vpow2.f32 %v7396_v16  ;;  %v7389_v9 = vsub.f32 %v7357_v38, %v7369_v6 }
0x1371   :  { %v7398_v28 = vmul.f32 1.442695, %v7389_v9 }
0x1372   :  { %v7372_v2 = vpop.xlane.xlu0 %7371 }
0x1373   :  { %16872 = vpow2.f32 %v7398_v28  ;;  %v7390_v23 = vsub.f32 %v7358_v60, %v7372_v2  ;;  %v7562_v2 = vsel %vm676_vm3, %v19455_v11, 0 }
0x1375   :  { %v7400_v24 = vmul.f32 1.442695, %v7390_v23 }
0x1376   :  { %v7375_v36 = vpop.xlane.xlu0 %7374 }
0x1377   :  { %16874 = vpow2.f32 %v7400_v24  ;;  %v7391_v46 = vsub.f32 %v7359_v61, %v7375_v36 }
0x1379   :  { %v7402_v54 = vmul.f32 1.442695, %v7391_v46 }
0x137a   :  { %v7378_v55 = vpop.xlane.xlu1 %7377 }
0x137b   :  { %16876 = vpow2.f32 %v7402_v54  ;;  %v7392_v15 = vsub.f32 %v7360_v22, %v7378_v55  ;;  %v7610_v54 = vsel %vm676_vm3, %v19457_v63, 0 }
0x137c   :  { %v19459_v1 = vpop.eup %16870 }
0x137d   :  { %v7404_v14 = vmul.f32 1.442695, %v7392_v15  ;;  %v7412_v4 = vsel %vm177_vm2, %v19459_v1, 0.0 }
0x137e   :  { %7413 = vadd.xlane.f32.xlu1 %v7412_v4  ;;  %v7381_v38 = vpop.xlane.xlu0 %7380 }
0x137f   :  { %16878 = vpow2.f32 %v7404_v14  ;;  %v7393_v57 = vsub.f32 %v7361_v34, %v7381_v38 }
0x1380   :  { %v19463_v31 = vpop.eup %16872 }
0x1381   :  { %v7406_v60 = vmul.f32 1.442695, %v7393_v57  ;;  %v7415_v61 = vsel %vm177_vm2, %v19463_v31, 0.0 }
0x1382   :  { %7416 = vadd.xlane.f32.xlu0 %v7415_v61  ;;  %v7384_v21 = vpop.xlane.xlu1 %7383 }
0x1383   :  { %16880 = vpow2.f32 %v7406_v60  ;;  %v7394_v17 = vsub.f32 %v19446_v52, %v7384_v21 }
0x1384   :  { %v19467_v37 = vpop.eup %16874 }
0x1385   :  { %v7418_v22 = vsel %vm177_vm2, %v19467_v37, 0.0  ;;  %v7408_v44 = vmul.f32 1.442695, %v7394_v17 }
0x1386   :  { %7419 = vadd.xlane.f32.xlu1 %v7418_v22  ;;  %v7387_v32 = vpop.xlane.xlu0 %7386  ;;  %v7701_v52 = vpop.permute.xlu1 %7700 }
0x1387   :  { %v7395_v41 = vsub.f32 %v7363_v5, %v7387_v32  ;;  %16882 = vpow2.f32 %v7408_v44  ;;  %v7706_v38 = vsel %vm676_vm3, %v7701_v52, 0 }
0x1388   :  { %v19471_v25 = vpop.eup %16876 }
0x1389   :  { %v7421_v33 = vsel %vm177_vm2, %v19471_v25, 0.0  ;;  %v7410_v8 = vmul.f32 1.442695, %v7395_v41 }
0x138a   :  { %7422 = vadd.xlane.f32.xlu0 %v7421_v33  ;;  %v7653_v5 = vpop.permute.xlu0 %7652 }
0x138b   :  { %16884 = vpow2.f32 %v7410_v8 }
0x138c   :  { %v19475_v53 = vpop.eup %16878 }
0x138d   :  { %v7424_v34 = vsel %vm177_vm2, %v19475_v53, 0.0 }
0x138e   :  { %7425 = vadd.xlane.f32.xlu1 %v7424_v34 }
0x1390   :  { %v19479_v39 = vpop.eup %16880 }
0x1391   :  { %v7427_v45 = vsel %vm177_vm2, %v19479_v39, 0.0 }
0x1392   :  { %7428 = vadd.xlane.f32.xlu0 %v7427_v45 }
0x1394   :  { %v19488_v56 = vpop.eup %16882 }
0x1395   :  { %v7430_v0 = vsel %vm177_vm2, %v19488_v56, 0.0 }
0x1398   :  { %v19492_v62 = vpop.eup %16884 }
0x1399   :  { %v7433_v29 = vsel %vm177_vm2, %v19492_v62, 0.0 }
0x139f   :  { %7796 = vrot.lane.b32.xlu1 %v19376_v47, %s17041_s26 }
0x13a8   :  { %7748 = vrot.lane.b32.xlu0 %v19368_v20, %s17041_s26  ;;  %s21619_s26 = smov 112  }
0x13c3   :  { %7431 = vadd.xlane.f32.xlu1 %v7430_v0 }
0x13c7   :  { %7434 = vadd.xlane.f32.xlu0 %v7433_v29 }
0x13d4   :  { %7896 = vrot.lane.b32.xlu1 %v19354_v26, %s17042_s27 }
0x13d8   :  { %7894 = vrot.lane.b32.xlu1 %v19354_v26, %s17043_s28 }
0x13dc   :  { %7996 = vrot.lane.b32.xlu1 %v19360_v13, %s17042_s27 }
0x13dd   :  { %7846 = vrot.lane.b32.xlu0 %v19348_v10, %s17042_s27 }
0x13e0   :  { %7994 = vrot.lane.b32.xlu1 %v19360_v13, %s17043_s28 }
0x13e1   :  { %7844 = vrot.lane.b32.xlu0 %v19348_v10, %s17043_s28 }
0x13e4   :  { %8096 = vrot.lane.b32.xlu1 %v19370_v51, %s17042_s27 }
0x13e5   :  { %7946 = vrot.lane.b32.xlu0 %v19352_v18, %s17042_s27 }
0x13e8   :  { %8094 = vrot.lane.b32.xlu1 %v19370_v51, %s17043_s28 }
0x13e9   :  { %7944 = vrot.lane.b32.xlu0 %v19352_v18, %s17043_s28 }
0x13ec   :  { %8196 = vrot.lane.b32.xlu1 %v19376_v47, %s17042_s27 }
0x13ed   :  { %8046 = vrot.lane.b32.xlu0 %v19364_v7, %s17042_s27 }
0x13f0   :  { %8194 = vrot.lane.b32.xlu1 %v19376_v47, %s17043_s28 }
0x13f1   :  { %8044 = vrot.lane.b32.xlu0 %v19364_v7, %s17043_s28 }
0x13f4   :  { %8348 = vrot.lane.b32.xlu1 %v19348_v10, %s21617_s2 }
0x13f5   :  { %8146 = vrot.lane.b32.xlu0 %v19368_v20, %s17042_s27  ;;  %s21620_s27 = smov 48  }
0x13f8   :  { %8444 = vrot.lane.b32.xlu1 %v19352_v18, %s21617_s2 }
0x13f9   :  { %8144 = vrot.lane.b32.xlu0 %v19368_v20, %s17043_s28  ;;  %s21621_s28 = smov 72  }
0x13fc   :  { %8492 = vrot.lane.b32.xlu1 %v19360_v13, %s21617_s2 }
0x13fd   :  { %8396 = vrot.lane.b32.xlu0 %v19354_v26, %s21617_s2 }
0x1407   :  { %v7414_v35 = vpop.xlane.xlu1 %7413 }
0x1408   :  { %16886 = vrcp.f32 %v7414_v35 }
0x140b   :  { %v7417_v43 = vpop.xlane.xlu0 %7416 }
0x140c   :  { %16888 = vrcp.f32 %v7417_v43 }
0x140f   :  { %v7420_v58 = vpop.xlane.xlu1 %7419 }
0x1410   :  { %16890 = vrcp.f32 %v7420_v58 }
0x1413   :  { %v7423_v30 = vpop.xlane.xlu0 %7422 }
0x1414   :  { %16892 = vrcp.f32 %v7423_v30 }
0x1415   :  { %v16887_v19 = vpop.eup %16886 }
0x1416   :  { %v7444_v16 = vmul.f32 %v16887_v19, %v19459_v1  ;;  %v7658_v1 = vsel %vm676_vm3, %v7653_v5, 0 }
0x1417   :  { %v7426_v6 = vpop.xlane.xlu1 %7425 }
0x1418   :  { %v7452_v9 = vpack.c.bf16 %v7444_v16, %v7444_v16  ;;  %16894 = vrcp.f32 %v7426_v6 }
0x1419   :  { %v16889_v28 = vpop.eup %16888 }
0x141a   :  { %v7445_v23 = vmul.f32 %v16889_v28, %v19463_v31  ;;  %15960 = vmatmul.mubr.msk.bf16.vlgmr.msra.gmra.mxu0 %vm177_vm2, %v7452_v9 }
0x141b   :  { %15970 = vmatpush3.bf16.msra.mxu0 %v7562_v2  ;;  %v7429_v24 = vpop.xlane.xlu0 %7428  ;;  %15971 = vmatprep.mubr.msk.bf16.mxu0 %vm17039_vm1, %v21616_v49 }
0x141c   :  { %v7453_v36 = vpack.c.bf16 %v7445_v23, %v7445_v23  ;;  %16896 = vrcp.f32 %v7429_v24  ;;  %15981 = vmatprep.subr.bf16.mxu0 %v21616_v49 }
0x141d   :  { %v16891_v46 = vpop.eup %16890 }
0x141e   :  { %v7446_v55 = vmul.f32 %v16891_v46, %v19467_v37  ;;  %15966 = vmatmul.mubr.msk.bf16.vlgmr.msra.gmra.mxu1 %vm177_vm2, %v7453_v36 }
0x141f   :  { %15976 = vmatpush3.bf16.msra.mxu1 %v7610_v54  ;;  %15977 = vmatprep.mubr.msk.bf16.mxu1 %vm17039_vm1, %v21616_v49  ;;  %v7749_v31 = vpop.permute.xlu0 %7748 }
0x1420   :  { %v7454_v11 = vpack.c.bf16 %v7446_v55, %v7446_v55  ;;  %15987 = vmatprep.subr.bf16.mxu1 %v21616_v49  ;;  %v7754_v22 = vsel %vm676_vm3, %v7749_v31, 0 }
0x1421   :  { %v16893_v15 = vpop.eup %16892 }
0x1422   :  { %v7447_v14 = vmul.f32 %v16893_v15, %v19471_v25  ;;  %15972 = vmatmul.mubr.msk.bf16.vlgmr.msra.gmra.mxu0 %vm177_vm2, %v7454_v11  ;;  %v7797_v25 = vpop.permute.xlu1 %7796 }
0x1423   :  { %15982 = vmatpush3.bf16.msra.mxu0 %v7658_v1  ;;  %15983 = vmatprep.mubr.msk.bf16.mxu0 %vm17039_vm1, %v21616_v49 }
0x1424   :  { %v7455_v63 = vpack.c.bf16 %v7447_v14, %v7447_v14  ;;  %15993 = vmatprep.subr.bf16.mxu0 %v21616_v49 }
0x1425   :  { %v16895_v4 = vpop.eup %16894 }
0x1426   :  { %v7448_v57 = vmul.f32 %v16895_v4, %v19475_v53  ;;  %15978 = vmatmul.mubr.msk.bf16.vlgmr.msra.gmra.mxu1 %vm177_vm2, %v7455_v63  ;;  %v7802_v53 = vsel %vm676_vm3, %v7797_v25, 0 }
0x1427   :  { %15988 = vmatpush3.bf16.msra.mxu1 %v7706_v38  ;;  %15989 = vmatprep.mubr.msk.bf16.mxu1 %vm17039_vm1, %v21616_v49 }
0x1428   :  { %v7456_v60 = vpack.c.bf16 %v7448_v57, %v7448_v57  ;;  %15999 = vmatprep.subr.bf16.mxu1 %v21616_v49 }
0x1429   :  { %v16897_v61 = vpop.eup %16896 }
0x142a   :  { %v7449_v37 = vmul.f32 %v16897_v61, %v19479_v39  ;;  %15984 = vmatmul.mubr.msk.bf16.vlgmr.msra.gmra.mxu0 %vm177_vm2, %v7456_v60 }
0x142b   :  { %15994 = vmatpush3.bf16.msra.mxu0 %v7754_v22  ;;  %15995 = vmatprep.mubr.msk.bf16.mxu0 %vm17039_vm1, %v21616_v49 }
0x142c   :  { %v7457_v33 = vpack.c.bf16 %v7449_v37, %v7449_v37  ;;  %16005 = vmatprep.subr.bf16.mxu0 %v21616_v49 }
0x142e   :  { %15990 = vmatmul.mubr.msk.bf16.vlgmr.msra.gmra.mxu1 %vm177_vm2, %v7457_v33 }
0x142f   :  { %16000 = vmatpush3.bf16.msra.mxu1 %v7802_v53  ;;  %16001 = vmatprep.mubr.msk.bf16.mxu1 %vm17039_vm1, %v21616_v49 }
0x1430   :  { %16011 = vmatprep.subr.bf16.mxu1 %v21616_v49 }
0x144c   :  { %v7432_v34 = vpop.xlane.xlu1 %7431 }
0x144d   :  { %16898 = vrcp.f32 %v7432_v34 }
0x1450   :  { %v7435_v39 = vpop.xlane.xlu0 %7434  ;;  %v7897_v45 = vpop.permute.xlu1 %7896 }
0x1451   :  { %16900 = vrcp.f32 %v7435_v39 }
0x1454   :  { %v7847_v21 = vpop.permute.xlu0 %7846  ;;  %v7895_v17 = vpop.permute.xlu1 %7894 }
0x1455   :  { %v7852_v43 = vsel %vm177_vm2, %v7847_v21, 0 }
0x1458   :  { %v7845_v32 = vpop.permute.xlu0 %7844  ;;  %v7997_v44 = vpop.permute.xlu1 %7996 }
0x1459   :  { %v8002_v9 = vsel %vm177_vm2, %v7997_v44, 0 }
0x145a   :  { %v16899_v41 = vpop.eup %16898 }
0x145b   :  { %v7450_v8 = vmul.f32 %v16899_v41, %v19488_v56  ;;  %v7902_v56 = vsel %vm177_vm2, %v7897_v45, 0 }
0x145c   :  { %v7947_v0 = vpop.permute.xlu0 %7946  ;;  %v7995_v5 = vpop.permute.xlu1 %7994 }
0x145d   :  { %v7458_v29 = vpack.c.bf16 %v7450_v8, %v7450_v8 }
0x145e   :  { %v16901_v52 = vpop.eup %16900 }
0x145f   :  { %v7451_v35 = vmul.f32 %v16901_v52, %v19492_v62  ;;  %15996 = vmatmul.mubr.msk.bf16.vlgmr.msra.gmra.mxu0 %vm177_vm2, %v7458_v29  ;;  %v7952_v62 = vsel %vm177_vm2, %v7947_v0, 0 }
0x1460   :  { %16006 = vmatpush3.bf16.xpose.msra.mxu0 %v7852_v43  ;;  %16007 = vmatprep.mubr.msk.bf16.mxu0 %vm17039_vm1, %v21616_v49  ;;  %v7945_v30 = vpop.permute.xlu0 %7944  ;;  %v8097_v19 = vpop.permute.xlu1 %8096 }
0x1461   :  { %v7459_v58 = vpack.c.bf16 %v7451_v35, %v7451_v35  ;;  %16017 = vmatprep.subr.bf16.mxu0 %v21616_v49  ;;  %v8102_v24 = vsel %vm177_vm2, %v8097_v19, 0 }
0x1463   :  { %16002 = vmatmul.mubr.msk.bf16.vlgmr.msra.gmra.mxu1 %vm177_vm2, %v7459_v58 }
0x1464   :  { %16012 = vmatpush3.bf16.xpose.msra.mxu1 %v7902_v56  ;;  %16013 = vmatprep.mubr.msk.bf16.mxu1 %vm17039_vm1, %v21616_v49  ;;  %v8047_v16 = vpop.permute.xlu0 %8046  ;;  %v8095_v6 = vpop.permute.xlu1 %8094 }
0x1465   :  { %16023 = vmatprep.subr.bf16.mxu1 %v21616_v49  ;;  %v8052_v2 = vsel %vm177_vm2, %v8047_v16, 0 }
0x1467   :  { %16008 = vmatmul.mubr.msk.bf16.vlgmr.msra.gmra.mxu0 %vm177_vm2, %v7845_v32 }
0x1468   :  { %16018 = vmatpush3.bf16.xpose.msra.mxu0 %v7952_v62  ;;  %16019 = vmatprep.mubr.msk.bf16.mxu0 %vm17039_vm1, %v21616_v49  ;;  %v8045_v28 = vpop.permute.xlu0 %8044  ;;  %v8197_v23 = vpop.permute.xlu1 %8196 }
0x1469   :  { %16029 = vmatprep.subr.bf16.mxu0 %v21616_v49  ;;  %v8202_v11 = vsel %vm177_vm2, %v8197_v23, 0 }
0x146b   :  { %16014 = vmatmul.mubr.msk.bf16.vlgmr.msra.gmra.mxu1 %vm177_vm2, %v7895_v17 }
0x146c   :  { %16024 = vmatpush3.bf16.xpose.msra.mxu1 %v8002_v9  ;;  %16025 = vmatprep.mubr.msk.bf16.mxu1 %vm17039_vm1, %v21616_v49  ;;  %v8147_v36 = vpop.permute.xlu0 %8146  ;;  %v8195_v46 = vpop.permute.xlu1 %8194 }
0x146d   :  { %16035 = vmatprep.subr.bf16.mxu1 %v21616_v49  ;;  %v8152_v54 = vsel %vm177_vm2, %v8147_v36, 0 }
0x146f   :  { %16020 = vmatmul.mubr.msk.bf16.vlgmr.msra.gmra.mxu0 %vm177_vm2, %v7945_v30 }
0x1470   :  { %16030 = vmatpush3.bf16.xpose.msra.mxu0 %v8052_v2  ;;  %16031 = vmatprep.mubr.msk.bf16.mxu0 %vm17039_vm1, %v21616_v49  ;;  %v8145_v55 = vpop.permute.xlu0 %8144  ;;  %v8349_v15 = vpop.permute.xlu1 %8348 }
0x1471   :  { %16041 = vmatprep.subr.bf16.mxu0 %v21616_v49  ;;  %v8354_v1 = vsel %vm676_vm3, %v8349_v15, 0 }
0x1473   :  { %16026 = vmatmul.mubr.msk.bf16.vlgmr.msra.gmra.mxu1 %vm177_vm2, %v7995_v5 }
0x1474   :  { %16036 = vmatpush3.bf16.xpose.msra.mxu1 %v8102_v24  ;;  %16037 = vmatprep.mubr.msk.bf16.mxu1 %vm17039_vm1, %v21616_v49  ;;  %v8397_v14 = vpop.permute.xlu0 %8396 }
0x1475   :  { %16047 = vmatprep.subr.bf16.mxu1 %v21616_v49  ;;  %v8402_v63 = vsel %vm676_vm3, %v8397_v14, 0 }
0x1477   :  { %16032 = vmatmul.mubr.msk.bf16.vlgmr.msra.gmra.mxu0 %vm177_vm2, %v8045_v28 }
0x1478   :  { %16042 = vmatpush3.bf16.xpose.msra.mxu0 %v8152_v54  ;;  %16043 = vmatprep.mubr.msk.bf16.mxu0 %vm17039_vm1, %v21616_v49 }
0x1479   :  { %16053 = vmatprep.subr.bf16.mxu0 %v21616_v49 }
0x147b   :  { %16038 = vmatmul.mubr.msk.bf16.vlgmr.msra.gmra.mxu1 %vm177_vm2, %v8095_v6 }
0x147c   :  { %16048 = vmatpush3.bf16.xpose.msra.mxu1 %v8202_v11  ;;  %16049 = vmatprep.mubr.msk.bf16.mxu1 %vm17039_vm1, %v21616_v49 }
0x147d   :  { %16059 = vmatprep.subr.bf16.mxu1 %v21616_v49 }
0x147f   :  { %16044 = vmatmul.mubr.msk.bf16.vlgmr.msra.gmra.mxu0 %vm177_vm2, %v8145_v55 }
0x1480   :  { %16054 = vmatpush3.bf16.msra.mxu0 %v8354_v1  ;;  %16055 = vmatprep.mubr.msk.bf16.mxu0 %vm17039_vm1, %v21616_v49 }
0x1481   :  { %16065 = vmatprep.subr.bf16.mxu0 %v21616_v49 }
0x1483   :  { %16050 = vmatmul.mubr.msk.bf16.vlgmr.msra.gmra.mxu1 %vm177_vm2, %v8195_v46 }
0x1484   :  { %16060 = vmatpush3.bf16.msra.mxu1 %v8402_v63  ;;  %16061 = vmatprep.mubr.msk.bf16.mxu1 %vm17039_vm1, %v21616_v49 }
0x1485   :  { %16071 = vmatprep.subr.bf16.mxu1 %v21616_v49 }
0x14da   :  { %v19626_v4 = vpop.f32.mrf.mxu0 }
0x14dc   :  { %v15961_v38 = vpop.f32.mrf.mxu0 }
0x14de   :  { %v7505_v57 = vpop.f32.mrf.mxu0  ;;  %v19628_v31 = vpop.f32.mrf.mxu1 }
0x14e0   :  { %v15962_v60 = vpop.f32.mrf.mxu0  ;;  %v15967_v61 = vpop.f32.mrf.mxu1 }
0x14e2   :  { %v7553_v37 = vpop.f32.mrf.mxu1  ;;  %v19630_v22 = vpop.f32.mrf.mxu0 }
0x14e4   :  { %v15968_v25 = vpop.f32.mrf.mxu1  ;;  %v15973_v33 = vpop.f32.mrf.mxu0 }
0x14e6   :  { %v7601_v53 = vpop.f32.mrf.mxu0  ;;  %v19632_v34 = vpop.f32.mrf.mxu1 }
0x14e8   :  { %v15974_v39 = vpop.f32.mrf.mxu0  ;;  %v15979_v45 = vpop.f32.mrf.mxu1 }
0x14ea   :  { %v7649_v21 = vpop.f32.mrf.mxu1  ;;  %v19634_v17 = vpop.f32.mrf.mxu0 }
0x14ec   :  { %v15980_v32 = vpop.f32.mrf.mxu1  ;;  %v15985_v44 = vpop.f32.mrf.mxu0 }
0x14ee   :  { %v7697_v41 = vpop.f32.mrf.mxu0  ;;  %v19636_v8 = vpop.f32.mrf.mxu1 }
0x14f0   :  { %v15986_v0 = vpop.f32.mrf.mxu0  ;;  %v15991_v29 = vpop.f32.mrf.mxu1 }
0x14f2   :  { %v7745_v52 = vpop.f32.mrf.mxu1 }
0x14f4   :  { %v15992_v5 = vpop.f32.mrf.mxu1 }
0x151f   :  { %v19638_v35 = vpop.f32.mrf.mxu0 }
0x1521   :  { %v15997_v43 = vpop.f32.mrf.mxu0 }
0x1523   :  { %v7793_v58 = vpop.f32.mrf.mxu0  ;;  %v19640_v30 = vpop.f32.mrf.mxu1 }
0x1525   :  { %v15998_v56 = vpop.f32.mrf.mxu0  ;;  %v16003_v19 = vpop.f32.mrf.mxu1 }
0x1527   :  { %v7841_v62 = vpop.f32.mrf.mxu1  ;;  %v7888_v16 = vpop.f32.mrf.mxu0 }
0x1528   :  { %v8244_v6 = vmul.f32 0.35355338, %v7888_v16 }
0x1529   :  { %v16004_v9 = vpop.f32.mrf.mxu1  ;;  %v16009_v28 = vpop.f32.mrf.mxu0 }
0x152a   :  { %v8252_v2 = vsel %vm177_vm2, %v8244_v6, -inf }
0x152b   :  { %8253 = vmax.xlane.f32.xlu0 %v8252_v2  ;;  %v7891_v23 = vpop.f32.mrf.mxu0  ;;  %v7938_v24 = vpop.f32.mrf.mxu1 }
0x152c   :  { %v8245_v36 = vmul.f32 0.35355338, %v7938_v24 }
0x152d   :  { %v16010_v46 = vpop.f32.mrf.mxu0  ;;  %v16015_v54 = vpop.f32.mrf.mxu1 }
0x152e   :  { %v8255_v55 = vsel %vm177_vm2, %v8245_v36, -inf }
0x152f   :  { %v7988_v11 = vpop.f32.mrf.mxu0  ;;  %8256 = vmax.xlane.f32.xlu1 %v8255_v55  ;;  %v7941_v15 = vpop.f32.mrf.mxu1 }
0x1530   :  { %v8246_v1 = vmul.f32 0.35355338, %v7988_v11  ;;  %v19657_v15 = vpop.permute.xlu1 %8444 }
0x1531   :  { %v16016_v14 = vpop.f32.mrf.mxu1  ;;  %v16021_v63 = vpop.f32.mrf.mxu0 }
0x1532   :  { %v8258_v38 = vsel %vm177_vm2, %v8246_v1, -inf }
0x1533   :  { %8259 = vmax.xlane.f32.xlu0 %v8258_v38  ;;  %v7991_v57 = vpop.f32.mrf.mxu0  ;;  %v8038_v60 = vpop.f32.mrf.mxu1 }
0x1534   :  { %v8247_v61 = vmul.f32 0.35355338, %v8038_v60  ;;  %v19659_v14 = vpop.permute.xlu1 %8492 }
0x1535   :  { %v16022_v37 = vpop.f32.mrf.mxu0  ;;  %v16027_v25 = vpop.f32.mrf.mxu1 }
0x1536   :  { %v8261_v33 = vsel %vm177_vm2, %v8247_v61, -inf }
0x1537   :  { %v8088_v53 = vpop.f32.mrf.mxu0  ;;  %8262 = vmax.xlane.f32.xlu0 %v8261_v33  ;;  %v8041_v39 = vpop.f32.mrf.mxu1 }
0x1538   :  { %v8248_v45 = vmul.f32 0.35355338, %v8088_v53 }
0x1539   :  { %v16028_v21 = vpop.f32.mrf.mxu1  ;;  %v16033_v32 = vpop.f32.mrf.mxu0 }
0x153a   :  { %v8264_v44 = vsel %vm177_vm2, %v8248_v45, -inf }
0x153b   :  { %v8091_v41 = vpop.f32.mrf.mxu0  ;;  %8265 = vmax.xlane.f32.xlu1 %v8264_v44  ;;  %v8138_v0 = vpop.f32.mrf.mxu1 }
0x153c   :  { %v8249_v29 = vmul.f32 0.35355338, %v8138_v0 }
0x153d   :  { %v16034_v52 = vpop.f32.mrf.mxu0  ;;  %v16039_v5 = vpop.f32.mrf.mxu1 }
0x153e   :  { %v8267_v43 = vsel %vm177_vm2, %v8249_v29, -inf }
0x153f   :  { %v8188_v58 = vpop.f32.mrf.mxu0  ;;  %8268 = vmax.xlane.f32.xlu0 %v8267_v43  ;;  %v8141_v56 = vpop.f32.mrf.mxu1 }
0x1540   :  { %v19648_v19 = vmul.f32 0.35355338, %v8188_v58 }
0x1541   :  { %v16040_v62 = vpop.f32.mrf.mxu1  ;;  %v16045_v16 = vpop.f32.mrf.mxu0 }
0x1542   :  { %v8270_v9 = vsel %vm177_vm2, %v19648_v19, -inf }
0x1543   :  { %v8191_v28 = vpop.f32.mrf.mxu0  ;;  %8271 = vmax.xlane.f32.xlu1 %v8270_v9  ;;  %v8238_v2 = vpop.f32.mrf.mxu1 }
0x1544   :  { %v8251_v23 = vmul.f32 0.35355338, %v8238_v2 }
0x1545   :  { %v16046_v24 = vpop.f32.mrf.mxu0  ;;  %v16051_v46 = vpop.f32.mrf.mxu1 }
0x1546   :  { %v8273_v54 = vsel %vm177_vm2, %v8251_v23, -inf }
0x1547   :  { %8274 = vmax.xlane.f32.xlu0 %v8273_v54  ;;  %v8241_v55 = vpop.f32.mrf.mxu1 }
0x1549   :  { %v16052_v11 = vpop.f32.mrf.mxu1 }
0x1554   :  { %8588 = vrot.lane.b32.xlu1 %v19370_v51, %s21617_s2 }
0x155d   :  { %8540 = vrot.lane.b32.xlu0 %v19364_v7, %s21617_s2 }
0x15b4   :  { %v8254_v63 = vpop.xlane.xlu0 %8253 }
0x15b5   :  { %v8276_v38 = vsub.f32 %v8244_v6, %v8254_v63 }
0x15b7   :  { %v8284_v57 = vmul.f32 1.442695, %v8276_v38 }
0x15b8   :  { %v8257_v60 = vpop.xlane.xlu1 %8256 }
0x15b9   :  { %16902 = vpow2.f32 %v8284_v57  ;;  %v8277_v37 = vsub.f32 %v8245_v36, %v8257_v60 }
0x15bb   :  { %v8286_v25 = vmul.f32 1.442695, %v8277_v37 }
0x15bc   :  { %v8260_v33 = vpop.xlane.xlu0 %8259 }
0x15bd   :  { %16904 = vpow2.f32 %v8286_v25  ;;  %v8278_v53 = vsub.f32 %v8246_v1, %v8260_v33 }
0x15bf   :  { %v8288_v39 = vmul.f32 1.442695, %v8278_v53 }
0x15c0   :  { %v8263_v21 = vpop.xlane.xlu0 %8262 }
0x15c1   :  { %16906 = vpow2.f32 %v8288_v39  ;;  %v8279_v32 = vsub.f32 %v8247_v61, %v8263_v21 }
0x15c3   :  { %v8290_v44 = vmul.f32 1.442695, %v8279_v32 }
0x15c4   :  { %v8266_v41 = vpop.xlane.xlu1 %8265 }
0x15c5   :  { %16908 = vpow2.f32 %v8290_v44  ;;  %v8280_v0 = vsub.f32 %v8248_v45, %v8266_v41 }
0x15c6   :  { %v19661_v52 = vpop.eup %16902 }
0x15c7   :  { %v8292_v5 = vmul.f32 1.442695, %v8280_v0  ;;  %v8300_v6 = vsel %vm177_vm2, %v19661_v52, 0.0 }
0x15c8   :  { %8301 = vadd.xlane.f32.xlu1 %v8300_v6  ;;  %v8269_v36 = vpop.xlane.xlu0 %8268 }
0x15c9   :  { %16910 = vpow2.f32 %v8292_v5  ;;  %v8281_v43 = vsub.f32 %v8249_v29, %v8269_v36  ;;  %v8450_v5 = vsel %vm676_vm3, %v19657_v15, 0 }
0x15ca   :  { %v19665_v58 = vpop.eup %16904 }
0x15cb   :  { %v8294_v1 = vmul.f32 1.442695, %v8281_v43  ;;  %v8303_v61 = vsel %vm177_vm2, %v19665_v58, 0.0 }
0x15cc   :  { %8304 = vadd.xlane.f32.xlu0 %v8303_v61  ;;  %v8272_v24 = vpop.xlane.xlu1 %8271 }
0x15cd   :  { %16912 = vpow2.f32 %v8294_v1  ;;  %v8282_v46 = vsub.f32 %v19648_v19, %v8272_v24  ;;  %v8498_v1 = vsel %vm676_vm3, %v19659_v14, 0 }
0x15ce   :  { %v19669_v56 = vpop.eup %16906 }
0x15cf   :  { %v8306_v45 = vsel %vm177_vm2, %v19669_v56, 0.0  ;;  %v8296_v55 = vmul.f32 1.442695, %v8282_v46 }
0x15d0   :  { %8307 = vadd.xlane.f32.xlu1 %v8306_v45  ;;  %v8275_v54 = vpop.xlane.xlu0 %8274  ;;  %v8589_v19 = vpop.permute.xlu1 %8588 }
0x15d1   :  { %v8283_v11 = vsub.f32 %v8251_v23, %v8275_v54  ;;  %16914 = vpow2.f32 %v8296_v55 }
0x15d2   :  { %v19673_v62 = vpop.eup %16908 }
0x15d3   :  { %v8309_v16 = vsel %vm177_vm2, %v19673_v62, 0.0  ;;  %v8298_v63 = vmul.f32 1.442695, %v8283_v11 }
0x15d4   :  { %8310 = vadd.xlane.f32.xlu0 %v8309_v16  ;;  %v8541_v23 = vpop.permute.xlu0 %8540 }
0x15d5   :  { %16916 = vpow2.f32 %v8298_v63  ;;  %v8546_v45 = vsel %vm676_vm3, %v8541_v23, 0 }
0x15d6   :  { %v19677_v29 = vpop.eup %16910 }
0x15d7   :  { %v8312_v9 = vsel %vm177_vm2, %v19677_v29, 0.0 }
0x15d8   :  { %8313 = vadd.xlane.f32.xlu1 %v8312_v9  ;;  %v8594_v9 = vsel %vm676_vm3, %v8589_v19, 0 }
0x15da   :  { %v19681_v28 = vpop.eup %16912 }
0x15db   :  { %v8315_v2 = vsel %vm177_vm2, %v19681_v28, 0.0 }
0x15dc   :  { %8316 = vadd.xlane.f32.xlu0 %v8315_v2 }
0x15de   :  { %v19690_v38 = vpop.eup %16914 }
0x15df   :  { %v8318_v57 = vsel %vm177_vm2, %v19690_v38, 0.0 }
0x15e2   :  { %v19694_v60 = vpop.eup %16916 }
0x15e3   :  { %v8321_v37 = vsel %vm177_vm2, %v19694_v60, 0.0 }
0x15e9   :  { %8684 = vrot.lane.b32.xlu1 %v19376_v47, %s21617_s2 }
0x15f2   :  { %8636 = vrot.lane.b32.xlu0 %v19368_v20, %s21617_s2 }
0x160d   :  { %8319 = vadd.xlane.f32.xlu1 %v8318_v57 }
0x1611   :  { %8322 = vadd.xlane.f32.xlu0 %v8321_v37 }
0x161e   :  { %8784 = vrot.lane.b32.xlu1 %v19354_v26, %s21618_s25 }
0x1622   :  { %8782 = vrot.lane.b32.xlu1 %v19354_v26, %s21619_s26 }
0x1626   :  { %8884 = vrot.lane.b32.xlu1 %v19360_v13, %s21618_s25 }
0x1627   :  { %8734 = vrot.lane.b32.xlu0 %v19348_v10, %s21618_s25 }
0x162a   :  { %8882 = vrot.lane.b32.xlu1 %v19360_v13, %s21619_s26 }
0x162b   :  { %8732 = vrot.lane.b32.xlu0 %v19348_v10, %s21619_s26 }
0x162e   :  { %8984 = vrot.lane.b32.xlu1 %v19370_v51, %s21618_s25 }
0x162f   :  { %8834 = vrot.lane.b32.xlu0 %v19352_v18, %s21618_s25 }
0x1632   :  { %8982 = vrot.lane.b32.xlu1 %v19370_v51, %s21619_s26 }
0x1633   :  { %8832 = vrot.lane.b32.xlu0 %v19352_v18, %s21619_s26 }
0x1636   :  { %9084 = vrot.lane.b32.xlu1 %v19376_v47, %s21618_s25 }
0x1637   :  { %8934 = vrot.lane.b32.xlu0 %v19364_v7, %s21618_s25 }
0x163a   :  { %9082 = vrot.lane.b32.xlu1 %v19376_v47, %s21619_s26 }
0x163b   :  { %8932 = vrot.lane.b32.xlu0 %v19364_v7, %s21619_s26 }
0x163e   :  { %9236 = vrot.lane.b32.xlu1 %v19348_v10, %s21620_s27 }
0x163f   :  { %9034 = vrot.lane.b32.xlu0 %v19368_v20, %s21618_s25 }
0x1642   :  { %9332 = vrot.lane.b32.xlu1 %v19352_v18, %s21620_s27 }
0x1643   :  { %9032 = vrot.lane.b32.xlu0 %v19368_v20, %s21619_s26 }
0x1646   :  { %9380 = vrot.lane.b32.xlu1 %v19360_v13, %s21620_s27 }
0x1647   :  { %9284 = vrot.lane.b32.xlu0 %v19354_v26, %s21620_s27 }
0x1651   :  { %v8302_v25 = vpop.xlane.xlu1 %8301 }
0x1652   :  { %16918 = vrcp.f32 %v8302_v25 }
0x1655   :  { %v8305_v33 = vpop.xlane.xlu0 %8304 }
0x1656   :  { %16920 = vrcp.f32 %v8305_v33 }
0x1659   :  { %v8308_v53 = vpop.xlane.xlu1 %8307 }
0x165a   :  { %16922 = vrcp.f32 %v8308_v53 }
0x165d   :  { %v8311_v39 = vpop.xlane.xlu0 %8310 }
0x165e   :  { %16924 = vrcp.f32 %v8311_v39 }
0x165f   :  { %v16919_v21 = vpop.eup %16918 }
0x1660   :  { %v8332_v32 = vmul.f32 %v16919_v21, %v19661_v52 }
0x1661   :  { %v8314_v44 = vpop.xlane.xlu1 %8313 }
0x1662   :  { %v8340_v41 = vpack.c.bf16 %v8332_v32, %v8332_v32  ;;  %16926 = vrcp.f32 %v8314_v44 }
0x1663   :  { %v16921_v0 = vpop.eup %16920 }
0x1664   :  { %v8333_v6 = vmul.f32 %v16921_v0, %v19665_v58  ;;  %16056 = vmatmul.mubr.msk.bf16.vlgmr.msra.gmra.mxu0 %vm177_vm2, %v8340_v41 }
0x1665   :  { %16066 = vmatpush3.bf16.msra.mxu0 %v8450_v5  ;;  %v8317_v36 = vpop.xlane.xlu0 %8316  ;;  %16067 = vmatprep.mubr.msk.bf16.mxu0 %vm17039_vm1, %v21616_v49  ;;  %v8685_v11 = vpop.permute.xlu1 %8684 }
0x1666   :  { %v8341_v43 = vpack.c.bf16 %v8333_v6, %v8333_v6  ;;  %16928 = vrcp.f32 %v8317_v36  ;;  %16077 = vmatprep.subr.bf16.mxu0 %v21616_v49  ;;  %v8690_v63 = vsel %vm676_vm3, %v8685_v11, 0 }
0x1667   :  { %v16923_v52 = vpop.eup %16922 }
0x1668   :  { %v8334_v61 = vmul.f32 %v16923_v52, %v19669_v56  ;;  %16062 = vmatmul.mubr.msk.bf16.vlgmr.msra.gmra.mxu1 %vm177_vm2, %v8341_v43 }
0x1669   :  { %16072 = vmatpush3.bf16.msra.mxu1 %v8498_v1  ;;  %16073 = vmatprep.mubr.msk.bf16.mxu1 %vm17039_vm1, %v21616_v49  ;;  %v8637_v24 = vpop.permute.xlu0 %8636 }
0x166a   :  { %v8342_v15 = vpack.c.bf16 %v8334_v61, %v8334_v61  ;;  %16083 = vmatprep.subr.bf16.mxu1 %v21616_v49  ;;  %v8642_v55 = vsel %vm676_vm3, %v8637_v24, 0 }
0x166b   :  { %v16925_v58 = vpop.eup %16924 }
0x166c   :  { %v8335_v16 = vmul.f32 %v16925_v58, %v19673_v62  ;;  %16068 = vmatmul.mubr.msk.bf16.vlgmr.msra.gmra.mxu0 %vm177_vm2, %v8342_v15 }
0x166d   :  { %16078 = vmatpush3.bf16.msra.mxu0 %v8546_v45  ;;  %16079 = vmatprep.mubr.msk.bf16.mxu0 %vm17039_vm1, %v21616_v49 }
0x166e   :  { %v8343_v14 = vpack.c.bf16 %v8335_v16, %v8335_v16  ;;  %16089 = vmatprep.subr.bf16.mxu0 %v21616_v49 }
0x166f   :  { %v16927_v56 = vpop.eup %16926 }
0x1670   :  { %v8336_v2 = vmul.f32 %v16927_v56, %v19677_v29  ;;  %16074 = vmatmul.mubr.msk.bf16.vlgmr.msra.gmra.mxu1 %vm177_vm2, %v8343_v14 }
0x1671   :  { %16084 = vmatpush3.bf16.msra.mxu1 %v8594_v9  ;;  %16085 = vmatprep.mubr.msk.bf16.mxu1 %vm17039_vm1, %v21616_v49 }
0x1672   :  { %v8344_v62 = vpack.c.bf16 %v8336_v2, %v8336_v2  ;;  %16095 = vmatprep.subr.bf16.mxu1 %v21616_v49 }
0x1673   :  { %v16929_v46 = vpop.eup %16928 }
0x1674   :  { %v8337_v54 = vmul.f32 %v16929_v46, %v19681_v28  ;;  %16080 = vmatmul.mubr.msk.bf16.vlgmr.msra.gmra.mxu0 %vm177_vm2, %v8344_v62 }
0x1675   :  { %16090 = vmatpush3.bf16.msra.mxu0 %v8642_v55  ;;  %16091 = vmatprep.mubr.msk.bf16.mxu0 %vm17039_vm1, %v21616_v49 }
0x1676   :  { %v8345_v29 = vpack.c.bf16 %v8337_v54, %v8337_v54  ;;  %16101 = vmatprep.subr.bf16.mxu0 %v21616_v49 }
0x1678   :  { %16086 = vmatmul.mubr.msk.bf16.vlgmr.msra.gmra.mxu1 %vm177_vm2, %v8345_v29 }
0x1679   :  { %16096 = vmatpush3.bf16.msra.mxu1 %v8690_v63  ;;  %16097 = vmatprep.mubr.msk.bf16.mxu1 %vm17039_vm1, %v21616_v49 }
0x167a   :  { %16107 = vmatprep.subr.bf16.mxu1 %v21616_v49 }
0x1696   :  { %v8320_v28 = vpop.xlane.xlu1 %8319 }
0x1697   :  { %16930 = vrcp.f32 %v8320_v28 }
0x169a   :  { %v8323_v57 = vpop.xlane.xlu0 %8322  ;;  %v8785_v37 = vpop.permute.xlu1 %8784 }
0x169b   :  { %16932 = vrcp.f32 %v8323_v57 }
0x169e   :  { %v8735_v19 = vpop.permute.xlu0 %8734  ;;  %v8783_v23 = vpop.permute.xlu1 %8782 }
0x169f   :  { %v8740_v5 = vsel %vm177_vm2, %v8735_v19, 0 }
0x16a2   :  { %v8733_v25 = vpop.permute.xlu0 %8732  ;;  %v8885_v33 = vpop.permute.xlu1 %8884 }
0x16a3   :  { %v8890_v61 = vsel %vm177_vm2, %v8885_v33, 0 }
0x16a4   :  { %v16931_v53 = vpop.eup %16930 }
0x16a5   :  { %v8338_v39 = vmul.f32 %v16931_v53, %v19690_v38  ;;  %v8790_v38 = vsel %vm177_vm2, %v8785_v37, 0 }
0x16a6   :  { %v8835_v21 = vpop.permute.xlu0 %8834  ;;  %v8883_v41 = vpop.permute.xlu1 %8882 }
0x16a7   :  { %v8346_v32 = vpack.c.bf16 %v8338_v39, %v8338_v39 }
0x16a8   :  { %v16933_v44 = vpop.eup %16932 }
0x16a9   :  { %v8339_v0 = vmul.f32 %v16933_v44, %v19694_v60  ;;  %16092 = vmatmul.mubr.msk.bf16.vlgmr.msra.gmra.mxu0 %vm177_vm2, %v8346_v32  ;;  %v8840_v60 = vsel %vm177_vm2, %v8835_v21, 0 }
0x16aa   :  { %16102 = vmatpush3.bf16.xpose.msra.mxu0 %v8740_v5  ;;  %16103 = vmatprep.mubr.msk.bf16.mxu0 %vm17039_vm1, %v21616_v49  ;;  %v8833_v36 = vpop.permute.xlu0 %8832  ;;  %v8985_v43 = vpop.permute.xlu1 %8984 }
0x16ab   :  { %v8347_v6 = vpack.c.bf16 %v8339_v0, %v8339_v0  ;;  %16113 = vmatprep.subr.bf16.mxu0 %v21616_v49  ;;  %v8990_v16 = vsel %vm177_vm2, %v8985_v43, 0 }
0x16ad   :  { %16098 = vmatmul.mubr.msk.bf16.vlgmr.msra.gmra.mxu1 %vm177_vm2, %v8347_v6 }
0x16ae   :  { %16108 = vmatpush3.bf16.xpose.msra.mxu1 %v8790_v38  ;;  %16109 = vmatprep.mubr.msk.bf16.mxu1 %vm17039_vm1, %v21616_v49  ;;  %v8935_v52 = vpop.permute.xlu0 %8934  ;;  %v8983_v1 = vpop.permute.xlu1 %8982 }
0x16af   :  { %16119 = vmatprep.subr.bf16.mxu1 %v21616_v49  ;;  %v8940_v58 = vsel %vm177_vm2, %v8935_v52, 0 }
0x16b1   :  { %16104 = vmatmul.mubr.msk.bf16.vlgmr.msra.gmra.mxu0 %vm177_vm2, %v8733_v25 }
0x16b2   :  { %16114 = vmatpush3.bf16.xpose.msra.mxu0 %v8840_v60  ;;  %16115 = vmatprep.mubr.msk.bf16.mxu0 %vm17039_vm1, %v21616_v49  ;;  %v8933_v15 = vpop.permute.xlu0 %8932  ;;  %v9085_v45 = vpop.permute.xlu1 %9084 }
0x16b3   :  { %16125 = vmatprep.subr.bf16.mxu0 %v21616_v49  ;;  %v9090_v24 = vsel %vm177_vm2, %v9085_v45, 0 }
0x16b5   :  { %16110 = vmatmul.mubr.msk.bf16.vlgmr.msra.gmra.mxu1 %vm177_vm2, %v8783_v23 }
0x16b6   :  { %16120 = vmatpush3.bf16.xpose.msra.mxu1 %v8890_v61  ;;  %16121 = vmatprep.mubr.msk.bf16.mxu1 %vm17039_vm1, %v21616_v49  ;;  %v9035_v14 = vpop.permute.xlu0 %9034  ;;  %v9083_v56 = vpop.permute.xlu1 %9082 }
0x16b7   :  { %16131 = vmatprep.subr.bf16.mxu1 %v21616_v49  ;;  %v9040_v9 = vsel %vm177_vm2, %v9035_v14, 0 }
0x16b9   :  { %16116 = vmatmul.mubr.msk.bf16.vlgmr.msra.gmra.mxu0 %vm177_vm2, %v8833_v36 }
0x16ba   :  { %16126 = vmatpush3.bf16.xpose.msra.mxu0 %v8940_v58  ;;  %16127 = vmatprep.mubr.msk.bf16.mxu0 %vm17039_vm1, %v21616_v49  ;;  %v9033_v2 = vpop.permute.xlu0 %9032  ;;  %v9237_v62 = vpop.permute.xlu1 %9236 }
0x16bb   :  { %16137 = vmatprep.subr.bf16.mxu0 %v21616_v49  ;;  %v9242_v46 = vsel %vm676_vm3, %v9237_v62, 0 }
0x16bd   :  { %16122 = vmatmul.mubr.msk.bf16.vlgmr.msra.gmra.mxu1 %vm177_vm2, %v8883_v41 }
0x16be   :  { %16132 = vmatpush3.bf16.xpose.msra.mxu1 %v8990_v16  ;;  %16133 = vmatprep.mubr.msk.bf16.mxu1 %vm17039_vm1, %v21616_v49  ;;  %v9285_v54 = vpop.permute.xlu0 %9284 }
0x16bf   :  { %16143 = vmatprep.subr.bf16.mxu1 %v21616_v49  ;;  %v9290_v55 = vsel %vm676_vm3, %v9285_v54, 0 }
0x16c1   :  { %16128 = vmatmul.mubr.msk.bf16.vlgmr.msra.gmra.mxu0 %vm177_vm2, %v8933_v15 }
0x16c2   :  { %16138 = vmatpush3.bf16.xpose.msra.mxu0 %v9040_v9  ;;  %16139 = vmatprep.mubr.msk.bf16.mxu0 %vm17039_vm1, %v21616_v49 }
0x16c3   :  { %16149 = vmatprep.subr.bf16.mxu0 %v21616_v49 }
0x16c5   :  { %16134 = vmatmul.mubr.msk.bf16.vlgmr.msra.gmra.mxu1 %vm177_vm2, %v8983_v1 }
0x16c6   :  { %16144 = vmatpush3.bf16.xpose.msra.mxu1 %v9090_v24  ;;  %16145 = vmatprep.mubr.msk.bf16.mxu1 %vm17039_vm1, %v21616_v49 }
0x16c7   :  { %16155 = vmatprep.subr.bf16.mxu1 %v21616_v49 }
0x16c9   :  { %16140 = vmatmul.mubr.msk.bf16.vlgmr.msra.gmra.mxu0 %vm177_vm2, %v9033_v2 }
0x16ca   :  { %16150 = vmatpush3.bf16.msra.mxu0 %v9242_v46  ;;  %16151 = vmatprep.mubr.msk.bf16.mxu0 %vm17039_vm1, %v21616_v49 }
0x16cb   :  { %16161 = vmatprep.subr.bf16.mxu0 %v21616_v49 }
0x16cd   :  { %16146 = vmatmul.mubr.msk.bf16.vlgmr.msra.gmra.mxu1 %vm177_vm2, %v9083_v56 }
0x16ce   :  { %16156 = vmatpush3.bf16.msra.mxu1 %v9290_v55  ;;  %16157 = vmatprep.mubr.msk.bf16.mxu1 %vm17039_vm1, %v21616_v49 }
0x16cf   :  { %16167 = vmatprep.subr.bf16.mxu1 %v21616_v49 }
0x1724   :  { %v19828_v11 = vpop.f32.mrf.mxu0 }
0x1726   :  { %v16057_v29 = vpop.f32.mrf.mxu0 }
0x1728   :  { %v8393_v63 = vpop.f32.mrf.mxu0  ;;  %v19830_v28 = vpop.f32.mrf.mxu1 }
0x1729   :  { %v16386_v57 = vpack.i.bf16 %v19830_v28, %v19828_v11 }
0x172a   :  { %v16058_v37 = vpop.f32.mrf.mxu0  ;;  %v16063_v19 = vpop.f32.mrf.mxu1 }
0x172c   :  { %v8441_v23 = vpop.f32.mrf.mxu1  ;;  %v19834_v25 = vpop.f32.mrf.mxu0 }
0x172e   :  { %v16064_v33 = vpop.f32.mrf.mxu1  ;;  %v16069_v53 = vpop.f32.mrf.mxu0 }
0x1730   :  { %v8489_v39 = vpop.f32.mrf.mxu0  ;;  %v19836_v21 = vpop.f32.mrf.mxu1 }
0x1731   :  { %v16391_v32 = vpack.i.bf16 %v19836_v21, %v19834_v25 }
0x1732   :  { %v16070_v44 = vpop.f32.mrf.mxu0  ;;  %v16075_v41 = vpop.f32.mrf.mxu1 }
0x1734   :  { %v8537_v0 = vpop.f32.mrf.mxu1  ;;  %v19840_v5 = vpop.f32.mrf.mxu0 }
0x1736   :  { %v16076_v6 = vpop.f32.mrf.mxu1  ;;  %v16081_v36 = vpop.f32.mrf.mxu0 }
0x1738   :  { %v8585_v38 = vpop.f32.mrf.mxu0  ;;  %v19842_v43 = vpop.f32.mrf.mxu1 }
0x173a   :  { %v16082_v52 = vpop.f32.mrf.mxu0  ;;  %v16087_v1 = vpop.f32.mrf.mxu1 }
0x173c   :  { %v8633_v61 = vpop.f32.mrf.mxu1 }
0x173e   :  { %v16088_v15 = vpop.f32.mrf.mxu1 }
0x1769   :  { %v19846_v58 = vpop.f32.mrf.mxu0 }
0x176b   :  { %v16093_v45 = vpop.f32.mrf.mxu0 }
0x176d   :  { %v8681_v16 = vpop.f32.mrf.mxu0  ;;  %v19848_v14 = vpop.f32.mrf.mxu1 }
0x176f   :  { %v16094_v9 = vpop.f32.mrf.mxu0  ;;  %v16099_v2 = vpop.f32.mrf.mxu1 }
0x1771   :  { %v8729_v24 = vpop.f32.mrf.mxu1  ;;  %v8776_v62 = vpop.f32.mrf.mxu0 }
0x1772   :  { %v9132_v46 = vmul.f32 0.35355338, %v8776_v62 }
0x1773   :  { %v16100_v54 = vpop.f32.mrf.mxu1  ;;  %v16105_v55 = vpop.f32.mrf.mxu0 }
0x1774   :  { %v9140_v29 = vsel %vm177_vm2, %v9132_v46, -inf }
0x1775   :  { %9141 = vmax.xlane.f32.xlu0 %v9140_v29  ;;  %v8779_v63 = vpop.f32.mrf.mxu0  ;;  %v8826_v37 = vpop.f32.mrf.mxu1 }
0x1776   :  { %v9133_v19 = vmul.f32 0.35355338, %v8826_v37 }
0x1777   :  { %v16106_v23 = vpop.f32.mrf.mxu0  ;;  %v16111_v33 = vpop.f32.mrf.mxu1 }
0x1778   :  { %v9143_v53 = vsel %vm177_vm2, %v9133_v19, -inf }
0x1779   :  { %v8876_v39 = vpop.f32.mrf.mxu0  ;;  %9144 = vmax.xlane.f32.xlu1 %v9143_v53  ;;  %v8829_v44 = vpop.f32.mrf.mxu1 }
0x177a   :  { %v9134_v41 = vmul.f32 0.35355338, %v8876_v39 }
0x177b   :  { %v16112_v0 = vpop.f32.mrf.mxu1  ;;  %v16117_v6 = vpop.f32.mrf.mxu0 }
0x177c   :  { %v9146_v36 = vsel %vm177_vm2, %v9134_v41, -inf }
0x177d   :  { %9147 = vmax.xlane.f32.xlu0 %v9146_v36  ;;  %v8879_v38 = vpop.f32.mrf.mxu0  ;;  %v8926_v52 = vpop.f32.mrf.mxu1 }
0x177e   :  { %v9135_v1 = vmul.f32 0.35355338, %v8926_v52 }
0x177f   :  { %v16118_v61 = vpop.f32.mrf.mxu0  ;;  %v16123_v15 = vpop.f32.mrf.mxu1 }
0x1780   :  { %v9149_v45 = vsel %vm177_vm2, %v9135_v1, -inf }
0x1781   :  { %v8976_v16 = vpop.f32.mrf.mxu0  ;;  %9150 = vmax.xlane.f32.xlu0 %v9149_v45  ;;  %v8929_v9 = vpop.f32.mrf.mxu1 }
0x1782   :  { %v9136_v2 = vmul.f32 0.35355338, %v8976_v16 }
0x1783   :  { %v16124_v24 = vpop.f32.mrf.mxu1  ;;  %v16129_v62 = vpop.f32.mrf.mxu0 }
0x1784   :  { %v9152_v54 = vsel %vm177_vm2, %v9136_v2, -inf  ;;  %v19867_v62 = vpop.permute.xlu1 %9332 }
0x1785   :  { %v8979_v55 = vpop.f32.mrf.mxu0  ;;  %9153 = vmax.xlane.f32.xlu1 %v9152_v54  ;;  %v9026_v29 = vpop.f32.mrf.mxu1 }
0x1786   :  { %v9137_v63 = vmul.f32 0.35355338, %v9026_v29 }
0x1787   :  { %v16130_v37 = vpop.f32.mrf.mxu0  ;;  %v16135_v23 = vpop.f32.mrf.mxu1 }
0x1788   :  { %v9155_v33 = vsel %vm177_vm2, %v9137_v63, -inf  ;;  %v19869_v54 = vpop.permute.xlu1 %9380 }
0x1789   :  { %v9076_v53 = vpop.f32.mrf.mxu0  ;;  %9156 = vmax.xlane.f32.xlu0 %v9155_v33  ;;  %v9029_v39 = vpop.f32.mrf.mxu1 }
0x178a   :  { %v19858_v44 = vmul.f32 0.35355338, %v9076_v53 }
0x178b   :  { %v16136_v0 = vpop.f32.mrf.mxu1  ;;  %v16141_v6 = vpop.f32.mrf.mxu0 }
0x178c   :  { %v9158_v36 = vsel %vm177_vm2, %v19858_v44, -inf }
0x178d   :  { %v9079_v38 = vpop.f32.mrf.mxu0  ;;  %9159 = vmax.xlane.f32.xlu1 %v9158_v36  ;;  %v9126_v52 = vpop.f32.mrf.mxu1 }
0x178e   :  { %v9139_v61 = vmul.f32 0.35355338, %v9126_v52 }
0x178f   :  { %v16142_v15 = vpop.f32.mrf.mxu0  ;;  %v16147_v45 = vpop.f32.mrf.mxu1 }
0x1790   :  { %v9161_v16 = vsel %vm177_vm2, %v9139_v61, -inf }
0x1791   :  { %9162 = vmax.xlane.f32.xlu0 %v9161_v16  ;;  %v9129_v9 = vpop.f32.mrf.mxu1 }
0x1793   :  { %v16148_v24 = vpop.f32.mrf.mxu1 }
0x179e   :  { %9476 = vrot.lane.b32.xlu1 %v19370_v51, %s21620_s27 }
0x17a7   :  { %9428 = vrot.lane.b32.xlu0 %v19364_v7, %s21620_s27 }
0x17fe   :  { %v9142_v55 = vpop.xlane.xlu0 %9141 }
0x17ff   :  { %v9164_v29 = vsub.f32 %v9132_v46, %v9142_v55 }
0x1801   :  { %v9172_v37 = vmul.f32 1.442695, %v9164_v29 }
0x1802   :  { %v9145_v23 = vpop.xlane.xlu1 %9144 }
0x1803   :  { %16934 = vpow2.f32 %v9172_v37  ;;  %v9165_v33 = vsub.f32 %v9133_v19, %v9145_v23 }
0x1805   :  { %v9174_v53 = vmul.f32 1.442695, %v9165_v33 }
0x1806   :  { %v9148_v39 = vpop.xlane.xlu0 %9147 }
0x1807   :  { %16936 = vpow2.f32 %v9174_v53  ;;  %v9166_v0 = vsub.f32 %v9134_v41, %v9148_v39 }
0x1809   :  { %v9176_v6 = vmul.f32 1.442695, %v9166_v0 }
0x180a   :  { %v9151_v36 = vpop.xlane.xlu0 %9150 }
0x180b   :  { %16938 = vpow2.f32 %v9176_v6  ;;  %v9167_v38 = vsub.f32 %v9135_v1, %v9151_v36 }
0x180d   :  { %v9178_v52 = vmul.f32 1.442695, %v9167_v38 }
0x180e   :  { %v9154_v15 = vpop.xlane.xlu1 %9153 }
0x180f   :  { %16940 = vpow2.f32 %v9178_v52  ;;  %v9168_v45 = vsub.f32 %v9136_v2, %v9154_v15 }
0x1810   :  { %v19871_v16 = vpop.eup %16934 }
0x1811   :  { %v9180_v9 = vmul.f32 1.442695, %v9168_v45  ;;  %v9188_v46 = vsel %vm177_vm2, %v19871_v16, 0.0 }
0x1812   :  { %9189 = vadd.xlane.f32.xlu1 %v9188_v46  ;;  %v9157_v19 = vpop.xlane.xlu0 %9156 }
0x1813   :  { %16942 = vpow2.f32 %v9180_v9  ;;  %v9169_v24 = vsub.f32 %v9137_v63, %v9157_v19 }
0x1814   :  { %v19875_v55 = vpop.eup %16936 }
0x1815   :  { %v9182_v41 = vmul.f32 1.442695, %v9169_v24  ;;  %v9191_v1 = vsel %vm177_vm2, %v19875_v55, 0.0 }
0x1816   :  { %9192 = vadd.xlane.f32.xlu0 %v9191_v1  ;;  %v9160_v0 = vpop.xlane.xlu1 %9159 }
0x1817   :  { %16944 = vpow2.f32 %v9182_v41  ;;  %v9170_v6 = vsub.f32 %v19858_v44, %v9160_v0 }
0x1818   :  { %v19879_v29 = vpop.eup %16938 }
0x1819   :  { %v9194_v2 = vsel %vm177_vm2, %v19879_v29, 0.0  ;;  %v9184_v38 = vmul.f32 1.442695, %v9170_v6  ;;  %v9338_v6 = vsel %vm676_vm3, %v19867_v62, 0 }
0x181a   :  { %9195 = vadd.xlane.f32.xlu1 %v9194_v2  ;;  %v9163_v36 = vpop.xlane.xlu0 %9162  ;;  %v9477_v44 = vpop.permute.xlu1 %9476 }
0x181b   :  { %v9171_v52 = vsub.f32 %v9139_v61, %v9163_v36  ;;  %16946 = vpow2.f32 %v9184_v38 }
0x181c   :  { %v19883_v37 = vpop.eup %16940 }
0x181d   :  { %v9197_v23 = vsel %vm177_vm2, %v19883_v37, 0.0  ;;  %v9186_v15 = vmul.f32 1.442695, %v9171_v52 }
0x181e   :  { %9198 = vadd.xlane.f32.xlu0 %v9197_v23  ;;  %v9429_v61 = vpop.permute.xlu0 %9428 }
0x181f   :  { %16948 = vpow2.f32 %v9186_v15  ;;  %v9386_v15 = vsel %vm676_vm3, %v19869_v54, 0 }
0x1820   :  { %v19887_v63 = vpop.eup %16942 }
0x1821   :  { %v9200_v33 = vsel %vm177_vm2, %v19887_v63, 0.0 }
0x1822   :  { %9201 = vadd.xlane.f32.xlu1 %v9200_v33 }
0x1824   :  { %v19891_v53 = vpop.eup %16944 }
0x1825   :  { %v9203_v39 = vsel %vm177_vm2, %v19891_v53, 0.0 }
0x1826   :  { %9204 = vadd.xlane.f32.xlu0 %v9203_v39 }
0x1828   :  { %v19900_v45 = vpop.eup %16946 }
0x1829   :  { %v9206_v9 = vsel %vm177_vm2, %v19900_v45, 0.0 }
0x182c   :  { %v19904_v46 = vpop.eup %16948 }
0x182d   :  { %v9209_v19 = vsel %vm177_vm2, %v19904_v46, 0.0 }
0x1833   :  { %9572 = vrot.lane.b32.xlu1 %v19376_v47, %s21620_s27 }
0x183c   :  { %9524 = vrot.lane.b32.xlu0 %v19368_v20, %s21620_s27 }
0x1857   :  { %9207 = vadd.xlane.f32.xlu1 %v9206_v9 }
0x185b   :  { %9210 = vadd.xlane.f32.xlu0 %v9209_v19  ;;  %v9434_v19 = vsel %vm676_vm3, %v9429_v61, 0 }
0x1868   :  { %9672 = vrot.lane.b32.xlu1 %v19354_v26, %s21621_s28 }
0x186c   :  { %9670 = vrot.lane.b32.xlu1 %v19354_v26, %s21622_s17 }
0x1870   :  { %9772 = vrot.lane.b32.xlu1 %v19360_v13, %s21621_s28 }
0x1871   :  { %9622 = vrot.lane.b32.xlu0 %v19348_v10, %s21621_s28 }
0x1874   :  { %9770 = vrot.lane.b32.xlu1 %v19360_v13, %s21622_s17 }
0x1875   :  { %9620 = vrot.lane.b32.xlu0 %v19348_v10, %s21622_s17 }
0x1878   :  { %9872 = vrot.lane.b32.xlu1 %v19370_v51, %s21621_s28 }
0x1879   :  { %9722 = vrot.lane.b32.xlu0 %v19352_v18, %s21621_s28 }
0x187c   :  { %9870 = vrot.lane.b32.xlu1 %v19370_v51, %s21622_s17 }
0x187d   :  { %9720 = vrot.lane.b32.xlu0 %v19352_v18, %s21622_s17 }
0x1880   :  { %9972 = vrot.lane.b32.xlu1 %v19376_v47, %s21621_s28 }
0x1881   :  { %9822 = vrot.lane.b32.xlu0 %v19364_v7, %s21621_s28 }
0x1884   :  { %9970 = vrot.lane.b32.xlu1 %v19376_v47, %s21622_s17 }
0x1885   :  { %9820 = vrot.lane.b32.xlu0 %v19364_v7, %s21622_s17 }
0x1888   :  { %10124 = vrot.lane.b32.xlu1 %v19348_v10, %s21623_s0 }
0x1889   :  { %9922 = vrot.lane.b32.xlu0 %v19368_v20, %s21621_s28 }
0x188d   :  { %9920 = vrot.lane.b32.xlu0 %v19368_v20, %s21622_s17 }
0x189b   :  { %v9190_v24 = vpop.xlane.xlu1 %9189 }
0x189c   :  { %16950 = vrcp.f32 %v9190_v24 }
0x189f   :  { %v9193_v41 = vpop.xlane.xlu0 %9192 }
0x18a0   :  { %16952 = vrcp.f32 %v9193_v41  ;;  %v9482_v41 = vsel %vm676_vm3, %v9477_v44, 0 }
0x18a3   :  { %v9196_v1 = vpop.xlane.xlu1 %9195 }
0x18a4   :  { %16954 = vrcp.f32 %v9196_v1 }
0x18a7   :  { %v9199_v2 = vpop.xlane.xlu0 %9198 }
0x18a8   :  { %16956 = vrcp.f32 %v9199_v2 }
0x18a9   :  { %v16951_v23 = vpop.eup %16950 }
0x18aa   :  { %v9220_v33 = vmul.f32 %v16951_v23, %v19871_v16 }
0x18ab   :  { %v9202_v10 = vpop.xlane.xlu1 %9201 }
0x18ac   :  { %v9228_v39 = vpack.c.bf16 %v9220_v33, %v9220_v33  ;;  %16958 = vrcp.f32 %v9202_v10 }
0x18ad   :  { %v16953_v0 = vpop.eup %16952 }
0x18ae   :  { %v9221_v36 = vmul.f32 %v16953_v0, %v19875_v55  ;;  %16152 = vmatmul.mubr.msk.bf16.vlgmr.msra.gmra.mxu0 %vm177_vm2, %v9228_v39 }
0x18af   :  { %16162 = vmatpush3.bf16.msra.mxu0 %v9338_v6  ;;  %v9205_v38 = vpop.xlane.xlu0 %9204  ;;  %16163 = vmatprep.mubr.msk.bf16.mxu0 %vm17039_vm1, %v21616_v49  ;;  %v9573_v44 = vpop.permute.xlu1 %9572 }
0x18b0   :  { %v9229_v52 = vpack.c.bf16 %v9221_v36, %v9221_v36  ;;  %16960 = vrcp.f32 %v9205_v38  ;;  %16173 = vmatprep.subr.bf16.mxu0 %v21616_v49  ;;  %v9578_v10 = vsel %vm676_vm3, %v9573_v44, 0 }
0x18b1   :  { %v16955_v16 = vpop.eup %16954 }
0x18b2   :  { %v9222_v9 = vmul.f32 %v16955_v16, %v19879_v29  ;;  %16158 = vmatmul.mubr.msk.bf16.vlgmr.msra.gmra.mxu1 %vm177_vm2, %v9229_v52 }
0x18b3   :  { %16168 = vmatpush3.bf16.msra.mxu1 %v9386_v15  ;;  %16169 = vmatprep.mubr.msk.bf16.mxu1 %vm17039_vm1, %v21616_v49  ;;  %v9525_v2 = vpop.permute.xlu0 %9524 }
0x18b4   :  { %v9230_v62 = vpack.c.bf16 %v9222_v9, %v9222_v9  ;;  %16179 = vmatprep.subr.bf16.mxu1 %v21616_v49  ;;  %v9530_v33 = vsel %vm676_vm3, %v9525_v2, 0 }
0x18b5   :  { %v16957_v55 = vpop.eup %16956 }
0x18b6   :  { %v9223_v24 = vmul.f32 %v16957_v55, %v19883_v37  ;;  %16164 = vmatmul.mubr.msk.bf16.vlgmr.msra.gmra.mxu0 %vm177_vm2, %v9230_v62 }
0x18b7   :  { %16174 = vmatpush3.bf16.msra.mxu0 %v9434_v19  ;;  %16175 = vmatprep.mubr.msk.bf16.mxu0 %vm17039_vm1, %v21616_v49 }
0x18b8   :  { %v9231_v54 = vpack.c.bf16 %v9223_v24, %v9223_v24  ;;  %16185 = vmatprep.subr.bf16.mxu0 %v21616_v49 }
0x18b9   :  { %v16959_v29 = vpop.eup %16958 }
0x18ba   :  { %v9224_v1 = vmul.f32 %v16959_v29, %v19887_v63  ;;  %16170 = vmatmul.mubr.msk.bf16.vlgmr.msra.gmra.mxu1 %vm177_vm2, %v9231_v54 }
0x18bb   :  { %16180 = vmatpush3.bf16.msra.mxu1 %v9482_v41  ;;  %16181 = vmatprep.mubr.msk.bf16.mxu1 %vm17039_vm1, %v21616_v49 }
0x18bc   :  { %v9232_v37 = vpack.c.bf16 %v9224_v1, %v9224_v1  ;;  %16191 = vmatprep.subr.bf16.mxu1 %v21616_v49 }
0x18bd   :  { %v16961_v61 = vpop.eup %16960 }
0x18be   :  { %v9225_v23 = vmul.f32 %v16961_v61, %v19891_v53  ;;  %16176 = vmatmul.mubr.msk.bf16.vlgmr.msra.gmra.mxu0 %vm177_vm2, %v9232_v37 }
0x18bf   :  { %16186 = vmatpush3.bf16.msra.mxu0 %v9530_v33  ;;  %16187 = vmatprep.mubr.msk.bf16.mxu0 %vm17039_vm1, %v21616_v49 }
0x18c0   :  { %v9233_v63 = vpack.c.bf16 %v9225_v23, %v9225_v23  ;;  %16197 = vmatprep.subr.bf16.mxu0 %v21616_v49 }
0x18c2   :  { %16182 = vmatmul.mubr.msk.bf16.vlgmr.msra.gmra.mxu1 %vm177_vm2, %v9233_v63 }
0x18c3   :  { %16192 = vmatpush3.bf16.msra.mxu1 %v9578_v10  ;;  %16193 = vmatprep.mubr.msk.bf16.mxu1 %vm17039_vm1, %v21616_v49 }
0x18c4   :  { %16203 = vmatprep.subr.bf16.mxu1 %v21616_v49 }
0x18e0   :  { %v9208_v53 = vpop.xlane.xlu1 %9207 }
0x18e1   :  { %16962 = vrcp.f32 %v9208_v53 }
0x18e4   :  { %v9211_v39 = vpop.xlane.xlu0 %9210  ;;  %v9673_v0 = vpop.permute.xlu1 %9672 }
0x18e5   :  { %16964 = vrcp.f32 %v9211_v39 }
0x18e8   :  { %v9623_v6 = vpop.permute.xlu0 %9622  ;;  %v9671_v36 = vpop.permute.xlu1 %9670 }
0x18e9   :  { %v9628_v54 = vsel %vm177_vm2, %v9623_v6, 0 }
0x18ec   :  { %v9621_v38 = vpop.permute.xlu0 %9620  ;;  %v9773_v52 = vpop.permute.xlu1 %9772 }
0x18ed   :  { %v9778_v61 = vsel %vm177_vm2, %v9773_v52, 0 }
0x18ee   :  { %v16963_v16 = vpop.eup %16962 }
0x18ef   :  { %v9226_v15 = vmul.f32 %v16963_v16, %v19900_v45  ;;  %v9678_v45 = vsel %vm177_vm2, %v9673_v0, 0 }
0x18f0   :  { %v9723_v9 = vpop.permute.xlu0 %9722  ;;  %v9771_v19 = vpop.permute.xlu1 %9770 }
0x18f1   :  { %v9234_v62 = vpack.c.bf16 %v9226_v15, %v9226_v15 }
0x18f2   :  { %v16965_v55 = vpop.eup %16964 }
0x18f3   :  { %v9227_v24 = vmul.f32 %v16965_v55, %v19904_v46  ;;  %16188 = vmatmul.mubr.msk.bf16.vlgmr.msra.gmra.mxu0 %vm177_vm2, %v9234_v62  ;;  %v9728_v46 = vsel %vm177_vm2, %v9723_v9, 0 }
0x18f4   :  { %16198 = vmatpush3.bf16.xpose.msra.mxu0 %v9628_v54  ;;  %16199 = vmatprep.mubr.msk.bf16.mxu0 %vm17039_vm1, %v21616_v49  ;;  %v9721_v41 = vpop.permute.xlu0 %9720  ;;  %v9873_v1 = vpop.permute.xlu1 %9872 }
0x18f5   :  { %v9235_v29 = vpack.c.bf16 %v9227_v24, %v9227_v24  ;;  %16209 = vmatprep.subr.bf16.mxu0 %v21616_v49  ;;  %v9878_v63 = vsel %vm177_vm2, %v9873_v1, 0 }
0x18f7   :  { %16194 = vmatmul.mubr.msk.bf16.vlgmr.msra.gmra.mxu1 %vm177_vm2, %v9235_v29 }
0x18f8   :  { %16204 = vmatpush3.bf16.xpose.msra.mxu1 %v9678_v45  ;;  %16205 = vmatprep.mubr.msk.bf16.mxu1 %vm17039_vm1, %v21616_v49  ;;  %v9823_v2 = vpop.permute.xlu0 %9822  ;;  %v9871_v37 = vpop.permute.xlu1 %9870 }
0x18f9   :  { %16215 = vmatprep.subr.bf16.mxu1 %v21616_v49  ;;  %v9828_v33 = vsel %vm177_vm2, %v9823_v2, 0 }
0x18fb   :  { %16200 = vmatmul.mubr.msk.bf16.vlgmr.msra.gmra.mxu0 %vm177_vm2, %v9621_v38 }
0x18fc   :  { %16210 = vmatpush3.bf16.xpose.msra.mxu0 %v9728_v46  ;;  %16211 = vmatprep.mubr.msk.bf16.mxu0 %vm17039_vm1, %v21616_v49  ;;  %v9821_v23 = vpop.permute.xlu0 %9820  ;;  %v9973_v44 = vpop.permute.xlu1 %9972 }
0x18fd   :  { %16221 = vmatprep.subr.bf16.mxu0 %v21616_v49  ;;  %v9978_v0 = vsel %vm177_vm2, %v9973_v44, 0 }
0x18ff   :  { %16206 = vmatmul.mubr.msk.bf16.vlgmr.msra.gmra.mxu1 %vm177_vm2, %v9671_v36 }
0x1900   :  { %16216 = vmatpush3.bf16.xpose.msra.mxu1 %v9778_v61  ;;  %16217 = vmatprep.mubr.msk.bf16.mxu1 %vm17039_vm1, %v21616_v49  ;;  %v9923_v10 = vpop.permute.xlu0 %9922  ;;  %v9971_v53 = vpop.permute.xlu1 %9970 }
0x1901   :  { %16227 = vmatprep.subr.bf16.mxu1 %v21616_v49  ;;  %v9928_v39 = vsel %vm177_vm2, %v9923_v10, 0 }
0x1903   :  { %16212 = vmatmul.mubr.msk.bf16.vlgmr.msra.gmra.mxu0 %vm177_vm2, %v9721_v41 }
0x1904   :  { %16222 = vmatpush3.bf16.xpose.msra.mxu0 %v9828_v33  ;;  %16223 = vmatprep.mubr.msk.bf16.mxu0 %vm17039_vm1, %v21616_v49  ;;  %v10125_v6 = vpop.permute.xlu1 %10124  ;;  %v9921_v36 = vpop.permute.xlu0 %9920 }
0x1905   :  { %16233 = vmatprep.subr.bf16.mxu0 %v21616_v49  ;;  %v10130_v38 = vsel %vm676_vm3, %v10125_v6, 0 }
0x1907   :  { %16218 = vmatmul.mubr.msk.bf16.vlgmr.msra.gmra.mxu1 %vm177_vm2, %v9771_v19 }
0x1908   :  { %16228 = vmatpush3.bf16.xpose.msra.mxu1 %v9878_v63  ;;  %16229 = vmatprep.mubr.msk.bf16.mxu1 %vm17039_vm1, %v21616_v49 }
0x1909   :  { %16239 = vmatprep.subr.bf16.mxu1 %v21616_v49 }
0x190b   :  { %16224 = vmatmul.mubr.msk.bf16.vlgmr.msra.gmra.mxu0 %vm177_vm2, %v9821_v23 }
0x190c   :  { %16234 = vmatpush3.bf16.xpose.msra.mxu0 %v9928_v39  ;;  %16235 = vmatprep.mubr.msk.bf16.mxu0 %vm17039_vm1, %v21616_v49 }
0x190d   :  { %16245 = vmatprep.subr.bf16.mxu0 %v21616_v49 }
0x190f   :  { %16230 = vmatmul.mubr.msk.bf16.vlgmr.msra.gmra.mxu1 %vm177_vm2, %v9871_v37 }
0x1910   :  { %16240 = vmatpush3.bf16.xpose.msra.mxu1 %v9978_v0  ;;  %16241 = vmatprep.mubr.msk.bf16.mxu1 %vm17039_vm1, %v21616_v49 }
0x1911   :  { %16251 = vmatprep.subr.bf16.mxu1 %v21616_v49 }
0x1913   :  { %16236 = vmatmul.mubr.msk.bf16.vlgmr.msra.gmra.mxu0 %vm177_vm2, %v9921_v36 }
0x1914   :  { %16246 = vmatpush3.bf16.msra.mxu0 %v10130_v38  ;;  %16247 = vmatprep.mubr.msk.bf16.mxu0 %vm17039_vm1, %v21616_v49 }
0x1915   :  { %16257 = vmatprep.subr.bf16.mxu0 %v21616_v49 }
0x1917   :  { %16242 = vmatmul.mubr.msk.bf16.vlgmr.msra.gmra.mxu1 %vm177_vm2, %v9971_v53 }
0x1918   :  { %16253 = vmatprep.mubr.msk.bf16.mxu1 %vm17039_vm1, %v21616_v49 }
0x196e   :  { %v20030_v52 = vpop.f32.mrf.mxu0 }
0x1970   :  { %v16153_v16 = vpop.f32.mrf.mxu0 }
0x1972   :  { %v9281_v15 = vpop.f32.mrf.mxu0  ;;  %v20032_v9 = vpop.f32.mrf.mxu1 }
0x1974   :  { %v16154_v55 = vpop.f32.mrf.mxu0  ;;  %v16159_v19 = vpop.f32.mrf.mxu1 }
0x1976   :  { %v9329_v24 = vpop.f32.mrf.mxu1  ;;  %v20036_v54 = vpop.f32.mrf.mxu0 }
0x1978   :  { %v16160_v29 = vpop.f32.mrf.mxu1  ;;  %v16165_v41 = vpop.f32.mrf.mxu0 }
0x197a   :  { %v9377_v45 = vpop.f32.mrf.mxu0  ;;  %v20038_v1 = vpop.f32.mrf.mxu1 }
0x197b   :  { %v16401_v46 = vpack.i.bf16 %v20038_v1, %v20036_v54 }
0x197c   :  { %v16166_v2 = vpop.f32.mrf.mxu0  ;;  %v16171_v37 = vpop.f32.mrf.mxu1 }
0x197e   :  { %v9425_v61 = vpop.f32.mrf.mxu1  ;;  %v20042_v23 = vpop.f32.mrf.mxu0 }
0x1980   :  { %v16172_v33 = vpop.f32.mrf.mxu1  ;;  %v16177_v44 = vpop.f32.mrf.mxu0 }
0x1982   :  { %v9473_v63 = vpop.f32.mrf.mxu0  ;;  %v20044_v10 = vpop.f32.mrf.mxu1 }
0x1984   :  { %v16178_v39 = vpop.f32.mrf.mxu0  ;;  %v16183_v0 = vpop.f32.mrf.mxu1 }
0x1986   :  { %v9521_v6 = vpop.f32.mrf.mxu1 }
0x1988   :  { %v16184_v36 = vpop.f32.mrf.mxu1 }
0x19b3   :  { %v20048_v38 = vpop.f32.mrf.mxu0 }
0x19b5   :  { %v16189_v16 = vpop.f32.mrf.mxu0 }
0x19b7   :  { %v9569_v15 = vpop.f32.mrf.mxu0  ;;  %v20050_v55 = vpop.f32.mrf.mxu1 }
0x19b9   :  { %v16190_v24 = vpop.f32.mrf.mxu0  ;;  %v16195_v29 = vpop.f32.mrf.mxu1 }
0x19bb   :  { %v9617_v41 = vpop.f32.mrf.mxu1  ;;  %v9664_v45 = vpop.f32.mrf.mxu0 }
0x19bc   :  { %v10020_v2 = vmul.f32 0.35355338, %v9664_v45 }
0x19bd   :  { %v16196_v37 = vpop.f32.mrf.mxu1  ;;  %v16201_v61 = vpop.f32.mrf.mxu0 }
0x19be   :  { %v10028_v33 = vsel %vm177_vm2, %v10020_v2, -inf }
0x19bf   :  { %10029 = vmax.xlane.f32.xlu0 %v10028_v33  ;;  %v9667_v44 = vpop.f32.mrf.mxu0  ;;  %v9714_v63 = vpop.f32.mrf.mxu1 }
0x19c0   :  { %v10021_v39 = vmul.f32 0.35355338, %v9714_v63 }
0x19c1   :  { %v16202_v0 = vpop.f32.mrf.mxu0  ;;  %v16207_v6 = vpop.f32.mrf.mxu1 }
0x19c2   :  { %v10031_v36 = vsel %vm177_vm2, %v10021_v39, -inf }
0x19c3   :  { %v9764_v16 = vpop.f32.mrf.mxu0  ;;  %10032 = vmax.xlane.f32.xlu1 %v10031_v36  ;;  %v9717_v15 = vpop.f32.mrf.mxu1 }
0x19c4   :  { %v10022_v24 = vmul.f32 0.35355338, %v9764_v16 }
0x19c5   :  { %v16208_v29 = vpop.f32.mrf.mxu1  ;;  %v16213_v41 = vpop.f32.mrf.mxu0 }
0x19c6   :  { %v10034_v45 = vsel %vm177_vm2, %v10022_v24, -inf }
0x19c7   :  { %10035 = vmax.xlane.f32.xlu0 %v10034_v45  ;;  %v9767_v37 = vpop.f32.mrf.mxu0  ;;  %v9814_v61 = vpop.f32.mrf.mxu1 }
0x19c8   :  { %v10023_v19 = vmul.f32 0.35355338, %v9814_v61 }
0x19c9   :  { %v16214_v33 = vpop.f32.mrf.mxu0  ;;  %v16219_v44 = vpop.f32.mrf.mxu1 }
0x19ca   :  { %v10037_v63 = vsel %vm177_vm2, %v10023_v19, -inf }
0x19cb   :  { %v9864_v0 = vpop.f32.mrf.mxu0  ;;  %10038 = vmax.xlane.f32.xlu0 %v10037_v63  ;;  %v9817_v6 = vpop.f32.mrf.mxu1 }
0x19cc   :  { %v20058_v56 = vmul.f32 0.35355338, %v9864_v0 }
0x19cd   :  { %v16220_v36 = vpop.f32.mrf.mxu1  ;;  %v16225_v15 = vpop.f32.mrf.mxu0 }
0x19ce   :  { %v10040_v16 = vsel %vm177_vm2, %v20058_v56, -inf }
0x19cf   :  { %v9867_v29 = vpop.f32.mrf.mxu0  ;;  %10041 = vmax.xlane.f32.xlu1 %v10040_v16  ;;  %v9914_v41 = vpop.f32.mrf.mxu1 }
0x19d0   :  { %v20062_v45 = vmul.f32 0.35355338, %v9914_v41 }
0x19d1   :  { %v16226_v37 = vpop.f32.mrf.mxu0  ;;  %v16231_v61 = vpop.f32.mrf.mxu1 }
0x19d2   :  { %v10043_v33 = vsel %vm177_vm2, %v20062_v45, -inf }
0x19d3   :  { %v9964_v44 = vpop.f32.mrf.mxu0  ;;  %10044 = vmax.xlane.f32.xlu0 %v10043_v33  ;;  %v9917_v63 = vpop.f32.mrf.mxu1 }
0x19d4   :  { %v10026_v0 = vmul.f32 0.35355338, %v9964_v44 }
0x19d5   :  { %v16232_v6 = vpop.f32.mrf.mxu1  ;;  %v16237_v36 = vpop.f32.mrf.mxu0 }
0x19d6   :  { %v10046_v15 = vsel %vm177_vm2, %v10026_v0, -inf }
0x19d7   :  { %v9967_v53 = vpop.f32.mrf.mxu0  ;;  %10047 = vmax.xlane.f32.xlu1 %v10046_v15  ;;  %v10014_v29 = vpop.f32.mrf.mxu1 }
0x19d8   :  { %v10027_v16 = vmul.f32 0.35355338, %v10014_v29 }
0x19d9   :  { %v16238_v60 = vpop.f32.mrf.mxu0  ;;  %v16243_v41 = vpop.f32.mrf.mxu1 }
0x19da   :  { %v10049_v37 = vsel %vm177_vm2, %v10027_v16, -inf }
0x19db   :  { %10050 = vmax.xlane.f32.xlu0 %v10049_v37  ;;  %v10017_v61 = vpop.f32.mrf.mxu1 }
0x19dd   :  { %v16244_v62 = vpop.f32.mrf.mxu1 }
0x19e8   :  { %10220 = vrot.lane.b32.xlu1 %v19352_v18, %s21623_s0 }
0x19ec   :  { %10268 = vrot.lane.b32.xlu1 %v19360_v13, %s21623_s0 }
0x19f1   :  { %10172 = vrot.lane.b32.xlu0 %v19354_v26, %s21623_s0 }
0x1a48   :  { %v10030_v53 = vpop.xlane.xlu0 %10029 }
0x1a49   :  { %v10052_v33 = vsub.f32 %v10020_v2, %v10030_v53 }
0x1a4b   :  { %v10060_v44 = vmul.f32 1.442695, %v10052_v33 }
0x1a4c   :  { %v10033_v63 = vpop.xlane.xlu1 %10032 }
0x1a4d   :  { %16966 = vpow2.f32 %v10060_v44  ;;  %v10053_v60 = vsub.f32 %v10021_v39, %v10033_v63 }
0x1a4f   :  { %v10062_v6 = vmul.f32 1.442695, %v10053_v60 }
0x1a50   :  { %v10036_v36 = vpop.xlane.xlu0 %10035 }
0x1a51   :  { %16968 = vpow2.f32 %v10062_v6  ;;  %v10054_v15 = vsub.f32 %v10022_v24, %v10036_v36 }
0x1a53   :  { %v10064_v62 = vmul.f32 1.442695, %v10054_v15 }
0x1a54   :  { %v10039_v29 = vpop.xlane.xlu0 %10038 }
0x1a55   :  { %16970 = vpow2.f32 %v10064_v62  ;;  %v10055_v18 = vsub.f32 %v10023_v19, %v10039_v29 }
0x1a57   :  { %v10066_v41 = vmul.f32 1.442695, %v10055_v18 }
0x1a58   :  { %v10042_v60 = vpop.xlane.xlu1 %10041 }
0x1a59   :  { %16972 = vpow2.f32 %v10066_v41  ;;  %v10056_v6 = vsub.f32 %v20058_v56, %v10042_v60 }
0x1a5a   :  { %v20074_v13 = vpop.eup %16966 }
0x1a5b   :  { %v10076_v26 = vsel %vm177_vm2, %v20074_v13, 0.0  ;;  %v10068_v62 = vmul.f32 1.442695, %v10056_v6 }
0x1a5c   :  { %10077 = vadd.xlane.f32.xlu1 %v10076_v26  ;;  %v10045_v37 = vpop.xlane.xlu0 %10044 }
0x1a5d   :  { %v10057_v15 = vsub.f32 %v20062_v45, %v10045_v37  ;;  %16974 = vpow2.f32 %v10068_v62 }
0x1a5e   :  { %v20078_v2 = vpop.eup %16968 }
0x1a5f   :  { %v10079_v39 = vsel %vm177_vm2, %v20078_v2, 0.0  ;;  %v10070_v18 = vmul.f32 1.442695, %v10057_v15 }
0x1a60   :  { %10080 = vadd.xlane.f32.xlu0 %v10079_v39  ;;  %v10048_v36 = vpop.xlane.xlu1 %10047 }
0x1a61   :  { %v10058_v29 = vsub.f32 %v10026_v0, %v10048_v36  ;;  %16976 = vpow2.f32 %v10070_v18 }
0x1a62   :  { %v20082_v24 = vpop.eup %16970 }
0x1a63   :  { %v10082_v19 = vsel %vm177_vm2, %v20082_v24, 0.0  ;;  %v10072_v41 = vmul.f32 1.442695, %v10058_v29 }
0x1a64   :  { %10083 = vadd.xlane.f32.xlu1 %v10082_v19  ;;  %v10051_v61 = vpop.xlane.xlu0 %10050  ;;  %v10221_v25 = vpop.permute.xlu1 %10220 }
0x1a65   :  { %v10059_v26 = vsub.f32 %v10027_v16, %v10051_v61  ;;  %16978 = vpow2.f32 %v10072_v41 }
0x1a66   :  { %v20086_v53 = vpop.eup %16972 }
0x1a67   :  { %v10085_v33 = vsel %vm177_vm2, %v20086_v53, 0.0  ;;  %v10074_v39 = vmul.f32 1.442695, %v10059_v26 }
0x1a68   :  { %v10173_v44 = vpop.permute.xlu0 %10172  ;;  %10086 = vadd.xlane.f32.xlu0 %v10085_v33  ;;  %v10269_v21 = vpop.permute.xlu1 %10268 }
0x1a69   :  { %v10178_v63 = vsel %vm676_vm3, %v10173_v44, 0  ;;  %16980 = vpow2.f32 %v10074_v39  ;;  %v10274_v44 = vsel %vm676_vm3, %v10269_v21, 0 }
0x1a6a   :  { %16252 = vmatpush3.bf16.msra.mxu1 %v10178_v63 }
0x1a6b   :  { %16263 = vmatprep.subr.bf16.mxu1 %v21616_v49 }
0x1a75   :  { %10364 = vrot.lane.b32.xlu1 %v19370_v51, %s21623_s0  ;;  %v20098_v51 = vpop.eup %16974 }
0x1a76   :  { %v20100_v19 = vpop.eup %16976 }
0x1a77   :  { %v20104_v56 = vpop.eup %16978  ;;  %v10091_v45 = vsel %vm177_vm2, %v20100_v19, 0.0 }
0x1a78   :  { %v10094_v0 = vsel %vm177_vm2, %v20104_v56, 0.0  ;;  %v20110_v16 = vpop.eup %16980 }
0x1a79   :  { %v10097_v37 = vsel %vm177_vm2, %v20110_v16, 0.0 }
0x1a7e   :  { %10316 = vrot.lane.b32.xlu0 %v19364_v7, %s21623_s0  ;;  %v10088_v7 = vsel %vm177_vm2, %v20098_v51, 0.0 }
0x1a99   :  { %10089 = vadd.xlane.f32.xlu1 %v10088_v7 }
0x1a9d   :  { %10092 = vadd.xlane.f32.xlu0 %v10091_v45  ;;  %10095 = vadd.xlane.f32.xlu1 %v10094_v0 }
0x1aa1   :  { %10098 = vadd.xlane.f32.xlu0 %v10097_v37 }
0x1aae   :  { %10460 = vrot.lane.b32.xlu1 %v19376_v47, %s21623_s0  ;;  %v21626_v47 = vpack.i.bf16 %v20032_v9, %v20030_v52 }
0x1ab2   :  { %16392 = vrot.lane.b32.xlu1 %v16391_v32, %s21624_s22 }
0x1ab6   :  { %16402 = vrot.lane.b32.xlu1 %v16401_v46, %s21625_s21 }
0x1ab7   :  { %10412 = vrot.lane.b32.xlu0 %v19368_v20, %s21623_s0 }
0x1abb   :  { %16387 = vrot.lane.b32.xlu0 %v16386_v57, %s21624_s22  ;;  %v10226_v57 = vsel %vm676_vm3, %v10221_v25, 0 }
0x1abf   :  { %16397 = vrot.lane.b32.xlu0 %v21626_v47, %s21625_s21 }
0x1ae5   :  { %v10078_v32 = vpop.xlane.xlu1 %10077 }
0x1ae6   :  { %16982 = vrcp.f32 %v10078_v32 }
0x1ae9   :  { %v10081_v61 = vpop.xlane.xlu0 %10080 }
0x1aea   :  { %16984 = vrcp.f32 %v10081_v61 }
0x1aed   :  { %v10084_v54 = vpop.xlane.xlu1 %10083 }
0x1aee   :  { %16986 = vrcp.f32 %v10084_v54 }
0x1af1   :  { %v10087_v1 = vpop.xlane.xlu0 %10086  ;;  %v10365_v15 = vpop.permute.xlu1 %10364 }
0x1af2   :  { %16988 = vrcp.f32 %v10087_v1  ;;  %v10370_v62 = vsel %vm676_vm3, %v10365_v15, 0 }
0x1af3   :  { %v16983_v20 = vpop.eup %16982 }
0x1af4   :  { %v10108_v46 = vmul.f32 %v16983_v20, %v20074_v13 }
0x1af5   :  { %v10317_v63 = vpop.permute.xlu0 %10316 }
0x1af6   :  { %v10116_v11 = vpack.c.bf16 %v10108_v46, %v10108_v46  ;;  %v10322_v36 = vsel %vm676_vm3, %v10317_v63, 0  ;;  %v21627_v46 = vmov 0  }
0x1af7   :  { %v16985_v28 = vpop.eup %16984 }
0x1af8   :  { %v10109_v52 = vmul.f32 %v16985_v28, %v20078_v2  ;;  %16248 = vmatmul.mubr.msk.bf16.vlgmr.msra.gmra.mxu0 %vm177_vm2, %v10116_v11 }
0x1af9   :  { %16258 = vmatpush3.bf16.msra.mxu0 %v10226_v57  ;;  %16259 = vmatprep.mubr.msk.bf16.mxu0 %vm17039_vm1, %v21616_v49 }
0x1afa   :  { %v10117_v9 = vpack.c.bf16 %v10109_v52, %v10109_v52  ;;  %16269 = vmatprep.subr.bf16.mxu0 %v21616_v49 }
0x1afb   :  { %v16987_v33 = vpop.eup %16986 }
0x1afc   :  { %v10110_v13 = vmul.f32 %v16987_v33, %v20082_v24  ;;  %16254 = vmatmul.mubr.msk.bf16.vlgmr.msra.gmra.mxu1 %vm177_vm2, %v10117_v9 }
0x1afd   :  { %16264 = vmatpush3.bf16.msra.mxu1 %v10274_v44  ;;  %16265 = vmatprep.mubr.msk.bf16.mxu1 %vm17039_vm1, %v21616_v49 }
0x1afe   :  { %v10118_v2 = vpack.c.bf16 %v10110_v13, %v10110_v13  ;;  %16275 = vmatprep.subr.bf16.mxu1 %v21616_v49 }
0x1aff   :  { %v16989_v60 = vpop.eup %16988 }
0x1b00   :  { %v10111_v6 = vmul.f32 %v16989_v60, %v20086_v53  ;;  %16260 = vmatmul.mubr.msk.bf16.vlgmr.msra.gmra.mxu0 %vm177_vm2, %v10118_v2  ;;  %v21629_v60 = vpack.i.bf16 %v19842_v43, %v19840_v5  ;;  %v21632_v5 = vpack.i.bf16 %v20050_v55, %v20048_v38 }
0x1b01   :  { %16270 = vmatpush3.bf16.msra.mxu0 %v10322_v36  ;;  %16271 = vmatprep.mubr.msk.bf16.mxu0 %vm17039_vm1, %v21616_v49 }
0x1b02   :  { %v10119_v24 = vpack.c.bf16 %v10111_v6, %v10111_v6  ;;  %16281 = vmatprep.subr.bf16.mxu0 %v21616_v49 }
0x1b04   :  { %16266 = vmatmul.mubr.msk.bf16.vlgmr.msra.gmra.mxu1 %vm177_vm2, %v10119_v24 }
0x1b05   :  { %16276 = vmatpush3.bf16.msra.mxu1 %v10370_v62  ;;  %16277 = vmatprep.mubr.msk.bf16.mxu1 %vm17039_vm1, %v21616_v49 }
0x1b06   :  { %16287 = vmatprep.subr.bf16.mxu1 %v21616_v49 }
0x1b22   :  { %v10090_v53 = vpop.xlane.xlu1 %10089 }
0x1b23   :  { %16990 = vrcp.f32 %v10090_v53  ;;  %v21630_v53 = vpack.i.bf16 %v20044_v10, %v20042_v23 }
0x1b26   :  { %v10093_v29 = vpop.xlane.xlu0 %10092  ;;  %v10096_v18 = vpop.xlane.xlu1 %10095 }
0x1b27   :  { %16992 = vrcp.f32 %v10093_v29 }
0x1b28   :  { %16994 = vrcp.f32 %v10096_v18 }
0x1b2a   :  { %v10099_v41 = vpop.xlane.xlu0 %10098  ;;  %v10461_v21 = vpop.permute.xlu1 %10460 }
0x1b2b   :  { %16996 = vrcp.f32 %v10099_v41  ;;  %v21631_v41 = vpack.i.bf16 %v19848_v14, %v19846_v58 }
0x1b2e   :  { %v10413_v7 = vpop.permute.xlu0 %10412 }
0x1b2f   :  { %v10418_v25 = vsel %vm676_vm3, %v10413_v7, 0 }
0x1b30   :  { %v16991_v26 = vpop.eup %16990 }
0x1b31   :  { %v10112_v39 = vmul.f32 %v16991_v26, %v20098_v51  ;;  %v10466_v51 = vsel %vm676_vm3, %v10461_v21, 0 }
0x1b33   :  { %v10120_v45 = vpack.c.bf16 %v10112_v39, %v10112_v39 }
0x1b34   :  { %v16993_v0 = vpop.eup %16992 }
0x1b35   :  { %v16995_v37 = vpop.eup %16994  ;;  %v10113_v47 = vmul.f32 %v16993_v0, %v20100_v19  ;;  %16272 = vmatmul.mubr.msk.bf16.vlgmr.msra.gmra.mxu0 %vm177_vm2, %v10120_v45 }
0x1b36   :  { %16282 = vmatpush3.bf16.msra.mxu0 %v10418_v25  ;;  %16283 = vmatprep.mubr.msk.bf16.mxu0 %vm17039_vm1, %v21616_v49  ;;  %v10114_v61 = vmul.f32 %v16995_v37, %v20104_v56  ;;  %v16580_v56 = vld [vmem:[%s21499_s3 + $0x18] sm:$0xff]  }
0x1b37   :  { %v10121_v32 = vpack.c.bf16 %v10113_v47, %v10113_v47  ;;  %16293 = vmatprep.subr.bf16.mxu0 %v16580_v56 }
0x1b38   :  { %v16997_v54 = vpop.eup %16996  ;;  %v10122_v19 = vpack.c.bf16 %v10114_v61, %v10114_v61 }
0x1b39   :  { %16278 = vmatmul.mubr.msk.bf16.vlgmr.msra.gmra.mxu1 %vm177_vm2, %v10121_v32  ;;  %v10115_v1 = vmul.f32 %v16997_v54, %v20110_v16  ;;  %v16388_v54 = vpop.permute.xlu0 %16387 }
0x1b3a   :  { %16288 = vmatpush3.bf16.msra.mxu1 %v10466_v51  ;;  %16289 = vmatprep.mubr.msk.bf16.mxu1 %vm17039_vm1, %v21616_v49  ;;  %v16581_v49 = vld [vmem:[%s21499_s3 + $0x10] sm:$0xff]  }
0x1b3b   :  { %v10123_v20 = vpack.c.bf16 %v10115_v1, %v10115_v1  ;;  %v16390_v1 = vunpack.i.h.bf16 %v16388_v54 }
0x1b3d   :  { %16284 = vmatmul.mubr.msk.bf16.vlgmr.msra.gmra.mxu0 %vm177_vm2, %v10122_v19  ;;  %v16398_v51 = vpop.permute.xlu0 %16397  ;;  %v16393_v19 = vpop.permute.xlu1 %16392 }
0x1b3e   :  { %16294 = vmatpush3.bf16.msra.mxu0 %v16580_v56  ;;  %v16400_v56 = vunpack.i.h.bf16 %v16398_v51 }
0x1b3f   :  { %16295 = vmatprep.subr.bf16.mxu0 %v16581_v49 }
0x1b41   :  { %16290 = vmatmul.mubr.msk.bf16.vlgmr.msra.gmra.mxu1 %vm177_vm2, %v10123_v20  ;;  %v16389_v20 = vunpack.i.l.bf16 %v16388_v54 }
0x1b42   :  { %11204 = vmatprep.mubr.bf16.mxu1 %v21627_v46  ;;  %16296 = vmatpush3.bf16.msra.mxu0 %v16581_v49  ;;  %v10605_v49 = vsel %vm177_vm2, %v19628_v31, %v16390_v1 }
0x1bb8   :  { %v10166_v11 = vpop.f32.mrf.mxu0 }
0x1bba   :  { %v16249_v28 = vpop.f32.mrf.mxu0 }
0x1bbc   :  { %v10169_v16 = vpop.f32.mrf.mxu0  ;;  %v10214_v57 = vpop.f32.mrf.mxu1 }
0x1bbd   :  { %v16406_v52 = vpack.i.bf16 %v10214_v57, %v10166_v11  ;;  %v16399_v11 = vunpack.i.l.bf16 %v16398_v51  ;;  %v10604_v16 = vsel %vm177_vm2, %v19626_v4, %v16389_v20 }
0x1bbe   :  { %v16250_v9 = vpop.f32.mrf.mxu0  ;;  %v16255_v33 = vpop.f32.mrf.mxu1 }
0x1bbf   :  { %16407 = vrot.lane.b32.xlu0 %v16406_v52, %s21628_s23  ;;  %v10612_v9 = vsel %vm3824_vm4, %v10604_v16, %v16399_v11  ;;  %v10613_v33 = vsel %vm3824_vm4, %v10605_v49, %v16400_v56 }
0x1bc0   :  { %v10217_v44 = vpop.f32.mrf.mxu1  ;;  %v10262_v13 = vpop.f32.mrf.mxu0 }
0x1bc1   :  { %v16403_v44 = vpop.permute.xlu1 %16402 }
0x1bc2   :  { %v16256_v63 = vpop.f32.mrf.mxu1  ;;  %v16261_v2 = vpop.f32.mrf.mxu0 }
0x1bc3   :  { %16417 = vrot.lane.b32.xlu0 %v21629_v60, %s21624_s22  ;;  %v16395_v60 = vunpack.i.h.bf16 %v16393_v19 }
0x1bc4   :  { %v10265_v6 = vpop.f32.mrf.mxu0  ;;  %v10310_v36 = vpop.f32.mrf.mxu1 }
0x1bc5   :  { %v16411_v15 = vpack.i.bf16 %v10310_v36, %v10262_v13  ;;  %v16394_v6 = vunpack.i.l.bf16 %v16393_v19  ;;  %v16405_v36 = vunpack.i.h.bf16 %v16403_v44  ;;  %v10607_v4 = vsel %vm177_vm2, %v19632_v34, %v16395_v60 }
0x1bc6   :  { %v16262_v24 = vpop.f32.mrf.mxu0  ;;  %v16267_v62 = vpop.f32.mrf.mxu1 }
0x1bc7   :  { %16427 = vrot.lane.b32.xlu0 %v21630_v53, %s21625_s21  ;;  %16412 = vrot.lane.b32.xlu1 %v16411_v15, %s21628_s23  ;;  %v16404_v15 = vunpack.i.l.bf16 %v16403_v44  ;;  %v10606_v24 = vsel %vm177_vm2, %v19630_v22, %v16394_v6 }
0x1bc8   :  { %v10313_v29 = vpop.f32.mrf.mxu1 }
0x1bc9   :  { %v10614_v29 = vsel %vm3824_vm4, %v10606_v24, %v16404_v15 }
0x1bca   :  { %v16268_v18 = vpop.f32.mrf.mxu1 }
0x1bcb   :  { %16422 = vrot.lane.b32.xlu1 %v21631_v41, %s21624_s22  ;;  %v10615_v18 = vsel %vm3824_vm4, %v10607_v4, %v16405_v36 }
0x1bcf   :  { %16432 = vrot.lane.b32.xlu1 %v21632_v5, %s21625_s21 }
0x1bf5   :  { %v10358_v43 = vpop.f32.mrf.mxu0 }
0x1bf7   :  { %v16273_v26 = vpop.f32.mrf.mxu0 }
0x1bf9   :  { %v10361_v39 = vpop.f32.mrf.mxu0  ;;  %v10406_v7 = vpop.f32.mrf.mxu1 }
0x1bfa   :  { %v16436_v23 = vpack.i.bf16 %v10406_v7, %v10358_v43 }
0x1bfb   :  { %v16274_v10 = vpop.f32.mrf.mxu0  ;;  %v16279_v45 = vpop.f32.mrf.mxu1 }
0x1bfc   :  { %16437 = vrot.lane.b32.xlu0 %v16436_v23, %s21628_s23 }
0x1bfd   :  { %v10409_v0 = vpop.f32.mrf.mxu1  ;;  %v10454_v37 = vpop.f32.mrf.mxu0 }
0x1bff   :  { %v16280_v47 = vpop.f32.mrf.mxu1  ;;  %v16285_v25 = vpop.f32.mrf.mxu0 }
0x1c01   :  { %v10457_v58 = vpop.f32.mrf.mxu0  ;;  %v10502_v14 = vpop.f32.mrf.mxu1 }
0x1c02   :  { %v16441_v21 = vpack.i.bf16 %v10502_v14, %v10454_v37 }
0x1c03   :  { %v16286_v32 = vpop.f32.mrf.mxu0  ;;  %v16291_v61 = vpop.f32.mrf.mxu1 }
0x1c04   :  { %16442 = vrot.lane.b32.xlu1 %v16441_v21, %s21628_s23 }
0x1c05   :  { %v10505_v38 = vpop.f32.mrf.mxu1 }
0x1c07   :  { %v16292_v55 = vpop.f32.mrf.mxu1 }
0x1c31   :  { %v16408_v28 = vpop.permute.xlu0 %16407 }
0x1c32   :  { %v16410_v57 = vunpack.i.h.bf16 %v16408_v28  ;;  %v16409_v52 = vunpack.i.l.bf16 %v16408_v28 }
0x1c34   :  { %v10621_v13 = vsel %vm3833_vm5, %v10613_v33, %v16410_v57  ;;  %v10620_v63 = vsel %vm3833_vm5, %v10612_v9, %v16409_v52 }
0x1c35   :  { %v10633_v2 = vpack.c.bf16 %v10621_v13, %v10620_v63  ;;  %v16418_v26 = vpop.permute.xlu0 %16417 }
0x1c36   :  { %v16420_v7 = vunpack.i.h.bf16 %v16418_v26  ;;  %v16419_v34 = vunpack.i.l.bf16 %v16418_v26 }
0x1c37   :  { %16297 = vmatprep.mubr.msk.bf16.mxu0 %vm88_vm0, %v10633_v2 }
0x1c38   :  { %v10609_v0 = vsel %vm177_vm2, %v19636_v8, %v16420_v7  ;;  %v10608_v37 = vsel %vm177_vm2, %v19634_v17, %v16419_v34 }
0x1c39   :  { %v16413_v31 = vpop.permute.xlu1 %16412  ;;  %v16428_v39 = vpop.permute.xlu0 %16427 }
0x1c3a   :  { %v16415_v62 = vunpack.i.h.bf16 %v16413_v31  ;;  %v16414_v53 = vunpack.i.l.bf16 %v16413_v31  ;;  %v16430_v10 = vunpack.i.h.bf16 %v16428_v39  ;;  %v16429_v22 = vunpack.i.l.bf16 %v16428_v39 }
0x1c3c   :  { %v10622_v41 = vsel %vm3833_vm5, %v10614_v29, %v16414_v53  ;;  %v10623_v5 = vsel %vm3833_vm5, %v10615_v18, %v16415_v62  ;;  %v10616_v58 = vsel %vm3824_vm4, %v10608_v37, %v16429_v22  ;;  %v10617_v14 = vsel %vm3824_vm4, %v10609_v0, %v16430_v10 }
0x1c3d   :  { %v10634_v43 = vpack.c.bf16 %v10623_v5, %v10622_v41  ;;  %v16423_v23 = vpop.permute.xlu1 %16422 }
0x1c3e   :  { %v16425_v55 = vunpack.i.h.bf16 %v16423_v23  ;;  %v16424_v54 = vunpack.i.l.bf16 %v16423_v23 }
0x1c3f   :  { %16298 = vmatmul.mubr.msk.bf16.vlgmr.msra.gmra.mxu0 %vm88_vm0, %v10634_v43 }
0x1c40   :  { %v10611_v17 = vsel %vm177_vm2, %v19640_v30, %v16425_v55  ;;  %v10610_v1 = vsel %vm177_vm2, %v19638_v35, %v16424_v54  ;;  %v14068_v35 = vld [vmem:[%s21500_s4 + $0x1] ss:$0 sm:$0xff] }
0x1c41   :  { %v16433_v21 = vpop.permute.xlu1 %16432 }
0x1c42   :  { %v16435_v51 = vunpack.i.h.bf16 %v16433_v21  ;;  %v16434_v19 = vunpack.i.l.bf16 %v16433_v21 }
0x1c44   :  { %v10618_v11 = vsel %vm3824_vm4, %v10610_v1, %v16434_v19  ;;  %v10619_v28 = vsel %vm3824_vm4, %v10611_v17, %v16435_v51  ;;  %v14103_v17 = vld [vmem:[%s21501_s7 + $0x1c0] sm:$0xff]  ;;  %v14096_v1 = vld [vmem:[%s21501_s7 + $0x188] sm:$0xff] }
0x1c6e   :  { %v16438_v45 = vpop.permute.xlu0 %16437 }
0x1c6f   :  { %v16440_v47 = vunpack.i.h.bf16 %v16438_v45  ;;  %v16439_v25 = vunpack.i.l.bf16 %v16438_v45 }
0x1c71   :  { %v10625_v32 = vsel %vm3833_vm5, %v10617_v14, %v16440_v47  ;;  %v10624_v61 = vsel %vm3833_vm5, %v10616_v58, %v16439_v25 }
0x1c72   :  { %v10635_v38 = vpack.c.bf16 %v10625_v32, %v10624_v61 }
0x1c74   :  { %16301 = vmatprep.mubr.msk.bf16.mxu0 %vm88_vm0, %v10635_v38 }
0x1c76   :  { %v16443_v8 = vpop.permute.xlu1 %16442 }
0x1c77   :  { %v16445_v20 = vunpack.i.h.bf16 %v16443_v8  ;;  %v16444_v56 = vunpack.i.l.bf16 %v16443_v8  ;;  %v14095_v8 = vld [vmem:[%s21501_s7 + $0x180] sm:$0xff] }
0x1c79   :  { %v10626_v49 = vsel %vm3833_vm5, %v10618_v11, %v16444_v56  ;;  %v10627_v16 = vsel %vm3833_vm5, %v10619_v28, %v16445_v20  ;;  %v14130_v20 = vcombine.high %v14095_v8, %v14103_v17  ;;  %v14104_v56 = vld [vmem:[%s21501_s7 + $0x1c8] sm:$0xff]  ;;  %v14129_v11 = vcombine.low %v14095_v8, %v14103_v17 }
0x1c7a   :  { %v10636_v57 = vpack.c.bf16 %v10627_v16, %v10626_v49  ;;  %v14131_v28 = vcombine.low %v14096_v1, %v14104_v56  ;;  %v14132_v49 = vcombine.high %v14096_v1, %v14104_v56  ;;  %v14079_v16 = vld [vmem:[%s21501_s7 + $0x100] sm:$0xff] }
0x1c7b   :  { %11184 = vmatprep.subr.bf16.mxu1 %v14130_v20  ;;  %v20375_v20 = vld [vmem:[%s21502_s5 + $0x1] ss:$0 sm:$0xff] }
0x1c7c   :  { %16302 = vmatmul.mubr.msk.bf16.gmra.mxu0 %vm88_vm0, %v10636_v57  ;;  %11257 = vmatprep.subr.bf16.mxu0 %v14132_v49  ;;  %v14087_v57 = vld [vmem:[%s21501_s7 + $0x140] sm:$0xff] }
0x1c7d   :  { %11277 = vmatprep.mubr.bf16.mxu0 %v21627_v46  ;;  %11185 = vmatpush1.bf16.msra.mxu1 %v14129_v11 }
0x1c7e   :  { %11258 = vmatpush1.bf16.msra.mxu0 %v14131_v28 }
0x1cff   :  { %v16299_v52 = vpop.f32.mrf.mxu0 }
0x1d00   :  { %v10712_v9 = vadd.f32 %v16299_v52, %v14068_v35  ;;  %v14080_v52 = vld [vmem:[%s21501_s7 + $0x108] sm:$0xff] }
0x1d01   :  { %v10703_v30 = vpop.f32.mrf.mxu0 }
0x1d02   :  { %v10704_v33 = vadd.f32 %v14068_v35, %v10703_v30  ;;  %v10736_v2 = vadd.f32 %v10712_v9, %v19318_v27  ;;  %v14088_v30 = vld [vmem:[%s21501_s7 + $0x148] sm:$0xff]  ;;  %v14113_v9 = vcombine.low %v14079_v16, %v14087_v57 }
0x1d03   :  { %v16300_v44 = vpop.f32.mrf.mxu0 }
0x1d04   :  { %v10734_v13 = vadd.f32 %v10704_v33, %v19310_v42  ;;  %v10715_v60 = vadd.f32 %v16300_v44, %v14068_v35  ;;  %v10752_v24 = vsel %vm88_vm0, %v10736_v2, 0.0  ;;  %v14115_v33 = vcombine.low %v14080_v52, %v14088_v30 }
0x1d05   :  { %v10706_v63 = vpop.f32.mrf.mxu0  ;;  %v14116_v44 = vcombine.high %v14080_v52, %v14088_v30 }
0x1d06   :  { %v10707_v6 = vadd.f32 %v14068_v35, %v10706_v63  ;;  %v10746_v36 = vsel %vm88_vm0, %v10734_v13, 0.0  ;;  %v10737_v31 = vadd.f32 %v10715_v60, %v19320_v12 }
0x1d07   :  { %10747 = vadd.xlane.f32.xlu0 %v10746_v36  ;;  %11259 = vmatprep.subr.bf16.mxu0 %v14116_v44  ;;  %v14090_v44 = vld [vmem:[%s21501_s7 + $0x158] sm:$0xff] }
0x1d08   :  { %v10735_v15 = vadd.f32 %v10707_v6, %v19312_v48  ;;  %v10755_v42 = vsel %vm88_vm0, %v10737_v31, 0.0  ;;  %11260 = vmatpush1.bf16.msra.mxu0 %v14115_v33  ;;  %v14089_v33 = vld [vmem:[%s21501_s7 + $0x150] sm:$0xff] }
0x1d0a   :  { %v10749_v4 = vsel %vm88_vm0, %v10735_v15, 0.0 }
0x1d0b   :  { %10750 = vadd.xlane.f32.xlu1 %v10749_v4  ;;  %10753 = vadd.xlane.f32.xlu0 %v10752_v24 }
0x1d0f   :  { %10756 = vadd.xlane.f32.xlu0 %v10755_v42 }
0x1d3c   :  { %v16303_v62 = vpop.f32.mrf.mxu0 }
0x1d3d   :  { %v10728_v53 = vadd.f32 %v16303_v62, %v14068_v35 }
0x1d3e   :  { %v10719_v27 = vpop.f32.mrf.mxu0 }
0x1d3f   :  { %v10720_v29 = vadd.f32 %v14068_v35, %v10719_v27  ;;  %v20251_v12 = vadd.f32 %v10728_v53, %v19336_v59 }
0x1d40   :  { %v16304_v18 = vpop.f32.mrf.mxu0 }
0x1d41   :  { %v20248_v41 = vadd.f32 %v10720_v29, %v19328_v3  ;;  %v10731_v5 = vadd.f32 %v16304_v18, %v14068_v35  ;;  %v10764_v3 = vsel %vm88_vm0, %v20251_v12, 0.0 }
0x1d42   :  { %v10722_v48 = vpop.f32.mrf.mxu0 }
0x1d43   :  { %v10723_v43 = vadd.f32 %v14068_v35, %v10722_v48  ;;  %v10758_v26 = vsel %vm88_vm0, %v20248_v41, 0.0  ;;  %v20259_v7 = vadd.f32 %v10731_v5, %v19338_v50  ;;  %v14114_v35 = vcombine.high %v14079_v16, %v14087_v57  ;;  %v20382_v16 = vld [vmem:[%s21503_s6 + $0x1] ss:$0 sm:$0xff] }
0x1d44   :  { %10759 = vadd.xlane.f32.xlu1 %v10758_v26  ;;  %v14105_v26 = vld [vmem:[%s21501_s7 + $0x1d0] sm:$0xff] }
0x1d45   :  { %v20256_v39 = vadd.f32 %v10723_v43, %v19330_v40  ;;  %v10767_v59 = vsel %vm88_vm0, %v20259_v7, 0.0  ;;  %11186 = vmatprep.subr.bf16.mxu1 %v14114_v35  ;;  %v14097_v43 = vld [vmem:[%s21501_s7 + $0x190] sm:$0xff] }
0x1d46   :  { %11187 = vmatpush1.bf16.msra.mxu1 %v14113_v9  ;;  %v14081_v35 = vld [vmem:[%s21501_s7 + $0x110] sm:$0xff] }
0x1d47   :  { %v10761_v34 = vsel %vm88_vm0, %v20256_v39, 0.0 }
0x1d48   :  { %10765 = vadd.xlane.f32.xlu1 %v10764_v3  ;;  %10762 = vadd.xlane.f32.xlu0 %v10761_v34  ;;  %v14106_v3 = vld [vmem:[%s21501_s7 + $0x1d8] sm:$0xff] }
0x1d4c   :  { %10768 = vadd.xlane.f32.xlu0 %v10767_v59 }
0x1d90   :  { %v10748_v23 = vpop.xlane.xlu0 %10747 }
0x1d91   :  { %v10770_v10 = vmul.f32 0.03125, %v10748_v23 }
0x1d93   :  { %v20267_v22 = vsub.f32 %v10734_v13, %v10770_v10  ;;  %v20350_v10 = vld [vmem:[%s21501_s7 + $0x1a0] sm:$0xff] }
0x1d94   :  { %v10751_v40 = vpop.xlane.xlu1 %10750  ;;  %v10754_v45 = vpop.xlane.xlu0 %10753 }
0x1d95   :  { %v10771_v50 = vmul.f32 0.03125, %v10751_v40  ;;  %v10772_v0 = vmul.f32 0.03125, %v10754_v45  ;;  %v10786_v37 = vmul.f32 %v20267_v22, %v20267_v22  ;;  %v20355_v40 = vld [vmem:[%s21501_s7 + $0x1e0] sm:$0xff]  ;;  %v20360_v45 = vld [vmem:[%s21501_s7 + $0x1a8] sm:$0xff] }
0x1d97   :  { %v20271_v47 = vsub.f32 %v10735_v15, %v10771_v50  ;;  %v20273_v25 = vsub.f32 %v10736_v2, %v10772_v0  ;;  %v10794_v58 = vsel %vm88_vm0, %v10786_v37, 0.0  ;;  %v20365_v0 = vld [vmem:[%s21501_s7 + $0x1e8] sm:$0xff] }
0x1d98   :  { %10795 = vadd.xlane.f32.xlu1 %v10794_v58  ;;  %v10757_v14 = vpop.xlane.xlu0 %10756 }
0x1d99   :  { %v10773_v21 = vmul.f32 0.03125, %v10757_v14  ;;  %v10787_v32 = vmul.f32 %v20271_v47, %v20271_v47  ;;  %v10788_v61 = vmul.f32 %v20273_v25, %v20273_v25  ;;  %v14137_v14 = vcombine.low %v20350_v10, %v20355_v40 }
0x1d9b   :  { %v20280_v38 = vsub.f32 %v10737_v31, %v10773_v21  ;;  %v10797_v55 = vsel %vm88_vm0, %v10787_v32, 0.0  ;;  %v10800_v54 = vsel %vm88_vm0, %v10788_v61, 0.0  ;;  %v14139_v21 = vcombine.low %v20360_v45, %v20365_v0 }
0x1d9c   :  { %10798 = vadd.xlane.f32.xlu0 %v10797_v55  ;;  %10801 = vadd.xlane.f32.xlu1 %v10800_v54 }
0x1d9d   :  { %v10789_v51 = vmul.f32 %v20280_v38, %v20280_v38 }
0x1d9f   :  { %v10803_v19 = vsel %vm88_vm0, %v10789_v51, 0.0 }
0x1da0   :  { %10804 = vadd.xlane.f32.xlu0 %v10803_v19 }
0x1dcd   :  { %v10760_v13 = vpop.xlane.xlu1 %10759 }
0x1dce   :  { %v10774_v63 = vmul.f32 0.03125, %v10760_v13 }
0x1dd0   :  { %v20312_v2 = vsub.f32 %v20248_v41, %v10774_v63  ;;  %v14133_v63 = vcombine.low %v14097_v43, %v14105_v26 }
0x1dd1   :  { %v10766_v60 = vpop.xlane.xlu1 %10765  ;;  %v10763_v6 = vpop.xlane.xlu0 %10762 }
0x1dd2   :  { %v10776_v36 = vmul.f32 0.03125, %v10766_v60  ;;  %v10775_v15 = vmul.f32 0.03125, %v10763_v6  ;;  %v10790_v31 = vmul.f32 %v20312_v2, %v20312_v2  ;;  %v14118_v6 = vcombine.high %v14081_v35, %v14089_v33 }
0x1dd4   :  { %v20317_v4 = vsub.f32 %v20251_v12, %v10776_v36  ;;  %v20320_v24 = vsub.f32 %v20256_v39, %v10775_v15  ;;  %v10806_v42 = vsel %vm88_vm0, %v10790_v31, 0.0  ;;  %v14098_v39 = vld [vmem:[%s21501_s7 + $0x198] sm:$0xff] }
0x1dd5   :  { %10807 = vadd.xlane.f32.xlu1 %v10806_v42  ;;  %v10769_v62 = vpop.xlane.xlu0 %10768  ;;  %v14136_v34 = vcombine.high %v14098_v39, %v14106_v3  ;;  %v14135_v60 = vcombine.low %v14098_v39, %v14106_v3  ;;  %v14117_v42 = vcombine.low %v14081_v35, %v14089_v33  ;;  %v14101_v35 = vld [vmem:[%s21501_s7 + $0x1b0] sm:$0xff]  ;;  %v14102_v33 = vld [vmem:[%s21501_s7 + $0x1b8] sm:$0xff] }
0x1dd6   :  { %v10777_v27 = vmul.f32 0.03125, %v10769_v62  ;;  %v10792_v53 = vmul.f32 %v20317_v4, %v20317_v4  ;;  %v10791_v29 = vmul.f32 %v20320_v24, %v20320_v24 }
0x1dd7   :  { %11403 = vmatprep.subr.bf16.mxu0 %v14136_v34 }
0x1dd8   :  { %v20328_v18 = vsub.f32 %v20259_v7, %v10777_v27  ;;  %v10812_v41 = vsel %vm88_vm0, %v10792_v53, 0.0  ;;  %v10809_v48 = vsel %vm88_vm0, %v10791_v29, 0.0  ;;  %v14134_v7 = vcombine.high %v14097_v43, %v14105_v26 }
0x1dd9   :  { %10813 = vadd.xlane.f32.xlu1 %v10812_v41  ;;  %10810 = vadd.xlane.f32.xlu0 %v10809_v48  ;;  %v14138_v27 = vcombine.high %v20350_v10, %v20355_v40  ;;  %v14140_v53 = vcombine.high %v20360_v45, %v20365_v0  ;;  %v14085_v10 = vld [vmem:[%s21501_s7 + $0x130] sm:$0xff]  ;;  %v14086_v45 = vld [vmem:[%s21501_s7 + $0x138] sm:$0xff] }
0x1dda   :  { %v10793_v12 = vmul.f32 %v20328_v18, %v20328_v18  ;;  %11330 = vmatprep.subr.bf16.mxu1 %v14134_v7  ;;  %v14093_v40 = vld [vmem:[%s21501_s7 + $0x170] sm:$0xff]  ;;  %v14094_v0 = vld [vmem:[%s21501_s7 + $0x178] sm:$0xff] }
0x1ddc   :  { %v10815_v5 = vsel %vm88_vm0, %v10793_v12, 0.0 }
0x1ddd   :  { %10816 = vadd.xlane.f32.xlu0 %v10815_v5 }
0x1e21   :  { %v10796_v59 = vpop.xlane.xlu1 %10795 }
0x1e22   :  { %v10818_v23 = vmul.f32 0.03125, %v10796_v59 }
0x1e24   :  { %v10826_v50 = vadd.f32 1e-05, %v10818_v23 }
0x1e25   :  { %v10802_v37 = vpop.xlane.xlu1 %10801  ;;  %v10799_v58 = vpop.xlane.xlu0 %10798 }
0x1e26   :  { %16998 = vrsqrt.f32 %v10826_v50  ;;  %v10820_v32 = vmul.f32 0.03125, %v10802_v37  ;;  %v10819_v61 = vmul.f32 0.03125, %v10799_v58 }
0x1e28   :  { %v10827_v55 = vadd.f32 1e-05, %v10819_v61  ;;  %v10828_v54 = vadd.f32 1e-05, %v10820_v32 }
0x1e29   :  { %v10805_v51 = vpop.xlane.xlu0 %10804 }
0x1e2a   :  { %v10821_v19 = vmul.f32 0.03125, %v10805_v51  ;;  %17000 = vrsqrt.f32 %v10827_v55 }
0x1e2b   :  { %17002 = vrsqrt.f32 %v10828_v54 }
0x1e2c   :  { %v10829_v8 = vadd.f32 1e-05, %v10821_v19 }
0x1e2e   :  { %17004 = vrsqrt.f32 %v10829_v8 }
0x1e33   :  { %v16999_v17 = vpop.eup %16998 }
0x1e34   :  { %v10842_v1 = vmul.f32 %v16999_v17, %v20267_v22 }
0x1e36   :  { %v10856_v11 = vmul.f32 %v20375_v20, %v10842_v1 }
0x1e37   :  { %v17001_v56 = vpop.eup %17000 }
0x1e38   :  { %v10843_v28 = vmul.f32 %v17001_v56, %v20271_v47  ;;  %v17003_v49 = vpop.eup %17002  ;;  %v20390_v30 = vadd.f32 %v20382_v16, %v10856_v11 }
0x1e39   :  { %v10844_v47 = vmul.f32 %v17003_v49, %v20273_v25  ;;  %v14091_v49 = vld [vmem:[%s21501_s7 + $0x160] sm:$0xff] }
0x1e3a   :  { %v10857_v52 = vmul.f32 %v20375_v20, %v10843_v28 }
0x1e3b   :  { %v17005_v57 = vpop.eup %17004  ;;  %v10858_v15 = vmul.f32 %v20375_v20, %v10844_v47  ;;  %v14109_v47 = vld [vmem:[%s21501_s7 + $0x1f0] sm:$0xff] }
0x1e3c   :  { %v10845_v22 = vmul.f32 %v17005_v57, %v20280_v38  ;;  %v20394_v9 = vadd.f32 %v20382_v16, %v10857_v52  ;;  %v14082_v38 = vld [vmem:[%s21501_s7 + $0x118] sm:$0xff]  ;;  %v14092_v57 = vld [vmem:[%s21501_s7 + $0x168] sm:$0xff] }
0x1e3d   :  { %v14120_v36 = vcombine.high %v14082_v38, %v14090_v44  ;;  %v14119_v62 = vcombine.low %v14082_v38, %v14090_v44  ;;  %v20425_v29 = vadd.f32 %v20382_v16, %v10858_v15  ;;  %v14110_v38 = vld [vmem:[%s21501_s7 + $0x1f8] sm:$0xff]  ;;  %v14125_v15 = vcombine.low %v14085_v10, %v14093_v40 }
0x1e3e   :  { %v20407_v13 = vpack.c.bf16 %v20394_v9, %v20390_v30  ;;  %v10859_v25 = vmul.f32 %v20375_v20, %v10845_v22 }
0x1e3f   :  { %21634 = vst [vmem:[#allocation29_spill] sm:$0xff] %v20425_v29 }
0x1e40   :  { %14145 = vmatmul.mubr.msk.bf16.vlgmr.msra.gmra.mxu1 %vm88_vm0, %v20407_v13  ;;  %14149 = vmatmul.mubr.msk.bf16.vlgmr.msra.gmra.mxu0 %vm88_vm0, %v20407_v13  ;;  %v20418_v31 = vadd.f32 %v20382_v16, %v10859_v25 }
0x1e41   :  { %11214 = vmatprep.mubr.bf16.mxu1 %v21627_v46  ;;  %11287 = vmatprep.mubr.bf16.mxu0 %v21627_v46 }
0x1e42   :  { %21633 = vst [vmem:[#allocation27_spill] sm:$0xff] %v20418_v31  ;;  %11331 = vmatpush1.bf16.msra.mxu1 %v14133_v63  ;;  %11404 = vmatpush1.bf16.msra.mxu0 %v14135_v60  ;;  %v20429_v41 = vpack.c.bf16 %v20418_v31, %v20425_v29  ;;  %v14142_v63 = vcombine.high %v14101_v35, %v14109_v47 }
0x1e43   :  { %11332 = vmatprep.subr.bf16.mxu1 %v14118_v6  ;;  %11405 = vmatprep.subr.bf16.mxu0 %v14120_v36  ;;  %v14144_v60 = vcombine.high %v14102_v33, %v14110_v38  ;;  %v14126_v6 = vcombine.high %v14085_v10, %v14093_v40  ;;  %v14128_v36 = vcombine.high %v14086_v45, %v14094_v0 }
0x1e46   :  { %11333 = vmatpush1.bf16.msra.mxu1 %v14117_v42  ;;  %11406 = vmatpush1.bf16.msra.mxu0 %v14119_v62  ;;  %v14127_v42 = vcombine.low %v14086_v45, %v14094_v0  ;;  %v16582_v62 = vld [vmem:[%s21504_s9 + $0x478] sm:$0xff]  }
0x1e47   :  { %11476 = vmatprep.subr.bf16.mxu1 %v14138_v27  ;;  %11549 = vmatprep.subr.bf16.mxu0 %v14140_v53  ;;  %v16583_v27 = vld [vmem:[%s21504_s9 + $0x4f8] sm:$0xff]  }
0x1e48   :  { %14146 = vmatmul.mubr.msk.bf16.gmra.mxu1 %vm88_vm0, %v20429_v41  ;;  %14150 = vmatmul.mubr.msk.bf16.gmra.mxu0 %vm88_vm0, %v20429_v41  ;;  %v16584_v53 = vld [vmem:[%s21504_s9 + $0x438] sm:$0xff]  }
0x1e49   :  { %11224 = vmatprep.mubr.bf16.mxu1 %v21627_v46  ;;  %11297 = vmatprep.mubr.bf16.mxu0 %v21627_v46 }
0x1e5e   :  { %v10808_v48 = vpop.xlane.xlu1 %10807 }
0x1e5f   :  { %v10822_v12 = vmul.f32 0.03125, %v10808_v48  ;;  %v16585_v48 = vld [vmem:[%s21504_s9 + $0x4b8] sm:$0xff]  }
0x1e61   :  { %v10830_v5 = vadd.f32 1e-05, %v10822_v12  ;;  %v16586_v12 = vld [vmem:[%s21504_s9 + $0x470] sm:$0xff]  }
0x1e62   :  { %v10814_v43 = vpop.xlane.xlu1 %10813  ;;  %v10811_v26 = vpop.xlane.xlu0 %10810 }
0x1e63   :  { %17006 = vrsqrt.f32 %v10830_v5  ;;  %v10824_v39 = vmul.f32 0.03125, %v10814_v43  ;;  %v10823_v7 = vmul.f32 0.03125, %v10811_v26  ;;  %v16587_v5 = vld [vmem:[%s21504_s9 + $0x4f0] sm:$0xff]  }
0x1e64   :  { %v16588_v43 = vld [vmem:[%s21504_s9 + $0x430] sm:$0xff]  }
0x1e65   :  { %v10831_v3 = vadd.f32 1e-05, %v10823_v7  ;;  %v10832_v34 = vadd.f32 1e-05, %v10824_v39  ;;  %v16589_v26 = vld [vmem:[%s21504_s9 + $0x4b0] sm:$0xff]   ;;  %v16591_v39 = vld [vmem:[%s21504_s9 + $0x4e8] sm:$0xff]  }
0x1e66   :  { %v10817_v59 = vpop.xlane.xlu0 %10816  ;;  %v16592_v7 = vld [vmem:[%s21504_s9 + $0x428] sm:$0xff]  }
0x1e67   :  { %v10825_v23 = vmul.f32 0.03125, %v10817_v59  ;;  %17008 = vrsqrt.f32 %v10831_v3  ;;  %v16593_v3 = vld [vmem:[%s21504_s9 + $0x4a8] sm:$0xff]   ;;  %v16595_v59 = vld [vmem:[%s21504_s9 + $0x4e0] sm:$0xff]  }
0x1e68   :  { %17010 = vrsqrt.f32 %v10832_v34  ;;  %v16594_v34 = vld [vmem:[%s21504_s9 + $0x460] sm:$0xff]  }
0x1e69   :  { %v10833_v50 = vadd.f32 1e-05, %v10825_v23  ;;  %v16596_v23 = vld [vmem:[%s21504_s9 + $0x420] sm:$0xff]  }
0x1e6b   :  { %17012 = vrsqrt.f32 %v10833_v50  ;;  %v16597_v50 = vld [vmem:[%s21504_s9 + $0x4a0] sm:$0xff]  }
0x1e70   :  { %v17007_v37 = vpop.eup %17006 }
0x1e71   :  { %v10846_v58 = vmul.f32 %v17007_v37, %v20312_v2  ;;  %v16599_v37 = vld [vmem:[%s21504_s9 + $0x4d8] sm:$0xff]  }
0x1e73   :  { %v10860_v61 = vmul.f32 %v20375_v20, %v10846_v58  ;;  %v16600_v58 = vld [vmem:[%s21504_s9 + $0x418] sm:$0xff]  }
0x1e74   :  { %v17009_v32 = vpop.eup %17008 }
0x1e75   :  { %v10847_v55 = vmul.f32 %v17009_v32, %v20320_v24  ;;  %v17011_v54 = vpop.eup %17010  ;;  %v20443_v17 = vadd.f32 %v20382_v16, %v10860_v61  ;;  %v16601_v32 = vld [vmem:[%s21504_s9 + $0x498] sm:$0xff]   ;;  %v16602_v61 = vld [vmem:[%s21504_s9 + $0x450] sm:$0xff]  }
0x1e76   :  { %v10848_v1 = vmul.f32 %v17011_v54, %v20317_v4  ;;  %v16604_v54 = vld [vmem:[%s21504_s9 + $0x410] sm:$0xff]  }
0x1e77   :  { %v10861_v19 = vmul.f32 %v20375_v20, %v10847_v55  ;;  %21635 = vst [vmem:[#allocation17_spill] sm:$0xff] %v20443_v17  ;;  %v16603_v55 = vld [vmem:[%s21504_s9 + $0x4d0] sm:$0xff]  }
0x1e78   :  { %v17013_v51 = vpop.eup %17012  ;;  %v10862_v11 = vmul.f32 %v20375_v20, %v10848_v1  ;;  %v16609_v1 = vld [vmem:[%s21504_s9 + $0x488] sm:$0xff]  }
0x1e79   :  { %v10849_v8 = vmul.f32 %v17013_v51, %v20328_v18  ;;  %v20447_v56 = vadd.f32 %v20382_v16, %v10861_v19  ;;  %v16605_v51 = vld [vmem:[%s21504_s9 + $0x490] sm:$0xff]   ;;  %v16606_v19 = vld [vmem:[%s21504_s9 + $0x448] sm:$0xff]  }
0x1e7a   :  { %v20465_v18 = vadd.f32 %v20382_v16, %v10862_v11  ;;  %v16612_v11 = vld [vmem:[%s21504_s9 + $0x400] sm:$0xff]  }
0x1e7b   :  { %21636 = vst [vmem:[#allocation21_spill] sm:$0xff] %v20447_v56  ;;  %v20451_v2 = vpack.c.bf16 %v20447_v56, %v20443_v17  ;;  %v10863_v24 = vmul.f32 %v20375_v20, %v10849_v8  ;;  %v14083_v20 = vld [vmem:[%s21501_s7 + $0x120] sm:$0xff]  ;;  %v16608_v8 = vld [vmem:[%s21504_s9 + $0x408] sm:$0xff]  }
0x1e7c   :  { %21638 = vst [vmem:[#allocation25_spill] sm:$0xff] %v20465_v18  ;;  %v14122_v52 = vcombine.high %v14083_v20, %v14091_v49  ;;  %v14121_v44 = vcombine.low %v14083_v20, %v14091_v49  ;;  %v16613_v20 = vld [vmem:[%s21504_s9 + $0x480] sm:$0xff]   ;;  %v16614_v49 = vld [vmem:[%s21504_s9 + $0x578] sm:$0xff]  }
0x1e7d   :  { %14147 = vmatmul.mubr.msk.bf16.gmra.mxu1 %vm88_vm0, %v20451_v2  ;;  %14151 = vmatmul.mubr.msk.bf16.gmra.mxu0 %vm88_vm0, %v20451_v2  ;;  %v20462_v4 = vadd.f32 %v20382_v16, %v10863_v24  ;;  %v14084_v16 = vld [vmem:[%s21501_s7 + $0x128] sm:$0xff]  ;;  %v16611_v24 = vld [vmem:[%s21504_s9 + $0x4c0] sm:$0xff]  }
0x1e7e   :  { %11234 = vmatprep.mubr.bf16.mxu1 %v21627_v46  ;;  %11307 = vmatprep.mubr.bf16.mxu0 %v21627_v46  ;;  %v14124_v22 = vcombine.high %v14084_v16, %v14092_v57  ;;  %v14123_v25 = vcombine.low %v14084_v16, %v14092_v57  ;;  %v20694_v16 = vld [vmem:[%s21505_s8 + $0x10] sm:$0xff] }
0x1e7f   :  { %21637 = vst [vmem:[#allocation23_spill] sm:$0xff] %v20462_v4  ;;  %v20469_v28 = vpack.c.bf16 %v20462_v4, %v20465_v18 }
0x1e85   :  { %14148 = vmatmul.mubr.msk.bf16.gmra.mxu1 %vm88_vm0, %v20469_v28  ;;  %14152 = vmatmul.mubr.msk.bf16.gmra.mxu0 %vm88_vm0, %v20469_v28 }
0x1e86   :  { %11350 = vmatprep.mubr.bf16.mxu1 %v21627_v46  ;;  %11423 = vmatprep.mubr.bf16.mxu0 %v21627_v46 }
0x1e8d   :  { %14153 = vmatmul.mubr.msk.bf16.vlgmr.msra.gmra.mxu1 %vm88_vm0, %v20407_v13  ;;  %14157 = vmatmul.mubr.msk.bf16.vlgmr.msra.gmra.mxu0 %vm88_vm0, %v20407_v13 }
0x1e8e   :  { %11360 = vmatprep.mubr.bf16.mxu1 %v21627_v46  ;;  %11433 = vmatprep.mubr.bf16.mxu0 %v21627_v46 }
0x1e8f   :  { %11477 = vmatpush1.bf16.msra.mxu1 %v14137_v14  ;;  %11550 = vmatpush1.bf16.msra.mxu0 %v14139_v21  ;;  %v14141_v14 = vcombine.low %v14101_v35, %v14109_v47  ;;  %v14143_v21 = vcombine.low %v14102_v33, %v14110_v38  ;;  %v21640_v47 = vld [vmem:[#allocation10_spill] sm:$0xff]  ;;  %v21641_v38 = vld [vmem:[#allocation11_spill] sm:$0xff] }
0x1e90   :  { %11478 = vmatprep.subr.bf16.mxu1 %v14122_v52  ;;  %11551 = vmatprep.subr.bf16.mxu0 %v14124_v22  ;;  %v21639_v22 = vld [vmem:[#allocation9_spill] sm:$0xff]  ;;  %v20702_v33 = vrot.slane %v20694_v16, %v21640_v47 }
0x1e91   :  { %v20698_v35 = vrot.slane %v20694_v16, %v21639_v22 }
0x1e93   :  { %11479 = vmatpush1.bf16.msra.mxu1 %v14121_v44  ;;  %11552 = vmatpush1.bf16.msra.mxu0 %v14123_v25  ;;  %v20706_v44 = vrot.slane %v20694_v16, %v21641_v38  ;;  %v21642_v25 = vld [vmem:[#allocation12_spill] sm:$0xff] }
0x1e94   :  { %11622 = vmatprep.subr.bf16.mxu1 %v14142_v63  ;;  %11695 = vmatprep.subr.bf16.mxu0 %v14144_v60  ;;  %v20710_v63 = vrot.slane %v20694_v16, %v21642_v25 }
0x1e95   :  { %14154 = vmatmul.mubr.msk.bf16.gmra.mxu1 %vm88_vm0, %v20429_v41  ;;  %14158 = vmatmul.mubr.msk.bf16.gmra.mxu0 %vm88_vm0, %v20429_v41 }
0x1e96   :  { %11370 = vmatprep.mubr.bf16.mxu1 %v21627_v46  ;;  %11443 = vmatprep.mubr.bf16.mxu0 %v21627_v46 }
0x1e9d   :  { %14155 = vmatmul.mubr.msk.bf16.gmra.mxu1 %vm88_vm0, %v20451_v2  ;;  %14159 = vmatmul.mubr.msk.bf16.gmra.mxu0 %vm88_vm0, %v20451_v2 }
0x1e9e   :  { %11380 = vmatprep.mubr.bf16.mxu1 %v21627_v46  ;;  %11453 = vmatprep.mubr.bf16.mxu0 %v21627_v46 }
0x1ea5   :  { %14156 = vmatmul.mubr.msk.bf16.gmra.mxu1 %vm88_vm0, %v20469_v28  ;;  %14160 = vmatmul.mubr.msk.bf16.gmra.mxu0 %vm88_vm0, %v20469_v28 }
0x1ea6   :  { %11496 = vmatprep.mubr.bf16.mxu1 %v21627_v46  ;;  %11569 = vmatprep.mubr.bf16.mxu0 %v21627_v46 }
0x1ead   :  { %14161 = vmatmul.mubr.msk.bf16.vlgmr.msra.gmra.mxu1 %vm88_vm0, %v20407_v13  ;;  %14165 = vmatmul.mubr.msk.bf16.vlgmr.msra.gmra.mxu0 %vm88_vm0, %v20407_v13 }
0x1eae   :  { %11506 = vmatprep.mubr.bf16.mxu1 %v21627_v46  ;;  %11579 = vmatprep.mubr.bf16.mxu0 %v21627_v46 }
0x1eaf   :  { %11623 = vmatpush1.bf16.msra.mxu1 %v14141_v14  ;;  %11696 = vmatpush1.bf16.msra.mxu0 %v14143_v21 }
0x1eb0   :  { %11624 = vmatprep.subr.bf16.mxu1 %v14126_v6  ;;  %11697 = vmatprep.subr.bf16.mxu0 %v14128_v36 }
0x1eb3   :  { %11625 = vmatpush1.bf16.msra.mxu1 %v14125_v15  ;;  %11698 = vmatpush1.bf16.msra.mxu0 %v14127_v42 }
0x1eb4   :  { %15169 = vmatprep.subr.bf16.mxu1 %v16582_v62  ;;  %15209 = vmatprep.subr.bf16.mxu0 %v16583_v27 }
0x1eb5   :  { %14162 = vmatmul.mubr.msk.bf16.gmra.mxu1 %vm88_vm0, %v20429_v41  ;;  %14166 = vmatmul.mubr.msk.bf16.gmra.mxu0 %vm88_vm0, %v20429_v41 }
0x1eb6   :  { %11516 = vmatprep.mubr.bf16.mxu1 %v21627_v46  ;;  %11589 = vmatprep.mubr.bf16.mxu0 %v21627_v46 }
0x1ebd   :  { %14163 = vmatmul.mubr.msk.bf16.gmra.mxu1 %vm88_vm0, %v20451_v2  ;;  %14167 = vmatmul.mubr.msk.bf16.gmra.mxu0 %vm88_vm0, %v20451_v2 }
0x1ebe   :  { %11526 = vmatprep.mubr.bf16.mxu1 %v21627_v46  ;;  %11599 = vmatprep.mubr.bf16.mxu0 %v21627_v46 }
0x1ec5   :  { %14164 = vmatmul.mubr.msk.bf16.gmra.mxu1 %vm88_vm0, %v20469_v28  ;;  %14168 = vmatmul.mubr.msk.bf16.gmra.mxu0 %vm88_vm0, %v20469_v28 }
0x1ec6   :  { %11642 = vmatprep.mubr.bf16.mxu1 %v21627_v46  ;;  %11715 = vmatprep.mubr.bf16.mxu0 %v21627_v46 }
0x1ecd   :  { %14169 = vmatmul.mubr.msk.bf16.vlgmr.msra.gmra.mxu1 %vm88_vm0, %v20407_v13  ;;  %14173 = vmatmul.mubr.msk.bf16.vlgmr.msra.gmra.mxu0 %vm88_vm0, %v20407_v13  ;;  %v16590_v13 = vld [vmem:[%s21504_s9 + $0x468] sm:$0xff]  }
0x1ece   :  { %11652 = vmatprep.mubr.bf16.mxu1 %v21627_v46  ;;  %11725 = vmatprep.mubr.bf16.mxu0 %v21627_v46 }
0x1ecf   :  { %15170 = vmatpush3.bf16.msra.mxu1 %v16584_v53  ;;  %15210 = vmatpush3.bf16.msra.mxu0 %v16585_v48 }
0x1ed0   :  { %15171 = vmatprep.subr.bf16.mxu1 %v16586_v12  ;;  %15211 = vmatprep.subr.bf16.mxu0 %v16587_v5 }
0x1ed3   :  { %15172 = vmatpush3.bf16.msra.mxu1 %v16588_v43  ;;  %15212 = vmatpush3.bf16.msra.mxu0 %v16589_v26 }
0x1ed4   :  { %15173 = vmatprep.subr.bf16.mxu1 %v16590_v13  ;;  %15213 = vmatprep.subr.bf16.mxu0 %v16591_v39 }
0x1ed5   :  { %14170 = vmatmul.mubr.msk.bf16.gmra.mxu1 %vm88_vm0, %v20429_v41  ;;  %14174 = vmatmul.mubr.msk.bf16.gmra.mxu0 %vm88_vm0, %v20429_v41  ;;  %v16598_v41 = vld [vmem:[%s21504_s9 + $0x458] sm:$0xff]  }
0x1ed6   :  { %11662 = vmatprep.mubr.bf16.mxu1 %v21627_v46  ;;  %11735 = vmatprep.mubr.bf16.mxu0 %v21627_v46 }
0x1ed7   :  { %15174 = vmatpush3.bf16.msra.mxu1 %v16592_v7  ;;  %15214 = vmatpush3.bf16.msra.mxu0 %v16593_v3 }
0x1ed8   :  { %15175 = vmatprep.subr.bf16.mxu1 %v16594_v34  ;;  %15215 = vmatprep.subr.bf16.mxu0 %v16595_v59 }
0x1edb   :  { %15176 = vmatpush3.bf16.msra.mxu1 %v16596_v23  ;;  %15216 = vmatpush3.bf16.msra.mxu0 %v16597_v50 }
0x1edc   :  { %15177 = vmatprep.subr.bf16.mxu1 %v16598_v41  ;;  %15217 = vmatprep.subr.bf16.mxu0 %v16599_v37  ;;  %v16616_v37 = vld [vmem:[%s21504_s9 + $0x538] sm:$0xff]  }
0x1edd   :  { %14171 = vmatmul.mubr.msk.bf16.gmra.mxu1 %vm88_vm0, %v20451_v2  ;;  %14175 = vmatmul.mubr.msk.bf16.gmra.mxu0 %vm88_vm0, %v20451_v2  ;;  %v16610_v2 = vld [vmem:[%s21504_s9 + $0x440] sm:$0xff]  }
0x1ede   :  { %11672 = vmatprep.mubr.bf16.mxu1 %v21627_v46  ;;  %11745 = vmatprep.mubr.bf16.mxu0 %v21627_v46  ;;  %v16607_v46 = vld [vmem:[%s21504_s9 + $0x4c8] sm:$0xff]  }
0x1edf   :  { %15178 = vmatpush3.bf16.msra.mxu1 %v16600_v58  ;;  %15218 = vmatpush3.bf16.msra.mxu0 %v16601_v32  ;;  %v16617_v58 = vld [vmem:[%s21504_s9 + $0x5b8] sm:$0xff]  }
0x1ee0   :  { %15179 = vmatprep.subr.bf16.mxu1 %v16602_v61  ;;  %15219 = vmatprep.subr.bf16.mxu0 %v16603_v55 }
0x1ee3   :  { %15180 = vmatpush3.bf16.msra.mxu1 %v16604_v54  ;;  %15220 = vmatpush3.bf16.msra.mxu0 %v16605_v51 }
0x1ee4   :  { %15181 = vmatprep.subr.bf16.mxu1 %v16606_v19  ;;  %15221 = vmatprep.subr.bf16.mxu0 %v16607_v46  ;;  %v16618_v19 = vld [vmem:[%s21504_s9 + $0x570] sm:$0xff]  }
0x1ee5   :  { %14172 = vmatmul.mubr.msk.bf16.gmra.mxu1 %vm88_vm0, %v20469_v28  ;;  %14176 = vmatmul.mubr.msk.bf16.gmra.mxu0 %vm88_vm0, %v20469_v28  ;;  %v16615_v28 = vld [vmem:[%s21504_s9 + $0x5f8] sm:$0xff]   ;;  %v16619_v46 = vld [vmem:[%s21504_s9 + $0x5f0] sm:$0xff]  }
0x1ee7   :  { %15182 = vmatpush3.bf16.msra.mxu1 %v16608_v8  ;;  %15222 = vmatpush3.bf16.msra.mxu0 %v16609_v1 }
0x1ee8   :  { %15183 = vmatprep.subr.bf16.mxu1 %v16610_v2  ;;  %15223 = vmatprep.subr.bf16.mxu0 %v16611_v24 }
0x1eeb   :  { %15184 = vmatpush3.bf16.msra.mxu1 %v16612_v11  ;;  %15224 = vmatpush3.bf16.msra.mxu0 %v16613_v20 }
0x1eec   :  { %15249 = vmatprep.subr.bf16.mxu1 %v16614_v49  ;;  %15289 = vmatprep.subr.bf16.mxu0 %v16615_v28 }
0x1f00   :  { %v11206_v57 = vpop.f32.mrf.mxu1  ;;  %v11279_v52 = vpop.f32.mrf.mxu0 }
0x1f01   :  { %v11207_v36 = vadd.f32 %v11206_v57, %v20706_v44  ;;  %v11280_v15 = vadd.f32 %v11279_v52, %v20710_v63  ;;  %v16620_v52 = vld [vmem:[%s21504_s9 + $0x530] sm:$0xff]  }
0x1f02   :  { %v11208_v60 = vpop.f32.mrf.mxu1  ;;  %v11281_v10 = vpop.f32.mrf.mxu0 }
0x1f03   :  { %v11209_v0 = vadd.f32 %v11208_v60, %v20698_v35  ;;  %v11282_v14 = vadd.f32 %v11281_v10, %v20702_v33  ;;  %v11756_v3 = vmax.f32 %v11207_v36, 0.0  ;;  %v11758_v34 = vmax.f32 %v11280_v15, 0.0  ;;  %v16621_v60 = vld [vmem:[%s21504_s9 + $0x5b0] sm:$0xff]  }
0x1f04   :  { %v11210_v40 = vpop.f32.mrf.mxu1  ;;  %v11283_v45 = vpop.f32.mrf.mxu0 }
0x1f05   :  { %v11211_v21 = vadd.f32 %v11210_v40, %v20706_v44  ;;  %v11284_v6 = vadd.f32 %v11283_v45, %v20710_v63  ;;  %v11757_v26 = vmax.f32 %v11209_v0, 0.0  ;;  %v11759_v13 = vmax.f32 %v11282_v14, 0.0  ;;  %v16622_v45 = vld [vmem:[%s21504_s9 + $0x568] sm:$0xff]  }
0x1f06   :  { %v11212_v42 = vpop.f32.mrf.mxu1  ;;  %v11285_v62 = vpop.f32.mrf.mxu0  ;;  %v16623_v0 = vld [vmem:[%s21504_s9 + $0x5e8] sm:$0xff]  }
0x1f07   :  { %v11213_v27 = vadd.f32 %v11212_v42, %v20698_v35  ;;  %v11286_v53 = vadd.f32 %v11285_v62, %v20702_v33  ;;  %v11772_v48 = vmax.f32 %v11211_v21, 0.0  ;;  %v11774_v12 = vmax.f32 %v11284_v6, 0.0 }
0x1f08   :  { %v11216_v5 = vpop.f32.mrf.mxu1  ;;  %v11289_v43 = vpop.f32.mrf.mxu0 }
0x1f09   :  { %v11773_v39 = vmax.f32 %v11213_v27, 0.0  ;;  %v11775_v7 = vmax.f32 %v11286_v53, 0.0  ;;  %v12141_v32 = vpack.c.bf16 %v11772_v48, %v11756_v3  ;;  %v12143_v61 = vpack.c.bf16 %v11774_v12, %v11758_v34  ;;  %v16624_v53 = vld [vmem:[%s21504_s9 + $0x528] sm:$0xff]   ;;  %v16631_v3 = vld [vmem:[%s21504_s9 + $0x5d8] sm:$0xff]  }
0x1f0a   :  { %v11218_v59 = vpop.f32.mrf.mxu1  ;;  %v11291_v23 = vpop.f32.mrf.mxu0  ;;  %v11217_v24 = vadd.f32 %v11216_v5, %v20706_v44  ;;  %v11290_v11 = vadd.f32 %v11289_v43, %v20710_v63  ;;  %v16625_v48 = vld [vmem:[%s21504_s9 + $0x5a8] sm:$0xff]   ;;  %v16626_v43 = vld [vmem:[%s21504_s9 + $0x560] sm:$0xff]   ;;  %v16632_v34 = vld [vmem:[%s21504_s9 + $0x518] sm:$0xff]  }
0x1f0b   :  { %v12142_v50 = vpack.c.bf16 %v11773_v39, %v11757_v26  ;;  %v12144_v41 = vpack.c.bf16 %v11775_v7, %v11759_v13  ;;  %v11219_v55 = vadd.f32 %v11218_v59, %v20698_v35  ;;  %v11292_v8 = vadd.f32 %v11291_v23, %v20702_v33  ;;  %v16627_v26 = vld [vmem:[%s21504_s9 + $0x5e0] sm:$0xff]   ;;  %v16630_v7 = vld [vmem:[%s21504_s9 + $0x558] sm:$0xff]   ;;  %v16634_v23 = vld [vmem:[%s21504_s9 + $0x550] sm:$0xff]  }
0x1f0c   :  { %v11220_v54 = vpop.f32.mrf.mxu1  ;;  %v11293_v51 = vpop.f32.mrf.mxu0  ;;  %v11788_v15 = vmax.f32 %v11217_v24, 0.0  ;;  %v11790_v42 = vmax.f32 %v11290_v11, 0.0  ;;  %v16628_v13 = vld [vmem:[%s21504_s9 + $0x520] sm:$0xff]   ;;  %v16633_v59 = vld [vmem:[%s21504_s9 + $0x598] sm:$0xff]  }
0x1f0d   :  { %v11221_v1 = vadd.f32 %v11220_v54, %v20706_v44  ;;  %v11294_v2 = vadd.f32 %v11293_v51, %v20710_v63  ;;  %13013 = vmatprep.mubr.bf16.mxu1 %v12142_v50  ;;  %13078 = vmatprep.mubr.bf16.mxu0 %v12144_v41  ;;  %v11789_v14 = vmax.f32 %v11219_v55, 0.0  ;;  %v11791_v21 = vmax.f32 %v11292_v8, 0.0  ;;  %v16629_v39 = vld [vmem:[%s21504_s9 + $0x5a0] sm:$0xff]   ;;  %v16635_v50 = vld [vmem:[%s21504_s9 + $0x5d0] sm:$0xff]   ;;  %v16641_v55 = vld [vmem:[%s21504_s9 + $0x588] sm:$0xff]  }
0x1f0e   :  { %v11222_v20 = vpop.f32.mrf.mxu1  ;;  %v11295_v49 = vpop.f32.mrf.mxu0  ;;  %13014 = vmatmul.mubr.bf16.vlgmr.msra.gmra.mxu1 %v12141_v32  ;;  %13079 = vmatmul.mubr.bf16.vlgmr.msra.gmra.mxu0 %v12143_v61  ;;  %v16636_v41 = vld [vmem:[%s21504_s9 + $0x510] sm:$0xff]   ;;  %v16639_v32 = vld [vmem:[%s21504_s9 + $0x5c8] sm:$0xff]   ;;  %v16642_v54 = vld [vmem:[%s21504_s9 + $0x540] sm:$0xff]  }
0x1f0f   :  { %v11223_v28 = vadd.f32 %v11222_v20, %v20698_v35  ;;  %v11296_v57 = vadd.f32 %v11295_v49, %v20702_v33  ;;  %15250 = vmatpush3.bf16.msra.mxu1 %v16616_v37  ;;  %15290 = vmatpush3.bf16.msra.mxu0 %v16617_v58  ;;  %v11804_v10 = vmax.f32 %v11221_v1, 0.0  ;;  %v11806_v40 = vmax.f32 %v11294_v2, 0.0  ;;  %v16637_v37 = vld [vmem:[%s21504_s9 + $0x590] sm:$0xff]   ;;  %v16638_v58 = vld [vmem:[%s21504_s9 + $0x548] sm:$0xff]   ;;  %v16643_v51 = vld [vmem:[%s21504_s9 + $0x5c0] sm:$0xff]  }
0x1f10   :  { %15251 = vmatprep.subr.bf16.mxu1 %v16618_v19  ;;  %15291 = vmatprep.subr.bf16.mxu0 %v16619_v46  ;;  %v16640_v61 = vld [vmem:[%s21504_s9 + $0x508] sm:$0xff]   ;;  %v16644_v19 = vld [vmem:[%s21504_s9 + $0x500] sm:$0xff]   ;;  %v16646_v8 = vld [vmem:[%s21504_s9 + $0x678] sm:$0xff]  }
0x1f11   :  { %v11805_v6 = vmax.f32 %v11223_v28, 0.0  ;;  %v11807_v36 = vmax.f32 %v11296_v57, 0.0  ;;  %v12157_v12 = vpack.c.bf16 %v11804_v10, %v11788_v15  ;;  %v12159_v5 = vpack.c.bf16 %v11806_v40, %v11790_v42  ;;  %v16645_v46 = vld [vmem:[%s21504_s9 + $0x580] sm:$0xff]   ;;  %v16647_v1 = vld [vmem:[%s21504_s9 + $0x6f8] sm:$0xff]  }
0x1f13   :  { %v12158_v62 = vpack.c.bf16 %v11805_v6, %v11789_v14  ;;  %v12160_v27 = vpack.c.bf16 %v11807_v36, %v11791_v21  ;;  %15252 = vmatpush3.bf16.msra.mxu1 %v16620_v52  ;;  %15292 = vmatpush3.bf16.msra.mxu0 %v16621_v60 }
0x1f14   :  { %15253 = vmatprep.subr.bf16.mxu1 %v16622_v45  ;;  %15293 = vmatprep.subr.bf16.mxu0 %v16623_v0 }
0x1f15   :  { %13021 = vmatprep.mubr.bf16.mxu1 %v12158_v62  ;;  %13086 = vmatprep.mubr.bf16.mxu0 %v12160_v27 }
0x1f16   :  { %13022 = vmatmul.mubr.bf16.gmra.mxu1 %v12157_v12  ;;  %13087 = vmatmul.mubr.bf16.gmra.mxu0 %v12159_v5 }
0x1f17   :  { %15254 = vmatpush3.bf16.msra.mxu1 %v16624_v53  ;;  %15294 = vmatpush3.bf16.msra.mxu0 %v16625_v48 }
0x1f18   :  { %15255 = vmatprep.subr.bf16.mxu1 %v16626_v43  ;;  %15295 = vmatprep.subr.bf16.mxu0 %v16627_v26 }
0x1f1b   :  { %15256 = vmatpush3.bf16.msra.mxu1 %v16628_v13  ;;  %15296 = vmatpush3.bf16.msra.mxu0 %v16629_v39 }
0x1f1c   :  { %15257 = vmatprep.subr.bf16.mxu1 %v16630_v7  ;;  %15297 = vmatprep.subr.bf16.mxu0 %v16631_v3 }
0x1f1f   :  { %15258 = vmatpush3.bf16.msra.mxu1 %v16632_v34  ;;  %15298 = vmatpush3.bf16.msra.mxu0 %v16633_v59 }
0x1f20   :  { %15259 = vmatprep.subr.bf16.mxu1 %v16634_v23  ;;  %15299 = vmatprep.subr.bf16.mxu0 %v16635_v50 }
0x1f23   :  { %15260 = vmatpush3.bf16.msra.mxu1 %v16636_v41  ;;  %15300 = vmatpush3.bf16.msra.mxu0 %v16637_v37 }
0x1f24   :  { %15261 = vmatprep.subr.bf16.mxu1 %v16638_v58  ;;  %15301 = vmatprep.subr.bf16.mxu0 %v16639_v32 }
0x1f27   :  { %15262 = vmatpush3.bf16.msra.mxu1 %v16640_v61  ;;  %15302 = vmatpush3.bf16.msra.mxu0 %v16641_v55 }
0x1f28   :  { %15263 = vmatprep.subr.bf16.mxu1 %v16642_v54  ;;  %15303 = vmatprep.subr.bf16.mxu0 %v16643_v51 }
0x1f2b   :  { %15264 = vmatpush3.bf16.msra.mxu1 %v16644_v19  ;;  %15304 = vmatpush3.bf16.msra.mxu0 %v16645_v46 }
0x1f2c   :  { %15329 = vmatprep.subr.bf16.mxu1 %v16646_v8  ;;  %15369 = vmatprep.subr.bf16.mxu0 %v16647_v1 }
0x1f3d   :  { %v11226_v2 = vpop.f32.mrf.mxu1  ;;  %v11299_v24 = vpop.f32.mrf.mxu0 }
0x1f3e   :  { %v11227_v40 = vadd.f32 %v11226_v2, %v20706_v44  ;;  %v11300_v45 = vadd.f32 %v11299_v24, %v20710_v63  ;;  %v21643_v24 = vld [vmem:[#allocation13_spill] sm:$0xff] }
0x1f3f   :  { %v11228_v11 = vpop.f32.mrf.mxu1  ;;  %v11301_v20 = vpop.f32.mrf.mxu0 }
0x1f40   :  { %v11229_v57 = vadd.f32 %v11228_v11, %v20698_v35  ;;  %v11302_v52 = vadd.f32 %v11301_v20, %v20702_v33  ;;  %v11820_v5 = vmax.f32 %v11227_v40, 0.0  ;;  %v11822_v43 = vmax.f32 %v11300_v45, 0.0  ;;  %v21644_v20 = vld [vmem:[#allocation14_spill] sm:$0xff] }
0x1f41   :  { %v11230_v49 = vpop.f32.mrf.mxu1  ;;  %v11303_v28 = vpop.f32.mrf.mxu0  ;;  %v20842_v11 = vrot.slane %v20694_v16, %v21643_v24 }
0x1f42   :  { %v11231_v60 = vadd.f32 %v11230_v49, %v20706_v44  ;;  %v11304_v10 = vadd.f32 %v11303_v28, %v20710_v63  ;;  %v11821_v27 = vmax.f32 %v11229_v57, 0.0  ;;  %v11823_v53 = vmax.f32 %v11302_v52, 0.0 }
0x1f43   :  { %v11232_v0 = vpop.f32.mrf.mxu1  ;;  %v11305_v14 = vpop.f32.mrf.mxu0 }
0x1f44   :  { %v11233_v21 = vadd.f32 %v11232_v0, %v20698_v35  ;;  %v11306_v6 = vadd.f32 %v11305_v14, %v20702_v33  ;;  %v11836_v36 = vmax.f32 %v11231_v60, 0.0  ;;  %v11838_v15 = vmax.f32 %v11304_v10, 0.0  ;;  %v21645_v60 = vld [vmem:[#allocation15_spill] sm:$0xff]  ;;  %v21646_v10 = vld [vmem:[#allocation16_spill] sm:$0xff] }
0x1f45   :  { %v11236_v42 = vpop.f32.mrf.mxu1  ;;  %v11309_v62 = vpop.f32.mrf.mxu0  ;;  %v20854_v40 = vrot.slane %v20694_v16, %v21646_v10 }
0x1f46   :  { %v11837_v48 = vmax.f32 %v11233_v21, 0.0  ;;  %v11839_v12 = vmax.f32 %v11306_v6, 0.0  ;;  %v12173_v3 = vpack.c.bf16 %v11836_v36, %v11820_v5  ;;  %v12175_v34 = vpack.c.bf16 %v11838_v15, %v11822_v43 }
0x1f47   :  { %v11238_v26 = vpop.f32.mrf.mxu1  ;;  %v11311_v13 = vpop.f32.mrf.mxu0  ;;  %v11237_v32 = vadd.f32 %v11236_v42, %v20706_v44  ;;  %v11310_v61 = vadd.f32 %v11309_v62, %v20710_v63 }
0x1f48   :  { %v12174_v39 = vpack.c.bf16 %v11837_v48, %v11821_v27  ;;  %v12176_v7 = vpack.c.bf16 %v11839_v12, %v11823_v53  ;;  %v11239_v59 = vadd.f32 %v11238_v26, %v20698_v35  ;;  %v11312_v41 = vadd.f32 %v11311_v13, %v20702_v33 }
0x1f49   :  { %v11240_v23 = vpop.f32.mrf.mxu1  ;;  %v11313_v50 = vpop.f32.mrf.mxu0  ;;  %v11852_v52 = vmax.f32 %v11237_v32, 0.0 }
0x1f4a   :  { %v11241_v37 = vadd.f32 %v11240_v23, %v20706_v44  ;;  %v11314_v58 = vadd.f32 %v11313_v50, %v20710_v63  ;;  %13029 = vmatprep.mubr.bf16.mxu1 %v12174_v39  ;;  %13094 = vmatprep.mubr.bf16.mxu0 %v12176_v7  ;;  %v20846_v44 = vrot.slane %v20694_v16, %v21644_v20  ;;  %v11853_v63 = vmax.f32 %v11239_v59, 0.0 }
0x1f4b   :  { %v11242_v55 = vpop.f32.mrf.mxu1  ;;  %v11315_v54 = vpop.f32.mrf.mxu0  ;;  %13030 = vmatmul.mubr.bf16.gmra.mxu1 %v12173_v3  ;;  %13095 = vmatmul.mubr.bf16.gmra.mxu0 %v12175_v34  ;;  %v11855_v49 = vmax.f32 %v11312_v41, 0.0 }
0x1f4c   :  { %v11243_v51 = vadd.f32 %v11242_v55, %v20698_v35  ;;  %v11316_v19 = vadd.f32 %v11315_v54, %v20702_v33  ;;  %v11868_v46 = vmax.f32 %v11241_v37, 0.0  ;;  %v11870_v8 = vmax.f32 %v11314_v58, 0.0 }
0x1f4d   :  { %v11352_v1 = vpop.f32.mrf.mxu1  ;;  %v11425_v2 = vpop.f32.mrf.mxu0  ;;  %v11854_v35 = vmax.f32 %v11310_v61, 0.0  ;;  %v20850_v33 = vrot.slane %v20694_v16, %v21645_v60 }
0x1f4e   :  { %v11869_v28 = vmax.f32 %v11243_v51, 0.0  ;;  %v11871_v57 = vmax.f32 %v11316_v19, 0.0  ;;  %v12189_v6 = vpack.c.bf16 %v11868_v46, %v11852_v52  ;;  %v11426_v12 = vadd.f32 %v11425_v2, %v20854_v40  ;;  %v16648_v51 = vld [vmem:[%s21504_s9 + $0x638] sm:$0xff]  }
0x1f4f   :  { %v11354_v45 = vpop.f32.mrf.mxu1  ;;  %v11427_v0 = vpop.f32.mrf.mxu0  ;;  %v12191_v36 = vpack.c.bf16 %v11870_v8, %v11854_v35  ;;  %v11353_v16 = vadd.f32 %v11352_v1, %v20850_v33  ;;  %v16649_v19 = vld [vmem:[%s21504_s9 + $0x6b8] sm:$0xff]  }
0x1f50   :  { %v12190_v14 = vpack.c.bf16 %v11869_v28, %v11853_v63  ;;  %v12192_v21 = vpack.c.bf16 %v11871_v57, %v11855_v49  ;;  %v11355_v15 = vadd.f32 %v11354_v45, %v20842_v11  ;;  %v11428_v27 = vadd.f32 %v11427_v0, %v20846_v44  ;;  %v16650_v49 = vld [vmem:[%s21504_s9 + $0x670] sm:$0xff]  }
0x1f51   :  { %v11356_v42 = vpop.f32.mrf.mxu1  ;;  %v11429_v62 = vpop.f32.mrf.mxu0  ;;  %v11760_v37 = vmax.f32 %v11353_v16, 0.0  ;;  %v11762_v58 = vmax.f32 %v11426_v12, 0.0  ;;  %v16651_v28 = vld [vmem:[%s21504_s9 + $0x6f0] sm:$0xff]   ;;  %v16654_v16 = vld [vmem:[%s21504_s9 + $0x668] sm:$0xff]  }
0x1f52   :  { %v11357_v53 = vadd.f32 %v11356_v42, %v20850_v33  ;;  %v11430_v48 = vadd.f32 %v11429_v62, %v20854_v40  ;;  %13037 = vmatprep.mubr.bf16.mxu1 %v12190_v14  ;;  %13102 = vmatprep.mubr.bf16.mxu0 %v12192_v21  ;;  %v11761_v59 = vmax.f32 %v11355_v15, 0.0  ;;  %v11763_v23 = vmax.f32 %v11428_v27, 0.0  ;;  %v16652_v15 = vld [vmem:[%s21504_s9 + $0x630] sm:$0xff]  }
0x1f53   :  { %v11358_v5 = vpop.f32.mrf.mxu1  ;;  %v11431_v43 = vpop.f32.mrf.mxu0  ;;  %13038 = vmatmul.mubr.bf16.gmra.mxu1 %v12189_v6  ;;  %13103 = vmatmul.mubr.bf16.gmra.mxu0 %v12191_v36 }
0x1f54   :  { %v11359_v26 = vadd.f32 %v11358_v5, %v20842_v11  ;;  %v11432_v13 = vadd.f32 %v11431_v43, %v20846_v44  ;;  %v11776_v39 = vmax.f32 %v11357_v53, 0.0  ;;  %v11778_v7 = vmax.f32 %v11430_v48, 0.0  ;;  %v16653_v48 = vld [vmem:[%s21504_s9 + $0x6b0] sm:$0xff]  }
0x1f55   :  { %v11362_v3 = vpop.f32.mrf.mxu1  ;;  %v11435_v34 = vpop.f32.mrf.mxu0 }
0x1f56   :  { %v11777_v50 = vmax.f32 %v11359_v26, 0.0  ;;  %v11779_v41 = vmax.f32 %v11432_v13, 0.0  ;;  %v12145_v46 = vpack.c.bf16 %v11776_v39, %v11760_v37  ;;  %v12147_v8 = vpack.c.bf16 %v11778_v7, %v11762_v58 }
0x1f57   :  { %v11364_v32 = vpop.f32.mrf.mxu1  ;;  %v11437_v61 = vpop.f32.mrf.mxu0  ;;  %v11363_v45 = vadd.f32 %v11362_v3, %v20850_v33  ;;  %v11436_v0 = vadd.f32 %v11435_v34, %v20854_v40 }
0x1f58   :  { %v12146_v55 = vpack.c.bf16 %v11777_v50, %v11761_v59  ;;  %v12148_v54 = vpack.c.bf16 %v11779_v41, %v11763_v23  ;;  %v11365_v1 = vadd.f32 %v11364_v32, %v20842_v11  ;;  %v11438_v57 = vadd.f32 %v11437_v61, %v20846_v44  ;;  %v16655_v23 = vld [vmem:[%s21504_s9 + $0x6e8] sm:$0xff]  }
0x1f59   :  { %v11366_v2 = vpop.f32.mrf.mxu1  ;;  %v11439_v63 = vpop.f32.mrf.mxu0  ;;  %v11792_v13 = vmax.f32 %v11363_v45, 0.0  ;;  %v11794_v39 = vmax.f32 %v11436_v0, 0.0  ;;  %v16656_v50 = vld [vmem:[%s21504_s9 + $0x628] sm:$0xff]  }
0x1f5a   :  { %v11367_v52 = vadd.f32 %v11366_v2, %v20850_v33  ;;  %v11440_v35 = vadd.f32 %v11439_v63, %v20854_v40  ;;  %13143 = vmatprep.mubr.bf16.mxu1 %v12146_v55  ;;  %13208 = vmatprep.mubr.bf16.mxu0 %v12148_v54  ;;  %v11793_v12 = vmax.f32 %v11365_v1, 0.0  ;;  %v11795_v5 = vmax.f32 %v11438_v57, 0.0  ;;  %v16657_v55 = vld [vmem:[%s21504_s9 + $0x6a8] sm:$0xff]   ;;  %v16658_v54 = vld [vmem:[%s21504_s9 + $0x660] sm:$0xff]  }
0x1f5b   :  { %v11368_v14 = vpop.f32.mrf.mxu1  ;;  %v11441_v21 = vpop.f32.mrf.mxu0  ;;  %13144 = vmatmul.mubr.bf16.vlgmr.msra.gmra.mxu1 %v12145_v46  ;;  %13209 = vmatmul.mubr.bf16.vlgmr.msra.gmra.mxu0 %v12147_v8  ;;  %v16659_v8 = vld [vmem:[%s21504_s9 + $0x6e0] sm:$0xff]  }
0x1f5c   :  { %v11369_v6 = vadd.f32 %v11368_v14, %v20842_v11  ;;  %v11442_v36 = vadd.f32 %v11441_v21, %v20846_v44  ;;  %15330 = vmatpush3.bf16.msra.mxu1 %v16648_v51  ;;  %15370 = vmatpush3.bf16.msra.mxu0 %v16649_v19  ;;  %v11808_v42 = vmax.f32 %v11367_v52, 0.0  ;;  %v11810_v62 = vmax.f32 %v11440_v35, 0.0  ;;  %v16660_v52 = vld [vmem:[%s21504_s9 + $0x620] sm:$0xff]  }
0x1f5d   :  { %v11372_v27 = vpop.f32.mrf.mxu1  ;;  %v11445_v53 = vpop.f32.mrf.mxu0  ;;  %15331 = vmatprep.subr.bf16.mxu1 %v16650_v49  ;;  %15371 = vmatprep.subr.bf16.mxu0 %v16651_v28  ;;  %v16661_v21 = vld [vmem:[%s21504_s9 + $0x6a0] sm:$0xff]  }
0x1f5e   :  { %v11809_v43 = vmax.f32 %v11369_v6, 0.0  ;;  %v11811_v26 = vmax.f32 %v11442_v36, 0.0  ;;  %v12161_v41 = vpack.c.bf16 %v11808_v42, %v11792_v13  ;;  %v12163_v37 = vpack.c.bf16 %v11810_v62, %v11794_v39  ;;  %v16662_v6 = vld [vmem:[%s21504_s9 + $0x658] sm:$0xff]  }
0x1f5f   :  { %v11374_v7 = vpop.f32.mrf.mxu1  ;;  %v11447_v3 = vpop.f32.mrf.mxu0  ;;  %v11373_v1 = vadd.f32 %v11372_v27, %v20850_v33  ;;  %v11446_v2 = vadd.f32 %v11445_v53, %v20854_v40 }
0x1f60   :  { %v12162_v34 = vpack.c.bf16 %v11809_v43, %v11793_v12  ;;  %v12164_v59 = vpack.c.bf16 %v11811_v26, %v11795_v5  ;;  %15332 = vmatpush3.bf16.msra.mxu1 %v16652_v15  ;;  %v11375_v58 = vadd.f32 %v11374_v7, %v20842_v11  ;;  %15372 = vmatpush3.bf16.msra.mxu0 %v16653_v48  ;;  %v16663_v43 = vld [vmem:[%s21504_s9 + $0x6d8] sm:$0xff]  }
0x1f61   :  { %v11376_v32 = vpop.f32.mrf.mxu1  ;;  %v11449_v61 = vpop.f32.mrf.mxu0  ;;  %15333 = vmatprep.subr.bf16.mxu1 %v16654_v16  ;;  %v11448_v51 = vadd.f32 %v11447_v3, %v20846_v44  ;;  %15373 = vmatprep.subr.bf16.mxu0 %v16655_v23  ;;  %v11824_v27 = vmax.f32 %v11373_v1, 0.0  ;;  %v11826_v53 = vmax.f32 %v11446_v2, 0.0  ;;  %v16664_v26 = vld [vmem:[%s21504_s9 + $0x618] sm:$0xff]   ;;  %v16666_v23 = vld [vmem:[%s21504_s9 + $0x650] sm:$0xff]  }
0x1f62   :  { %v11377_v19 = vadd.f32 %v11376_v32, %v20850_v33  ;;  %v11450_v46 = vadd.f32 %v11449_v61, %v20854_v40  ;;  %13151 = vmatprep.mubr.bf16.mxu1 %v12162_v34  ;;  %13216 = vmatprep.mubr.bf16.mxu0 %v12164_v59  ;;  %v11825_v36 = vmax.f32 %v11375_v58, 0.0  ;;  %v16665_v59 = vld [vmem:[%s21504_s9 + $0x698] sm:$0xff]   ;;  %v16667_v58 = vld [vmem:[%s21504_s9 + $0x6d0] sm:$0xff]  }
0x1f63   :  { %v11378_v63 = vpop.f32.mrf.mxu1  ;;  %v11451_v49 = vpop.f32.mrf.mxu0  ;;  %13152 = vmatmul.mubr.bf16.gmra.mxu1 %v12161_v41  ;;  %13217 = vmatmul.mubr.bf16.gmra.mxu0 %v12163_v37  ;;  %v11827_v15 = vmax.f32 %v11448_v51, 0.0 }
0x1f64   :  { %v11379_v28 = vadd.f32 %v11378_v63, %v20842_v11  ;;  %v11452_v57 = vadd.f32 %v11451_v49, %v20846_v44  ;;  %15334 = vmatpush3.bf16.msra.mxu1 %v16656_v50  ;;  %v11840_v35 = vmax.f32 %v11377_v19, 0.0  ;;  %v11842_v45 = vmax.f32 %v11450_v46, 0.0  ;;  %15374 = vmatpush3.bf16.msra.mxu0 %v16657_v55  ;;  %v20951_v46 = vld [vmem:[%s21505_s8 + $0x18] sm:$0xff]  ;;  %v16669_v63 = vld [vmem:[%s21504_s9 + $0x690] sm:$0xff]   ;;  %v16670_v49 = vld [vmem:[%s21504_s9 + $0x648] sm:$0xff]  }
0x1f65   :  { %v11382_v0 = vpop.f32.mrf.mxu1  ;;  %v11455_v14 = vpop.f32.mrf.mxu0  ;;  %15335 = vmatprep.subr.bf16.mxu1 %v16658_v54  ;;  %15375 = vmatprep.subr.bf16.mxu0 %v16659_v8 }
0x1f66   :  { %v11841_v42 = vmax.f32 %v11379_v28, 0.0  ;;  %v11843_v62 = vmax.f32 %v11452_v57, 0.0  ;;  %v12177_v13 = vpack.c.bf16 %v11840_v35, %v11824_v27  ;;  %v12179_v39 = vpack.c.bf16 %v11842_v45, %v11826_v53 }
0x1f67   :  { %v11384_v48 = vpop.f32.mrf.mxu1  ;;  %v11457_v16 = vpop.f32.mrf.mxu0  ;;  %v11383_v32 = vadd.f32 %v11382_v0, %v20850_v33  ;;  %v11456_v61 = vadd.f32 %v11455_v14, %v20854_v40  ;;  %v20976_v0 = vrot.slane %v20951_v46, %v21642_v25 }
0x1f68   :  { %v12178_v12 = vpack.c.bf16 %v11841_v42, %v11825_v36  ;;  %v12180_v5 = vpack.c.bf16 %v11843_v62, %v11827_v15  ;;  %15336 = vmatpush3.bf16.msra.mxu1 %v16660_v52  ;;  %v11385_v7 = vadd.f32 %v11384_v48, %v20842_v11  ;;  %15376 = vmatpush3.bf16.msra.mxu0 %v16661_v21  ;;  %v16671_v15 = vld [vmem:[%s21504_s9 + $0x6c8] sm:$0xff]  }
0x1f69   :  { %v11386_v3 = vpop.f32.mrf.mxu1  ;;  %v11459_v34 = vpop.f32.mrf.mxu0  ;;  %15337 = vmatprep.subr.bf16.mxu1 %v16662_v6  ;;  %v11458_v50 = vadd.f32 %v11457_v16, %v20846_v44  ;;  %15377 = vmatprep.subr.bf16.mxu0 %v16663_v43  ;;  %v11858_v45 = vmax.f32 %v11456_v61, 0.0  ;;  %v16672_v42 = vld [vmem:[%s21504_s9 + $0x608] sm:$0xff]   ;;  %v16674_v16 = vld [vmem:[%s21504_s9 + $0x640] sm:$0xff]   ;;  %v16678_v61 = vld [vmem:[%s21504_s9 + $0x778] sm:$0xff]  }
0x1f6a   :  { %v11387_v41 = vadd.f32 %v11386_v3, %v20850_v33  ;;  %v11460_v37 = vadd.f32 %v11459_v34, %v20854_v40  ;;  %13159 = vmatprep.mubr.bf16.mxu1 %v12178_v12  ;;  %13224 = vmatprep.mubr.bf16.mxu0 %v12180_v5  ;;  %v16668_v33 = vld [vmem:[%s21504_s9 + $0x610] sm:$0xff]   ;;  %v11857_v28 = vmax.f32 %v11385_v7, 0.0  ;;  %v16673_v48 = vld [vmem:[%s21504_s9 + $0x688] sm:$0xff]  }
0x1f6b   :  { %v11388_v55 = vpop.f32.mrf.mxu1  ;;  %v11461_v54 = vpop.f32.mrf.mxu0  ;;  %13160 = vmatmul.mubr.bf16.gmra.mxu1 %v12177_v13  ;;  %13225 = vmatmul.mubr.bf16.gmra.mxu0 %v12179_v39  ;;  %v11859_v57 = vmax.f32 %v11458_v50, 0.0 }
0x1f6c   :  { %v11389_v51 = vadd.f32 %v11388_v55, %v20842_v11  ;;  %v11462_v19 = vadd.f32 %v11461_v54, %v20846_v44  ;;  %15338 = vmatpush3.bf16.msra.mxu1 %v16664_v26  ;;  %v11872_v40 = vmax.f32 %v11387_v41, 0.0  ;;  %v11874_v8 = vmax.f32 %v11460_v37, 0.0  ;;  %15378 = vmatpush3.bf16.msra.mxu0 %v16665_v59  ;;  %v16675_v26 = vld [vmem:[%s21504_s9 + $0x6c0] sm:$0xff]  }
0x1f6d   :  { %v11498_v1 = vpop.f32.mrf.mxu1  ;;  %v11571_v2 = vpop.f32.mrf.mxu0  ;;  %v20958_v11 = vrot.slane %v20951_v46, %v21639_v22  ;;  %v20962_v44 = vrot.slane %v20951_v46, %v21640_v47  ;;  %15339 = vmatprep.subr.bf16.mxu1 %v16666_v23  ;;  %15379 = vmatprep.subr.bf16.mxu0 %v16667_v58  ;;  %v11856_v22 = vmax.f32 %v11383_v32, 0.0  ;;  %v20972_v47 = vrot.slane %v20951_v46, %v21641_v38  ;;  %v16676_v23 = vld [vmem:[%s21504_s9 + $0x600] sm:$0xff]  }
0x1f6e   :  { %v11873_v52 = vmax.f32 %v11389_v51, 0.0  ;;  %v11875_v35 = vmax.f32 %v11462_v19, 0.0  ;;  %v12195_v38 = vpack.c.bf16 %v11874_v8, %v11858_v45  ;;  %v11572_v39 = vadd.f32 %v11571_v2, %v20976_v0  ;;  %v16677_v32 = vld [vmem:[%s21504_s9 + $0x680] sm:$0xff]   ;;  %v16679_v2 = vld [vmem:[%s21504_s9 + $0x7f8] sm:$0xff]  }
0x1f6f   :  { %v11500_v14 = vpop.f32.mrf.mxu1  ;;  %v11573_v21 = vpop.f32.mrf.mxu0  ;;  %v12193_v62 = vpack.c.bf16 %v11872_v40, %v11856_v22  ;;  %v11499_v13 = vadd.f32 %v11498_v1, %v20972_v47 }
0x1f70   :  { %v12194_v6 = vpack.c.bf16 %v11873_v52, %v11857_v28  ;;  %v12196_v36 = vpack.c.bf16 %v11875_v35, %v11859_v57  ;;  %15340 = vmatpush3.bf16.msra.mxu1 %v16668_v33  ;;  %v11501_v27 = vadd.f32 %v11500_v14, %v20958_v11  ;;  %15380 = vmatpush3.bf16.msra.mxu0 %v16669_v63  ;;  %v11766_v40 = vmax.f32 %v11572_v39, 0.0  ;;  %v16680_v28 = vld [vmem:[%s21504_s9 + $0x738] sm:$0xff]   ;;  %v16686_v39 = vld [vmem:[%s21504_s9 + $0x768] sm:$0xff]  }
0x1f71   :  { %v11502_v25 = vpop.f32.mrf.mxu1  ;;  %v11575_v53 = vpop.f32.mrf.mxu0  ;;  %15341 = vmatprep.subr.bf16.mxu1 %v16670_v49  ;;  %v11574_v12 = vadd.f32 %v11573_v21, %v20962_v44  ;;  %15381 = vmatprep.subr.bf16.mxu0 %v16671_v15  ;;  %v11764_v33 = vmax.f32 %v11499_v13, 0.0  ;;  %v16681_v14 = vld [vmem:[%s21504_s9 + $0x7b8] sm:$0xff]   ;;  %v16682_v21 = vld [vmem:[%s21504_s9 + $0x770] sm:$0xff]  }
0x1f72   :  { %v11503_v5 = vadd.f32 %v11502_v25, %v20972_v47  ;;  %v11576_v43 = vadd.f32 %v11575_v53, %v20976_v0  ;;  %13167 = vmatprep.mubr.bf16.mxu1 %v12194_v6  ;;  %13232 = vmatprep.mubr.bf16.mxu0 %v12196_v36  ;;  %v11765_v55 = vmax.f32 %v11501_v27, 0.0  ;;  %v16685_v13 = vld [vmem:[%s21504_s9 + $0x7b0] sm:$0xff]  }
0x1f73   :  { %v11504_v7 = vpop.f32.mrf.mxu1  ;;  %v11577_v3 = vpop.f32.mrf.mxu0  ;;  %13168 = vmatmul.mubr.bf16.gmra.mxu1 %v12193_v62  ;;  %13233 = vmatmul.mubr.bf16.gmra.mxu0 %v12195_v38  ;;  %v11767_v54 = vmax.f32 %v11574_v12, 0.0 }
0x1f74   :  { %v11505_v34 = vadd.f32 %v11504_v7, %v20958_v11  ;;  %v11578_v59 = vadd.f32 %v11577_v3, %v20962_v44  ;;  %15342 = vmatpush3.bf16.msra.mxu1 %v16672_v42  ;;  %v11780_v50 = vmax.f32 %v11503_v5, 0.0  ;;  %v11782_v41 = vmax.f32 %v11576_v43, 0.0  ;;  %15382 = vmatpush3.bf16.msra.mxu0 %v16673_v48  ;;  %v16683_v42 = vld [vmem:[%s21504_s9 + $0x7f0] sm:$0xff]  }
0x1f75   :  { %v11508_v37 = vpop.f32.mrf.mxu1  ;;  %v11581_v58 = vpop.f32.mrf.mxu0  ;;  %15343 = vmatprep.subr.bf16.mxu1 %v16674_v16  ;;  %15383 = vmatprep.subr.bf16.mxu0 %v16675_v26  ;;  %v16684_v16 = vld [vmem:[%s21504_s9 + $0x730] sm:$0xff]  }
0x1f76   :  { %v11781_v51 = vmax.f32 %v11505_v34, 0.0  ;;  %v11783_v19 = vmax.f32 %v11578_v59, 0.0  ;;  %v12149_v57 = vpack.c.bf16 %v11780_v50, %v11764_v33  ;;  %v12151_v52 = vpack.c.bf16 %v11782_v41, %v11766_v40 }
0x1f77   :  { %v11510_v8 = vpop.f32.mrf.mxu1  ;;  %v11583_v1 = vpop.f32.mrf.mxu0  ;;  %v11509_v62 = vadd.f32 %v11508_v37, %v20972_v47  ;;  %v11582_v38 = vadd.f32 %v11581_v58, %v20976_v0  ;;  %v16687_v58 = vld [vmem:[%s21504_s9 + $0x7e8] sm:$0xff]  }
0x1f78   :  { %v12150_v63 = vpack.c.bf16 %v11781_v51, %v11765_v55  ;;  %v12152_v49 = vpack.c.bf16 %v11783_v19, %v11767_v54  ;;  %15344 = vmatpush3.bf16.msra.mxu1 %v16676_v23  ;;  %v11511_v35 = vadd.f32 %v11510_v8, %v20958_v11  ;;  %15384 = vmatpush3.bf16.msra.mxu0 %v16677_v32  ;;  %v16688_v55 = vld [vmem:[%s21504_s9 + $0x728] sm:$0xff]  }
0x1f79   :  { %v11512_v22 = vpop.f32.mrf.mxu1  ;;  %v11585_v45 = vpop.f32.mrf.mxu0  ;;  %15409 = vmatprep.subr.bf16.mxu1 %v16678_v61  ;;  %v11584_v6 = vadd.f32 %v11583_v1, %v20962_v44  ;;  %15449 = vmatprep.subr.bf16.mxu0 %v16679_v2  ;;  %v11796_v23 = vmax.f32 %v11509_v62, 0.0  ;;  %v11798_v50 = vmax.f32 %v11582_v38, 0.0  ;;  %v16689_v8 = vld [vmem:[%s21504_s9 + $0x7a8] sm:$0xff]   ;;  %v16690_v1 = vld [vmem:[%s21504_s9 + $0x760] sm:$0xff]   ;;  %v16694_v38 = vld [vmem:[%s21504_s9 + $0x758] sm:$0xff]  }
0x1f7a   :  { %v11513_v36 = vadd.f32 %v11512_v22, %v20972_v47  ;;  %v11586_v15 = vadd.f32 %v11585_v45, %v20976_v0  ;;  %13273 = vmatprep.mubr.bf16.mxu1 %v12150_v63  ;;  %13338 = vmatprep.mubr.bf16.mxu0 %v12152_v49  ;;  %v11797_v7 = vmax.f32 %v11511_v35, 0.0  ;;  %v16693_v62 = vld [vmem:[%s21504_s9 + $0x7a0] sm:$0xff]  }
0x1f7b   :  { %v11514_v27 = vpop.f32.mrf.mxu1  ;;  %v11587_v25 = vpop.f32.mrf.mxu0  ;;  %13274 = vmatmul.mubr.bf16.vlgmr.msra.gmra.mxu1 %v12149_v57  ;;  %13339 = vmatmul.mubr.bf16.vlgmr.msra.gmra.mxu0 %v12151_v52  ;;  %v11799_v3 = vmax.f32 %v11584_v6, 0.0 }
0x1f7c   :  { %v11515_v53 = vadd.f32 %v11514_v27, %v20958_v11  ;;  %v11588_v48 = vadd.f32 %v11587_v25, %v20962_v44  ;;  %15410 = vmatpush3.bf16.msra.mxu1 %v16680_v28  ;;  %v11812_v12 = vmax.f32 %v11513_v36, 0.0  ;;  %v11814_v5 = vmax.f32 %v11586_v15, 0.0  ;;  %15450 = vmatpush3.bf16.msra.mxu0 %v16681_v14  ;;  %v16691_v28 = vld [vmem:[%s21504_s9 + $0x7e0] sm:$0xff]  }
0x1f7d   :  { %v11518_v43 = vpop.f32.mrf.mxu1  ;;  %v11591_v26 = vpop.f32.mrf.mxu0  ;;  %15411 = vmatprep.subr.bf16.mxu1 %v16682_v21  ;;  %15451 = vmatprep.subr.bf16.mxu0 %v16683_v42  ;;  %v16692_v21 = vld [vmem:[%s21504_s9 + $0x720] sm:$0xff]  }
0x1f7e   :  { %v11813_v34 = vmax.f32 %v11515_v53, 0.0  ;;  %v11815_v59 = vmax.f32 %v11588_v48, 0.0  ;;  %v12165_v54 = vpack.c.bf16 %v11812_v12, %v11796_v23  ;;  %v12167_v51 = vpack.c.bf16 %v11814_v5, %v11798_v50 }
0x1f7f   :  { %v11520_v41 = vpop.f32.mrf.mxu1  ;;  %v11593_v37 = vpop.f32.mrf.mxu0  ;;  %v11519_v57 = vadd.f32 %v11518_v43, %v20972_v47  ;;  %v11592_v52 = vadd.f32 %v11591_v26, %v20976_v0  ;;  %v16695_v26 = vld [vmem:[%s21504_s9 + $0x7d8] sm:$0xff]  }
0x1f80   :  { %v12166_v32 = vpack.c.bf16 %v11813_v34, %v11797_v7  ;;  %v12168_v61 = vpack.c.bf16 %v11815_v59, %v11799_v3  ;;  %15412 = vmatpush3.bf16.msra.mxu1 %v16684_v16  ;;  %v11521_v19 = vadd.f32 %v11520_v41, %v20958_v11  ;;  %15452 = vmatpush3.bf16.msra.mxu0 %v16685_v13  ;;  %v16696_v7 = vld [vmem:[%s21504_s9 + $0x718] sm:$0xff]  }
0x1f81   :  { %v11522_v33 = vpop.f32.mrf.mxu1  ;;  %v11595_v40 = vpop.f32.mrf.mxu0  ;;  %15413 = vmatprep.subr.bf16.mxu1 %v16686_v39  ;;  %v11594_v2 = vadd.f32 %v11593_v37, %v20962_v44  ;;  %15453 = vmatprep.subr.bf16.mxu0 %v16687_v58  ;;  %v11828_v16 = vmax.f32 %v11519_v57, 0.0  ;;  %v11830_v12 = vmax.f32 %v11592_v52, 0.0  ;;  %v16697_v41 = vld [vmem:[%s21504_s9 + $0x798] sm:$0xff]   ;;  %v16698_v37 = vld [vmem:[%s21504_s9 + $0x750] sm:$0xff]  }
0x1f82   :  { %v11523_v63 = vadd.f32 %v11522_v33, %v20972_v47  ;;  %v11596_v49 = vadd.f32 %v11595_v40, %v20976_v0  ;;  %13281 = vmatprep.mubr.bf16.mxu1 %v12166_v32  ;;  %13346 = vmatprep.mubr.bf16.mxu0 %v12168_v61  ;;  %v11829_v27 = vmax.f32 %v11521_v19, 0.0 }
0x1f83   :  { %v11524_v35 = vpop.f32.mrf.mxu1  ;;  %v11597_v22 = vpop.f32.mrf.mxu0  ;;  %13282 = vmatmul.mubr.bf16.gmra.mxu1 %v12165_v54  ;;  %13347 = vmatmul.mubr.bf16.gmra.mxu0 %v12167_v51  ;;  %v11831_v25 = vmax.f32 %v11594_v2, 0.0 }
0x1f84   :  { %v11525_v45 = vadd.f32 %v11524_v35, %v20958_v11  ;;  %v11598_v14 = vadd.f32 %v11597_v22, %v20962_v44  ;;  %15414 = vmatpush3.bf16.msra.mxu1 %v16688_v55  ;;  %v11844_v6 = vmax.f32 %v11523_v63, 0.0  ;;  %v11846_v36 = vmax.f32 %v11596_v49, 0.0  ;;  %15454 = vmatpush3.bf16.msra.mxu0 %v16689_v8  ;;  %v16699_v55 = vld [vmem:[%s21504_s9 + $0x7d0] sm:$0xff]  }
0x1f85   :  { %v11528_v15 = vpop.f32.mrf.mxu1  ;;  %v11601_v42 = vpop.f32.mrf.mxu0  ;;  %15415 = vmatprep.subr.bf16.mxu1 %v16690_v1  ;;  %15455 = vmatprep.subr.bf16.mxu0 %v16691_v28  ;;  %v16700_v1 = vld [vmem:[%s21504_s9 + $0x710] sm:$0xff]   ;;  %v16702_v28 = vld [vmem:[%s21504_s9 + $0x748] sm:$0xff]  }
0x1f86   :  { %v11845_v53 = vmax.f32 %v11525_v45, 0.0  ;;  %v11847_v48 = vmax.f32 %v11598_v14, 0.0  ;;  %v12181_v3 = vpack.c.bf16 %v11844_v6, %v11828_v16  ;;  %v12183_v34 = vpack.c.bf16 %v11846_v36, %v11830_v12  ;;  %v16703_v36 = vld [vmem:[%s21504_s9 + $0x7c8] sm:$0xff]  }
0x1f87   :  { %v11530_v5 = vpop.f32.mrf.mxu1  ;;  %v11603_v43 = vpop.f32.mrf.mxu0  ;;  %v11529_v54 = vadd.f32 %v11528_v15, %v20972_v47  ;;  %v11602_v51 = vadd.f32 %v11601_v42, %v20976_v0  ;;  %v21120_v14 = vrot.slane %v20951_v46, %v21646_v10 }
0x1f88   :  { %v12182_v13 = vpack.c.bf16 %v11845_v53, %v11829_v27  ;;  %v12184_v39 = vpack.c.bf16 %v11847_v48, %v11831_v25  ;;  %15416 = vmatpush3.bf16.msra.mxu1 %v16692_v21  ;;  %v11531_v59 = vadd.f32 %v11530_v5, %v20958_v11  ;;  %15456 = vmatpush3.bf16.msra.mxu0 %v16693_v62  ;;  %v16704_v62 = vld [vmem:[%s21504_s9 + $0x708] sm:$0xff]   ;;  %v16706_v53 = vld [vmem:[%s21504_s9 + $0x740] sm:$0xff]  }
0x1f89   :  { %v11532_v23 = vpop.f32.mrf.mxu1  ;;  %v11605_v50 = vpop.f32.mrf.mxu0  ;;  %15417 = vmatprep.subr.bf16.mxu1 %v16694_v38  ;;  %v11604_v58 = vadd.f32 %v11603_v43, %v20962_v44  ;;  %15457 = vmatprep.subr.bf16.mxu0 %v16695_v26  ;;  %v11862_v45 = vmax.f32 %v11602_v51, 0.0  ;;  %v16705_v25 = vld [vmem:[%s21504_s9 + $0x788] sm:$0xff]   ;;  %v16707_v5 = vld [vmem:[%s21504_s9 + $0x7c0] sm:$0xff]  }
0x1f8a   :  { %v11533_v32 = vadd.f32 %v11532_v23, %v20972_v47  ;;  %v11606_v61 = vadd.f32 %v11605_v50, %v20976_v0  ;;  %13289 = vmatprep.mubr.bf16.mxu1 %v12182_v13  ;;  %13354 = vmatprep.mubr.bf16.mxu0 %v12184_v39  ;;  %v21102_v0 = vrot.slane %v20951_v46, %v21643_v24  ;;  %v11861_v57 = vmax.f32 %v11531_v59, 0.0 }
0x1f8b   :  { %v11534_v19 = vpop.f32.mrf.mxu1  ;;  %v11607_v33 = vpop.f32.mrf.mxu0  ;;  %13290 = vmatmul.mubr.bf16.gmra.mxu1 %v12181_v3  ;;  %13355 = vmatmul.mubr.bf16.gmra.mxu0 %v12183_v34  ;;  %v11863_v52 = vmax.f32 %v11604_v58, 0.0  ;;  %v11860_v24 = vmax.f32 %v11529_v54, 0.0  ;;  %v16708_v34 = vld [vmem:[%s21504_s9 + $0x700] sm:$0xff]  }
0x1f8c   :  { %v11535_v40 = vadd.f32 %v11534_v19, %v20958_v11  ;;  %v11608_v8 = vadd.f32 %v11607_v33, %v20962_v44  ;;  %15418 = vmatpush3.bf16.msra.mxu1 %v16696_v7  ;;  %v11876_v2 = vmax.f32 %v11533_v32, 0.0  ;;  %v11878_v63 = vmax.f32 %v11606_v61, 0.0  ;;  %15458 = vmatpush3.bf16.msra.mxu0 %v16697_v41  ;;  %v16701_v44 = vld [vmem:[%s21504_s9 + $0x790] sm:$0xff]  }
0x1f8d   :  { %v11644_v47 = vpop.f32.mrf.mxu1  ;;  %v11717_v49 = vpop.f32.mrf.mxu0  ;;  %v21106_v11 = vrot.slane %v20951_v46, %v21644_v20  ;;  %15419 = vmatprep.subr.bf16.mxu1 %v16698_v37  ;;  %15459 = vmatprep.subr.bf16.mxu0 %v16699_v55  ;;  %v21116_v20 = vrot.slane %v20951_v46, %v21645_v60  ;;  %v16709_v37 = vld [vmem:[%s21504_s9 + $0x780] sm:$0xff]  }
0x1f8e   :  { %v11877_v35 = vmax.f32 %v11535_v40, 0.0  ;;  %v11879_v22 = vmax.f32 %v11608_v8, 0.0  ;;  %v12197_v38 = vpack.c.bf16 %v11876_v2, %v11860_v24  ;;  %v12199_v60 = vpack.c.bf16 %v11878_v63, %v11862_v45 }
0x1f8f   :  { %v11646_v21 = vpop.f32.mrf.mxu1  ;;  %v11719_v6 = vpop.f32.mrf.mxu0  ;;  %v11645_v43 = vadd.f32 %v11644_v47, %v21116_v20  ;;  %v11718_v26 = vadd.f32 %v11717_v49, %v21120_v14 }
0x1f90   :  { %v12198_v15 = vpack.c.bf16 %v11877_v35, %v11861_v57  ;;  %v12200_v42 = vpack.c.bf16 %v11879_v22, %v11863_v52  ;;  %15420 = vmatpush3.bf16.msra.mxu1 %v16700_v1  ;;  %v11647_v27 = vadd.f32 %v11646_v21, %v21102_v0  ;;  %15460 = vmatpush3.bf16.msra.mxu0 %v16701_v44 }
0x1f91   :  { %v11648_v10 = vpop.f32.mrf.mxu1  ;;  %v11721_v46 = vpop.f32.mrf.mxu0  ;;  %15421 = vmatprep.subr.bf16.mxu1 %v16702_v28  ;;  %v11720_v48 = vadd.f32 %v11719_v6, %v21106_v11  ;;  %15461 = vmatprep.subr.bf16.mxu0 %v16703_v36  ;;  %v11768_v54 = vmax.f32 %v11645_v43, 0.0  ;;  %v11770_v51 = vmax.f32 %v11718_v26, 0.0 }
0x1f92   :  { %v11649_v16 = vadd.f32 %v11648_v10, %v21116_v20  ;;  %v11722_v12 = vadd.f32 %v11721_v46, %v21120_v14  ;;  %13297 = vmatprep.mubr.bf16.mxu1 %v12198_v15  ;;  %13362 = vmatprep.mubr.bf16.mxu0 %v12200_v42  ;;  %v11769_v58 = vmax.f32 %v11647_v27, 0.0 }
0x1f93   :  { %v11650_v13 = vpop.f32.mrf.mxu1  ;;  %v11723_v39 = vpop.f32.mrf.mxu0  ;;  %13298 = vmatmul.mubr.bf16.gmra.mxu1 %v12197_v38  ;;  %13363 = vmatmul.mubr.bf16.gmra.mxu0 %v12199_v60  ;;  %v11771_v32 = vmax.f32 %v11720_v48, 0.0 }
0x1f94   :  { %v11651_v7 = vadd.f32 %v11650_v13, %v21102_v0  ;;  %v11724_v3 = vadd.f32 %v11723_v39, %v21106_v11  ;;  %15422 = vmatpush3.bf16.msra.mxu1 %v16704_v62  ;;  %v11784_v59 = vmax.f32 %v11649_v16, 0.0  ;;  %v11786_v23 = vmax.f32 %v11722_v12, 0.0  ;;  %15462 = vmatpush3.bf16.msra.mxu0 %v16705_v25 }
0x1f95   :  { %v11654_v50 = vpop.f32.mrf.mxu1  ;;  %v11727_v41 = vpop.f32.mrf.mxu0  ;;  %15423 = vmatprep.subr.bf16.mxu1 %v16706_v53  ;;  %15463 = vmatprep.subr.bf16.mxu0 %v16707_v5 }
0x1f96   :  { %v11785_v61 = vmax.f32 %v11651_v7, 0.0  ;;  %v11787_v55 = vmax.f32 %v11724_v3, 0.0  ;;  %v12153_v1 = vpack.c.bf16 %v11784_v59, %v11768_v54  ;;  %v12155_v2 = vpack.c.bf16 %v11786_v23, %v11770_v51 }
0x1f97   :  { %v11656_v19 = vpop.f32.mrf.mxu1  ;;  %v11729_v33 = vpop.f32.mrf.mxu0  ;;  %v11655_v52 = vadd.f32 %v11654_v50, %v21116_v20  ;;  %v11728_v35 = vadd.f32 %v11727_v41, %v21120_v14 }
0x1f98   :  { %v12154_v40 = vpack.c.bf16 %v11785_v61, %v11769_v58  ;;  %v12156_v8 = vpack.c.bf16 %v11787_v55, %v11771_v32  ;;  %15424 = vmatpush3.bf16.msra.mxu1 %v16708_v34  ;;  %v11657_v63 = vadd.f32 %v11656_v19, %v21102_v0  ;;  %15464 = vmatpush3.bf16.msra.mxu0 %v16709_v37 }
0x1f99   :  { %v11658_v47 = vpop.f32.mrf.mxu1  ;;  %v11731_v49 = vpop.f32.mrf.mxu0  ;;  %v11730_v44 = vadd.f32 %v11729_v33, %v21106_v11  ;;  %v11800_v10 = vmax.f32 %v11655_v52, 0.0  ;;  %v11802_v46 = vmax.f32 %v11728_v35, 0.0 }
0x1f9a   :  { %v11659_v28 = vadd.f32 %v11658_v47, %v21116_v20  ;;  %v11732_v57 = vadd.f32 %v11731_v49, %v21120_v14  ;;  %13403 = vmatprep.mubr.bf16.mxu1 %v12154_v40  ;;  %13468 = vmatprep.mubr.bf16.mxu0 %v12156_v8  ;;  %v11801_v62 = vmax.f32 %v11657_v63, 0.0 }
0x1f9b   :  { %v11660_v22 = vpop.f32.mrf.mxu1  ;;  %v11733_v24 = vpop.f32.mrf.mxu0  ;;  %13404 = vmatmul.mubr.bf16.vlgmr.msra.gmra.mxu1 %v12153_v1  ;;  %13469 = vmatmul.mubr.bf16.vlgmr.msra.gmra.mxu0 %v12155_v2  ;;  %v11803_v38 = vmax.f32 %v11730_v44, 0.0 }
0x1f9c   :  { %v11661_v45 = vadd.f32 %v11660_v22, %v21102_v0  ;;  %v11734_v21 = vadd.f32 %v11733_v24, %v21106_v11  ;;  %v11816_v6 = vmax.f32 %v11659_v28, 0.0  ;;  %v11818_v36 = vmax.f32 %v11732_v57, 0.0 }
0x1f9d   :  { %v11664_v15 = vpop.f32.mrf.mxu1  ;;  %v11737_v42 = vpop.f32.mrf.mxu0 }
0x1f9e   :  { %v11817_v60 = vmax.f32 %v11661_v45, 0.0  ;;  %v11819_v27 = vmax.f32 %v11734_v21, 0.0  ;;  %v12169_v12 = vpack.c.bf16 %v11816_v6, %v11800_v10  ;;  %v12171_v5 = vpack.c.bf16 %v11818_v36, %v11802_v46 }
0x1f9f   :  { %v11666_v25 = vpop.f32.mrf.mxu1  ;;  %v11739_v53 = vpop.f32.mrf.mxu0  ;;  %v11665_v34 = vadd.f32 %v11664_v15, %v21116_v20  ;;  %v11738_v59 = vadd.f32 %v11737_v42, %v21120_v14 }
0x1fa0   :  { %v12170_v48 = vpack.c.bf16 %v11817_v60, %v11801_v62  ;;  %v12172_v16 = vpack.c.bf16 %v11819_v27, %v11803_v38  ;;  %v11667_v43 = vadd.f32 %v11666_v25, %v21102_v0  ;;  %v11740_v39 = vadd.f32 %v11739_v53, %v21106_v11 }
0x1fa1   :  { %v11668_v26 = vpop.f32.mrf.mxu1  ;;  %v11741_v13 = vpop.f32.mrf.mxu0  ;;  %v11832_v40 = vmax.f32 %v11665_v34, 0.0  ;;  %v11834_v8 = vmax.f32 %v11738_v59, 0.0 }
0x1fa2   :  { %v11669_v7 = vadd.f32 %v11668_v26, %v21116_v20  ;;  %v11742_v3 = vadd.f32 %v11741_v13, %v21120_v14  ;;  %13411 = vmatprep.mubr.bf16.mxu1 %v12170_v48  ;;  %13476 = vmatprep.mubr.bf16.mxu0 %v12172_v16  ;;  %v11833_v54 = vmax.f32 %v11667_v43, 0.0  ;;  %v11835_v51 = vmax.f32 %v11740_v39, 0.0 }
0x1fa3   :  { %v11670_v23 = vpop.f32.mrf.mxu1  ;;  %v11743_v50 = vpop.f32.mrf.mxu0  ;;  %13412 = vmatmul.mubr.bf16.gmra.mxu1 %v12169_v12  ;;  %13477 = vmatmul.mubr.bf16.gmra.mxu0 %v12171_v5 }
0x1fa4   :  { %v11671_v41 = vadd.f32 %v11670_v23, %v21102_v0  ;;  %v11744_v37 = vadd.f32 %v11743_v50, %v21106_v11  ;;  %v11848_v58 = vmax.f32 %v11669_v7, 0.0  ;;  %v11850_v32 = vmax.f32 %v11742_v3, 0.0 }
0x1fa5   :  { %v11674_v61 = vpop.f32.mrf.mxu1  ;;  %v11747_v55 = vpop.f32.mrf.mxu0 }
0x1fa6   :  { %v11849_v19 = vmax.f32 %v11671_v41, 0.0  ;;  %v11851_v33 = vmax.f32 %v11744_v37, 0.0  ;;  %v12185_v49 = vpack.c.bf16 %v11848_v58, %v11832_v40  ;;  %v12187_v44 = vpack.c.bf16 %v11850_v32, %v11834_v8 }
0x1fa7   :  { %v11676_v1 = vpop.f32.mrf.mxu1  ;;  %v11749_v2 = vpop.f32.mrf.mxu0  ;;  %v11675_v45 = vadd.f32 %v11674_v61, %v21116_v20  ;;  %v11748_v36 = vadd.f32 %v11747_v55, %v21120_v14 }
0x1fa8   :  { %v12186_v63 = vpack.c.bf16 %v11849_v19, %v11833_v54  ;;  %v12188_v47 = vpack.c.bf16 %v11851_v33, %v11835_v51  ;;  %v11677_v28 = vadd.f32 %v11676_v1, %v21102_v0  ;;  %v11750_v35 = vadd.f32 %v11749_v2, %v21106_v11 }
0x1fa9   :  { %v11678_v57 = vpop.f32.mrf.mxu1  ;;  %v11751_v52 = vpop.f32.mrf.mxu0  ;;  %v11864_v25 = vmax.f32 %v11675_v45, 0.0  ;;  %v11866_v53 = vmax.f32 %v11748_v36, 0.0 }
0x1faa   :  { %v11679_v22 = vadd.f32 %v11678_v57, %v21116_v20  ;;  %v11752_v24 = vadd.f32 %v11751_v52, %v21120_v14  ;;  %13419 = vmatprep.mubr.bf16.mxu1 %v12186_v63  ;;  %13484 = vmatprep.mubr.bf16.mxu0 %v12188_v47  ;;  %v11865_v62 = vmax.f32 %v11677_v28, 0.0  ;;  %v11867_v60 = vmax.f32 %v11750_v35, 0.0 }
0x1fab   :  { %v11680_v21 = vpop.f32.mrf.mxu1  ;;  %v11753_v6 = vpop.f32.mrf.mxu0  ;;  %13420 = vmatmul.mubr.bf16.gmra.mxu1 %v12185_v49  ;;  %13485 = vmatmul.mubr.bf16.gmra.mxu0 %v12187_v44 }
0x1fac   :  { %v11681_v15 = vadd.f32 %v11680_v21, %v21102_v0  ;;  %v11754_v42 = vadd.f32 %v11753_v6, %v21106_v11  ;;  %v11880_v38 = vmax.f32 %v11679_v22, 0.0  ;;  %v11882_v27 = vmax.f32 %v11752_v24, 0.0  ;;  %v21178_v11 = vld [vmem:[%s21506_s10 + $0x1] ss:$0 sm:$0xff] }
0x1fae   :  { %v11881_v10 = vmax.f32 %v11681_v15, 0.0  ;;  %v11883_v46 = vmax.f32 %v11754_v42, 0.0  ;;  %v12201_v16 = vpack.c.bf16 %v11880_v38, %v11864_v25  ;;  %v12203_v12 = vpack.c.bf16 %v11882_v27, %v11866_v53 }
0x1fb0   :  { %v12202_v48 = vpack.c.bf16 %v11881_v10, %v11865_v62  ;;  %v12204_v20 = vpack.c.bf16 %v11883_v46, %v11867_v60 }
0x1fb2   :  { %13427 = vmatprep.mubr.bf16.mxu1 %v12202_v48  ;;  %13492 = vmatprep.mubr.bf16.mxu0 %v12204_v20 }
0x1fb3   :  { %13428 = vmatmul.mubr.bf16.gmra.mxu1 %v12201_v16  ;;  %13493 = vmatmul.mubr.bf16.gmra.mxu0 %v12203_v12 }
0x1fce   :  { %v15185_v0 = vpop.f32.mrf.mxu1  ;;  %v15225_v14 = vpop.f32.mrf.mxu0 }
0x1fd0   :  { %v15186_v5 = vpop.f32.mrf.mxu1  ;;  %v15226_v43 = vpop.f32.mrf.mxu0 }
0x1fd1   :  { %v15187_v26 = vadd.f32 %v15186_v5, %v15185_v0  ;;  %v15227_v13 = vadd.f32 %v15226_v43, %v15225_v14 }
0x1fd2   :  { %v15188_v39 = vpop.f32.mrf.mxu1  ;;  %v15228_v7 = vpop.f32.mrf.mxu0 }
0x1fd3   :  { %v13016_v3 = vadd.f32 %v15187_v26, %v21178_v11 }
0x1fd4   :  { %v15189_v34 = vpop.f32.mrf.mxu1  ;;  %v15229_v59 = vpop.f32.mrf.mxu0 }
0x1fd5   :  { %v21181_v23 = vadd.f32 %v15227_v13, %v13016_v3  ;;  %v15190_v50 = vadd.f32 %v15189_v34, %v15188_v39  ;;  %v15230_v41 = vadd.f32 %v15229_v59, %v15228_v7 }
0x1fd6   :  { %v15191_v37 = vpop.f32.mrf.mxu1  ;;  %v15231_v58 = vpop.f32.mrf.mxu0 }
0x1fd7   :  { %v13019_v32 = vadd.f32 %v15190_v50, %v21178_v11 }
0x1fd8   :  { %v15192_v61 = vpop.f32.mrf.mxu1  ;;  %v15232_v55 = vpop.f32.mrf.mxu0 }
0x1fd9   :  { %v21184_v54 = vadd.f32 %v15230_v41, %v13019_v32  ;;  %v15193_v51 = vadd.f32 %v15192_v61, %v15191_v37  ;;  %v15233_v19 = vadd.f32 %v15232_v55, %v15231_v58 }
0x1fda   :  { %v15194_v33 = vpop.f32.mrf.mxu1  ;;  %v15234_v40 = vpop.f32.mrf.mxu0 }
0x1fdb   :  { %v13024_v8 = vadd.f32 %v15193_v51, %v21178_v11 }
0x1fdc   :  { %v15195_v1 = vpop.f32.mrf.mxu1  ;;  %v15235_v2 = vpop.f32.mrf.mxu0 }
0x1fdd   :  { %v21187_v63 = vadd.f32 %v15233_v19, %v13024_v8  ;;  %v15196_v47 = vadd.f32 %v15195_v1, %v15194_v33  ;;  %v15236_v49 = vadd.f32 %v15235_v2, %v15234_v40 }
0x1fdf   :  { %v13027_v44 = vadd.f32 %v15196_v47, %v21178_v11 }
0x1fe1   :  { %v21190_v28 = vadd.f32 %v15236_v49, %v13027_v44 }
0x200b   :  { %v15197_v57 = vpop.f32.mrf.mxu1  ;;  %v15237_v52 = vpop.f32.mrf.mxu0 }
0x200d   :  { %v15198_v35 = vpop.f32.mrf.mxu1  ;;  %v15238_v22 = vpop.f32.mrf.mxu0 }
0x200e   :  { %v15199_v24 = vadd.f32 %v15198_v35, %v15197_v57  ;;  %v15239_v45 = vadd.f32 %v15238_v22, %v15237_v52 }
0x200f   :  { %v15200_v21 = vpop.f32.mrf.mxu1  ;;  %v15240_v6 = vpop.f32.mrf.mxu0 }
0x2010   :  { %v13032_v36 = vadd.f32 %v15199_v24, %v21178_v11 }
0x2011   :  { %v15201_v15 = vpop.f32.mrf.mxu1  ;;  %v15241_v42 = vpop.f32.mrf.mxu0 }
0x2012   :  { %v21193_v62 = vadd.f32 %v15239_v45, %v13032_v36  ;;  %v15202_v38 = vadd.f32 %v15201_v15, %v15200_v21  ;;  %v15242_v60 = vadd.f32 %v15241_v42, %v15240_v6 }
0x2013   :  { %v15203_v27 = vpop.f32.mrf.mxu1  ;;  %v15243_v10 = vpop.f32.mrf.mxu0 }
0x2014   :  { %v13035_v46 = vadd.f32 %v15202_v38, %v21178_v11 }
0x2015   :  { %v15204_v25 = vpop.f32.mrf.mxu1  ;;  %v15244_v53 = vpop.f32.mrf.mxu0 }
0x2016   :  { %v21196_v48 = vadd.f32 %v15242_v60, %v13035_v46  ;;  %v15205_v20 = vadd.f32 %v15204_v25, %v15203_v27  ;;  %v15245_v16 = vadd.f32 %v15244_v53, %v15243_v10 }
0x2017   :  { %v15206_v12 = vpop.f32.mrf.mxu1  ;;  %v15246_v0 = vpop.f32.mrf.mxu0 }
0x2018   :  { %v13040_v14 = vadd.f32 %v15205_v20, %v21178_v11 }
0x2019   :  { %v15207_v5 = vpop.f32.mrf.mxu1  ;;  %v15247_v43 = vpop.f32.mrf.mxu0 }
0x201a   :  { %v21199_v26 = vadd.f32 %v15245_v16, %v13040_v14  ;;  %v15208_v13 = vadd.f32 %v15207_v5, %v15206_v12  ;;  %v15248_v39 = vadd.f32 %v15247_v43, %v15246_v0 }
0x201b   :  { %v15265_v7 = vpop.f32.mrf.mxu1  ;;  %v21201_v3 = vpop.f32.mrf.mxu0 }
0x201c   :  { %21647 = vst [vmem:[#allocation26_spill] sm:$0xff] %v21199_v26  ;;  %v13043_v34 = vadd.f32 %v15208_v13, %v21178_v11 }
0x201d   :  { %v15266_v59 = vpop.f32.mrf.mxu1  ;;  %v15306_v50 = vpop.f32.mrf.mxu0 }
0x201e   :  { %v21204_v41 = vadd.f32 %v15248_v39, %v13043_v34 }
0x201f   :  { %v15268_v37 = vpop.f32.mrf.mxu1  ;;  %v21206_v58 = vpop.f32.mrf.mxu0 }
0x2020   :  { %21648 = vst [vmem:[#allocation4_spill] sm:$0xff] %v21204_v41 }
0x2021   :  { %v15269_v32 = vpop.f32.mrf.mxu1  ;;  %v21208_v61 = vpop.f32.mrf.mxu0 }
0x2023   :  { %v15271_v55 = vpop.f32.mrf.mxu1  ;;  %v21210_v51 = vpop.f32.mrf.mxu0 }
0x2025   :  { %v15272_v19 = vpop.f32.mrf.mxu1  ;;  %v21212_v33 = vpop.f32.mrf.mxu0 }
0x2027   :  { %v21214_v40 = vpop.f32.mrf.mxu1  ;;  %v21216_v8 = vpop.f32.mrf.mxu0 }
0x2029   :  { %v15275_v11 = vpop.f32.mrf.mxu1  ;;  %v21218_v1 = vpop.f32.mrf.mxu0 }
0x202b   :  { %v21220_v2 = vpop.f32.mrf.mxu1  ;;  %v21222_v47 = vpop.f32.mrf.mxu0 }
0x202d   :  { %v21224_v49 = vpop.f32.mrf.mxu1  ;;  %v21226_v44 = vpop.f32.mrf.mxu0 }
0x202f   :  { %v21228_v57 = vpop.f32.mrf.mxu1  ;;  %v21230_v52 = vpop.f32.mrf.mxu0 }
0x2031   :  { %v21232_v35 = vpop.f32.mrf.mxu1  ;;  %v21234_v22 = vpop.f32.mrf.mxu0 }
0x2033   :  { %v21236_v24 = vpop.f32.mrf.mxu1  ;;  %v21238_v45 = vpop.f32.mrf.mxu0 }
0x2034   :  { %21649 = vst [vmem:[#allocation19_spill] sm:$0xff] %v21238_v45 }
0x2035   :  { %v21240_v21 = vpop.f32.mrf.mxu1  ;;  %v21242_v6 = vpop.f32.mrf.mxu0 }
0x2036   :  { %21650 = vst [vmem:[#allocation20_spill] sm:$0xff] %v21242_v6 }
0x2037   :  { %v21244_v36 = vpop.f32.mrf.mxu1  ;;  %v21246_v15 = vpop.f32.mrf.mxu0 }
0x2038   :  { %21651 = vst [vmem:[#allocation31_spill] sm:$0xff] %v21244_v36  ;;  %21652 = vst [vmem:[#allocation28_spill] sm:$0xff] %v21246_v15  ;;  %v15267_v15 = vadd.f32 %v15266_v59, %v15265_v7  ;;  %v15273_v7 = vadd.f32 %v15272_v19, %v15271_v55 }
0x2039   :  { %v21248_v42 = vpop.f32.mrf.mxu1  ;;  %v21250_v38 = vpop.f32.mrf.mxu0 }
0x203a   :  { %21653 = vst [vmem:[#allocation30_spill] sm:$0xff] %v21248_v42  ;;  %21654 = vst [vmem:[#allocation18_spill] sm:$0xff] %v21250_v38  ;;  %v13146_v29 = vadd.f32 %v15267_v15, %v21181_v23  ;;  %v15270_v42 = vadd.f32 %v15269_v32, %v15268_v37  ;;  %v15310_v23 = vadd.f32 %v21208_v61, %v21206_v58 }
0x203b   :  { %v15345_v60 = vpop.f32.mrf.mxu1  ;;  %v15385_v27 = vpop.f32.mrf.mxu0 }
0x203d   :  { %v15346_v10 = vpop.f32.mrf.mxu1  ;;  %v15386_v46 = vpop.f32.mrf.mxu0 }
0x203e   :  { %v15347_v26 = vadd.f32 %v15346_v10, %v15345_v60 }
0x203f   :  { %v15348_v25 = vpop.f32.mrf.mxu1  ;;  %v15388_v53 = vpop.f32.mrf.mxu0 }
0x2041   :  { %v15349_v20 = vpop.f32.mrf.mxu1  ;;  %v15389_v16 = vpop.f32.mrf.mxu0 }
0x2042   :  { %v15350_v32 = vadd.f32 %v15349_v20, %v15348_v25 }
0x2043   :  { %v15351_v12 = vpop.f32.mrf.mxu1  ;;  %v21252_v0 = vpop.f32.mrf.mxu0 }
0x2045   :  { %v15352_v14 = vpop.f32.mrf.mxu1  ;;  %v21254_v5 = vpop.f32.mrf.mxu0 }
0x2047   :  { %v15354_v43 = vpop.f32.mrf.mxu1  ;;  %v21256_v13 = vpop.f32.mrf.mxu0 }
0x2049   :  { %v15355_v39 = vpop.f32.mrf.mxu1  ;;  %v21258_v34 = vpop.f32.mrf.mxu0 }
0x204b   :  { %v21260_v4 = vpop.f32.mrf.mxu1  ;;  %v21262_v18 = vpop.f32.mrf.mxu0 }
0x204c   :  { %21655 = vst [vmem:[#allocation3_spill] sm:$0xff] %v21262_v18 }
0x204d   :  { %v21264_v56 = vpop.f32.mrf.mxu1  ;;  %v21266_v17 = vpop.f32.mrf.mxu0 }
0x204e   :  { %21656 = vst [vmem:[#allocation22_spill] sm:$0xff] %v21266_v17  ;;  %v15307_v17 = vadd.f32 %v15306_v50, %v21201_v3  ;;  %v13154_v3 = vadd.f32 %v15273_v7, %v21187_v63  ;;  %v15276_v50 = vadd.f32 %v15275_v11, %v21214_v40  ;;  %v15279_v63 = vadd.f32 %v21224_v49, %v21220_v2 }
0x204f   :  { %v21268_v38 = vpop.f32.mrf.mxu1  ;;  %v21270_v31 = vpop.f32.mrf.mxu0  ;;  %v15390_v40 = vadd.f32 %v15389_v16, %v15388_v53  ;;  %v15393_v2 = vadd.f32 %v21254_v5, %v21252_v0 }
0x2050   :  { %21657 = vst [vmem:[#allocation24_spill] sm:$0xff] %v21268_v38  ;;  %21658 = vst [vmem:[#allocation5_spill] sm:$0xff] %v21270_v31  ;;  %v13211_v31 = vadd.f32 %v15307_v17, %v13146_v29  ;;  %v15387_v29 = vadd.f32 %v15386_v46, %v15385_v27  ;;  %v13157_v61 = vadd.f32 %v15276_v50, %v21190_v28 }
0x2051   :  { %v21272_v41 = vpop.f32.mrf.mxu1  ;;  %v21274_v6 = vpop.f32.mrf.mxu0  ;;  %v15356_v46 = vadd.f32 %v15355_v39, %v15354_v43  ;;  %v15282_v28 = vadd.f32 %v21232_v35, %v21228_v57  ;;  %v13162_v53 = vadd.f32 %v15279_v63, %v21193_v62  ;;  %v15359_v57 = vadd.f32 %v21264_v56, %v21260_v4 }
0x2052   :  { %21659 = vst [vmem:[#allocation32_spill] sm:$0xff] %v21272_v41  ;;  %21660 = vst [vmem:[#allocation6_spill] sm:$0xff] %v21274_v6  ;;  %v13149_v6 = vadd.f32 %v15270_v42, %v21184_v54  ;;  %v13276_v37 = vadd.f32 %v15347_v26, %v13211_v31  ;;  %v15313_v54 = vadd.f32 %v21212_v33, %v21210_v51 }
0x2053   :  { %v21276_v45 = vpop.f32.mrf.mxu1  ;;  %v21279_v36 = vpop.f32.mrf.mxu0  ;;  %v15353_v42 = vadd.f32 %v15352_v14, %v15351_v12  ;;  %v15316_v51 = vadd.f32 %v21218_v1, %v21216_v8  ;;  %v13165_v50 = vadd.f32 %v15282_v28, %v21196_v48 }
0x2054   :  { %21661 = vst [vmem:[#allocation8_spill] sm:$0xff] %v21276_v45  ;;  %v13214_v19 = vadd.f32 %v15310_v23, %v13149_v6  ;;  %v13341_v10 = vadd.f32 %v15387_v29, %v13276_v37  ;;  %v13219_v26 = vadd.f32 %v15313_v54, %v13154_v3 }
0x2055   :  { %v21281_v18 = vpop.f32.mrf.mxu1  ;;  %v21284_v38 = vpop.f32.mrf.mxu0  ;;  %v13222_v37 = vadd.f32 %v15316_v51, %v13157_v61 }
0x2056   :  { %v13284_v33 = vadd.f32 %v15353_v42, %v13219_v26  ;;  %v21665_v26 = vld [vmem:[#allocation26_spill] sm:$0xff] }
0x2057   :  { %v21286_v59 = vpop.f32.mrf.mxu1  ;;  %v21289_v41 = vpop.f32.mrf.mxu0  ;;  %v13287_v39 = vadd.f32 %v15356_v46, %v13222_v37  ;;  %v21663_v48 = vld [vmem:[#allocation24_spill] sm:$0xff] }
0x2058   :  { %21662 = vst [vmem:[#allocation7_spill] sm:$0xff] %v21289_v41  ;;  %v13279_v41 = vadd.f32 %v15350_v32, %v13214_v19  ;;  %v13349_v43 = vadd.f32 %v15393_v2, %v13284_v33  ;;  %v21670_v33 = vld [vmem:[#allocation29_spill] sm:$0xff] }
0x2059   :  { %v21291_v45 = vpop.f32.mrf.mxu1  ;;  %v21295_v15 = vpop.f32.mrf.mxu0  ;;  %v21664_v42 = vld [vmem:[#allocation32_spill] sm:$0xff] }
0x205a   :  { %v13344_v12 = vadd.f32 %v15390_v40, %v13279_v41  ;;  %v15319_v41 = vadd.f32 %v21226_v44, %v21222_v47  ;;  %v15396_v47 = vadd.f32 %v21258_v34, %v21256_v13 }
0x205b   :  { %v15425_v55 = vpop.f32.mrf.mxu1  ;;  %v15465_v17 = vpop.f32.mrf.mxu0 }
0x205c   :  { %v13352_v54 = vadd.f32 %v15396_v47, %v13287_v39  ;;  %v21679_v47 = vld [vmem:[#allocation18_spill] sm:$0xff] }
0x205d   :  { %v15426_v60 = vpop.f32.mrf.mxu1  ;;  %v15466_v31 = vpop.f32.mrf.mxu0 }
0x205e   :  { %v15427_v58 = vadd.f32 %v15426_v60, %v15425_v55  ;;  %v15467_v6 = vadd.f32 %v15466_v31, %v15465_v17  ;;  %v13227_v55 = vadd.f32 %v15319_v41, %v13162_v53  ;;  %v15322_v17 = vadd.f32 %v21234_v22, %v21230_v52  ;;  %v21668_v52 = vld [vmem:[#allocation3_spill] sm:$0xff]  ;;  %v21669_v22 = vld [vmem:[#allocation22_spill] sm:$0xff]  ;;  %v21674_v41 = vld [vmem:[#allocation5_spill] sm:$0xff] }
0x205f   :  { %v15428_v25 = vpop.f32.mrf.mxu1  ;;  %v15468_v27 = vpop.f32.mrf.mxu0  ;;  %v15362_v60 = vadd.f32 %v21664_v42, %v21663_v48 }
0x2060   :  { %v13406_v11 = vadd.f32 %v15427_v58, %v13341_v10  ;;  %v13230_v31 = vadd.f32 %v15322_v17, %v13165_v50 }
0x2061   :  { %v15429_v20 = vpop.f32.mrf.mxu1  ;;  %v15469_v23 = vpop.f32.mrf.mxu0 }
0x2062   :  { %v13471_v14 = vadd.f32 %v15467_v6, %v13406_v11  ;;  %v15430_v7 = vadd.f32 %v15429_v20, %v15428_v25  ;;  %v15470_v32 = vadd.f32 %v15469_v23, %v15468_v27  ;;  %v21667_v25 = vld [vmem:[#allocation30_spill] sm:$0xff]  ;;  %v15399_v11 = vadd.f32 %v21669_v22, %v21668_v52  ;;  %v21671_v20 = vld [vmem:[#allocation19_spill] sm:$0xff]  ;;  %v21673_v23 = vld [vmem:[#allocation8_spill] sm:$0xff] }
0x2063   :  { %v15431_v49 = vpop.f32.mrf.mxu1  ;;  %v15471_v8 = vpop.f32.mrf.mxu0  ;;  %v15365_v37 = vadd.f32 %v21281_v18, %v21673_v23  ;;  %v21677_v18 = vld [vmem:[#allocation27_spill] sm:$0xff] }
0x2064   :  { %v13409_v16 = vadd.f32 %v15430_v7, %v13344_v12  ;;  %v21312_v1 = vadd.f32 %v13471_v14, %v20390_v30  ;;  %v15285_v30 = vadd.f32 %v21240_v21, %v21236_v24  ;;  %v13292_v21 = vadd.f32 %v15359_v57, %v13227_v55  ;;  %v21672_v12 = vld [vmem:[#allocation20_spill] sm:$0xff]  ;;  %v21681_v52 = vld [vmem:[#allocation7_spill] sm:$0xff] }
0x2065   :  { %v15432_v3 = vpop.f32.mrf.mxu1  ;;  %v15472_v5 = vpop.f32.mrf.mxu0  ;;  %v15325_v14 = vadd.f32 %v21672_v12, %v21671_v20  ;;  %v13295_v7 = vadd.f32 %v15362_v60, %v13230_v31  ;;  %v21676_v57 = vld [vmem:[#allocation4_spill] sm:$0xff]  ;;  %v15405_v60 = vadd.f32 %v21284_v38, %v21279_v36  ;;  %v15408_v36 = vadd.f32 %v21295_v15, %v21681_v52 }
0x2066   :  { %v13474_v35 = vadd.f32 %v15470_v32, %v13409_v16  ;;  %v15433_v0 = vadd.f32 %v15432_v3, %v15431_v49  ;;  %v13513_v62 = vsel %vm88_vm0, %v21312_v1, 0.0  ;;  %v15473_v29 = vadd.f32 %v15472_v5, %v15471_v8 }
0x2067   :  { %v15434_v44 = vpop.f32.mrf.mxu1  ;;  %13514 = vadd.xlane.f32.xlu1 %v13513_v62  ;;  %v15474_v56 = vpop.f32.mrf.mxu0  ;;  %v13170_v61 = vadd.f32 %v15285_v30, %v21665_v26  ;;  %v13357_v2 = vadd.f32 %v15399_v11, %v13292_v21  ;;  %v21678_v30 = vld [vmem:[#allocation28_spill] sm:$0xff] }
0x2068   :  { %v13414_v19 = vadd.f32 %v15433_v0, %v13349_v43  ;;  %v21326_v4 = vadd.f32 %v13474_v35, %v20394_v9  ;;  %v21666_v9 = vld [vmem:[#allocation31_spill] sm:$0xff]  ;;  %v21675_v43 = vld [vmem:[#allocation6_spill] sm:$0xff] }
0x2069   :  { %v15435_v24 = vpop.f32.mrf.mxu1  ;;  %v15475_v34 = vpop.f32.mrf.mxu0  ;;  %v15288_v63 = vadd.f32 %v21667_v25, %v21666_v9  ;;  %v13235_v8 = vadd.f32 %v15325_v14, %v13170_v61  ;;  %v15402_v39 = vadd.f32 %v21675_v43, %v21674_v41 }
0x206a   :  { %v13479_v10 = vadd.f32 %v15473_v29, %v13414_v19  ;;  %v15436_v13 = vadd.f32 %v15435_v24, %v15434_v44  ;;  %v13516_v58 = vsel %vm88_vm0, %v21326_v4, 0.0  ;;  %v15476_v27 = vadd.f32 %v15475_v34, %v15474_v56 }
0x206b   :  { %v15437_v40 = vpop.f32.mrf.mxu1  ;;  %13517 = vadd.xlane.f32.xlu0 %v13516_v58  ;;  %v15477_v51 = vpop.f32.mrf.mxu0  ;;  %v13173_v35 = vadd.f32 %v15288_v63, %v21676_v57  ;;  %v15328_v44 = vadd.f32 %v21679_v47, %v21678_v30  ;;  %v13360_v55 = vadd.f32 %v15402_v39, %v13295_v7  ;;  %v13300_v19 = vadd.f32 %v15365_v37, %v13235_v8  ;;  %v21680_v58 = vld [vmem:[#allocation17_spill] sm:$0xff] }
0x206c   :  { %v13417_v6 = vadd.f32 %v15436_v13, %v13352_v54  ;;  %v21340_v46 = vadd.f32 %v13479_v10, %v21670_v33  ;;  %v15368_v56 = vadd.f32 %v21291_v45, %v21286_v59 }
0x206d   :  { %v15438_v28 = vpop.f32.mrf.mxu1  ;;  %v15478_v16 = vpop.f32.mrf.mxu0  ;;  %v13238_v21 = vadd.f32 %v15328_v44, %v13173_v35  ;;  %v13365_v26 = vadd.f32 %v15405_v60, %v13300_v19 }
0x206e   :  { %v13482_v49 = vadd.f32 %v15476_v27, %v13417_v6  ;;  %v15439_v53 = vadd.f32 %v15438_v28, %v15437_v40  ;;  %v13519_v32 = vsel %vm88_vm0, %v21340_v46, 0.0  ;;  %v15479_v5 = vadd.f32 %v15478_v16, %v15477_v51  ;;  %v21682_v6 = vld [vmem:[#allocation21_spill] sm:$0xff] }
0x206f   :  { %v15440_v3 = vpop.f32.mrf.mxu1  ;;  %13520 = vadd.xlane.f32.xlu1 %v13519_v32  ;;  %v15480_v62 = vpop.f32.mrf.mxu0  ;;  %v13303_v45 = vadd.f32 %v15368_v56, %v13238_v21  ;;  %v21683_v28 = vld [vmem:[#allocation25_spill] sm:$0xff] }
0x2070   :  { %v13422_v0 = vadd.f32 %v15439_v53, %v13357_v2  ;;  %v21352_v50 = vadd.f32 %v13482_v49, %v21677_v18  ;;  %v21684_v53 = vld [vmem:[#allocation23_spill] sm:$0xff] }
0x2071   :  { %v15441_v29 = vpop.f32.mrf.mxu1  ;;  %v15481_v48 = vpop.f32.mrf.mxu0  ;;  %v13368_v33 = vadd.f32 %v15408_v36, %v13303_v45 }
0x2072   :  { %v13487_v17 = vadd.f32 %v15479_v5, %v13422_v0  ;;  %v15442_v54 = vadd.f32 %v15441_v29, %v15440_v3  ;;  %v13522_v42 = vsel %vm88_vm0, %v21352_v50, 0.0  ;;  %v15482_v13 = vadd.f32 %v15481_v48, %v15480_v62 }
0x2073   :  { %v15443_v24 = vpop.f32.mrf.mxu1  ;;  %13523 = vadd.xlane.f32.xlu0 %v13522_v42  ;;  %v15483_v34 = vpop.f32.mrf.mxu0 }
0x2074   :  { %v13425_v10 = vadd.f32 %v15442_v54, %v13360_v55  ;;  %v13505_v31 = vadd.f32 %v13487_v17, %v21680_v58 }
0x2075   :  { %v15444_v61 = vpop.f32.mrf.mxu1  ;;  %v15484_v25 = vpop.f32.mrf.mxu0 }
0x2076   :  { %v13490_v59 = vadd.f32 %v15482_v13, %v13425_v10  ;;  %v15445_v9 = vadd.f32 %v15444_v61, %v15443_v24  ;;  %v13525_v63 = vsel %vm88_vm0, %v13505_v31, 0.0  ;;  %v15485_v22 = vadd.f32 %v15484_v25, %v15483_v34 }
0x2077   :  { %v15446_v40 = vpop.f32.mrf.mxu1  ;;  %13526 = vadd.xlane.f32.xlu1 %v13525_v63  ;;  %v15486_v11 = vpop.f32.mrf.mxu0  ;;  %v20_v63 = vstv %s21509_s14 }
0x2078   :  { %v13430_v38 = vadd.f32 %v15445_v9, %v13365_v26  ;;  %v13506_v27 = vadd.f32 %v13490_v59, %v21682_v6  ;;  %21 = vst [vmem:[#allocation2] sm:$0x1] %v20_v63 }
0x2079   :  { %v15447_v51 = vpop.f32.mrf.mxu1  ;;  %v15487_v14 = vpop.f32.mrf.mxu0 }
0x207a   :  { %v13495_v20 = vadd.f32 %v15485_v22, %v13430_v38  ;;  %v15448_v12 = vadd.f32 %v15447_v51, %v15446_v40  ;;  %v13528_v7 = vsel %vm88_vm0, %v13506_v27, 0.0  ;;  %v15488_v37 = vadd.f32 %v15487_v14, %v15486_v11 }
0x207b   :  { %13529 = vadd.xlane.f32.xlu0 %v13528_v7 }
0x207c   :  { %v13433_v23 = vadd.f32 %v15448_v12, %v13368_v33  ;;  %v13507_v2 = vadd.f32 %v13495_v20, %v21683_v28 }
0x207e   :  { %v13498_v49 = vadd.f32 %v15488_v37, %v13433_v23  ;;  %v13531_v15 = vsel %vm88_vm0, %v13507_v2, 0.0  ;;  %v21422_v37 = vld [vmem:[%s21507_s11 + $0x1] ss:$0 sm:$0xff] }
0x207f   :  { %13532 = vadd.xlane.f32.xlu1 %v13531_v15  ;;  %v21428_v15 = vld [vmem:[%s21508_s12 + $0x1] ss:$0 sm:$0xff] }
0x2080   :  { %v13508_v16 = vadd.f32 %v13498_v49, %v21684_v53 }
0x2082   :  { %v13534_v32 = vsel %vm88_vm0, %v13508_v16, 0.0 }
0x2083   :  { %13535 = vadd.xlane.f32.xlu0 %v13534_v32 }
0x20f0   :  { %v13515_v8 = vpop.xlane.xlu1 %13514 }
0x20f1   :  { %v13537_v41 = vmul.f32 0.03125, %v13515_v8  ;;  %v14567_v8 = vld [vmem:[%s21510_s13] ss:$0 sm:$0xff] }
0x20f3   :  { %v21373_v43 = vsub.f32 %v21312_v1, %v13537_v41 }
0x20f4   :  { %v13518_v39 = vpop.xlane.xlu0 %13517 }
0x20f5   :  { %v13538_v3 = vmul.f32 0.03125, %v13518_v39  ;;  %v13553_v57 = vmul.f32 %v21373_v43, %v21373_v43 }
0x20f7   :  { %v21378_v35 = vsub.f32 %v21326_v4, %v13538_v3  ;;  %v13561_v0 = vsel %vm88_vm0, %v13553_v57, 0.0 }
0x20f8   :  { %v13521_v5 = vpop.xlane.xlu1 %13520  ;;  %13562 = vadd.xlane.f32.xlu1 %v13561_v0 }
0x20f9   :  { %v13539_v62 = vmul.f32 0.03125, %v13521_v5  ;;  %v13554_v18 = vmul.f32 %v21378_v35, %v21378_v35 }
0x20fb   :  { %v21384_v30 = vsub.f32 %v21340_v46, %v13539_v62  ;;  %v13564_v1 = vsel %vm88_vm0, %v13554_v18, 0.0 }
0x20fc   :  { %v13524_v47 = vpop.xlane.xlu0 %13523  ;;  %13565 = vadd.xlane.f32.xlu0 %v13564_v1 }
0x20fd   :  { %v13540_v44 = vmul.f32 0.03125, %v13524_v47  ;;  %v13555_v4 = vmul.f32 %v21384_v30, %v21384_v30 }
0x20ff   :  { %v21390_v55 = vsub.f32 %v21352_v50, %v13540_v44  ;;  %v13567_v19 = vsel %vm88_vm0, %v13555_v4, 0.0 }
0x2100   :  { %v13527_v29 = vpop.xlane.xlu1 %13526  ;;  %13568 = vadd.xlane.f32.xlu1 %v13567_v19 }
0x2101   :  { %v13541_v56 = vmul.f32 0.03125, %v13527_v29  ;;  %v13556_v46 = vmul.f32 %v21390_v55, %v21390_v55 }
0x2103   :  { %v21395_v17 = vsub.f32 %v13505_v31, %v13541_v56  ;;  %v13570_v54 = vsel %vm88_vm0, %v13556_v46, 0.0 }
0x2104   :  { %v13530_v48 = vpop.xlane.xlu0 %13529  ;;  %13571 = vadd.xlane.f32.xlu0 %v13570_v54 }
0x2105   :  { %v13542_v42 = vmul.f32 0.03125, %v13530_v48  ;;  %v13557_v60 = vmul.f32 %v21395_v17, %v21395_v17 }
0x2107   :  { %v21400_v50 = vsub.f32 %v13506_v27, %v13542_v42  ;;  %v13573_v24 = vsel %vm88_vm0, %v13557_v60, 0.0 }
0x2108   :  { %13574 = vadd.xlane.f32.xlu1 %v13573_v24  ;;  %v13533_v21 = vpop.xlane.xlu1 %13532 }
0x2109   :  { %v13543_v10 = vmul.f32 0.03125, %v13533_v21  ;;  %v13558_v13 = vmul.f32 %v21400_v50, %v21400_v50 }
0x210b   :  { %v21405_v34 = vsub.f32 %v13507_v2, %v13543_v10  ;;  %v13576_v58 = vsel %vm88_vm0, %v13558_v13, 0.0 }
0x210c   :  { %13577 = vadd.xlane.f32.xlu0 %v13576_v58  ;;  %v13536_v31 = vpop.xlane.xlu0 %13535 }
0x210d   :  { %v13544_v26 = vmul.f32 0.03125, %v13536_v31  ;;  %v13559_v61 = vmul.f32 %v21405_v34, %v21405_v34 }
0x210f   :  { %v21410_v45 = vsub.f32 %v13508_v16, %v13544_v26  ;;  %v13579_v59 = vsel %vm88_vm0, %v13559_v61, 0.0 }
0x2110   :  { %13580 = vadd.xlane.f32.xlu1 %v13579_v59 }
0x2111   :  { %v13560_v9 = vmul.f32 %v21410_v45, %v21410_v45 }
0x2113   :  { %v13582_v25 = vsel %vm88_vm0, %v13560_v9, 0.0 }
0x2114   :  { %13583 = vadd.xlane.f32.xlu0 %v13582_v25 }
0x2181   :  { %v13563_v40 = vpop.xlane.xlu1 %13562 }
0x2182   :  { %v13585_v52 = vmul.f32 0.03125, %v13563_v40 }
0x2184   :  { %v13593_v36 = vadd.f32 1e-05, %v13585_v52 }
0x2185   :  { %v13566_v38 = vpop.xlane.xlu0 %13565 }
0x2186   :  { %17014 = vrsqrt.f32 %v13593_v36  ;;  %v13586_v22 = vmul.f32 0.03125, %v13566_v38 }
0x2188   :  { %v13594_v11 = vadd.f32 1e-05, %v13586_v22 }
0x2189   :  { %v13569_v6 = vpop.xlane.xlu1 %13568 }
0x218a   :  { %17016 = vrsqrt.f32 %v13594_v11  ;;  %v13587_v27 = vmul.f32 0.03125, %v13569_v6 }
0x218c   :  { %v13595_v51 = vadd.f32 1e-05, %v13587_v27 }
0x218d   :  { %v13572_v33 = vpop.xlane.xlu0 %13571 }
0x218e   :  { %17018 = vrsqrt.f32 %v13595_v51  ;;  %v13588_v20 = vmul.f32 0.03125, %v13572_v33 }
0x2190   :  { %v13596_v12 = vadd.f32 1e-05, %v13588_v20 }
0x2191   :  { %v13575_v14 = vpop.xlane.xlu1 %13574 }
0x2192   :  { %17020 = vrsqrt.f32 %v13596_v12  ;;  %v13589_v7 = vmul.f32 0.03125, %v13575_v14  ;;  %v14568_v14 = vld [vmem:[#allocation2] ss:$0 sm:$0xff] }
0x2193   :  { %v17015_v23 = vpop.eup %17014 }
0x2194   :  { %v13597_v28 = vadd.f32 1e-05, %v13589_v7  ;;  %v13609_v2 = vmul.f32 %v17015_v23, %v21373_v43 }
0x2195   :  { %v13578_v49 = vpop.xlane.xlu0 %13577 }
0x2196   :  { %17022 = vrsqrt.f32 %v13597_v28  ;;  %v13590_v53 = vmul.f32 0.03125, %v13578_v49  ;;  %v13623_v16 = vmul.f32 %v21422_v37, %v13609_v2 }
0x2197   :  { %v17017_v32 = vpop.eup %17016 }
0x2198   :  { %v13598_v41 = vadd.f32 1e-05, %v13590_v53  ;;  %v13637_v39 = vadd.f32 %v21428_v15, %v13623_v16  ;;  %v13610_v43 = vmul.f32 %v17017_v32, %v21378_v35 }
0x2199   :  { %v13581_v3 = vpop.xlane.xlu1 %13580 }
0x219a   :  { %17024 = vrsqrt.f32 %v13598_v41  ;;  %v13591_v57 = vmul.f32 0.03125, %v13581_v3  ;;  %v13652_v0 = vmul.f32 %v14567_v8, %v13637_v39  ;;  %v13624_v5 = vmul.f32 %v21422_v37, %v13610_v43 }
0x219b   :  { %v17019_v62 = vpop.eup %17018 }
0x219c   :  { %v13599_v18 = vadd.f32 1e-05, %v13591_v57  ;;  %v13660_v1 = vsel %vm88_vm0, %v13652_v0, 0.0  ;;  %v13638_v47 = vadd.f32 %v21428_v15, %v13624_v5  ;;  %v13611_v44 = vmul.f32 %v17019_v62, %v21384_v30 }
0x219d   :  { %v13584_v4 = vpop.xlane.xlu0 %13583  ;;  %13661 = vadd.xlane.f32.xlu1 %v13660_v1 }
0x219e   :  { %17026 = vrsqrt.f32 %v13599_v18  ;;  %v13592_v19 = vmul.f32 0.03125, %v13584_v4  ;;  %v13653_v29 = vmul.f32 %v14567_v8, %v13638_v47  ;;  %v13625_v35 = vmul.f32 %v21422_v37, %v13611_v44 }
0x219f   :  { %v17021_v56 = vpop.eup %17020 }
0x21a0   :  { %v13600_v46 = vadd.f32 1e-05, %v13592_v19  ;;  %v13663_v54 = vsel %vm88_vm0, %v13653_v29, 0.0  ;;  %v13639_v48 = vadd.f32 %v21428_v15, %v13625_v35  ;;  %v13612_v42 = vmul.f32 %v17021_v56, %v21390_v55 }
0x21a1   :  { %13664 = vadd.xlane.f32.xlu0 %v13663_v54 }
0x21a2   :  { %17028 = vrsqrt.f32 %v13600_v46  ;;  %v13654_v60 = vmul.f32 %v14567_v8, %v13639_v48  ;;  %v13626_v30 = vmul.f32 %v21422_v37, %v13612_v42 }
0x21a3   :  { %v17023_v24 = vpop.eup %17022 }
0x21a4   :  { %v13666_v21 = vsel %vm88_vm0, %v13654_v60, 0.0  ;;  %v13640_v10 = vadd.f32 %v21428_v15, %v13626_v30  ;;  %v13613_v13 = vmul.f32 %v17023_v24, %v21395_v17 }
0x21a5   :  { %13667 = vadd.xlane.f32.xlu1 %v13666_v21 }
0x21a6   :  { %v13655_v58 = vmul.f32 %v14567_v8, %v13640_v10  ;;  %v13627_v31 = vmul.f32 %v21422_v37, %v13613_v13 }
0x21a7   :  { %v17025_v26 = vpop.eup %17024 }
0x21a8   :  { %v13669_v61 = vsel %vm88_vm0, %v13655_v58, 0.0  ;;  %v13641_v55 = vadd.f32 %v21428_v15, %v13627_v31  ;;  %v13614_v59 = vmul.f32 %v17025_v26, %v21400_v50 }
0x21a9   :  { %13670 = vadd.xlane.f32.xlu0 %v13669_v61 }
0x21aa   :  { %v13656_v9 = vmul.f32 %v14567_v8, %v13641_v55  ;;  %v13628_v25 = vmul.f32 %v21422_v37, %v13614_v59 }
0x21ab   :  { %v17027_v63 = vpop.eup %17026 }
0x21ac   :  { %v13672_v40 = vsel %vm88_vm0, %v13656_v9, 0.0  ;;  %v13642_v17 = vadd.f32 %v21428_v15, %v13628_v25  ;;  %v13615_v52 = vmul.f32 %v17027_v63, %v21405_v34 }
0x21ad   :  { %13673 = vadd.xlane.f32.xlu1 %v13672_v40 }
0x21ae   :  { %v13657_v36 = vmul.f32 %v14567_v8, %v13642_v17  ;;  %v13629_v38 = vmul.f32 %v21422_v37, %v13615_v52 }
0x21af   :  { %v17029_v22 = vpop.eup %17028 }
0x21b0   :  { %v13675_v11 = vsel %vm88_vm0, %v13657_v36, 0.0  ;;  %v13643_v50 = vadd.f32 %v21428_v15, %v13629_v38  ;;  %v13616_v6 = vmul.f32 %v17029_v22, %v21410_v45 }
0x21b1   :  { %13676 = vadd.xlane.f32.xlu0 %v13675_v11 }
0x21b2   :  { %v13658_v27 = vmul.f32 %v14567_v8, %v13643_v50  ;;  %v13630_v51 = vmul.f32 %v21422_v37, %v13616_v6 }
0x21b4   :  { %v13678_v33 = vsel %vm88_vm0, %v13658_v27, 0.0  ;;  %v13644_v20 = vadd.f32 %v21428_v15, %v13630_v51 }
0x21b5   :  { %13679 = vadd.xlane.f32.xlu1 %v13678_v33 }
0x21b6   :  { %v13659_v34 = vmul.f32 %v14567_v8, %v13644_v20 }
0x21b8   :  { %v13681_v12 = vsel %vm88_vm0, %v13659_v34, 0.0 }
0x21b9   :  { %13682 = vadd.xlane.f32.xlu0 %v13681_v12 }
0x2226   :  { %v13662_v7 = vpop.xlane.xlu1 %13661 }
0x2227   :  { %v13691_v23 = vadd.f32 %v14568_v14, %v13662_v7 }
0x2229   :  { %13700 = vst.msk [vmem:[%s21511_s15] sm:$0xff] %vm13699_vm6, %v13691_v23 }
0x222a   :  { %v13665_v45 = vpop.xlane.xlu0 %13664 }
0x222b   :  { %v13692_v37 = vadd.f32 %v14568_v14, %v13665_v45 }
0x222d   :  { %13701 = vst.msk [vmem:[%s21511_s15 + $0x8] sm:$0xff] %vm13699_vm6, %v13692_v37 }
0x222e   :  { %v13668_v28 = vpop.xlane.xlu1 %13667 }
0x222f   :  { %v13693_v2 = vadd.f32 %v14568_v14, %v13668_v28 }
0x2231   :  { %13702 = vst.msk [vmem:[%s21511_s15 + $0x10] sm:$0xff] %vm13699_vm6, %v13693_v2 }
0x2232   :  { %v13671_v49 = vpop.xlane.xlu0 %13670 }
0x2233   :  { %v13694_v15 = vadd.f32 %v14568_v14, %v13671_v49 }
0x2235   :  { %13703 = vst.msk [vmem:[%s21511_s15 + $0x18] sm:$0xff] %vm13699_vm6, %v13694_v15 }
0x2236   :  { %v13674_v53 = vpop.xlane.xlu1 %13673 }
0x2237   :  { %v13695_v16 = vadd.f32 %v14568_v14, %v13674_v53 }
0x2239   :  { %13704 = vst.msk [vmem:[%s21511_s15 + $0x20] sm:$0xff] %vm13699_vm6, %v13695_v16 }
0x223a   :  { %v13677_v32 = vpop.xlane.xlu0 %13676 }
0x223b   :  { %v13696_v8 = vadd.f32 %v14568_v14, %v13677_v32 }
0x223d   :  { %13705 = vst.msk [vmem:[%s21511_s15 + $0x28] sm:$0xff] %vm13699_vm6, %v13696_v8 }
0x223e   :  { %v13680_v41 = vpop.xlane.xlu1 %13679 }
0x223f   :  { %v13697_v39 = vadd.f32 %v14568_v14, %v13680_v41 }
0x2241   :  { %13706 = vst.msk [vmem:[%s21511_s15 + $0x30] sm:$0xff] %vm13699_vm6, %v13697_v39 }
0x2242   :  { %v13683_v43 = vpop.xlane.xlu0 %13682 }
0x2243   :  { %v13698_v3 = vadd.f32 %v14568_v14, %v13683_v43 }
0x2245   :  { %13707 = vst.msk [vmem:[%s21511_s15 + $0x38] sm:$0xff] %vm13699_vm6, %v13698_v3 }

</bundles_post_ra>
